<compile_context>
chip_gen: v6e
topology: v6e:2x2x1
jax: 0.10.0
libtpu: 0.0.40
codegen_flags: <defaults>
</compile_context>

<pallas_src>
import functools

import jax
import jax.numpy as jnp
from jax import lax
from jax.experimental import pallas as pl
from jax.experimental.pallas import tpu as pltpu


def _relu_ins_conv_kernel(x_ref, w_ref, o_ref, slab_ref, *,
                          K, Ho, Wo, stride, Bt, Cout, eps):
    """Bt batch elements: im2col -> one bf16 MXU matmul -> fused InstanceNorm + ReLU."""
    Cin = x_ref.shape[-1]
    M = Ho * Wo

    # ---- im2col slab [Bt*M, K*K*Cin] (bf16): K*K shifted window reads -----------------
    # Scratch is fully overwritten every grid step, so it is never re-zeroed.
    for kh in range(K):
        for kw in range(K):
            if stride == 1:
                tap = x_ref[:, kh:kh + Ho, kw:kw + Wo, :]
            else:
                tap = x_ref[:, pl.ds(kh, Ho, stride), pl.ds(kw, Wo, stride), :]
            t = kh * K + kw
            slab_ref[:, t * Cin:(t + 1) * Cin] = tap.reshape(Bt * M, Cin)

    # ---- conv: ONE bf16 MXU matmul with f32 accumulation --------------------------------
    # [Bt*M, K*K*Cin] @ [K*K*Cin, CPAD] -> f32 [Bt*M, CPAD]
    conv = jnp.dot(slab_ref[...], w_ref[...], preferred_element_type=jnp.float32)
    # NOTE: conv bias intentionally omitted -- InstanceNorm's mean subtraction cancels it.

    # ---- per batch element: InstanceNorm2d(affine=False) + ReLU in one fused pass -------
    for bt in range(Bt):
        c = conv[bt * M:(bt + 1) * M, :]                      # [M, CPAD] f32
        mean = jnp.mean(c, axis=0, keepdims=True)             # [1, CPAD]
        msq = jnp.mean(c * c, axis=0, keepdims=True)          # E[x^2]
        scale = lax.rsqrt(msq - mean * mean + eps)            # biased var (PyTorch), EUP rsqrt
        shift = -mean * scale
        y = jnp.maximum(c * scale + shift, 0.0)               # single fused VPU sweep
        # channel-major store of only the real Cout channels: [Cout, Ho*Wo]
        o_ref[bt] = y.T[:Cout, :].astype(o_ref.dtype)


def relu_ins_conv2d(x_nchw, weight_oihw, bias=None, *, stride=1, padding=0, eps=1e-5):
    """Pallas forward of ReLUINSConv2d.  x: [B, Cin, H, W] NCHW (PyTorch layout)."""
    B, Cin, H, W = x_nchw.shape
    Cout, _, K, _ = weight_oihw.shape
    Hp, Wp = H + 2 * padding, W + 2 * padding
    Ho = (Hp - K) // stride + 1
    Wo = (Wp - K) // stride + 1
    M = Ho * Wo
    KKC = K * K * Cin
    CPAD = max(128, -(-Cout // 128) * 128)     # lane-dense matmul output width

    # Conv bias is mathematically cancelled by InstanceNorm2d(affine=False)'s mean
    # subtraction (per-channel constant), so it is accepted for API fidelity but unused.
    del bias

    # -------- layout-only glue in XLA (no compute) -------------------------------------
    x_nhwc = jnp.transpose(x_nchw, (0, 2, 3, 1)).astype(jnp.bfloat16)
    x_pad = jnp.pad(x_nhwc, ((0, 0), (padding, padding), (padding, padding), (0, 0)))
    # OIHW -> [kh, kw, cin, cout] -> [K*K*Cin, Cout], zero-padded to CPAD output lanes.
    w_kc = jnp.transpose(weight_oihw, (2, 3, 1, 0)).reshape(KKC, Cout)
    w_kc = jnp.pad(w_kc, ((0, 0), (0, CPAD - Cout))).astype(jnp.bfloat16)

    # -------- batch blocking: Bt batch elements per grid step under a VMEM budget --------
    def _bytes_per_batch():
        slab = M * 128 * 2                                        # bf16 slab, lanes pad to 128
        xblk = Hp * (-(-Wp // 16) * 16) * 128 * 2                 # bf16 x window, padded dims
        oblk = (-(-Cout // 8) * 8) * max(-(-M // 128) * 128, 128) * 4
        return slab + 2 * xblk + 2 * oblk                         # slab + double-buffered I/O

    budget = 24 * 2**20
    Bt = 1
    for d in range(1, B + 1):
        if B % d == 0 and d * M <= 4096 and d * _bytes_per_batch() <= budget:
            Bt = d
    vmem_limit = int(min(max(16 * 2**20, 4 * Bt * _bytes_per_batch()), 48 * 2**20))

    kernel = functools.partial(_relu_ins_conv_kernel, K=K, Ho=Ho, Wo=Wo,
                               stride=stride, Bt=Bt, Cout=Cout, eps=eps)

    out = pl.pallas_call(
        kernel,
        out_shape=jax.ShapeDtypeStruct((B, Cout, M), x_nchw.dtype),
        grid_spec=pltpu.PrefetchScalarGridSpec(
            num_scalar_prefetch=0,
            grid=(B // Bt,),
            in_specs=[
                pl.BlockSpec((Bt, Hp, Wp, Cin), lambda b: (b, 0, 0, 0)),
                pl.BlockSpec((KKC, CPAD), lambda b: (0, 0)),
            ],
            out_specs=pl.BlockSpec((Bt, Cout, M), lambda b: (b, 0, 0)),
            scratch_shapes=[pltpu.VMEM((Bt * M, KKC), jnp.bfloat16)],
        ),
        compiler_params=pltpu.CompilerParams(
            dimension_semantics=("parallel",),
            vmem_limit_bytes=vmem_limit,
        ),
    )(x_pad, w_kc)

    # Output is already channel-major; only a (free) reshape back to NCHW is needed.
    return out.reshape(B, Cout, Ho, Wo)


def relu_ins_conv2d_reference(x, weight, bias, *, stride, padding, eps=1e-5):
    """Pure-JAX reference matching the PyTorch forward exactly (NCHW, with conv bias)."""
    out = lax.conv_general_dilated(
        x, weight, window_strides=(stride, stride),
        padding=[(padding, padding), (padding, padding)],
        dimension_numbers=("NCHW", "OIHW", "NCHW"),
        precision=lax.Precision.HIGHEST)
    out = out + bias.reshape(1, -1, 1, 1)
    mean = out.mean(axis=(2, 3), keepdims=True)
    var = ((out - mean) ** 2).mean(axis=(2, 3), keepdims=True)   # biased, like InstanceNorm2d
    out = (out - mean) * lax.rsqrt(var + eps)
    return jnp.maximum(out, 0.0)


if __name__ == "__main__":
    key = jax.random.PRNGKey(0)
    B, Cin, H, W = 2, 4, 16, 16          # input NCHW, like the PyTorch module
    Cout, K = 8, 3                        # ReLUINSConv2d(4, 8, kernel_size=3, ...)

    kx, kwt, kb = jax.random.split(key, 3)
    x = jax.random.normal(kx, (B, Cin, H, W), dtype=jnp.float32)
    weight = 0.02 * jax.random.normal(kwt, (Cout, Cin, K, K), dtype=jnp.float32)  # gaussian init
    bias = 0.1 * jax.random.normal(kb, (Cout,), dtype=jnp.float32)

    # Round test data to bf16-representable values so the bf16-operand MXU matmul and the
    # f32 XLA reference conv agree tightly.
    x = x.astype(jnp.bfloat16).astype(jnp.float32)
    weight = weight.astype(jnp.bfloat16).astype(jnp.float32)
    bias = bias.astype(jnp.bfloat16).astype(jnp.float32)

    for stride, padding in [(1, 1), (2, 1)]:   # exercise the module's stride/padding args
        out = relu_ins_conv2d(x, weight, bias, stride=stride, padding=padding)
        out = jax.block_until_ready(out)
        ref = relu_ins_conv2d_reference(x, weight, bias, stride=stride, padding=padding)
        Ho = (H + 2 * padding - K) // stride + 1
        assert out.shape == (B, Cout, Ho, Ho), (stride, out.shape)
        err = float(jnp.max(jnp.abs(out - ref)))
        assert jnp.allclose(out, ref, rtol=1e-3, atol=1e-3), (stride, err)

    print("KERNEL_OK")
</pallas_src>

<mosaic_0001>
module attributes {stable_mosaic.version = 11 : i64} {
  func.func @_relu_ins_conv_kernel(%arg0: i32, %arg1: memref<2x18x18x4xbf16, #tpu.memory_space<vmem>>, %arg2: memref<36x128xbf16, #tpu.memory_space<vmem>>, %arg3: memref<2x8x256xf32, #tpu.memory_space<vmem>>, %arg4: memref<512x36xbf16, #tpu.memory_space<vmem>>) attributes {dimension_semantics = [#tpu.dimension_semantics<parallel>], iteration_bounds = array<i64: 1>, scalar_prefetch = 0 : i64, scratch_operands = 1 : i64, tpu.core_type = #tpu.core_type<tc>, window_params = [{transform_indices = @transform_0, window_bounds = array<i64: 2, 18, 18, 4>}, {pipeline_mode = #tpu.pipeline_mode<synchronous>, transform_indices = @transform_1, window_bounds = array<i64: 36, 128>}, {transform_indices = @transform_2, window_bounds = array<i64: 2, 8, 256>}]} {
    %c0 = arith.constant 0 : index
    %c0_0 = arith.constant 0 : index
    %c0_1 = arith.constant 0 : index
    %c0_2 = arith.constant 0 : index
    %0 = vector.load %arg1[%c0, %c0_0, %c0_1, %c0_2] : memref<2x18x18x4xbf16, #tpu.memory_space<vmem>>, vector<2x16x16x4xbf16>
    %1 = vector.shape_cast %0 : vector<2x16x16x4xbf16> to vector<512x4xbf16>
    %c0_3 = arith.constant 0 : index
    %c0_4 = arith.constant 0 : index
    %2 = vector.load %arg4[%c0_3, %c0_4] : memref<512x36xbf16, #tpu.memory_space<vmem>>, vector<512x4xbf16>
    tpu.vector_store %arg4[%c0_3, %c0_4], %1 {strides = array<i32>} : memref<512x36xbf16, #tpu.memory_space<vmem>>, vector<512x4xbf16>,
    %c0_5 = arith.constant 0 : index
    %c0_6 = arith.constant 0 : index
    %c1 = arith.constant 1 : index
    %c0_7 = arith.constant 0 : index
    %3 = vector.load %arg1[%c0_5, %c0_6, %c1, %c0_7] : memref<2x18x18x4xbf16, #tpu.memory_space<vmem>>, vector<2x16x16x4xbf16>
    %4 = vector.shape_cast %3 : vector<2x16x16x4xbf16> to vector<512x4xbf16>
    %c0_8 = arith.constant 0 : index
    %c4 = arith.constant 4 : index
    %5 = vector.load %arg4[%c0_8, %c4] : memref<512x36xbf16, #tpu.memory_space<vmem>>, vector<512x4xbf16>
    tpu.vector_store %arg4[%c0_8, %c4], %4 {strides = array<i32>} : memref<512x36xbf16, #tpu.memory_space<vmem>>, vector<512x4xbf16>,
    %c0_9 = arith.constant 0 : index
    %c0_10 = arith.constant 0 : index
    %c2 = arith.constant 2 : index
    %c0_11 = arith.constant 0 : index
    %6 = vector.load %arg1[%c0_9, %c0_10, %c2, %c0_11] : memref<2x18x18x4xbf16, #tpu.memory_space<vmem>>, vector<2x16x16x4xbf16>
    %7 = vector.shape_cast %6 : vector<2x16x16x4xbf16> to vector<512x4xbf16>
    %c0_12 = arith.constant 0 : index
    %c8 = arith.constant 8 : index
    %8 = vector.load %arg4[%c0_12, %c8] : memref<512x36xbf16, #tpu.memory_space<vmem>>, vector<512x4xbf16>
    tpu.vector_store %arg4[%c0_12, %c8], %7 {strides = array<i32>} : memref<512x36xbf16, #tpu.memory_space<vmem>>, vector<512x4xbf16>,
    %c0_13 = arith.constant 0 : index
    %c1_14 = arith.constant 1 : index
    %c0_15 = arith.constant 0 : index
    %c0_16 = arith.constant 0 : index
    %9 = vector.load %arg1[%c0_13, %c1_14, %c0_15, %c0_16] : memref<2x18x18x4xbf16, #tpu.memory_space<vmem>>, vector<2x16x16x4xbf16>
    %10 = vector.shape_cast %9 : vector<2x16x16x4xbf16> to vector<512x4xbf16>
    %c0_17 = arith.constant 0 : index
    %c12 = arith.constant 12 : index
    %11 = vector.load %arg4[%c0_17, %c12] : memref<512x36xbf16, #tpu.memory_space<vmem>>, vector<512x4xbf16>
    tpu.vector_store %arg4[%c0_17, %c12], %10 {strides = array<i32>} : memref<512x36xbf16, #tpu.memory_space<vmem>>, vector<512x4xbf16>,
    %c0_18 = arith.constant 0 : index
    %c1_19 = arith.constant 1 : index
    %c1_20 = arith.constant 1 : index
    %c0_21 = arith.constant 0 : index
    %12 = vector.load %arg1[%c0_18, %c1_19, %c1_20, %c0_21] : memref<2x18x18x4xbf16, #tpu.memory_space<vmem>>, vector<2x16x16x4xbf16>
    %13 = vector.shape_cast %12 : vector<2x16x16x4xbf16> to vector<512x4xbf16>
    %c0_22 = arith.constant 0 : index
    %c16 = arith.constant 16 : index
    %14 = vector.load %arg4[%c0_22, %c16] : memref<512x36xbf16, #tpu.memory_space<vmem>>, vector<512x4xbf16>
    tpu.vector_store %arg4[%c0_22, %c16], %13 {strides = array<i32>} : memref<512x36xbf16, #tpu.memory_space<vmem>>, vector<512x4xbf16>,
    %c0_23 = arith.constant 0 : index
    %c1_24 = arith.constant 1 : index
    %c2_25 = arith.constant 2 : index
    %c0_26 = arith.constant 0 : index
    %15 = vector.load %arg1[%c0_23, %c1_24, %c2_25, %c0_26] : memref<2x18x18x4xbf16, #tpu.memory_space<vmem>>, vector<2x16x16x4xbf16>
    %16 = vector.shape_cast %15 : vector<2x16x16x4xbf16> to vector<512x4xbf16>
    %c0_27 = arith.constant 0 : index
    %c20 = arith.constant 20 : index
    %17 = vector.load %arg4[%c0_27, %c20] : memref<512x36xbf16, #tpu.memory_space<vmem>>, vector<512x4xbf16>
    tpu.vector_store %arg4[%c0_27, %c20], %16 {strides = array<i32>} : memref<512x36xbf16, #tpu.memory_space<vmem>>, vector<512x4xbf16>,
    %c0_28 = arith.constant 0 : index
    %c2_29 = arith.constant 2 : index
    %c0_30 = arith.constant 0 : index
    %c0_31 = arith.constant 0 : index
    %18 = vector.load %arg1[%c0_28, %c2_29, %c0_30, %c0_31] : memref<2x18x18x4xbf16, #tpu.memory_space<vmem>>, vector<2x16x16x4xbf16>
    %19 = vector.shape_cast %18 : vector<2x16x16x4xbf16> to vector<512x4xbf16>
    %c0_32 = arith.constant 0 : index
    %c24 = arith.constant 24 : index
    %20 = vector.load %arg4[%c0_32, %c24] : memref<512x36xbf16, #tpu.memory_space<vmem>>, vector<512x4xbf16>
    tpu.vector_store %arg4[%c0_32, %c24], %19 {strides = array<i32>} : memref<512x36xbf16, #tpu.memory_space<vmem>>, vector<512x4xbf16>,
    %c0_33 = arith.constant 0 : index
    %c2_34 = arith.constant 2 : index
    %c1_35 = arith.constant 1 : index
    %c0_36 = arith.constant 0 : index
    %21 = vector.load %arg1[%c0_33, %c2_34, %c1_35, %c0_36] : memref<2x18x18x4xbf16, #tpu.memory_space<vmem>>, vector<2x16x16x4xbf16>
    %22 = vector.shape_cast %21 : vector<2x16x16x4xbf16> to vector<512x4xbf16>
    %c0_37 = arith.constant 0 : index
    %c28 = arith.constant 28 : index
    %23 = vector.load %arg4[%c0_37, %c28] : memref<512x36xbf16, #tpu.memory_space<vmem>>, vector<512x4xbf16>
    tpu.vector_store %arg4[%c0_37, %c28], %22 {strides = array<i32>} : memref<512x36xbf16, #tpu.memory_space<vmem>>, vector<512x4xbf16>,
    %c0_38 = arith.constant 0 : index
    %c2_39 = arith.constant 2 : index
    %c2_40 = arith.constant 2 : index
    %c0_41 = arith.constant 0 : index
    %24 = vector.load %arg1[%c0_38, %c2_39, %c2_40, %c0_41] : memref<2x18x18x4xbf16, #tpu.memory_space<vmem>>, vector<2x16x16x4xbf16>
    %25 = vector.shape_cast %24 : vector<2x16x16x4xbf16> to vector<512x4xbf16>
    %c0_42 = arith.constant 0 : index
    %c32 = arith.constant 32 : index
    %26 = vector.load %arg4[%c0_42, %c32] : memref<512x36xbf16, #tpu.memory_space<vmem>>, vector<512x4xbf16>
    tpu.vector_store %arg4[%c0_42, %c32], %25 {strides = array<i32>} : memref<512x36xbf16, #tpu.memory_space<vmem>>, vector<512x4xbf16>,
    %c0_43 = arith.constant 0 : index
    %c0_44 = arith.constant 0 : index
    %27 = vector.load %arg4[%c0_43, %c0_44] : memref<512x36xbf16, #tpu.memory_space<vmem>>, vector<512x36xbf16>
    %c0_45 = arith.constant 0 : index
    %c0_46 = arith.constant 0 : index
    %28 = vector.load %arg2[%c0_45, %c0_46] : memref<36x128xbf16, #tpu.memory_space<vmem>>, vector<36x128xbf16>
    %cst = arith.constant dense<0.000000e+00> : vector<512x128xf32>
    %29 = tpu.matmul %27, %28, %cst {dimension_numbers = #tpu.dot_dimension_numbers<[1], [0], [0], [1], [0, 0, 1, 1], [], []>} : vector<512x36xbf16>, vector<36x128xbf16>, vector<512x128xf32> -> vector<512x128xf32>
    %30 = vector.extract_strided_slice %29 {offsets = [0, 0], sizes = [256, 128], strides = [1, 1]} : vector<512x128xf32> to vector<256x128xf32>
    %cst_47 = arith.constant dense<0.000000e+00> : vector<128xf32>
    %31 = vector.multi_reduction <add>, %30, %cst_47 [0] : vector<256x128xf32> to vector<128xf32>
    %32 = vector.shape_cast %31 : vector<128xf32> to vector<1x128xf32>
    %cst_48 = arith.constant 2.560000e+02 : f32
    %33 = vector.broadcast %cst_48 : f32 to vector<1x128xf32>
    %34 = arith.divf %32, %33 : vector<1x128xf32>
    %35 = arith.mulf %30, %30 : vector<256x128xf32>
    %cst_49 = arith.constant dense<0.000000e+00> : vector<128xf32>
    %36 = vector.multi_reduction <add>, %35, %cst_49 [0] : vector<256x128xf32> to vector<128xf32>
    %37 = vector.shape_cast %36 : vector<128xf32> to vector<1x128xf32>
    %cst_50 = arith.constant 2.560000e+02 : f32
    %38 = vector.broadcast %cst_50 : f32 to vector<1x128xf32>
    %39 = arith.divf %37, %38 : vector<1x128xf32>
    %40 = arith.mulf %34, %34 : vector<1x128xf32>
    %41 = arith.subf %39, %40 : vector<1x128xf32>
    %cst_51 = arith.constant 9.99999974E-6 : f32
    %42 = vector.broadcast %cst_51 : f32 to vector<1x128xf32>
    %43 = arith.addf %41, %42 : vector<1x128xf32>
    %44 = math.rsqrt %43 : vector<1x128xf32>
    %cst_52 = arith.constant 0.000000e+00 : f32
    %45 = vector.broadcast %cst_52 : f32 to vector<1x128xf32>
    %46 = arith.subf %45, %34 : vector<1x128xf32>
    %47 = arith.mulf %46, %44 : vector<1x128xf32>
    %48 = vector.broadcast %44 : vector<1x128xf32> to vector<256x128xf32>
    %49 = arith.mulf %30, %48 : vector<256x128xf32>
    %50 = vector.broadcast %47 : vector<1x128xf32> to vector<256x128xf32>
    %51 = arith.addf %49, %50 : vector<256x128xf32>
    %cst_53 = arith.constant 0.000000e+00 : f32
    %52 = vector.broadcast %cst_53 : f32 to vector<256x128xf32>
    %53 = arith.maximumf %51, %52 : vector<256x128xf32>
    %54 = tpu.transpose %53, [1, 0] : vector<256x128xf32> -> vector<128x256xf32>
    %55 = vector.extract_strided_slice %54 {offsets = [0, 0], sizes = [8, 256], strides = [1, 1]} : vector<128x256xf32> to vector<8x256xf32>
    %c0_54 = arith.constant 0 : index
    %c0_55 = arith.constant 0 : index
    %c0_56 = arith.constant 0 : index
    %56 = vector.load %arg3[%c0_54, %c0_55, %c0_56] : memref<2x8x256xf32, #tpu.memory_space<vmem>>, vector<1x8x256xf32>
    %57 = vector.shape_cast %56 : vector<1x8x256xf32> to vector<8x256xf32>
    %58 = vector.shape_cast %55 : vector<8x256xf32> to vector<1x8x256xf32>
    tpu.vector_store %arg3[%c0_54, %c0_55, %c0_56], %58 {strides = array<i32>} : memref<2x8x256xf32, #tpu.memory_space<vmem>>, vector<1x8x256xf32>,
    %59 = vector.extract_strided_slice %29 {offsets = [256, 0], sizes = [256, 128], strides = [1, 1]} : vector<512x128xf32> to vector<256x128xf32>
    %cst_57 = arith.constant dense<0.000000e+00> : vector<128xf32>
    %60 = vector.multi_reduction <add>, %59, %cst_57 [0] : vector<256x128xf32> to vector<128xf32>
    %61 = vector.shape_cast %60 : vector<128xf32> to vector<1x128xf32>
    %cst_58 = arith.constant 2.560000e+02 : f32
    %62 = vector.broadcast %cst_58 : f32 to vector<1x128xf32>
    %63 = arith.divf %61, %62 : vector<1x128xf32>
    %64 = arith.mulf %59, %59 : vector<256x128xf32>
    %cst_59 = arith.constant dense<0.000000e+00> : vector<128xf32>
    %65 = vector.multi_reduction <add>, %64, %cst_59 [0] : vector<256x128xf32> to vector<128xf32>
    %66 = vector.shape_cast %65 : vector<128xf32> to vector<1x128xf32>
    %cst_60 = arith.constant 2.560000e+02 : f32
    %67 = vector.broadcast %cst_60 : f32 to vector<1x128xf32>
    %68 = arith.divf %66, %67 : vector<1x128xf32>
    %69 = arith.mulf %63, %63 : vector<1x128xf32>
    %70 = arith.subf %68, %69 : vector<1x128xf32>
    %cst_61 = arith.constant 9.99999974E-6 : f32
    %71 = vector.broadcast %cst_61 : f32 to vector<1x128xf32>
    %72 = arith.addf %70, %71 : vector<1x128xf32>
    %73 = math.rsqrt %72 : vector<1x128xf32>
    %cst_62 = arith.constant 0.000000e+00 : f32
    %74 = vector.broadcast %cst_62 : f32 to vector<1x128xf32>
    %75 = arith.subf %74, %63 : vector<1x128xf32>
    %76 = arith.mulf %75, %73 : vector<1x128xf32>
    %77 = vector.broadcast %73 : vector<1x128xf32> to vector<256x128xf32>
    %78 = arith.mulf %59, %77 : vector<256x128xf32>
    %79 = vector.broadcast %76 : vector<1x128xf32> to vector<256x128xf32>
    %80 = arith.addf %78, %79 : vector<256x128xf32>
    %cst_63 = arith.constant 0.000000e+00 : f32
    %81 = vector.broadcast %cst_63 : f32 to vector<256x128xf32>
    %82 = arith.maximumf %80, %81 : vector<256x128xf32>
    %83 = tpu.transpose %82, [1, 0] : vector<256x128xf32> -> vector<128x256xf32>
    %84 = vector.extract_strided_slice %83 {offsets = [0, 0], sizes = [8, 256], strides = [1, 1]} : vector<128x256xf32> to vector<8x256xf32>
    %c1_64 = arith.constant 1 : index
    %c0_65 = arith.constant 0 : index
    %c0_66 = arith.constant 0 : index
    %85 = vector.load %arg3[%c1_64, %c0_65, %c0_66] : memref<2x8x256xf32, #tpu.memory_space<vmem>>, vector<1x8x256xf32>
    %86 = vector.shape_cast %85 : vector<1x8x256xf32> to vector<8x256xf32>
    %87 = vector.shape_cast %84 : vector<8x256xf32> to vector<1x8x256xf32>
    tpu.vector_store %arg3[%c1_64, %c0_65, %c0_66], %87 {strides = array<i32>} : memref<2x8x256xf32, #tpu.memory_space<vmem>>, vector<1x8x256xf32>,
    return
  }
  func.func @transform_0(%arg0: i32) -> (i32, i32, i32, i32) {
    %c0_i32 = arith.constant 0 : i32
    %c0_i32_0 = arith.constant 0 : i32
    %c0_i32_1 = arith.constant 0 : i32
    %c0_i32_2 = arith.constant 0 : i32
    return %arg0, %c0_i32, %c0_i32_0, %c0_i32_1 : i32, i32, i32, i32
  }
  func.func @transform_1(%arg0: i32) -> (i32, i32) {
    %c0_i32 = arith.constant 0 : i32
    %c0_i32_0 = arith.constant 0 : i32
    %c0_i32_1 = arith.constant 0 : i32
    return %c0_i32, %c0_i32_0 : i32, i32
  }
  func.func @transform_2(%arg0: i32) -> (i32, i32, i32) {
    %c0_i32 = arith.constant 0 : i32
    %c0_i32_0 = arith.constant 0 : i32
    %c0_i32_1 = arith.constant 0 : i32
    return %arg0, %c0_i32, %c0_i32_0 : i32, i32, i32
  }
}

</mosaic_0001>

<bundles_post_ra>
// kernel: tpu_custom_call.1
= control target key start
LH: loop header
LB: loop body
LE: loop exit
PB: predicated region body
PF: predicated region fallthrough
CT: control target
= control target key end

     0   :  { %vm238_vm0 = vsmask.f32 3328  ;;  %vm239_vm1 = vsmask.f32 7440  ;;  %s8365_s3 = smov 4   ;;  %vm1201_vm3 = vcmask 60448   ;;  %s13581_s0 = inlined_call_operand.vmem [shape: bf16[2,18,18,4], index: 0, kind: input, shape index: {}]   ;;  %s13582_s1 = inlined_call_operand.vmem [shape: bf16[36,128], index: 1, kind: input, shape index: {}]   ;;  %s13583_s2 = inlined_call_operand.hbm [shape: f32[2,8,256], index: 2, kind: output, shape index: {}]  }
   0x1   :  { %v145_v0 = vld [vmem:[%s13581_s0 + $0xc] sm:$0xf]  ;;  %v146_v1 = vld [vmem:[%s13581_s0 + $0x10] sm:$0xf]  ;;  %v142_v6 = vld [vmem:[%s13581_s0] sm:$0xf] }
   0x2   :  { %v266_v2 = vshrl.u32 %v145_v0, 16  ;;  %v269_v3 = vshll.u32 %v145_v0, 16  ;;  %v275_v4 = vshll.u32 %v146_v1, 16  ;;  %v279_v5 = vshrl.u32 %v146_v1, 16  ;;  %v143_v7 = vld [vmem:[%s13581_s0 + $0x4] sm:$0xf]  ;;  %vm8413_vm2 = vmor %vm238_vm0, %vm239_vm1 }
   0x3   :  { %v242_v11 = vshrl.u32 %v142_v6, 16  ;;  %v147_v12 = vld [vmem:[%s13581_s0 + $0x14] sm:$0x1]  ;;  %v245_v14 = vshll.u32 %v142_v6, 16  ;;  %v251_v15 = vshll.u32 %v143_v7, 16  ;;  %v255_v16 = vshrl.u32 %v143_v7, 16 }
   0x4   :  { %v268_v8 = vrot.slane %v266_v2, 4  ;;  %v271_v9 = vrot.slane %v269_v3, 5  ;;  %v277_v10 = vrot.slane %v275_v4, 5  ;;  %v281_v13 = vrot.slane %v279_v5, 4  ;;  %v144_v17 = vld [vmem:[%s13581_s0 + $0x8] sm:$0x1] }
   0x5   :  { %v244_v19 = vrot.slane %v242_v11, 4  ;;  %v285_v20 = vshll.u32 %v147_v12, 16  ;;  %v261_v21 = vshll.u32 %v144_v17, 16  ;;  %v149_v22 = vld [vmem:[%s13581_s0 + $0x1c] sm:$0xf]  ;;  %v247_v24 = vrot.slane %v245_v14, 5 }
   0x6   :  { %v272_v18 = vor.u32 %v271_v9, %v268_v8  ;;  %v253_v25 = vrot.slane %v251_v15, 5  ;;  %v257_v26 = vrot.slane %v255_v16, 4  ;;  %v282_v27 = vor.u32 %v281_v13, %v277_v10  ;;  %v150_v28 = vld [vmem:[%s13581_s0 + $0x20] sm:$0x1]  ;;  %v148_v33 = vld [vmem:[%s13581_s0 + $0x18] sm:$0xf] }
   0x7   :  { %v287_v30 = vrot.slane %v285_v20, 5  ;;  %v263_v31 = vrot.slane %v261_v21, 5  ;;  %v299_v32 = vshll.u32 %v149_v22, 16  ;;  %v248_v34 = vor.u32 %v247_v24, %v244_v19  ;;  %v152_v38 = vld [vmem:[%s13581_s0 + $0x28] sm:$0xf]  ;;  %s8366_s25 = smov 8  }
   0x8   :  { %v273_v29 = vrot.slane %v272_v18, 4  ;;  %v283_v35 = vrot.slane %v282_v27, 4  ;;  %v258_v36 = vor.u32 %v257_v26, %v253_v25  ;;  %v303_v37 = vshrl.u32 %v149_v22, 16  ;;  %v153_v43 = vld [vmem:[%s13581_s0 + $0x2c] sm:$0x1] }
   0x9   :  { %v301_v40 = vrot.slane %v299_v32, 5  ;;  %v309_v41 = vshll.u32 %v150_v28, 16  ;;  %v290_v42 = vshrl.u32 %v148_v33, 16  ;;  %v249_v44 = vrot.slane %v248_v34, 4  ;;  %v151_v48 = vld [vmem:[%s13581_s0 + $0x24] sm:$0xf] }
   0xa   :  { %v278_v39 = vsel %vm8413_vm2, %v273_v29, %v277_v10  ;;  %v288_v45 = vsel %vm8413_vm2, %v283_v35, %v287_v30  ;;  %v259_v46 = vrot.slane %v258_v36, 4  ;;  %v305_v47 = vrot.slane %v303_v37, 4  ;;  %v155_v53 = vld [vmem:[%s13581_s0 + $0x34] sm:$0xf]  ;;  %v156_v62 = vld [vmem:[%s13581_s0 + $0x38] sm:$0x1] }
   0xb   :  { %1013 = vrot.lane.b32.xlu1 %v278_v39, %s8365_s3  ;;  %v311_v49 = vrot.slane %v309_v41, 5  ;;  %v292_v50 = vrot.slane %v290_v42, 4  ;;  %v293_v51 = vshll.u32 %v148_v33, 16  ;;  %v323_v52 = vshll.u32 %v152_v38, 16  ;;  %v154_v3 = vld [vmem:[%s13581_s0 + $0x30] sm:$0xf] }
   0xc   :  { %v254_v54 = vsel %vm8413_vm2, %v249_v44, %v253_v25  ;;  %v264_v55 = vsel %vm8413_vm2, %v259_v46, %v263_v31  ;;  %v306_v56 = vor.u32 %v305_v47, %v301_v40  ;;  %v327_v57 = vshrl.u32 %v152_v38, 16  ;;  %v158_v8 = vld [vmem:[%s13581_s0 + $0x40] sm:$0xf]  ;;  %v159_v17 = vld [vmem:[%s13581_s0 + $0x44] sm:$0x1] }
   0xd   :  { %1009 = vrot.lane.b32.xlu0 %v254_v54, %s8365_s3  ;;  %v295_v58 = vrot.slane %v293_v51, 5  ;;  %v325_v59 = vrot.slane %v323_v52, 5  ;;  %v333_v60 = vshll.u32 %v153_v43, 16  ;;  %v314_v61 = vshrl.u32 %v151_v48, 16  ;;  %v157_v22 = vld [vmem:[%s13581_s0 + $0x3c] sm:$0xf] }
   0xe   :  { %v307_v63 = vrot.slane %v306_v56, 4  ;;  %v329_v0 = vrot.slane %v327_v57, 4  ;;  %v317_v1 = vshll.u32 %v151_v48, 16  ;;  %v347_v2 = vshll.u32 %v155_v53, 16  ;;  %v161_v28 = vld [vmem:[%s13581_s0 + $0x4c] sm:$0xf] }
   0xf   :  { %1015 = vrot.lane.b32.xlu1 %v288_v45, %s8365_s3  ;;  %v296_v4 = vor.u32 %v295_v58, %v292_v50  ;;  %v335_v5 = vrot.slane %v333_v60, 5  ;;  %v316_v6 = vrot.slane %v314_v61, 4  ;;  %v351_v7 = vshrl.u32 %v155_v53, 16  ;;  %v160_v42 = vld [vmem:[%s13581_s0 + $0x48] sm:$0xf] }
  0x10   :  { %v312_v9 = vsel %vm8413_vm2, %v307_v63, %v311_v49  ;;  %v330_v10 = vor.u32 %v329_v0, %v325_v59  ;;  %v319_v11 = vrot.slane %v317_v1, 5  ;;  %v8457_v12 = vrot.slane %v347_v2, 5  ;;  %v164_v47 = vld [vmem:[%s13581_s0 + $0x58] sm:$0xf]  ;;  %v163_v61 = vld [vmem:[%s13581_s0 + $0x54] sm:$0xf] }
  0x11   :  { %1011 = vrot.lane.b32.xlu0 %v264_v55, %s8365_s3  ;;  %v297_v13 = vrot.slane %v296_v4, 4  ;;  %v353_v14 = vrot.slane %v351_v7, 4  ;;  %v357_v15 = vshll.u32 %v156_v62, 16  ;;  %v338_v16 = vshrl.u32 %v154_v3, 16 }
  0x12   :  { %v331_v18 = vrot.slane %v330_v10, 4  ;;  %v320_v19 = vor.u32 %v319_v11, %v316_v6  ;;  %v341_v20 = vshll.u32 %v154_v3, 16  ;;  %v371_v21 = vshll.u32 %v158_v8, 16  ;;  %v167_v6 = vld [vmem:[%s13581_s0 + $0x64] sm:$0xf] }
  0x13   :  { %1019 = vrot.lane.b32.xlu1 %v312_v9, %s8365_s3  ;;  %v302_v24 = vsel %vm8413_vm2, %v297_v13, %v301_v40  ;;  %v354_v25 = vor.u32 %v353_v14, %v8457_v12  ;;  %v359_v26 = vrot.slane %v357_v15, 5  ;;  %v340_v27 = vrot.slane %v338_v16, 4  ;;  %v162_v40 = vld [vmem:[%s13581_s0 + $0x50] sm:$0x1]  ;;  %v168_v11 = vld [vmem:[%s13581_s0 + $0x68] sm:$0x1] }
  0x14   :  { %v336_v29 = vsel %vm8413_vm2, %v331_v18, %v335_v5  ;;  %v321_v30 = vrot.slane %v320_v19, 4  ;;  %v343_v31 = vrot.slane %v341_v20, 5  ;;  %v8475_v32 = vrot.slane %v371_v21, 5  ;;  %v166_v16 = vld [vmem:[%s13581_s0 + $0x60] sm:$0xf] }
  0x15   :  { %1017 = vrot.lane.b32.xlu0 %v302_v24, %s8365_s3  ;;  %v355_v33 = vrot.slane %v354_v25, 4  ;;  %v375_v34 = vshrl.u32 %v158_v8, 16  ;;  %v381_v35 = vshll.u32 %v159_v17, 16  ;;  %v362_v36 = vshrl.u32 %v157_v22, 16 }
  0x16   :  { %v326_v37 = vsel %vm8413_vm2, %v321_v30, %v325_v59  ;;  %v344_v38 = vor.u32 %v343_v31, %v340_v27  ;;  %v365_v39 = vshll.u32 %v157_v22, 16  ;;  %v395_v41 = vshll.u32 %v161_v28, 16  ;;  %v165_v59 = vld [vmem:[%s13581_s0 + $0x5c] sm:$0x1]  ;;  %v171_v31 = vld [vmem:[%s13581_s0 + $0x74] sm:$0x1] }
  0x17   :  { %1023 = vrot.lane.b32.xlu1 %v336_v29, %s8365_s3  ;;  %v360_v43 = vsel %vm8413_vm2, %v355_v33, %v359_v26  ;;  %v377_v44 = vrot.slane %v375_v34, 4  ;;  %v383_v45 = vrot.slane %v381_v35, 5  ;;  %v364_v46 = vrot.slane %v362_v36, 4  ;;  %v170_v26 = vld [vmem:[%s13581_s0 + $0x70] sm:$0xf] }
  0x18   :  { %v345_v48 = vrot.slane %v344_v38, 4  ;;  %v367_v49 = vrot.slane %v365_v39, 5  ;;  %v8492_v50 = vrot.slane %v395_v41, 5  ;;  %v399_v51 = vshrl.u32 %v161_v28, 16  ;;  %v169_v36 = vld [vmem:[%s13581_s0 + $0x6c] sm:$0xf] }
  0x19   :  { %1021 = vrot.lane.b32.xlu0 %v326_v37, %s8365_s3  ;;  %v378_v52 = vor.u32 %v377_v44, %v8475_v32  ;;  %v405_v53 = vshll.u32 %v162_v40, 16  ;;  %v386_v54 = vshrl.u32 %v160_v42, 16  ;;  %v389_v55 = vshll.u32 %v160_v42, 16 }
  0x1a   :  { %v350_v56 = vsel %vm8413_vm2, %v345_v48, %v8457_v12  ;;  %v368_v57 = vor.u32 %v367_v49, %v364_v46  ;;  %v401_v58 = vrot.slane %v399_v51, 4  ;;  %v419_v60 = vshll.u32 %v164_v47, 16 }
  0x1b   :  { %1027 = vrot.lane.b32.xlu1 %v360_v43, %s8365_s3  ;;  %v379_v62 = vrot.slane %v378_v52, 4  ;;  %v407_v63 = vrot.slane %v405_v53, 5  ;;  %v388_v0 = vrot.slane %v386_v54, 4  ;;  %v391_v1 = vrot.slane %v389_v55, 5  ;;  %v174_v54 = vld [vmem:[%s13581_s0 + $0x80] sm:$0x1] }
  0x1c   :  { %v369_v2 = vrot.slane %v368_v57, 4  ;;  %v402_v3 = vor.u32 %v401_v58, %v8492_v50  ;;  %v8507_v4 = vrot.slane %v419_v60, 5  ;;  %v423_v5 = vshrl.u32 %v164_v47, 16  ;;  %v172_v55 = vld [vmem:[%s13581_s0 + $0x78] sm:$0xf] }
  0x1d   :  { %1025 = vrot.lane.b32.xlu0 %v350_v56, %s8365_s3  ;;  %v384_v7 = vsel %vm8413_vm2, %v379_v62, %v383_v45  ;;  %v392_v8 = vor.u32 %v391_v1, %v388_v0  ;;  %v429_v9 = vshll.u32 %v165_v59, 16  ;;  %v410_v10 = vshrl.u32 %v163_v61, 16  ;;  %v173_v45 = vld [vmem:[%s13581_s0 + $0x7c] sm:$0xf]  ;;  %v176_v0 = vld [vmem:[%s13581_s0 + $0x88] sm:$0xf] }
  0x1e   :  { %v374_v12 = vsel %vm8413_vm2, %v369_v2, %v8475_v32  ;;  %v403_v13 = vrot.slane %v402_v3, 4  ;;  %v425_v14 = vrot.slane %v423_v5, 4  ;;  %v413_v15 = vshll.u32 %v163_v61, 16 }
  0x1f   :  { %1031 = vrot.lane.b32.xlu1 %v384_v7, %s8365_s3  ;;  %v393_v17 = vrot.slane %v392_v8, 4  ;;  %v431_v18 = vrot.slane %v429_v9, 5  ;;  %v412_v19 = vrot.slane %v410_v10, 4  ;;  %v443_v20 = vshll.u32 %v167_v6, 16  ;;  %v177_v9 = vld [vmem:[%s13581_s0 + $0x8c] sm:$0x1] }
  0x20   :  { %v408_v21 = vsel %vm8413_vm2, %v403_v13, %v407_v63  ;;  %v426_v22 = vor.u32 %v425_v14, %v8507_v4  ;;  %v415_v24 = vrot.slane %v413_v15, 5  ;;  %v447_v25 = vshrl.u32 %v167_v6, 16  ;;  %v175_v10 = vld [vmem:[%s13581_s0 + $0x84] sm:$0xf] }
  0x21   :  { %1029 = vrot.lane.b32.xlu0 %v374_v12, %s8365_s3  ;;  %v398_v27 = vsel %vm8413_vm2, %v393_v17, %v8492_v50  ;;  %v445_v28 = vrot.slane %v443_v20, 5  ;;  %v453_v29 = vshll.u32 %v168_v11, 16  ;;  %v434_v30 = vshrl.u32 %v166_v16, 16 }
  0x22   :  { %v427_v32 = vrot.slane %v426_v22, 4  ;;  %v416_v33 = vor.u32 %v415_v24, %v412_v19  ;;  %v449_v34 = vrot.slane %v447_v25, 4  ;;  %v437_v35 = vshll.u32 %v166_v16, 16  ;;  %v179_v19 = vld [vmem:[%s13581_s0 + $0x94] sm:$0xf] }
  0x23   :  { %1035 = vrot.lane.b32.xlu1 %v408_v21, %s8365_s3  ;;  %v455_v37 = vrot.slane %v453_v29, 5  ;;  %v436_v38 = vrot.slane %v434_v30, 4  ;;  %v467_v39 = vshll.u32 %v170_v26, 16  ;;  %v471_v40 = vshrl.u32 %v170_v26, 16  ;;  %v180_v29 = vld [vmem:[%s13581_s0 + $0x98] sm:$0x1] }
  0x24   :  { %v432_v41 = vsel %vm8413_vm2, %v427_v32, %v431_v18  ;;  %v417_v42 = vrot.slane %v416_v33, 4  ;;  %v450_v43 = vor.u32 %v449_v34, %v445_v28  ;;  %v439_v44 = vrot.slane %v437_v35, 5  ;;  %v178_v30 = vld [vmem:[%s13581_s0 + $0x90] sm:$0xf] }
  0x25   :  { %1033 = vrot.lane.b32.xlu0 %v398_v27, %s8365_s3  ;;  %v469_v46 = vrot.slane %v467_v39, 5  ;;  %v473_v47 = vrot.slane %v471_v40, 4  ;;  %v477_v48 = vshll.u32 %v171_v31, 16  ;;  %v458_v49 = vshrl.u32 %v169_v36, 16  ;;  %v182_v39 = vld [vmem:[%s13581_s0 + $0xa0] sm:$0xf] }
  0x26   :  { %v422_v50 = vsel %vm8413_vm2, %v417_v42, %v8507_v4  ;;  %v451_v51 = vrot.slane %v450_v43, 4  ;;  %v440_v52 = vor.u32 %v439_v44, %v436_v38  ;;  %v461_v53 = vshll.u32 %v169_v36, 16  ;;  %v183_v44 = vld [vmem:[%s13581_s0 + $0xa4] sm:$0x1] }
  0x27   :  { %1039 = vrot.lane.b32.xlu1 %v432_v41, %s8365_s3  ;;  %v474_v56 = vor.u32 %v473_v47, %v469_v46  ;;  %v479_v57 = vrot.slane %v477_v48, 5  ;;  %v460_v58 = vrot.slane %v458_v49, 4  ;;  %v491_v59 = vshll.u32 %v173_v45, 16  ;;  %v181_v49 = vld [vmem:[%s13581_s0 + $0x9c] sm:$0xf] }
  0x28   :  { %v456_v60 = vsel %vm8413_vm2, %v451_v51, %v455_v37  ;;  %v441_v61 = vrot.slane %v440_v52, 4  ;;  %v463_v62 = vrot.slane %v461_v53, 5  ;;  %v495_v63 = vshrl.u32 %v173_v45, 16 }
  0x29   :  { %1037 = vrot.lane.b32.xlu0 %v422_v50, %s8365_s3  ;;  %v475_v1 = vrot.slane %v474_v56, 4  ;;  %v493_v2 = vrot.slane %v491_v59, 5  ;;  %v501_v3 = vshll.u32 %v174_v54, 16  ;;  %v482_v4 = vshrl.u32 %v172_v55, 16 }
  0x2a   :  { %v446_v5 = vsel %vm8413_vm2, %v441_v61, %v445_v28  ;;  %v464_v6 = vor.u32 %v463_v62, %v460_v58  ;;  %v497_v7 = vrot.slane %v495_v63, 4  ;;  %v485_v8 = vshll.u32 %v172_v55, 16  ;;  %v185_v58 = vld [vmem:[%s13581_s0 + $0xac] sm:$0xf]  ;;  %v186_v63 = vld [vmem:[%s13581_s0 + $0xb0] sm:$0x1] }
  0x2b   :  { %1043 = vrot.lane.b32.xlu1 %v456_v60, %s8365_s3  ;;  %v480_v11 = vsel %vm8413_vm2, %v475_v1, %v479_v57  ;;  %v503_v12 = vrot.slane %v501_v3, 5  ;;  %v484_v13 = vrot.slane %v482_v4, 4  ;;  %v515_v14 = vshll.u32 %v176_v0, 16  ;;  %v184_v4 = vld [vmem:[%s13581_s0 + $0xa8] sm:$0xf] }
  0x2c   :  { %v465_v15 = vrot.slane %v464_v6, 4  ;;  %v498_v16 = vor.u32 %v497_v7, %v493_v2  ;;  %v487_v17 = vrot.slane %v485_v8, 5  ;;  %v519_v18 = vshrl.u32 %v176_v0, 16 }
  0x2d   :  { %1041 = vrot.lane.b32.xlu0 %v446_v5, %s8365_s3  ;;  %v517_v20 = vrot.slane %v515_v14, 5  ;;  %v525_v21 = vshll.u32 %v177_v9, 16  ;;  %v506_v22 = vshrl.u32 %v175_v10, 16  ;;  %v509_v24 = vshll.u32 %v175_v10, 16 }
  0x2e   :  { %v470_v25 = vsel %vm8413_vm2, %v465_v15, %v469_v46  ;;  %v499_v26 = vrot.slane %v498_v16, 4  ;;  %v488_v27 = vor.u32 %v487_v17, %v484_v13  ;;  %v521_v28 = vrot.slane %v519_v18, 4  ;;  %v188_v13 = vld [vmem:[%s13581_s0 + $0xb8] sm:$0xf] }
  0x2f   :  { %1047 = vrot.lane.b32.xlu1 %v480_v11, %s8365_s3  ;;  %v527_v31 = vrot.slane %v525_v21, 5  ;;  %v508_v32 = vrot.slane %v506_v22, 4  ;;  %v511_v33 = vrot.slane %v509_v24, 5  ;;  %v539_v34 = vshll.u32 %v179_v19, 16  ;;  %v189_v22 = vld [vmem:[%s13581_s0 + $0xbc] sm:$0x1] }
  0x30   :  { %v504_v35 = vsel %vm8413_vm2, %v499_v26, %v503_v12  ;;  %v489_v36 = vrot.slane %v488_v27, 4  ;;  %v522_v37 = vor.u32 %v521_v28, %v517_v20  ;;  %v543_v38 = vshrl.u32 %v179_v19, 16  ;;  %v187_v24 = vld [vmem:[%s13581_s0 + $0xb4] sm:$0xf] }
  0x31   :  { %1045 = vrot.lane.b32.xlu0 %v470_v25, %s8365_s3  ;;  %v512_v40 = vor.u32 %v511_v33, %v508_v32  ;;  %v541_v41 = vrot.slane %v539_v34, 5  ;;  %v549_v42 = vshll.u32 %v180_v29, 16  ;;  %v530_v43 = vshrl.u32 %v178_v30, 16  ;;  %v191_v33 = vld [vmem:[%s13581_s0 + $0xdc] sm:$0xf] }
  0x32   :  { %v494_v45 = vsel %vm8413_vm2, %v489_v36, %v493_v2  ;;  %v523_v46 = vrot.slane %v522_v37, 4  ;;  %v545_v47 = vrot.slane %v543_v38, 4  ;;  %v533_v48 = vshll.u32 %v178_v30, 16 }
  0x33   :  { %1051 = vrot.lane.b32.xlu1 %v504_v35, %s8365_s3  ;;  %v513_v50 = vrot.slane %v512_v40, 4  ;;  %v551_v51 = vrot.slane %v549_v42, 5  ;;  %v532_v52 = vrot.slane %v530_v43, 4  ;;  %v563_v53 = vshll.u32 %v182_v39, 16  ;;  %v192_v42 = vld [vmem:[%s13581_s0 + $0xe0] sm:$0x1] }
  0x34   :  { %v528_v54 = vsel %vm8413_vm2, %v523_v46, %v527_v31  ;;  %v546_v55 = vor.u32 %v545_v47, %v541_v41  ;;  %v535_v56 = vrot.slane %v533_v48, 5  ;;  %v567_v57 = vshrl.u32 %v182_v39, 16  ;;  %v190_v43 = vld [vmem:[%s13581_s0 + $0xd8] sm:$0xf] }
  0x35   :  { %1049 = vrot.lane.b32.xlu0 %v494_v45, %s8365_s3  ;;  %v518_v59 = vsel %vm8413_vm2, %v513_v50, %v517_v20  ;;  %v565_v60 = vrot.slane %v563_v53, 5  ;;  %v573_v61 = vshll.u32 %v183_v44, 16  ;;  %v554_v62 = vshrl.u32 %v181_v49, 16 }
  0x36   :  { %v547_v0 = vrot.slane %v546_v55, 4  ;;  %v536_v1 = vor.u32 %v535_v56, %v532_v52  ;;  %v569_v2 = vrot.slane %v567_v57, 4  ;;  %v557_v3 = vshll.u32 %v181_v49, 16  ;;  %v194_v52 = vld [vmem:[%s13581_s0 + $0xe8] sm:$0xf] }
  0x37   :  { %1055 = vrot.lane.b32.xlu1 %v528_v54, %s8365_s3  ;;  %v575_v5 = vrot.slane %v573_v61, 5  ;;  %v556_v6 = vrot.slane %v554_v62, 4  ;;  %v587_v7 = vshll.u32 %v185_v58, 16  ;;  %v591_v8 = vshrl.u32 %v185_v58, 16  ;;  %v195_v61 = vld [vmem:[%s13581_s0 + $0xec] sm:$0x1] }
  0x38   :  { %v552_v9 = vsel %vm8413_vm2, %v547_v0, %v551_v51  ;;  %v537_v10 = vrot.slane %v536_v1, 4  ;;  %v570_v11 = vor.u32 %v569_v2, %v565_v60  ;;  %v559_v12 = vrot.slane %v557_v3, 5  ;;  %v193_v62 = vld [vmem:[%s13581_s0 + $0xe4] sm:$0xf] }
  0x39   :  { %1053 = vrot.lane.b32.xlu0 %v518_v59, %s8365_s3  ;;  %v589_v14 = vrot.slane %v587_v7, 5  ;;  %v593_v15 = vrot.slane %v591_v8, 4  ;;  %v597_v16 = vshll.u32 %v186_v63, 16  ;;  %v578_v17 = vshrl.u32 %v184_v4, 16  ;;  %v197_v7 = vld [vmem:[%s13581_s0 + $0xf4] sm:$0xf] }
  0x3a   :  { %v542_v18 = vsel %vm8413_vm2, %v537_v10, %v541_v41  ;;  %v571_v19 = vrot.slane %v570_v11, 4  ;;  %v560_v20 = vor.u32 %v559_v12, %v556_v6  ;;  %v581_v21 = vshll.u32 %v184_v4, 16  ;;  %v198_v12 = vld [vmem:[%s13581_s0 + $0xf8] sm:$0x1] }
  0x3b   :  { %1059 = vrot.lane.b32.xlu1 %v552_v9, %s8365_s3  ;;  %v594_v25 = vor.u32 %v593_v15, %v589_v14  ;;  %v599_v26 = vrot.slane %v597_v16, 5  ;;  %v580_v27 = vrot.slane %v578_v17, 4  ;;  %v611_v28 = vshll.u32 %v188_v13, 16  ;;  %v196_v17 = vld [vmem:[%s13581_s0 + $0xf0] sm:$0xf] }
  0x3c   :  { %v576_v29 = vsel %vm8413_vm2, %v571_v19, %v575_v5  ;;  %v561_v30 = vrot.slane %v560_v20, 4  ;;  %v583_v31 = vrot.slane %v581_v21, 5  ;;  %v615_v32 = vshrl.u32 %v188_v13, 16 }
  0x3d   :  { %1057 = vrot.lane.b32.xlu0 %v542_v18, %s8365_s3  ;;  %v595_v34 = vrot.slane %v594_v25, 4  ;;  %v613_v35 = vrot.slane %v611_v28, 5  ;;  %v621_v36 = vshll.u32 %v189_v22, 16  ;;  %v602_v37 = vshrl.u32 %v187_v24, 16 }
  0x3e   :  { %v566_v38 = vsel %vm8413_vm2, %v561_v30, %v565_v60  ;;  %v584_v39 = vor.u32 %v583_v31, %v580_v27  ;;  %v617_v40 = vrot.slane %v615_v32, 4  ;;  %v605_v41 = vshll.u32 %v187_v24, 16  ;;  %v200_v27 = vld [vmem:[%s13581_s0 + $0x100] sm:$0xf]  ;;  %v201_v32 = vld [vmem:[%s13581_s0 + $0x104] sm:$0x1] }
  0x3f   :  { %1063 = vrot.lane.b32.xlu1 %v576_v29, %s8365_s3  ;;  %v600_v44 = vsel %vm8413_vm2, %v595_v34, %v599_v26  ;;  %v623_v45 = vrot.slane %v621_v36, 5  ;;  %v604_v46 = vrot.slane %v602_v37, 4  ;;  %v635_v47 = vshll.u32 %v191_v33, 16  ;;  %v199_v37 = vld [vmem:[%s13581_s0 + $0xfc] sm:$0xf] }
  0x40   :  { %v585_v48 = vrot.slane %v584_v39, 4  ;;  %v618_v49 = vor.u32 %v617_v40, %v613_v35  ;;  %v607_v50 = vrot.slane %v605_v41, 5  ;;  %v639_v51 = vshrl.u32 %v191_v33, 16 }
  0x41   :  { %1061 = vrot.lane.b32.xlu0 %v566_v38, %s8365_s3  ;;  %v637_v53 = vrot.slane %v635_v47, 5  ;;  %v645_v54 = vshll.u32 %v192_v42, 16  ;;  %v626_v55 = vshrl.u32 %v190_v43, 16  ;;  %v629_v56 = vshll.u32 %v190_v43, 16 }
  0x42   :  { %v590_v57 = vsel %vm8413_vm2, %v585_v48, %v589_v14  ;;  %v619_v58 = vrot.slane %v618_v49, 4  ;;  %v608_v59 = vor.u32 %v607_v50, %v604_v46  ;;  %v641_v60 = vrot.slane %v639_v51, 4  ;;  %v203_v46 = vld [vmem:[%s13581_s0 + $0x10c] sm:$0xf] }
  0x43   :  { %1067 = vrot.lane.b32.xlu1 %v600_v44, %s8365_s3  ;;  %v647_v63 = vrot.slane %v645_v54, 5  ;;  %v628_v0 = vrot.slane %v626_v55, 4  ;;  %v631_v1 = vrot.slane %v629_v56, 5  ;;  %v659_v2 = vshll.u32 %v194_v52, 16  ;;  %v204_v55 = vld [vmem:[%s13581_s0 + $0x110] sm:$0x1] }
  0x44   :  { %v624_v3 = vsel %vm8413_vm2, %v619_v58, %v623_v45  ;;  %v609_v4 = vrot.slane %v608_v59, 4  ;;  %v642_v5 = vor.u32 %v641_v60, %v637_v53  ;;  %v663_v6 = vshrl.u32 %v194_v52, 16  ;;  %v202_v56 = vld [vmem:[%s13581_s0 + $0x108] sm:$0xf] }
  0x45   :  { %1065 = vrot.lane.b32.xlu0 %v590_v57, %s8365_s3  ;;  %v632_v8 = vor.u32 %v631_v1, %v628_v0  ;;  %v661_v9 = vrot.slane %v659_v2, 5  ;;  %v669_v10 = vshll.u32 %v195_v61, 16  ;;  %v650_v11 = vshrl.u32 %v193_v62, 16  ;;  %v206_v1 = vld [vmem:[%s13581_s0 + $0x118] sm:$0xf] }
  0x46   :  { %v614_v13 = vsel %vm8413_vm2, %v609_v4, %v613_v35  ;;  %v643_v14 = vrot.slane %v642_v5, 4  ;;  %v665_v15 = vrot.slane %v663_v6, 4  ;;  %v653_v16 = vshll.u32 %v193_v62, 16 }
  0x47   :  { %1071 = vrot.lane.b32.xlu1 %v624_v3, %s8365_s3  ;;  %v633_v18 = vrot.slane %v632_v8, 4  ;;  %v671_v19 = vrot.slane %v669_v10, 5  ;;  %v652_v20 = vrot.slane %v650_v11, 4  ;;  %v683_v21 = vshll.u32 %v197_v7, 16  ;;  %v207_v10 = vld [vmem:[%s13581_s0 + $0x11c] sm:$0x1] }
  0x48   :  { %v648_v22 = vsel %vm8413_vm2, %v643_v14, %v647_v63  ;;  %v666_v24 = vor.u32 %v665_v15, %v661_v9  ;;  %v655_v25 = vrot.slane %v653_v16, 5  ;;  %v687_v26 = vshrl.u32 %v197_v7, 16  ;;  %v205_v11 = vld [vmem:[%s13581_s0 + $0x114] sm:$0xf] }
  0x49   :  { %1069 = vrot.lane.b32.xlu0 %v614_v13, %s8365_s3  ;;  %v638_v28 = vsel %vm8413_vm2, %v633_v18, %v637_v53  ;;  %v685_v29 = vrot.slane %v683_v21, 5  ;;  %v693_v30 = vshll.u32 %v198_v12, 16  ;;  %v674_v31 = vshrl.u32 %v196_v17, 16 }
  0x4a   :  { %v667_v33 = vrot.slane %v666_v24, 4  ;;  %v656_v34 = vor.u32 %v655_v25, %v652_v20  ;;  %v689_v35 = vrot.slane %v687_v26, 4  ;;  %v677_v36 = vshll.u32 %v196_v17, 16  ;;  %v209_v20 = vld [vmem:[%s13581_s0 + $0x124] sm:$0xf] }
  0x4b   :  { %1075 = vrot.lane.b32.xlu1 %v648_v22, %s8365_s3  ;;  %v695_v38 = vrot.slane %v693_v30, 5  ;;  %v676_v39 = vrot.slane %v674_v31, 4  ;;  %v707_v40 = vshll.u32 %v200_v27, 16  ;;  %v711_v41 = vshrl.u32 %v200_v27, 16  ;;  %v210_v30 = vld [vmem:[%s13581_s0 + $0x128] sm:$0x1] }
  0x4c   :  { %v672_v42 = vsel %vm8413_vm2, %v667_v33, %v671_v19  ;;  %v657_v43 = vrot.slane %v656_v34, 4  ;;  %v690_v44 = vor.u32 %v689_v35, %v685_v29  ;;  %v679_v45 = vrot.slane %v677_v36, 5  ;;  %v208_v31 = vld [vmem:[%s13581_s0 + $0x120] sm:$0xf] }
  0x4d   :  { %1073 = vrot.lane.b32.xlu0 %v638_v28, %s8365_s3  ;;  %v709_v47 = vrot.slane %v707_v40, 5  ;;  %v713_v48 = vrot.slane %v711_v41, 4  ;;  %v717_v49 = vshll.u32 %v201_v32, 16  ;;  %v698_v50 = vshrl.u32 %v199_v37, 16  ;;  %v212_v40 = vld [vmem:[%s13581_s0 + $0x130] sm:$0xf] }
  0x4e   :  { %v662_v51 = vsel %vm8413_vm2, %v657_v43, %v661_v9  ;;  %v691_v52 = vrot.slane %v690_v44, 4  ;;  %v680_v53 = vor.u32 %v679_v45, %v676_v39  ;;  %v701_v54 = vshll.u32 %v199_v37, 16  ;;  %v213_v45 = vld [vmem:[%s13581_s0 + $0x134] sm:$0x1] }
  0x4f   :  { %1079 = vrot.lane.b32.xlu1 %v672_v42, %s8365_s3  ;;  %v714_v57 = vor.u32 %v713_v48, %v709_v47  ;;  %v719_v58 = vrot.slane %v717_v49, 5  ;;  %v700_v59 = vrot.slane %v698_v50, 4  ;;  %v731_v60 = vshll.u32 %v203_v46, 16  ;;  %v211_v50 = vld [vmem:[%s13581_s0 + $0x12c] sm:$0xf] }
  0x50   :  { %v696_v61 = vsel %vm8413_vm2, %v691_v52, %v695_v38  ;;  %v681_v62 = vrot.slane %v680_v53, 4  ;;  %v703_v63 = vrot.slane %v701_v54, 5  ;;  %v735_v0 = vshrl.u32 %v203_v46, 16 }
  0x51   :  { %1077 = vrot.lane.b32.xlu0 %v662_v51, %s8365_s3  ;;  %v715_v2 = vrot.slane %v714_v57, 4  ;;  %v733_v3 = vrot.slane %v731_v60, 5  ;;  %v741_v4 = vshll.u32 %v204_v55, 16  ;;  %v722_v5 = vshrl.u32 %v202_v56, 16 }
  0x52   :  { %v686_v6 = vsel %vm8413_vm2, %v681_v62, %v685_v29  ;;  %v704_v7 = vor.u32 %v703_v63, %v700_v59  ;;  %v737_v8 = vrot.slane %v735_v0, 4  ;;  %v725_v9 = vshll.u32 %v202_v56, 16  ;;  %v215_v59 = vld [vmem:[%s13581_s0 + $0x13c] sm:$0xf]  ;;  %v216_v0 = vld [vmem:[%s13581_s0 + $0x140] sm:$0x1] }
  0x53   :  { %1083 = vrot.lane.b32.xlu1 %v696_v61, %s8365_s3  ;;  %v720_v12 = vsel %vm8413_vm2, %v715_v2, %v719_v58  ;;  %v743_v13 = vrot.slane %v741_v4, 5  ;;  %v724_v14 = vrot.slane %v722_v5, 4  ;;  %v755_v15 = vshll.u32 %v206_v1, 16  ;;  %v214_v5 = vld [vmem:[%s13581_s0 + $0x138] sm:$0xf] }
  0x54   :  { %v705_v16 = vrot.slane %v704_v7, 4  ;;  %v738_v17 = vor.u32 %v737_v8, %v733_v3  ;;  %v727_v18 = vrot.slane %v725_v9, 5  ;;  %v759_v19 = vshrl.u32 %v206_v1, 16 }
  0x55   :  { %1081 = vrot.lane.b32.xlu0 %v686_v6, %s8365_s3  ;;  %v757_v21 = vrot.slane %v755_v15, 5  ;;  %v765_v22 = vshll.u32 %v207_v10, 16  ;;  %v746_v24 = vshrl.u32 %v205_v11, 16  ;;  %v749_v25 = vshll.u32 %v205_v11, 16 }
  0x56   :  { %v710_v26 = vsel %vm8413_vm2, %v705_v16, %v709_v47  ;;  %v739_v27 = vrot.slane %v738_v17, 4  ;;  %v728_v28 = vor.u32 %v727_v18, %v724_v14  ;;  %v761_v29 = vrot.slane %v759_v19, 4  ;;  %v218_v14 = vld [vmem:[%s13581_s0 + $0x148] sm:$0xf] }
  0x57   :  { %1087 = vrot.lane.b32.xlu1 %v720_v12, %s8365_s3  ;;  %v767_v32 = vrot.slane %v765_v22, 5  ;;  %v748_v33 = vrot.slane %v746_v24, 4  ;;  %v751_v34 = vrot.slane %v749_v25, 5  ;;  %v779_v35 = vshll.u32 %v209_v20, 16  ;;  %v219_v24 = vld [vmem:[%s13581_s0 + $0x14c] sm:$0x1] }
  0x58   :  { %v744_v36 = vsel %vm8413_vm2, %v739_v27, %v743_v13  ;;  %v729_v37 = vrot.slane %v728_v28, 4  ;;  %v762_v38 = vor.u32 %v761_v29, %v757_v21  ;;  %v783_v39 = vshrl.u32 %v209_v20, 16  ;;  %v217_v25 = vld [vmem:[%s13581_s0 + $0x144] sm:$0xf] }
  0x59   :  { %1085 = vrot.lane.b32.xlu0 %v710_v26, %s8365_s3  ;;  %v752_v41 = vor.u32 %v751_v34, %v748_v33  ;;  %v781_v42 = vrot.slane %v779_v35, 5  ;;  %v789_v43 = vshll.u32 %v210_v30, 16  ;;  %v770_v44 = vshrl.u32 %v208_v31, 16  ;;  %v221_v34 = vld [vmem:[%s13581_s0 + $0x154] sm:$0xf] }
  0x5a   :  { %v734_v46 = vsel %vm8413_vm2, %v729_v37, %v733_v3  ;;  %v763_v47 = vrot.slane %v762_v38, 4  ;;  %v785_v48 = vrot.slane %v783_v39, 4  ;;  %v773_v49 = vshll.u32 %v208_v31, 16 }
  0x5b   :  { %1091 = vrot.lane.b32.xlu1 %v744_v36, %s8365_s3  ;;  %v753_v51 = vrot.slane %v752_v41, 4  ;;  %v791_v52 = vrot.slane %v789_v43, 5  ;;  %v772_v53 = vrot.slane %v770_v44, 4  ;;  %v803_v54 = vshll.u32 %v212_v40, 16  ;;  %v222_v43 = vld [vmem:[%s13581_s0 + $0x158] sm:$0x1] }
  0x5c   :  { %v768_v55 = vsel %vm8413_vm2, %v763_v47, %v767_v32  ;;  %v786_v56 = vor.u32 %v785_v48, %v781_v42  ;;  %v775_v57 = vrot.slane %v773_v49, 5  ;;  %v807_v58 = vshrl.u32 %v212_v40, 16  ;;  %v220_v44 = vld [vmem:[%s13581_s0 + $0x150] sm:$0xf] }
  0x5d   :  { %1089 = vrot.lane.b32.xlu0 %v734_v46, %s8365_s3  ;;  %v758_v60 = vsel %vm8413_vm2, %v753_v51, %v757_v21  ;;  %v805_v61 = vrot.slane %v803_v54, 5  ;;  %v813_v62 = vshll.u32 %v213_v45, 16  ;;  %v794_v63 = vshrl.u32 %v211_v50, 16 }
  0x5e   :  { %v787_v1 = vrot.slane %v786_v56, 4  ;;  %v776_v2 = vor.u32 %v775_v57, %v772_v53  ;;  %v809_v3 = vrot.slane %v807_v58, 4  ;;  %v797_v4 = vshll.u32 %v211_v50, 16  ;;  %v224_v53 = vld [vmem:[%s13581_s0 + $0x160] sm:$0xf] }
  0x5f   :  { %1095 = vrot.lane.b32.xlu1 %v768_v55, %s8365_s3  ;;  %v815_v6 = vrot.slane %v813_v62, 5  ;;  %v796_v7 = vrot.slane %v794_v63, 4  ;;  %v827_v8 = vshll.u32 %v215_v59, 16  ;;  %v831_v9 = vshrl.u32 %v215_v59, 16  ;;  %v225_v62 = vld [vmem:[%s13581_s0 + $0x164] sm:$0x1] }
  0x60   :  { %v792_v10 = vsel %vm8413_vm2, %v787_v1, %v791_v52  ;;  %v777_v11 = vrot.slane %v776_v2, 4  ;;  %v810_v12 = vor.u32 %v809_v3, %v805_v61  ;;  %v799_v13 = vrot.slane %v797_v4, 5  ;;  %v223_v63 = vld [vmem:[%s13581_s0 + $0x15c] sm:$0xf] }
  0x61   :  { %1093 = vrot.lane.b32.xlu0 %v758_v60, %s8365_s3  ;;  %v8774_v15 = vrot.slane %v827_v8, 5  ;;  %v833_v16 = vrot.slane %v831_v9, 4  ;;  %v837_v17 = vshll.u32 %v216_v0, 16  ;;  %v818_v18 = vshrl.u32 %v214_v5, 16  ;;  %v227_v8 = vld [vmem:[%s13581_s0 + $0x16c] sm:$0xf] }
  0x62   :  { %v782_v19 = vsel %vm8413_vm2, %v777_v11, %v781_v42  ;;  %v811_v20 = vrot.slane %v810_v12, 4  ;;  %v800_v21 = vor.u32 %v799_v13, %v796_v7  ;;  %v821_v22 = vshll.u32 %v214_v5, 16  ;;  %v228_v9 = vld [vmem:[%s13581_s0 + $0x170] sm:$0x1] }
  0x63   :  { %1099 = vrot.lane.b32.xlu1 %v792_v10, %s8365_s3  ;;  %v834_v26 = vor.u32 %v833_v16, %v8774_v15  ;;  %v839_v27 = vrot.slane %v837_v17, 5  ;;  %v820_v28 = vrot.slane %v818_v18, 4  ;;  %v851_v29 = vshll.u32 %v218_v14, 16 }
  0x64   :  { %v816_v30 = vsel %vm8413_vm2, %v811_v20, %v815_v6  ;;  %v801_v31 = vrot.slane %v800_v21, 4  ;;  %v823_v32 = vrot.slane %v821_v22, 5  ;;  %v855_v33 = vshrl.u32 %v218_v14, 16  ;;  %v226_v14 = vld [vmem:[%s13581_s0 + $0x168] sm:$0xf] }
  0x65   :  { %1097 = vrot.lane.b32.xlu0 %v782_v19, %s8365_s3  ;;  %v835_v35 = vrot.slane %v834_v26, 4  ;;  %v8792_v36 = vrot.slane %v851_v29, 5  ;;  %v861_v37 = vshll.u32 %v219_v24, 16  ;;  %v842_v38 = vshrl.u32 %v217_v25, 16  ;;  %v8844_v19 = vld [vmem:[%s13581_s0 + $0x178] sm:$0xf] }
  0x66   :  { %v806_v39 = vsel %vm8413_vm2, %v801_v31, %v805_v61  ;;  %v824_v40 = vor.u32 %v823_v32, %v820_v28  ;;  %v857_v41 = vrot.slane %v855_v33, 4  ;;  %v845_v42 = vshll.u32 %v217_v25, 16  ;;  %v15_v25 = vld [vmem:[%s13581_s0 + $0xc] sm:$0xf]  ;;  %v13_v26 = vld [vmem:[%s13581_s0] sm:$0xf] }
  0x67   :  { %1103 = vrot.lane.b32.xlu1 %v816_v30, %s8365_s3  ;;  %v840_v45 = vsel %vm8413_vm2, %v835_v35, %v839_v27  ;;  %v863_v46 = vrot.slane %v861_v37, 5  ;;  %v844_v47 = vrot.slane %v842_v38, 4  ;;  %v875_v48 = vshll.u32 %v221_v34, 16  ;;  %v16_v27 = vld [vmem:[%s13581_s0 + $0x10] sm:$0xf] }
  0x68   :  { %v825_v49 = vrot.slane %v824_v40, 4  ;;  %v858_v50 = vor.u32 %v857_v41, %v8792_v36  ;;  %v847_v51 = vrot.slane %v845_v42, 5  ;;  %v879_v52 = vshrl.u32 %v221_v34, 16  ;;  %v14_v28 = vld [vmem:[%s13581_s0 + $0x4] sm:$0xf] }
  0x69   :  { %1101 = vrot.lane.b32.xlu0 %v806_v39, %s8365_s3  ;;  %v8810_v54 = vrot.slane %v875_v48, 5  ;;  %v885_v55 = vshll.u32 %v222_v43, 16  ;;  %v866_v56 = vshrl.u32 %v220_v44, 16  ;;  %v869_v57 = vshll.u32 %v220_v44, 16  ;;  %v18_v29 = vld [vmem:[%s13581_s0 + $0x1c] sm:$0xf] }
  0x6a   :  { %v830_v58 = vsel %vm8413_vm2, %v825_v49, %v8774_v15  ;;  %v859_v59 = vrot.slane %v858_v50, 4  ;;  %v848_v60 = vor.u32 %v847_v51, %v844_v47  ;;  %v881_v61 = vrot.slane %v879_v52, 4  ;;  %v17_v30 = vld [vmem:[%s13581_s0 + $0x18] sm:$0xf]  ;;  %v20_v31 = vld [vmem:[%s13581_s0 + $0x28] sm:$0xf] }
  0x6b   :  { %1107 = vrot.lane.b32.xlu1 %v840_v45, %s8365_s3  ;;  %v887_v0 = vrot.slane %v885_v55, 5  ;;  %v868_v1 = vrot.slane %v866_v56, 4  ;;  %v871_v2 = vrot.slane %v869_v57, 5  ;;  %v899_v3 = vshll.u32 %v224_v53, 16  ;;  %v19_v32 = vld [vmem:[%s13581_s0 + $0x24] sm:$0xf] }
  0x6c   :  { %v864_v4 = vsel %vm8413_vm2, %v859_v59, %v863_v46  ;;  %v849_v5 = vrot.slane %v848_v60, 4  ;;  %v882_v6 = vor.u32 %v881_v61, %v8810_v54  ;;  %v903_v7 = vshrl.u32 %v224_v53, 16  ;;  %v22_v33 = vld [vmem:[%s13581_s0 + $0x34] sm:$0xf]  ;;  %v21_v34 = vld [vmem:[%s13581_s0 + $0x30] sm:$0xf] }
  0x6d   :  { %1105 = vrot.lane.b32.xlu0 %v830_v58, %s8365_s3  ;;  %v872_v10 = vor.u32 %v871_v2, %v868_v1  ;;  %v8832_v11 = vrot.slane %v899_v3, 5  ;;  %v909_v12 = vshll.u32 %v225_v62, 16  ;;  %v890_v13 = vshrl.u32 %v223_v63, 16  ;;  %v24_v35 = vld [vmem:[%s13581_s0 + $0x40] sm:$0xf] }
  0x6e   :  { %v854_v15 = vsel %vm8413_vm2, %v849_v5, %v8792_v36  ;;  %v883_v16 = vrot.slane %v882_v6, 4  ;;  %v905_v17 = vrot.slane %v903_v7, 4  ;;  %v893_v18 = vshll.u32 %v223_v63, 16  ;;  %v23_v36 = vld [vmem:[%s13581_s0 + $0x3c] sm:$0xf] }
  0x6f   :  { %1111 = vrot.lane.b32.xlu1 %v864_v4, %s8365_s3  ;;  %v8846_v20 = vrot.slane %v872_v10, 4  ;;  %v8848_v21 = vrot.slane %v909_v12, 5  ;;  %v892_v22 = vrot.slane %v890_v13, 4  ;;  %v923_v24 = vshll.u32 %v227_v8, 16  ;;  %v26_v37 = vld [vmem:[%s13581_s0 + $0x4c] sm:$0xf] }
  0x70   :  { %v25_v38 = vld [vmem:[%s13581_s0 + $0x48] sm:$0xf]  ;;  %v28_v39 = vld [vmem:[%s13581_s0 + $0x58] sm:$0xf]  ;;  %v27_v40 = vld [vmem:[%s13581_s0 + $0x54] sm:$0xf]  ;;  %v888_v46 = vsel %vm8413_vm2, %v883_v16, %v887_v0  ;;  %v906_v47 = vor.u32 %v905_v17, %v8832_v11 }
  0x71   :  { %v30_v41 = vld [vmem:[%s13581_s0 + $0x64] sm:$0xf]  ;;  %v29_v42 = vld [vmem:[%s13581_s0 + $0x60] sm:$0xf]  ;;  %v32_v43 = vld [vmem:[%s13581_s0 + $0x70] sm:$0xf]  ;;  %1109 = vrot.lane.b32.xlu0 %v854_v15, %s8365_s3  ;;  %v878_v55 = vsel %vm8413_vm2, %v8846_v20, %v8810_v54 }
  0x72   :  { %v31_v44 = vld [vmem:[%s13581_s0 + $0x6c] sm:$0xf]  ;;  %v34_v45 = vld [vmem:[%s13581_s0 + $0x7c] sm:$0xf]  ;;  %v895_v48 = vrot.slane %v893_v18, 5  ;;  %v927_v49 = vshrl.u32 %v227_v8, 16 }
  0x73   :  { %v8919_v50 = vld [vmem:[%s13581_s0 + $0x17c] sm:$0x1]  ;;  %v8924_v51 = vld [vmem:[%s13581_s0 + $0x174] sm:$0xf]  ;;  %v33_v52 = vld [vmem:[%s13581_s0 + $0x78] sm:$0xf]  ;;  %1115 = vrot.lane.b32.xlu1 %v888_v46, %s8365_s3 }
  0x74   :  { %v36_v53 = vld [vmem:[%s13581_s0 + $0x88] sm:$0xf]  ;;  %v8937_v56 = vrot.slane %v923_v24, 5  ;;  %v933_v57 = vshll.u32 %v228_v9, 16  ;;  %v914_v58 = vshrl.u32 %v226_v14, 16  ;;  %v907_v60 = vrot.slane %v906_v47, 4 }
  0x75   :  { %v35_v59 = vld [vmem:[%s13581_s0 + $0x84] sm:$0xf]  ;;  %v896_v61 = vor.u32 %v895_v48, %v892_v22  ;;  %v929_v62 = vrot.slane %v927_v49, 4  ;;  %v917_v63 = vshll.u32 %v226_v14, 16  ;;  %v38_v0 = vld [vmem:[%s13581_s0 + $0x94] sm:$0xf]  ;;  %1113 = vrot.lane.b32.xlu0 %v878_v55, %s8365_s3 }
  0x76   :  { %v8946_v54 = vrot.slane %v933_v57, 5  ;;  %v916_v1 = vrot.slane %v914_v58, 4  ;;  %vm77_vm4 = vcmask 27648   ;;  %v947_v2 = vshll.u32 %v8844_v19, 16  ;;  %v37_v3 = vld [vmem:[%s13581_s0 + $0x90] sm:$0xf] }
  0x77   :  { %v912_v4 = vsel %vm8413_vm2, %v907_v60, %v8848_v21  ;;  %v897_v5 = vrot.slane %v896_v61, 4  ;;  %v930_v6 = vor.u32 %v929_v62, %v8937_v56  ;;  %v919_v7 = vrot.slane %v917_v63, 5  ;;  %80 = vst.msk [vmem:[#allocation2 + $0x8] sm:$0xf] %vm77_vm4, %v15_v25  ;;  %78 = vst.msk [vmem:[#allocation2] sm:$0xf] %vm77_vm4, %v13_v26 }
  0x78   :  { %81 = vst.msk [vmem:[#allocation2 + $0xc] sm:$0xf] %vm77_vm4, %v16_v27  ;;  %79 = vst.msk [vmem:[#allocation2 + $0x4] sm:$0xf] %vm77_vm4, %v14_v28  ;;  %v233_v8 = vld [vmem:[%s13581_s0 + $0x184] sm:$0xf]  ;;  %1119 = vrot.lane.b32.xlu1 %v912_v4, %s8365_s3 }
  0x79   :  { %v234_v9 = vld [vmem:[%s13581_s0 + $0x188] sm:$0x1]  ;;  %83 = vst.msk [vmem:[#allocation2 + $0x14] sm:$0xf] %vm77_vm4, %v18_v29  ;;  %82 = vst.msk [vmem:[#allocation2 + $0x10] sm:$0xf] %vm77_vm4, %v17_v30  ;;  %v902_v16 = vsel %vm8413_vm2, %v897_v5, %v8832_v11  ;;  %v920_v18 = vor.u32 %v919_v7, %v916_v1 }
  0x7a   :  { %85 = vst.msk [vmem:[#allocation2 + $0x1c] sm:$0xf] %vm77_vm4, %v20_v31  ;;  %84 = vst.msk [vmem:[#allocation2 + $0x18] sm:$0xf] %vm77_vm4, %v19_v32  ;;  %v8989_v10 = vrot.slane %v947_v2, 5  ;;  %v951_v12 = vshrl.u32 %v8844_v19, 16  ;;  %1117 = vrot.lane.b32.xlu0 %v902_v16, %s8365_s3 }
  0x7b   :  { %87 = vst.msk [vmem:[#allocation2 + $0x24] sm:$0xf] %vm77_vm4, %v22_v33  ;;  %86 = vst.msk [vmem:[#allocation2 + $0x20] sm:$0xf] %vm77_vm4, %v21_v34  ;;  %v957_v13 = vshll.u32 %v8919_v50, 16  ;;  %v938_v14 = vshrl.u32 %v8924_v51, 16 }
  0x7c   :  { %89 = vst.msk [vmem:[#allocation2 + $0x2c] sm:$0xf] %vm77_vm4, %v24_v35  ;;  %88 = vst.msk [vmem:[#allocation2 + $0x28] sm:$0xf] %vm77_vm4, %v23_v36  ;;  %v232_v15 = vld [vmem:[%s13581_s0 + $0x180] sm:$0xf] }
  0x7d   :  { %91 = vst.msk [vmem:[#allocation2 + $0x34] sm:$0xf] %vm77_vm4, %v26_v37  ;;  %90 = vst.msk [vmem:[#allocation2 + $0x30] sm:$0xf] %vm77_vm4, %v25_v38  ;;  %v931_v17 = vrot.slane %v930_v6, 4  ;;  %v941_v20 = vshll.u32 %v8924_v51, 16  ;;  %v1014_v47 = vpop.permute.xlu1 %1013 }
  0x7e   :  { %93 = vst.msk [vmem:[#allocation2 + $0x3c] sm:$0xf] %vm77_vm4, %v28_v39  ;;  %92 = vst.msk [vmem:[#allocation2 + $0x38] sm:$0xf] %vm77_vm4, %v27_v40  ;;  %v40_v19 = vld [vmem:[%s13581_s0 + $0xa0] sm:$0xf] }
  0x7f   :  { %95 = vst.msk [vmem:[#allocation2 + $0x44] sm:$0xf] %vm77_vm4, %v30_v41  ;;  %94 = vst.msk [vmem:[#allocation2 + $0x40] sm:$0xf] %vm77_vm4, %v29_v42  ;;  %v39_v21 = vld [vmem:[%s13581_s0 + $0x9c] sm:$0xf]  ;;  %v936_v27 = vsel %vm8413_vm2, %v931_v17, %v8946_v54 }
  0x80   :  { %97 = vst.msk [vmem:[#allocation2 + $0x4c] sm:$0xf] %vm77_vm4, %v32_v43  ;;  %96 = vst.msk [vmem:[#allocation2 + $0x48] sm:$0xf] %vm77_vm4, %v31_v44  ;;  %v953_v22 = vrot.slane %v951_v12, 4  ;;  %v959_v24 = vrot.slane %v957_v13, 5  ;;  %1123 = vrot.lane.b32.xlu1 %v936_v27, %s8365_s3 }
  0x81   :  { %99 = vst.msk [vmem:[#allocation2 + $0x54] sm:$0xf] %vm77_vm4, %v34_v45  ;;  %98 = vst.msk [vmem:[#allocation2 + $0x50] sm:$0xf] %vm77_vm4, %v33_v52  ;;  %v940_v25 = vrot.slane %v938_v14, 4  ;;  %v971_v26 = vshll.u32 %v233_v8, 16  ;;  %v1016_v2 = vpop.permute.xlu1 %1015 }
  0x82   :  { %101 = vst.msk [vmem:[#allocation2 + $0x5c] sm:$0xf] %vm77_vm4, %v36_v53  ;;  %100 = vst.msk [vmem:[#allocation2 + $0x58] sm:$0xf] %vm77_vm4, %v35_v59  ;;  %v236_v11 = vld [vmem:[%s13581_s0 + $0x190] sm:$0xf]  ;;  %v954_v32 = vor.u32 %v953_v22, %v8989_v10 }
  0x83   :  { %103 = vst.msk [vmem:[#allocation2 + $0x64] sm:$0xf] %vm77_vm4, %v38_v0  ;;  %102 = vst.msk [vmem:[#allocation2 + $0x60] sm:$0xf] %vm77_vm4, %v37_v3  ;;  %v921_v28 = vrot.slane %v920_v18, 4  ;;  %v943_v29 = vrot.slane %v941_v20, 5  ;;  %v1010_v0 = vpop.permute.xlu0 %1009 }
  0x84   :  { %105 = vst.msk [vmem:[#allocation2 + $0x6c] sm:$0xf] %vm77_vm4, %v40_v19  ;;  %104 = vst.msk [vmem:[#allocation2 + $0x68] sm:$0xf] %vm77_vm4, %v39_v21  ;;  %v975_v30 = vshrl.u32 %v233_v8, 16  ;;  %v9021_v33 = vrot.slane %v971_v26, 5 }
  0x85   :  { %v237_v31 = vld [vmem:[%s13581_s0 + $0x194] sm:$0x1]  ;;  %v981_v34 = vshll.u32 %v234_v9, 16  ;;  %v962_v35 = vshrl.u32 %v232_v15, 16  ;;  %v235_v36 = vld [vmem:[%s13581_s0 + $0x18c] sm:$0xf]  ;;  %v926_v37 = vsel %vm8413_vm2, %v921_v28, %v8937_v56  ;;  %v944_v38 = vor.u32 %v943_v29, %v940_v25 }
  0x86   :  { %v977_v39 = vrot.slane %v975_v30, 4  ;;  %v965_v40 = vshll.u32 %v232_v15, 16  ;;  %v42_v41 = vld [vmem:[%s13581_s0 + $0xac] sm:$0xf]  ;;  %v41_v42 = vld [vmem:[%s13581_s0 + $0xa8] sm:$0xf]  ;;  %1121 = vrot.lane.b32.xlu0 %v926_v37, %s8365_s3 }
  0x87   :  { %v955_v43 = vrot.slane %v954_v32, 4  ;;  %v983_v44 = vrot.slane %v981_v34, 5  ;;  %v964_v45 = vrot.slane %v962_v35, 4  ;;  %v995_v46 = vshll.u32 %v236_v11, 16  ;;  %107 = vst.msk [vmem:[#allocation2 + $0x74] sm:$0xf] %vm77_vm4, %v42_v41  ;;  %v1012_v17 = vpop.permute.xlu0 %1011 }
  0x88   :  { %106 = vst.msk [vmem:[#allocation2 + $0x70] sm:$0xf] %vm77_vm4, %v41_v42  ;;  %v945_v48 = vrot.slane %v944_v38, 4  ;;  %v978_v49 = vor.u32 %v977_v39, %v9021_v33  ;;  %v967_v50 = vrot.slane %v965_v40, 5  ;;  %v999_v51 = vshrl.u32 %v236_v11, 16 }
  0x89   :  { %1204 = vst.msk [vmem:[#allocation2 + $0x8] sm:$0xf] %vm1201_vm3, %v1014_v47  ;;  %v960_v52 = vsel %vm8413_vm2, %v955_v43, %v959_v24  ;;  %v9043_v53 = vrot.slane %v995_v46, 5  ;;  %v1005_v55 = vshll.u32 %v237_v31, 16  ;;  %v986_v56 = vshrl.u32 %v235_v36, 16  ;;  %v1020_v24 = vpop.permute.xlu1 %1019 }
  0x8a   :  { %v9048_v57 = vld [vmem:[%s13581_s0 + $0x4] sm:$0xf]  ;;  %1127 = vrot.lane.b32.xlu1 %v960_v52, %s8365_s3  ;;  %v950_v58 = vsel %vm8413_vm2, %v945_v48, %v8989_v10  ;;  %v979_v59 = vrot.slane %v978_v49, 4  ;;  %v968_v60 = vor.u32 %v967_v50, %v964_v45  ;;  %v1001_v61 = vrot.slane %v999_v51, 4  ;;  %v44_v62 = vld [vmem:[%s13581_s0 + $0xb8] sm:$0xf] }
  0x8b   :  { %v43_v63 = vld [vmem:[%s13581_s0 + $0xb4] sm:$0xf]  ;;  %v988_v54 = vrot.slane %v986_v56, 4  ;;  %v989_v1 = vshll.u32 %v235_v36, 16  ;;  %109 = vst.msk [vmem:[#allocation2 + $0x7c] sm:$0xf] %vm77_vm4, %v44_v62  ;;  %1125 = vrot.lane.b32.xlu0 %v950_v58, %s8365_s3  ;;  %v1018_v32 = vpop.permute.xlu0 %1017 }
  0x8c   :  { %108 = vst.msk [vmem:[#allocation2 + $0x78] sm:$0xf] %vm77_vm4, %v43_v63  ;;  %v984_v3 = vsel %vm8413_vm2, %v979_v59, %v983_v44  ;;  %v969_v4 = vrot.slane %v968_v60, 4  ;;  %v1002_v5 = vor.u32 %v1001_v61, %v9043_v53  ;;  %v1007_v6 = vrot.slane %v1005_v55, 5  ;;  %v1268_v7 = vld [vmem:[%s13581_s0 + $0x8] sm:$0x1] }
  0x8d   :  { %1202 = vst.msk [vmem:[#allocation2] sm:$0xf] %vm1201_vm3, %v1010_v0  ;;  %v9072_v8 = vld [vmem:[%s13581_s0 + $0x10] sm:$0xf]  ;;  %1205 = vst.msk [vmem:[#allocation2 + $0xc] sm:$0xf] %vm1201_vm3, %v1016_v2  ;;  %v1024_v38 = vpop.permute.xlu1 %1023 }
  0x8e   :  { %v991_v9 = vrot.slane %v989_v1, 5  ;;  %vm1458_vm5 = vcmask 1042432   ;;  %vm1459_vm6 = vcmask 1046532   ;;  %v1463_v10 = vrot.slane %v9048_v57, 5  ;;  %v46_v12 = vld [vmem:[%s13581_s0 + $0xdc] sm:$0xf]  ;;  %1131 = vrot.lane.b32.xlu1 %v984_v3, %s8365_s3 }
  0x8f   :  { %v974_v13 = vsel %vm8413_vm2, %v969_v4, %v9021_v33  ;;  %v1003_v14 = vrot.slane %v1002_v5, 4  ;;  %v1266_v15 = vld [vmem:[%s13581_s0] sm:$0xe]  ;;  %111 = vst.msk [vmem:[#allocation2 + $0x84] sm:$0xf] %vm77_vm4, %v46_v12  ;;  %v1466_v19 = vrot.slane %v1268_v7, 5  ;;  %vm9101_vm7 = vmor %vm1458_vm5, %vm1459_vm6  ;;  %v1022_v45 = vpop.permute.xlu0 %1021 }
  0x90   :  { %v45_v16 = vld [vmem:[%s13581_s0 + $0xd8] sm:$0xf]  ;;  %v992_v18 = vor.u32 %v991_v9, %v988_v54  ;;  %v1465_v20 = vrot.slane %v1463_v10, 4  ;;  %v1271_v21 = vld [vmem:[%s13581_s0 + $0x14] sm:$0x1]  ;;  %v1470_v22 = vrot.slane %v9072_v8, 5  ;;  %1129 = vrot.lane.b32.xlu0 %v974_v13, %s8365_s3 }
  0x91   :  { %110 = vst.msk [vmem:[#allocation2 + $0x80] sm:$0xf] %vm77_vm4, %v45_v16  ;;  %v1008_v25 = vsel %vm8413_vm2, %v1003_v14, %v1007_v6  ;;  %v9108_v11 = vld [vmem:[%s13581_s0 + $0x1c] sm:$0xf]  ;;  %v48_v28 = vld [vmem:[%s13581_s0 + $0xe8] sm:$0xf]  ;;  %v1028_v51 = vpop.permute.xlu1 %1027 }
  0x92   :  { %1203 = vst.msk [vmem:[#allocation2 + $0x4] sm:$0xf] %vm1201_vm3, %v1012_v17  ;;  %1207 = vst.msk [vmem:[#allocation2 + $0x14] sm:$0xf] %vm1201_vm3, %v1020_v24  ;;  %v993_v27 = vrot.slane %v992_v18, 4  ;;  %1135 = vrot.lane.b32.xlu1 %v1008_v25, %s8365_s3  ;;  %v7506_v30 = vrot.slane %v1266_v15, 9  ;;  %v1467_v34 = vsel %vm9101_vm7, %v1465_v20, %v1466_v19 }
  0x93   :  { %v47_v29 = vld [vmem:[%s13581_s0 + $0xe4] sm:$0xf]  ;;  %v1473_v31 = vrot.slane %v1271_v21, 5  ;;  %113 = vst.msk [vmem:[#allocation2 + $0x8c] sm:$0xf] %vm77_vm4, %v48_v28  ;;  %v1472_v35 = vrot.slane %v1470_v22, 4  ;;  %v1026_v60 = vpop.permute.xlu0 %1025 }
  0x94   :  { %112 = vst.msk [vmem:[#allocation2 + $0x88] sm:$0xf] %vm77_vm4, %v47_v29  ;;  %v998_v33 = vsel %vm8413_vm2, %v993_v27, %v9043_v53  ;;  %v1269_v36 = vld [vmem:[%s13581_s0 + $0xc] sm:$0xe]  ;;  %v1477_v37 = vrot.slane %v9108_v11, 5  ;;  %v1464_v43 = vsel %vm9101_vm7, %v7506_v30, %v1463_v10 }
  0x95   :  { %1206 = vst.msk [vmem:[#allocation2 + $0x10] sm:$0xf] %vm1201_vm3, %v1018_v32  ;;  %v1274_v39 = vld [vmem:[%s13581_s0 + $0x20] sm:$0x1]  ;;  %v9137_v40 = vld [vmem:[%s13581_s0 + $0x28] sm:$0xf]  ;;  %1133 = vrot.lane.b32.xlu0 %v998_v33, %s8365_s3  ;;  %v1474_v46 = vsel %vm9101_vm7, %v1472_v35, %v1473_v31  ;;  %v1032_v1 = vpop.permute.xlu1 %1031 }
  0x96   :  { %v50_v41 = vld [vmem:[%s13581_s0 + $0xf4] sm:$0xf]  ;;  %1209 = vst.msk [vmem:[#allocation2 + $0x1c] sm:$0xf] %vm1201_vm3, %v1024_v38  ;;  %v49_v42 = vld [vmem:[%s13581_s0 + $0xf0] sm:$0xf]  ;;  %1687 = vrot.lane.b32.xlu1 %v1467_v34, %s8366_s25 }
  0x97   :  { %115 = vst.msk [vmem:[#allocation2 + $0x94] sm:$0xf] %vm77_vm4, %v50_v41  ;;  %v7507_v44 = vrot.slane %v1269_v36, 9  ;;  %114 = vst.msk [vmem:[#allocation2 + $0x90] sm:$0xf] %vm77_vm4, %v49_v42  ;;  %v1479_v47 = vrot.slane %v1477_v37, 4  ;;  %v1030_v8 = vpop.permute.xlu0 %1029 }
  0x98   :  { %v1480_v48 = vrot.slane %v1274_v39, 5  ;;  %v1272_v49 = vld [vmem:[%s13581_s0 + $0x18] sm:$0xe]  ;;  %v1484_v50 = vrot.slane %v9137_v40, 5  ;;  %1208 = vst.msk [vmem:[#allocation2 + $0x18] sm:$0xf] %vm1201_vm3, %v1022_v45 }
  0x99   :  { %v1277_v52 = vld [vmem:[%s13581_s0 + $0x2c] sm:$0x1]  ;;  %v9165_v53 = vld [vmem:[%s13581_s0 + $0x34] sm:$0xf]  ;;  %v52_v55 = vld [vmem:[%s13581_s0 + $0x100] sm:$0xf]  ;;  %1685 = vrot.lane.b32.xlu0 %v1464_v43, %s8366_s25  ;;  %v1471_v57 = vsel %vm9101_vm7, %v7507_v44, %v1470_v22  ;;  %v1036_v15 = vpop.permute.xlu1 %1035 }
  0x9a   :  { %1211 = vst.msk [vmem:[#allocation2 + $0x24] sm:$0xf] %vm1201_vm3, %v1028_v51  ;;  %v51_v56 = vld [vmem:[%s13581_s0 + $0xfc] sm:$0xf]  ;;  %1691 = vrot.lane.b32.xlu1 %v1474_v46, %s8366_s25  ;;  %v7508_v58 = vrot.slane %v1272_v49, 9  ;;  %v1481_v61 = vsel %vm9101_vm7, %v1479_v47, %v1480_v48  ;;  %v1486_v62 = vrot.slane %v1484_v50, 4 }
  0x9b   :  { %117 = vst.msk [vmem:[#allocation2 + $0x9c] sm:$0xf] %vm77_vm4, %v52_v55  ;;  %v1275_v59 = vld [vmem:[%s13581_s0 + $0x24] sm:$0xe]  ;;  %116 = vst.msk [vmem:[#allocation2 + $0x98] sm:$0xf] %vm77_vm4, %v51_v56  ;;  %v1034_v22 = vpop.permute.xlu0 %1033 }
  0x9c   :  { %v1487_v63 = vrot.slane %v1277_v52, 5  ;;  %v1280_v0 = vld [vmem:[%s13581_s0 + $0x38] sm:$0x1]  ;;  %v1491_v54 = vrot.slane %v9165_v53, 5  ;;  %1210 = vst.msk [vmem:[#allocation2 + $0x20] sm:$0xf] %vm1201_vm3, %v1026_v60  ;;  %v1478_v5 = vsel %vm9101_vm7, %v7508_v58, %v1477_v37 }
  0x9d   :  { %v9193_v2 = vld [vmem:[%s13581_s0 + $0x40] sm:$0xf]  ;;  %v54_v3 = vld [vmem:[%s13581_s0 + $0x10c] sm:$0xf]  ;;  %v53_v4 = vld [vmem:[%s13581_s0 + $0x108] sm:$0xf]  ;;  %1689 = vrot.lane.b32.xlu0 %v1471_v57, %s8366_s25  ;;  %v1040_v29 = vpop.permute.xlu1 %1039 }
  0x9e   :  { %1213 = vst.msk [vmem:[#allocation2 + $0x2c] sm:$0xf] %vm1201_vm3, %v1032_v1  ;;  %1695 = vrot.lane.b32.xlu1 %v1481_v61, %s8366_s25  ;;  %v7509_v6 = vrot.slane %v1275_v59, 9  ;;  %v1278_v7 = vld [vmem:[%s13581_s0 + $0x30] sm:$0xe]  ;;  %v1488_v9 = vsel %vm9101_vm7, %v1486_v62, %v1487_v63  ;;  %v1493_v10 = vrot.slane %v1491_v54, 4 }
  0x9f   :  { %119 = vst.msk [vmem:[#allocation2 + $0xa4] sm:$0xf] %vm77_vm4, %v54_v3  ;;  %118 = vst.msk [vmem:[#allocation2 + $0xa0] sm:$0xf] %vm77_vm4, %v53_v4  ;;  %v1494_v12 = vrot.slane %v1280_v0, 5  ;;  %v1498_v13 = vrot.slane %v9193_v2, 5  ;;  %v1038_v37 = vpop.permute.xlu0 %1037 }
  0xa0   :  { %v56_v14 = vld [vmem:[%s13581_s0 + $0x118] sm:$0xf]  ;;  %1212 = vst.msk [vmem:[#allocation2 + $0x28] sm:$0xf] %vm1201_vm3, %v1030_v8  ;;  %v1283_v16 = vld [vmem:[%s13581_s0 + $0x44] sm:$0x1]  ;;  %v1485_v20 = vsel %vm9101_vm7, %v7509_v6, %v1484_v50 }
  0xa1   :  { %v9224_v17 = vld [vmem:[%s13581_s0 + $0x4c] sm:$0xf]  ;;  %121 = vst.msk [vmem:[#allocation2 + $0xac] sm:$0xf] %vm77_vm4, %v56_v14  ;;  %v55_v18 = vld [vmem:[%s13581_s0 + $0x114] sm:$0xf]  ;;  %1693 = vrot.lane.b32.xlu0 %v1478_v5, %s8366_s25  ;;  %v1495_v24 = vsel %vm9101_vm7, %v1493_v10, %v1494_v12  ;;  %v1044_v43 = vpop.permute.xlu1 %1043 }
  0xa2   :  { %1215 = vst.msk [vmem:[#allocation2 + $0x34] sm:$0xf] %vm1201_vm3, %v1036_v15  ;;  %1699 = vrot.lane.b32.xlu1 %v1488_v9, %s8366_s25  ;;  %v7510_v19 = vrot.slane %v1278_v7, 9  ;;  %v1281_v21 = vld [vmem:[%s13581_s0 + $0x3c] sm:$0xe]  ;;  %v1500_v25 = vrot.slane %v1498_v13, 4 }
  0xa3   :  { %120 = vst.msk [vmem:[#allocation2 + $0xa8] sm:$0xf] %vm77_vm4, %v55_v18  ;;  %v1501_v11 = vrot.slane %v1283_v16, 5  ;;  %v1505_v27 = vrot.slane %v9224_v17, 5  ;;  %v58_v28 = vld [vmem:[%s13581_s0 + $0x124] sm:$0xf]  ;;  %v1042_v50 = vpop.permute.xlu0 %1041 }
  0xa4   :  { %1214 = vst.msk [vmem:[#allocation2 + $0x30] sm:$0xf] %vm1201_vm3, %v1034_v22  ;;  %v1286_v30 = vld [vmem:[%s13581_s0 + $0x50] sm:$0x1]  ;;  %v9252_v31 = vld [vmem:[%s13581_s0 + $0x58] sm:$0xf]  ;;  %v1492_v33 = vsel %vm9101_vm7, %v7510_v19, %v1491_v54 }
  0xa5   :  { %123 = vst.msk [vmem:[#allocation2 + $0xb4] sm:$0xf] %vm77_vm4, %v58_v28  ;;  %v57_v32 = vld [vmem:[%s13581_s0 + $0x120] sm:$0xf]  ;;  %1697 = vrot.lane.b32.xlu0 %v1485_v20, %s8366_s25  ;;  %v7511_v34 = vrot.slane %v1281_v21, 9  ;;  %v1502_v38 = vsel %vm9101_vm7, %v1500_v25, %v1501_v11  ;;  %v1507_v39 = vrot.slane %v1505_v27, 4  ;;  %v1048_v57 = vpop.permute.xlu1 %1047 }
  0xa6   :  { %1217 = vst.msk [vmem:[#allocation2 + $0x3c] sm:$0xf] %vm1201_vm3, %v1040_v29  ;;  %1703 = vrot.lane.b32.xlu1 %v1495_v24, %s8366_s25  ;;  %v1284_v35 = vld [vmem:[%s13581_s0 + $0x48] sm:$0xe]  ;;  %v1289_v36 = vld [vmem:[%s13581_s0 + $0x5c] sm:$0x1] }
  0xa7   :  { %122 = vst.msk [vmem:[#allocation2 + $0xb0] sm:$0xf] %vm77_vm4, %v57_v32  ;;  %v1508_v40 = vrot.slane %v1286_v30, 5  ;;  %v1512_v41 = vrot.slane %v9252_v31, 5  ;;  %v60_v42 = vld [vmem:[%s13581_s0 + $0x130] sm:$0xf]  ;;  %v1499_v46 = vsel %vm9101_vm7, %v7511_v34, %v1498_v13  ;;  %v1046_v54 = vpop.permute.xlu0 %1045 }
  0xa8   :  { %1216 = vst.msk [vmem:[#allocation2 + $0x38] sm:$0xf] %vm1201_vm3, %v1038_v37  ;;  %v9280_v44 = vld [vmem:[%s13581_s0 + $0x64] sm:$0xf]  ;;  %v59_v45 = vld [vmem:[%s13581_s0 + $0x12c] sm:$0xf] }
  0xa9   :  { %125 = vst.msk [vmem:[#allocation2 + $0xbc] sm:$0xf] %vm77_vm4, %v60_v42  ;;  %1701 = vrot.lane.b32.xlu0 %v1492_v33, %s8366_s25  ;;  %124 = vst.msk [vmem:[#allocation2 + $0xb8] sm:$0xf] %vm77_vm4, %v59_v45  ;;  %v7512_v47 = vrot.slane %v1284_v35, 9  ;;  %v1515_v48 = vrot.slane %v1289_v36, 5  ;;  %v1509_v51 = vsel %vm9101_vm7, %v1507_v39, %v1508_v40  ;;  %v1052_v6 = vpop.permute.xlu1 %1051 }
  0xaa   :  { %1219 = vst.msk [vmem:[#allocation2 + $0x44] sm:$0xf] %vm1201_vm3, %v1044_v43  ;;  %1707 = vrot.lane.b32.xlu1 %v1502_v38, %s8366_s25  ;;  %v1287_v49 = vld [vmem:[%s13581_s0 + $0x54] sm:$0xe]  ;;  %v1514_v52 = vrot.slane %v1512_v41, 4  ;;  %v1519_v53 = vrot.slane %v9280_v44, 5 }
  0xab   :  { %v62_v55 = vld [vmem:[%s13581_s0 + $0x13c] sm:$0xf]  ;;  %v61_v56 = vld [vmem:[%s13581_s0 + $0x138] sm:$0xf]  ;;  %1218 = vst.msk [vmem:[#allocation2 + $0x40] sm:$0xf] %vm1201_vm3, %v1042_v50  ;;  %v1506_v61 = vsel %vm9101_vm7, %v7512_v47, %v1505_v27  ;;  %v1050_v15 = vpop.permute.xlu0 %1049 }
  0xac   :  { %v1292_v58 = vld [vmem:[%s13581_s0 + $0x68] sm:$0x1]  ;;  %v9311_v59 = vld [vmem:[%s13581_s0 + $0x70] sm:$0xf]  ;;  %127 = vst.msk [vmem:[#allocation2 + $0xc4] sm:$0xf] %vm77_vm4, %v62_v55  ;;  %v1516_v1 = vsel %vm9101_vm7, %v1514_v52, %v1515_v48 }
  0xad   :  { %126 = vst.msk [vmem:[#allocation2 + $0xc0] sm:$0xf] %vm77_vm4, %v61_v56  ;;  %1705 = vrot.lane.b32.xlu0 %v1499_v46, %s8366_s25  ;;  %v1290_v60 = vld [vmem:[%s13581_s0 + $0x60] sm:$0xe]  ;;  %v7513_v62 = vrot.slane %v1287_v49, 9  ;;  %v1521_v2 = vrot.slane %v1519_v53, 4  ;;  %v1056_v21 = vpop.permute.xlu1 %1055 }
  0xae   :  { %1221 = vst.msk [vmem:[#allocation2 + $0x4c] sm:$0xf] %vm1201_vm3, %v1048_v57  ;;  %1711 = vrot.lane.b32.xlu1 %v1509_v51, %s8366_s25  ;;  %v64_v63 = vld [vmem:[%s13581_s0 + $0x148] sm:$0xf]  ;;  %v63_v0 = vld [vmem:[%s13581_s0 + $0x144] sm:$0xf] }
  0xaf   :  { %v1522_v3 = vrot.slane %v1292_v58, 5  ;;  %v1295_v4 = vld [vmem:[%s13581_s0 + $0x74] sm:$0x1]  ;;  %v1526_v5 = vrot.slane %v9311_v59, 5  ;;  %129 = vst.msk [vmem:[#allocation2 + $0xcc] sm:$0xf] %vm77_vm4, %v64_v63  ;;  %v1513_v10 = vsel %vm9101_vm7, %v7513_v62, %v1512_v41  ;;  %v1054_v30 = vpop.permute.xlu0 %1053 }
  0xb0   :  { %128 = vst.msk [vmem:[#allocation2 + $0xc8] sm:$0xf] %vm77_vm4, %v63_v0  ;;  %v9341_v7 = vld [vmem:[%s13581_s0 + $0x7c] sm:$0xf]  ;;  %v66_v8 = vld [vmem:[%s13581_s0 + $0x154] sm:$0xf] }
  0xb1   :  { %1220 = vst.msk [vmem:[#allocation2 + $0x48] sm:$0xf] %vm1201_vm3, %v1046_v54  ;;  %1709 = vrot.lane.b32.xlu0 %v1506_v61, %s8366_s25  ;;  %1223 = vst.msk [vmem:[#allocation2 + $0x54] sm:$0xf] %vm1201_vm3, %v1052_v6  ;;  %v65_v9 = vld [vmem:[%s13581_s0 + $0x150] sm:$0xf]  ;;  %v1523_v16 = vsel %vm9101_vm7, %v1521_v2, %v1522_v3  ;;  %v1060_v36 = vpop.permute.xlu1 %1059 }
  0xb2   :  { %131 = vst.msk [vmem:[#allocation2 + $0xd4] sm:$0xf] %vm77_vm4, %v66_v8  ;;  %1715 = vrot.lane.b32.xlu1 %v1516_v1, %s8366_s25  ;;  %v7514_v12 = vrot.slane %v1290_v60, 9  ;;  %v1529_v13 = vrot.slane %v1295_v4, 5  ;;  %v1293_v14 = vld [vmem:[%s13581_s0 + $0x6c] sm:$0xe] }
  0xb3   :  { %130 = vst.msk [vmem:[#allocation2 + $0xd0] sm:$0xf] %vm77_vm4, %v65_v9  ;;  %v1528_v17 = vrot.slane %v1526_v5, 4  ;;  %v1533_v18 = vrot.slane %v9341_v7, 5  ;;  %v68_v20 = vld [vmem:[%s13581_s0 + $0x160] sm:$0xf]  ;;  %v1058_v44 = vpop.permute.xlu0 %1057 }
  0xb4   :  { %v67_v19 = vld [vmem:[%s13581_s0 + $0x15c] sm:$0xf]  ;;  %1222 = vst.msk [vmem:[#allocation2 + $0x50] sm:$0xf] %vm1201_vm3, %v1050_v15  ;;  %v1298_v22 = vld [vmem:[%s13581_s0 + $0x80] sm:$0x1]  ;;  %v1520_v11 = vsel %vm9101_vm7, %v7514_v12, %v1519_v53 }
  0xb5   :  { %v9375_v24 = vld [vmem:[%s13581_s0 + $0x88] sm:$0xf]  ;;  %133 = vst.msk [vmem:[#allocation2 + $0xdc] sm:$0xf] %vm77_vm4, %v68_v20  ;;  %132 = vst.msk [vmem:[#allocation2 + $0xd8] sm:$0xf] %vm77_vm4, %v67_v19  ;;  %1713 = vrot.lane.b32.xlu0 %v1513_v10, %s8366_s25  ;;  %v1530_v31 = vsel %vm9101_vm7, %v1528_v17, %v1529_v13  ;;  %v1064_v50 = vpop.permute.xlu1 %1063 }
  0xb6   :  { %1225 = vst.msk [vmem:[#allocation2 + $0x5c] sm:$0xf] %vm1201_vm3, %v1056_v21  ;;  %v70_v25 = vld [vmem:[%s13581_s0 + $0x16c] sm:$0xf]  ;;  %1719 = vrot.lane.b32.xlu1 %v1523_v16, %s8366_s25  ;;  %v7515_v27 = vrot.slane %v1293_v14, 9  ;;  %v1535_v32 = vrot.slane %v1533_v18, 4 }
  0xb7   :  { %v1296_v28 = vld [vmem:[%s13581_s0 + $0x78] sm:$0xe]  ;;  %135 = vst.msk [vmem:[#allocation2 + $0xe4] sm:$0xf] %vm77_vm4, %v70_v25  ;;  %v69_v29 = vld [vmem:[%s13581_s0 + $0x168] sm:$0xf]  ;;  %v1062_v58 = vpop.permute.xlu0 %1061 }
  0xb8   :  { %v1536_v33 = vrot.slane %v1298_v22, 5  ;;  %v1301_v34 = vld [vmem:[%s13581_s0 + $0x8c] sm:$0x1]  ;;  %v1540_v35 = vrot.slane %v9375_v24, 5  ;;  %134 = vst.msk [vmem:[#allocation2 + $0xe0] sm:$0xf] %vm77_vm4, %v69_v29  ;;  %v1527_v40 = vsel %vm9101_vm7, %v7515_v27, %v1526_v5 }
  0xb9   :  { %1224 = vst.msk [vmem:[#allocation2 + $0x58] sm:$0xf] %vm1201_vm3, %v1054_v30  ;;  %v9405_v37 = vld [vmem:[%s13581_s0 + $0x94] sm:$0xf]  ;;  %v72_v38 = vld [vmem:[%s13581_s0 + $0x178] sm:$0xf]  ;;  %1717 = vrot.lane.b32.xlu0 %v1520_v11, %s8366_s25  ;;  %v1068_v0 = vpop.permute.xlu1 %1067 }
  0xba   :  { %v71_v39 = vld [vmem:[%s13581_s0 + $0x174] sm:$0xf]  ;;  %1227 = vst.msk [vmem:[#allocation2 + $0x64] sm:$0xf] %vm1201_vm3, %v1060_v36  ;;  %1723 = vrot.lane.b32.xlu1 %v1530_v31, %s8366_s25  ;;  %v7516_v41 = vrot.slane %v1296_v28, 9  ;;  %v1537_v45 = vsel %vm9101_vm7, %v1535_v32, %v1536_v33  ;;  %v1542_v46 = vrot.slane %v1540_v35, 4 }
  0xbb   :  { %137 = vst.msk [vmem:[#allocation2 + $0xec] sm:$0xf] %vm77_vm4, %v72_v38  ;;  %136 = vst.msk [vmem:[#allocation2 + $0xe8] sm:$0xf] %vm77_vm4, %v71_v39  ;;  %v1299_v42 = vld [vmem:[%s13581_s0 + $0x84] sm:$0xe]  ;;  %v1066_v4 = vpop.permute.xlu0 %1065 }
  0xbc   :  { %v74_v43 = vld [vmem:[%s13581_s0 + $0x184] sm:$0xf]  ;;  %v1543_v47 = vrot.slane %v1301_v34, 5  ;;  %v1547_v48 = vrot.slane %v9405_v37, 5  ;;  %v73_v49 = vld [vmem:[%s13581_s0 + $0x180] sm:$0xf]  ;;  %v1534_v56 = vsel %vm9101_vm7, %v7516_v41, %v1533_v18 }
  0xbd   :  { %139 = vst.msk [vmem:[#allocation2 + $0xf4] sm:$0xf] %vm77_vm4, %v74_v43  ;;  %v1304_v51 = vld [vmem:[%s13581_s0 + $0x98] sm:$0x1]  ;;  %v1306_v52 = vld [vmem:[%s13581_s0 + $0xa0] sm:$0xf]  ;;  %1721 = vrot.lane.b32.xlu0 %v1527_v40, %s8366_s25  ;;  %v1072_v10 = vpop.permute.xlu1 %1071 }
  0xbe   :  { %1226 = vst.msk [vmem:[#allocation2 + $0x60] sm:$0xf] %vm1201_vm3, %v1058_v44  ;;  %1229 = vst.msk [vmem:[#allocation2 + $0x6c] sm:$0xf] %vm1201_vm3, %v1064_v50  ;;  %v76_v53 = vld [vmem:[%s13581_s0 + $0x190] sm:$0xf]  ;;  %1727 = vrot.lane.b32.xlu1 %v1537_v45, %s8366_s25  ;;  %v1544_v59 = vsel %vm9101_vm7, %v1542_v46, %v1543_v47 }
  0xbf   :  { %138 = vst.msk [vmem:[#allocation2 + $0xf0] sm:$0xf] %vm77_vm4, %v73_v49  ;;  %v75_v55 = vld [vmem:[%s13581_s0 + $0x18c] sm:$0xf]  ;;  %v7517_v57 = vrot.slane %v1299_v42, 9  ;;  %v1549_v60 = vrot.slane %v1547_v48, 4  ;;  %v1070_v17 = vpop.permute.xlu0 %1069 }
  0xc0   :  { %141 = vst.msk [vmem:[#allocation2 + $0xfc] sm:$0xf] %vm77_vm4, %v76_v53  ;;  %140 = vst.msk [vmem:[#allocation2 + $0xf8] sm:$0xf] %vm77_vm4, %v75_v55  ;;  %v1550_v61 = vrot.slane %v1304_v51, 5  ;;  %v1554_v63 = vrot.slane %v1306_v52, 5 }
  0xc1   :  { %v1302_v62 = vld [vmem:[%s13581_s0 + $0x90] sm:$0xe]  ;;  %1228 = vst.msk [vmem:[#allocation2 + $0x68] sm:$0xf] %vm1201_vm3, %v1062_v58  ;;  %v1307_v54 = vld [vmem:[%s13581_s0 + $0xa4] sm:$0x1]  ;;  %1725 = vrot.lane.b32.xlu0 %v1534_v56, %s8366_s25  ;;  %v1541_v2 = vsel %vm9101_vm7, %v7517_v57, %v1540_v35  ;;  %v1076_v24 = vpop.permute.xlu1 %1075 }
  0xc2   :  { %v1309_v1 = vld [vmem:[%s13581_s0 + $0xac] sm:$0xf]  ;;  %1231 = vst.msk [vmem:[#allocation2 + $0x74] sm:$0xf] %vm1201_vm3, %v1068_v0  ;;  %1731 = vrot.lane.b32.xlu1 %v1544_v59, %s8366_s25  ;;  %v7518_v3 = vrot.slane %v1302_v62, 9  ;;  %v1551_v5 = vsel %vm9101_vm7, %v1549_v60, %v1550_v61  ;;  %v1556_v6 = vrot.slane %v1554_v63, 4 }
  0xc3   :  { %v1557_v7 = vrot.slane %v1307_v54, 5  ;;  %v1305_v8 = vld [vmem:[%s13581_s0 + $0x9c] sm:$0xe]  ;;  %v1561_v9 = vrot.slane %v1309_v1, 5  ;;  %1230 = vst.msk [vmem:[#allocation2 + $0x70] sm:$0xf] %vm1201_vm3, %v1066_v4  ;;  %v1074_v30 = vpop.permute.xlu0 %1073 }
  0xc4   :  { %v1310_v12 = vld [vmem:[%s13581_s0 + $0xb0] sm:$0x1]  ;;  %v1312_v13 = vld [vmem:[%s13581_s0 + $0xb8] sm:$0xf]  ;;  %1233 = vst.msk [vmem:[#allocation2 + $0x7c] sm:$0xf] %vm1201_vm3, %v1072_v10  ;;  %v1548_v14 = vsel %vm9101_vm7, %v7518_v3, %v1547_v48 }
  0xc5   :  { %1729 = vrot.lane.b32.xlu0 %v1541_v2, %s8366_s25  ;;  %v7519_v15 = vrot.slane %v1305_v8, 9  ;;  %v1308_v16 = vld [vmem:[%s13581_s0 + $0xa8] sm:$0xe]  ;;  %v1558_v18 = vsel %vm9101_vm7, %v1556_v6, %v1557_v7  ;;  %v1563_v20 = vrot.slane %v1561_v9, 4  ;;  %v1564_v19 = vrot.slane %v1310_v12, 5  ;;  %v1080_v36 = vpop.permute.xlu1 %1079 }
  0xc6   :  { %1735 = vrot.lane.b32.xlu1 %v1551_v5, %s8366_s25  ;;  %v1568_v21 = vrot.slane %v1312_v13, 5  ;;  %v1315_v22 = vld [vmem:[%s13581_s0 + $0xdc] sm:$0xf]  ;;  %1232 = vst.msk [vmem:[#allocation2 + $0x78] sm:$0xf] %vm1201_vm3, %v1070_v17  ;;  %v7520_v11 = vrot.slane %v1308_v16, 9 }
  0xc7   :  { %v1313_v25 = vld [vmem:[%s13581_s0 + $0xbc] sm:$0x1]  ;;  %1235 = vst.msk [vmem:[#allocation2 + $0x84] sm:$0xf] %vm1201_vm3, %v1076_v24  ;;  %v1555_v27 = vsel %vm9101_vm7, %v7519_v15, %v1554_v63  ;;  %v1311_v28 = vld [vmem:[%s13581_s0 + $0xb4] sm:$0xe]  ;;  %v1565_v31 = vsel %vm9101_vm7, %v1563_v20, %v1564_v19  ;;  %v1078_v43 = vpop.permute.xlu0 %1077 }
  0xc8   :  { %v1575_v29 = vrot.slane %v1315_v22, 5  ;;  %v1570_v32 = vrot.slane %v1568_v21, 4  ;;  %v1571_v33 = vrot.slane %v1313_v25, 5  ;;  %v1316_v34 = vld [vmem:[%s13581_s0 + $0xe0] sm:$0x1]  ;;  %v1562_v37 = vsel %vm9101_vm7, %v7520_v11, %v1561_v9 }
  0xc9   :  { %1733 = vrot.lane.b32.xlu0 %v1548_v14, %s8366_s25  ;;  %v1318_v35 = vld [vmem:[%s13581_s0 + $0xe8] sm:$0xf]  ;;  %1234 = vst.msk [vmem:[#allocation2 + $0x80] sm:$0xf] %vm1201_vm3, %v1074_v30  ;;  %1237 = vst.msk [vmem:[#allocation2 + $0x8c] sm:$0xf] %vm1201_vm3, %v1080_v36  ;;  %v1084_v45 = vpop.permute.xlu1 %1083 }
  0xca   :  { %1739 = vrot.lane.b32.xlu1 %v1558_v18, %s8366_s25  ;;  %v7521_v38 = vrot.slane %v1311_v28, 9  ;;  %v1577_v39 = vrot.slane %v1575_v29, 4  ;;  %v1578_v40 = vrot.slane %v1316_v34, 5  ;;  %v1314_v41 = vld [vmem:[%s13581_s0 + $0xd8] sm:$0xe]  ;;  %v1582_v42 = vrot.slane %v1318_v35, 5 }
  0xcb   :  { %v1572_v44 = vsel %vm9101_vm7, %v1570_v32, %v1571_v33  ;;  %1236 = vst.msk [vmem:[#allocation2 + $0x88] sm:$0xf] %vm1201_vm3, %v1078_v43  ;;  %v1319_v46 = vld [vmem:[%s13581_s0 + $0xec] sm:$0x1]  ;;  %v1321_v47 = vld [vmem:[%s13581_s0 + $0xf4] sm:$0xf] }
  0xcc   :  { %1239 = vst.msk [vmem:[#allocation2 + $0x94] sm:$0xf] %vm1201_vm3, %v1084_v45 }
  0xcd   :  { %1737 = vrot.lane.b32.xlu0 %v1555_v27, %s8366_s25 }
  0xce   :  { %1743 = vrot.lane.b32.xlu1 %v1565_v31, %s8366_s25 }
  0xd1   :  { %1741 = vrot.lane.b32.xlu0 %v1562_v37, %s8366_s25 }
  0xd2   :  { %7 = vsyncpa [#allocation4], 0  ;;  %1747 = vrot.lane.b32.xlu1 %v1572_v44, %s8366_s25  ;;  %v1569_v48 = vsel %vm9101_vm7, %v7521_v38, %v1568_v21  ;;  %v7522_v49 = vrot.slane %v1314_v41, 9  ;;  %v1082_v50 = vpop.permute.xlu0 %1081  ;;  %v1579_v51 = vsel %vm9101_vm7, %v1577_v39, %v1578_v40  ;;  %v1584_v52 = vrot.slane %v1582_v42, 4  ;;  %v1317_v55 = vld [vmem:[%s13581_s0 + $0xe4] sm:$0xe]  ;;  %v1088_v57 = vpop.permute.xlu1 %1087 }
  0xd3   :  { %v1585_v53 = vrot.slane %v1319_v46, 5  ;;  %v1589_v56 = vrot.slane %v1321_v47, 5  ;;  %1238 = vst.msk [vmem:[#allocation2 + $0x90] sm:$0xf] %vm1201_vm3, %v1082_v50  ;;  %v1322_v58 = vld [vmem:[%s13581_s0 + $0xf8] sm:$0x1] }
  0xd4   :  { %v1324_v59 = vld [vmem:[%s13581_s0 + $0x100] sm:$0xf]  ;;  %1241 = vst.msk [vmem:[#allocation2 + $0x9c] sm:$0xf] %vm1201_vm3, %v1088_v57  ;;  %v1576_v60 = vsel %vm9101_vm7, %v7522_v49, %v1575_v29  ;;  %v7523_v61 = vrot.slane %v1317_v55, 9  ;;  %v1592_v54 = vrot.slane %v1322_v58, 5 }
  0xd5   :  { %1745 = vrot.lane.b32.xlu0 %v1569_v48, %s8366_s25  ;;  %v1586_v63 = vsel %vm9101_vm7, %v1584_v52, %v1585_v53  ;;  %v1591_v0 = vrot.slane %v1589_v56, 4  ;;  %v1320_v1 = vld [vmem:[%s13581_s0 + $0xf0] sm:$0xe]  ;;  %v1596_v2 = vrot.slane %v1324_v59, 5  ;;  %v1325_v4 = vld [vmem:[%s13581_s0 + $0x104] sm:$0x1] }
  0xd6   :  { %1751 = vrot.lane.b32.xlu1 %v1579_v51, %s8366_s25  ;;  %v1086_v62 = vpop.permute.xlu0 %1085  ;;  %v1092_v3 = vpop.permute.xlu1 %1091  ;;  %v1327_v5 = vld [vmem:[%s13581_s0 + $0x10c] sm:$0xf]  ;;  %v1583_v6 = vsel %vm9101_vm7, %v7523_v61, %v1582_v42  ;;  %v7524_v7 = vrot.slane %v1320_v1, 9  ;;  %v1599_v12 = vrot.slane %v1325_v4, 5  ;;  %v1323_v13 = vld [vmem:[%s13581_s0 + $0xfc] sm:$0xe] }
  0xd7   :  { %1240 = vst.msk [vmem:[#allocation2 + $0x98] sm:$0xf] %vm1201_vm3, %v1086_v62  ;;  %1243 = vst.msk [vmem:[#allocation2 + $0xa4] sm:$0xf] %vm1201_vm3, %v1092_v3  ;;  %v1593_v9 = vsel %vm9101_vm7, %v1591_v0, %v1592_v54  ;;  %v1598_v10 = vrot.slane %v1596_v2, 4  ;;  %v1603_v14 = vrot.slane %v1327_v5, 5 }
  0xd8   :  { %v1328_v16 = vld [vmem:[%s13581_s0 + $0x110] sm:$0x1]  ;;  %v1330_v17 = vld [vmem:[%s13581_s0 + $0x118] sm:$0xf]  ;;  %v1590_v18 = vsel %vm9101_vm7, %v7524_v7, %v1589_v56  ;;  %v7525_v20 = vrot.slane %v1323_v13, 9  ;;  %vm1877_vm8 = vcmask 93248  }
  0xd9   :  { %1749 = vrot.lane.b32.xlu0 %v1576_v60, %s8366_s25  ;;  %v1600_v21 = vsel %vm9101_vm7, %v1598_v10, %v1599_v12  ;;  %v1605_v22 = vrot.slane %v1603_v14, 4  ;;  %v1606_v24 = vrot.slane %v1328_v16, 5  ;;  %v1326_v25 = vld [vmem:[%s13581_s0 + $0x108] sm:$0xe]  ;;  %v1610_v11 = vrot.slane %v1330_v17, 5  ;;  %s8367_s10 = smov 12  }
  0xda   :  { %1755 = vrot.lane.b32.xlu1 %v1586_v63, %s8366_s25  ;;  %v1090_v8 = vpop.permute.xlu0 %1089  ;;  %v1096_v15 = vpop.permute.xlu1 %1095  ;;  %v1331_v28 = vld [vmem:[%s13581_s0 + $0x11c] sm:$0x1]  ;;  %v1333_v29 = vld [vmem:[%s13581_s0 + $0x124] sm:$0xf]  ;;  %v1597_v30 = vsel %vm9101_vm7, %v7525_v20, %v1596_v2  ;;  %v7526_v31 = vrot.slane %v1326_v25, 9  ;;  %vm2263_vm9 = vcmask 126048  }
  0xdb   :  { %1242 = vst.msk [vmem:[#allocation2 + $0xa0] sm:$0xf] %vm1201_vm3, %v1090_v8  ;;  %1245 = vst.msk [vmem:[#allocation2 + $0xac] sm:$0xf] %vm1201_vm3, %v1096_v15  ;;  %v1607_v33 = vsel %vm9101_vm7, %v1605_v22, %v1606_v24  ;;  %v1612_v34 = vrot.slane %v1610_v11, 4  ;;  %v1613_v35 = vrot.slane %v1331_v28, 5 }
  0xdc   :  { %v1329_v36 = vld [vmem:[%s13581_s0 + $0x114] sm:$0xe]  ;;  %v1617_v37 = vrot.slane %v1333_v29, 5  ;;  %v1334_v39 = vld [vmem:[%s13581_s0 + $0x128] sm:$0x1]  ;;  %v1604_v41 = vsel %vm9101_vm7, %v7526_v31, %v1603_v14  ;;  %s8368_s8 = smov 16  }
  0xdd   :  { %1753 = vrot.lane.b32.xlu0 %v1583_v6, %s8366_s25  ;;  %v1336_v40 = vld [vmem:[%s13581_s0 + $0x130] sm:$0xf]  ;;  %v7527_v42 = vrot.slane %v1329_v36, 9  ;;  %v1614_v44 = vsel %vm9101_vm7, %v1612_v34, %v1613_v35  ;;  %v1620_v46 = vrot.slane %v1334_v39, 5  ;;  %v1332_v47 = vld [vmem:[%s13581_s0 + $0x120] sm:$0xe] }
  0xde   :  { %1759 = vrot.lane.b32.xlu1 %v1593_v9, %s8366_s25  ;;  %v1094_v19 = vpop.permute.xlu0 %1093  ;;  %v1100_v27 = vpop.permute.xlu1 %1099  ;;  %v1619_v45 = vrot.slane %v1617_v37, 4  ;;  %v1624_v48 = vrot.slane %v1336_v40, 5  ;;  %v1337_v50 = vld [vmem:[%s13581_s0 + $0x134] sm:$0x1]  ;;  %v1339_v51 = vld [vmem:[%s13581_s0 + $0x13c] sm:$0xf] }
  0xdf   :  { %1244 = vst.msk [vmem:[#allocation2 + $0xa8] sm:$0xf] %vm1201_vm3, %v1094_v19  ;;  %1247 = vst.msk [vmem:[#allocation2 + $0xb4] sm:$0xf] %vm1201_vm3, %v1100_v27  ;;  %v1611_v52 = vsel %vm9101_vm7, %v7527_v42, %v1610_v11  ;;  %v7528_v53 = vrot.slane %v1332_v47, 9  ;;  %v1627_v58 = vrot.slane %v1337_v50, 5 }
  0xe0   :  { %v1621_v56 = vsel %vm9101_vm7, %v1619_v45, %v1620_v46  ;;  %v1626_v57 = vrot.slane %v1624_v48, 4  ;;  %v1335_v59 = vld [vmem:[%s13581_s0 + $0x12c] sm:$0xe]  ;;  %v1631_v60 = vrot.slane %v1339_v51, 5  ;;  %v1340_v62 = vld [vmem:[%s13581_s0 + $0x140] sm:$0x1] }
  0xe1   :  { %1757 = vrot.lane.b32.xlu0 %v1590_v18, %s8366_s25  ;;  %v1342_v63 = vld [vmem:[%s13581_s0 + $0x148] sm:$0xf]  ;;  %v1618_v0 = vsel %vm9101_vm7, %v7528_v53, %v1617_v37  ;;  %v7529_v54 = vrot.slane %v1335_v59, 9  ;;  %v1634_v4 = vrot.slane %v1340_v62, 5  ;;  %v1338_v5 = vld [vmem:[%s13581_s0 + $0x138] sm:$0xe] }
  0xe2   :  { %1763 = vrot.lane.b32.xlu1 %v1600_v21, %s8366_s25  ;;  %v1098_v32 = vpop.permute.xlu0 %1097  ;;  %v1104_v38 = vpop.permute.xlu1 %1103  ;;  %v1628_v2 = vsel %vm9101_vm7, %v1626_v57, %v1627_v58  ;;  %v1633_v3 = vrot.slane %v1631_v60, 4  ;;  %v1638_v6 = vrot.slane %v1342_v63, 5  ;;  %v1343_v8 = vld [vmem:[%s13581_s0 + $0x14c] sm:$0x1]  ;;  %v1345_v9 = vld [vmem:[%s13581_s0 + $0x154] sm:$0xf] }
  0xe3   :  { %1246 = vst.msk [vmem:[#allocation2 + $0xb0] sm:$0xf] %vm1201_vm3, %v1098_v32  ;;  %1249 = vst.msk [vmem:[#allocation2 + $0xbc] sm:$0xf] %vm1201_vm3, %v1104_v38  ;;  %v1625_v10 = vsel %vm9101_vm7, %v7529_v54, %v1624_v48  ;;  %v7530_v12 = vrot.slane %v1338_v5, 9  ;;  %v1641_v16 = vrot.slane %v1343_v8, 5 }
  0xe4   :  { %v1635_v14 = vsel %vm9101_vm7, %v1633_v3, %v1634_v4  ;;  %v1640_v15 = vrot.slane %v1638_v6, 4  ;;  %v1341_v17 = vld [vmem:[%s13581_s0 + $0x144] sm:$0xe]  ;;  %v1645_v18 = vrot.slane %v1345_v9, 5  ;;  %v1346_v19 = vld [vmem:[%s13581_s0 + $0x158] sm:$0x1] }
  0xe5   :  { %1761 = vrot.lane.b32.xlu0 %v1597_v30, %s8366_s25  ;;  %v1348_v21 = vld [vmem:[%s13581_s0 + $0x160] sm:$0xf]  ;;  %v1632_v22 = vsel %vm9101_vm7, %v7530_v12, %v1631_v60  ;;  %v7531_v24 = vrot.slane %v1341_v17, 9  ;;  %v1648_v28 = vrot.slane %v1346_v19, 5  ;;  %v1344_v29 = vld [vmem:[%s13581_s0 + $0x150] sm:$0xe] }
  0xe6   :  { %1767 = vrot.lane.b32.xlu1 %v1607_v33, %s8366_s25  ;;  %v1102_v43 = vpop.permute.xlu0 %1101  ;;  %v1108_v49 = vpop.permute.xlu1 %1107  ;;  %v1642_v11 = vsel %vm9101_vm7, %v1640_v15, %v1641_v16  ;;  %v1647_v27 = vrot.slane %v1645_v18, 4  ;;  %v1652_v30 = vrot.slane %v1348_v21, 5  ;;  %v1349_v32 = vld [vmem:[%s13581_s0 + $0x164] sm:$0x1]  ;;  %v1351_v33 = vld [vmem:[%s13581_s0 + $0x16c] sm:$0xf] }
  0xe7   :  { %1248 = vst.msk [vmem:[#allocation2 + $0xb8] sm:$0xf] %vm1201_vm3, %v1102_v43  ;;  %1251 = vst.msk [vmem:[#allocation2 + $0xc4] sm:$0xf] %vm1201_vm3, %v1108_v49  ;;  %v1639_v34 = vsel %vm9101_vm7, %v7531_v24, %v1638_v6  ;;  %v7532_v35 = vrot.slane %v1344_v29, 9  ;;  %v1655_v39 = vrot.slane %v1349_v32, 5 }
  0xe8   :  { %v1649_v37 = vsel %vm9101_vm7, %v1647_v27, %v1648_v28  ;;  %v1654_v38 = vrot.slane %v1652_v30, 4  ;;  %v1347_v40 = vld [vmem:[%s13581_s0 + $0x15c] sm:$0xe]  ;;  %v1352_v43 = vld [vmem:[%s13581_s0 + $0x170] sm:$0x1]  ;;  %vm3384_vm10 = vcmask 158848  }
  0xe9   :  { %1765 = vrot.lane.b32.xlu0 %v1604_v41, %s8366_s25  ;;  %v1659_v41 = vrot.slane %v1351_v33, 5  ;;  %v1646_v45 = vsel %vm9101_vm7, %v7532_v35, %v1645_v18  ;;  %v7533_v46 = vrot.slane %v1347_v40, 9  ;;  %v1662_v50 = vrot.slane %v1352_v43, 5  ;;  %v1350_v51 = vld [vmem:[%s13581_s0 + $0x168] sm:$0xe]  ;;  %s8369_s22 = smov 20  }
  0xea   :  { %1771 = vrot.lane.b32.xlu1 %v1614_v44, %s8366_s25  ;;  %v1106_v55 = vpop.permute.xlu0 %1105  ;;  %v1112_v61 = vpop.permute.xlu1 %1111  ;;  %v1354_v44 = vld [vmem:[%s13581_s0 + $0x178] sm:$0xf]  ;;  %v1656_v48 = vsel %vm9101_vm7, %v1654_v38, %v1655_v39  ;;  %v7534_v58 = vrot.slane %v1350_v51, 9  ;;  %v1353_v63 = vld [vmem:[%s13581_s0 + $0x174] sm:$0xe]  ;;  %vm4057_vm11 = vcmask 191648  }
  0xeb   :  { %1250 = vst.msk [vmem:[#allocation2 + $0xc0] sm:$0xf] %vm1201_vm3, %v1106_v55  ;;  %1253 = vst.msk [vmem:[#allocation2 + $0xcc] sm:$0xf] %vm1201_vm3, %v1112_v61  ;;  %v1661_v49 = vrot.slane %v1659_v41, 4  ;;  %v1653_v57 = vsel %vm9101_vm7, %v7533_v46, %v1652_v30  ;;  %v7535_v4 = vrot.slane %v1353_v63, 9 }
  0xec   :  { %v1355_v55 = vld [vmem:[%s13581_s0 + $0x17c] sm:$0x1]  ;;  %v1660_v3 = vsel %vm9101_vm7, %v7534_v58, %v1659_v41  ;;  %v1356_v9 = vld [vmem:[%s13581_s0 + $0x180] sm:$0xe]  ;;  %v1359_v19 = vld [vmem:[%s13581_s0 + $0x18c] sm:$0xe] }
  0xed   :  { %1769 = vrot.lane.b32.xlu0 %v1611_v52, %s8366_s25  ;;  %v1666_v52 = vrot.slane %v1354_v44, 5  ;;  %v1663_v60 = vsel %vm9101_vm7, %v1661_v49, %v1662_v50  ;;  %v1669_v62 = vrot.slane %v1355_v55, 5  ;;  %v7536_v15 = vrot.slane %v1356_v9, 9  ;;  %v7539_v30 = vld [vmem:[%s13581_s0 + $0x10] sm:$0xf]  ;;  %s8370_s16 = smov 24  }
  0xee   :  { %1775 = vrot.lane.b32.xlu1 %v1621_v56, %s8366_s25  ;;  %v1110_v1 = vpop.permute.xlu0 %1109  ;;  %v1116_v7 = vpop.permute.xlu1 %1115  ;;  %v1357_v56 = vld [vmem:[%s13581_s0 + $0x184] sm:$0xf]  ;;  %v7537_v24 = vrot.slane %v1359_v19, 9  ;;  %v7538_v32 = vld [vmem:[%s13581_s0 + $0xc] sm:$0xf]  ;;  %s8371_s19 = smov 28  }
  0xef   :  { %1252 = vst.msk [vmem:[#allocation2 + $0xc8] sm:$0xf] %vm1201_vm3, %v1110_v1  ;;  %1255 = vst.msk [vmem:[#allocation2 + $0xd4] sm:$0xf] %vm1201_vm3, %v1116_v7  ;;  %v1668_v61 = vrot.slane %v1666_v52, 4  ;;  %vm6643_vm12 = vcmask 1041408  }
  0xf0   :  { %v1358_v1 = vld [vmem:[%s13581_s0 + $0x188] sm:$0x1]  ;;  %v7542_v40 = vld [vmem:[%s13581_s0 + $0x24] sm:$0xf]  ;;  %v7544_v44 = vld [vmem:[%s13581_s0 + $0x30] sm:$0xf] }
  0xf1   :  { %1773 = vrot.lane.b32.xlu0 %v1618_v0, %s8366_s25  ;;  %v1673_v0 = vrot.slane %v1357_v56, 5  ;;  %v1670_v6 = vsel %vm9101_vm7, %v1668_v61, %v1669_v62  ;;  %v1676_v8 = vrot.slane %v1358_v1, 5  ;;  %v7543_v38 = vld [vmem:[%s13581_s0 + $0x28] sm:$0xf]  ;;  %v7547_v46 = vld [vmem:[%s13581_s0 + $0x40] sm:$0xf] }
  0xf2   :  { %1779 = vrot.lane.b32.xlu1 %v1628_v2, %s8366_s25  ;;  %v1114_v13 = vpop.permute.xlu0 %1113  ;;  %v1120_v20 = vpop.permute.xlu1 %1119  ;;  %v1360_v2 = vld [vmem:[%s13581_s0 + $0x190] sm:$0xf]  ;;  %v7549_v50 = vld [vmem:[%s13581_s0 + $0x4c] sm:$0xf]  ;;  %v7551_v55 = vld [vmem:[%s13581_s0 + $0x58] sm:$0xf] }
  0xf3   :  { %1254 = vst.msk [vmem:[#allocation2 + $0xd0] sm:$0xf] %vm1201_vm3, %v1114_v13  ;;  %1257 = vst.msk [vmem:[#allocation2 + $0xdc] sm:$0xf] %vm1201_vm3, %v1120_v20  ;;  %v1675_v7 = vrot.slane %v1673_v0, 4  ;;  %s8372_s23 = smov 32  }
  0xf4   :  { %v1361_v13 = vld [vmem:[%s13581_s0 + $0x194] sm:$0x1]  ;;  %v7552_v61 = vld [vmem:[%s13581_s0 + $0x60] sm:$0xf]  ;;  %v7555_v63 = vld [vmem:[%s13581_s0 + $0x70] sm:$0xf] }
  0xf5   :  { %1777 = vrot.lane.b32.xlu0 %v1625_v10, %s8366_s25  ;;  %v1680_v10 = vrot.slane %v1360_v2, 5  ;;  %v1677_v17 = vsel %vm9101_vm7, %v1675_v7, %v1676_v8  ;;  %v1683_v20 = vrot.slane %v1361_v13, 5  ;;  %v7557_v2 = vld [vmem:[%s13581_s0 + $0x7c] sm:$0xf]  ;;  %v7558_v8 = vld [vmem:[%s13581_s0 + $0x84] sm:$0xf] }
  0xf6   :  { %1783 = vrot.lane.b32.xlu1 %v1635_v14, %s8366_s25  ;;  %v1118_v25 = vpop.permute.xlu0 %1117  ;;  %v1124_v31 = vpop.permute.xlu1 %1123  ;;  %v1667_v14 = vsel %vm9101_vm7, %v7535_v4, %v1666_v52  ;;  %v7548_v52 = vld [vmem:[%s13581_s0 + $0x48] sm:$0xf]  ;;  %v7556_v4 = vld [vmem:[%s13581_s0 + $0x78] sm:$0xf]  ;;  %v7560_v13 = vld [vmem:[%s13581_s0 + $0x90] sm:$0xf] }
  0xf7   :  { %1256 = vst.msk [vmem:[#allocation2 + $0xd8] sm:$0xf] %vm1201_vm3, %v1118_v25  ;;  %1259 = vst.msk [vmem:[#allocation2 + $0xe4] sm:$0xf] %vm1201_vm3, %v1124_v31  ;;  %v1682_v18 = vrot.slane %v1680_v10, 4  ;;  %v1681_v28 = vsel %vm9101_vm7, %v7537_v24, %v1680_v10  ;;  %vm4443_vm13 = vcmask 224448  }
  0xf8   :  { %v7561_v10 = vld [vmem:[%s13581_s0 + $0x94] sm:$0xf]  ;;  %v7567_v24 = vld [vmem:[%s13581_s0 + $0xb8] sm:$0xf]  ;;  %vm5564_vm14 = vcmask 257248   ;;  %vm6237_vm15 = vcmask 290048  }
  0xf9   :  { %1781 = vrot.lane.b32.xlu0 %v1632_v22, %s8366_s25  ;;  %v1674_v22 = vsel %vm9101_vm7, %v7536_v15, %v1673_v0  ;;  %v7563_v15 = vld [vmem:[%s13581_s0 + $0xa0] sm:$0xf]  ;;  %vm6546_vm0 = vcmask 293888   ;;  %v8033_v23 = vld [vmem:[%s13581_s0 + $0xd4] sm:$0x1] }
  0xfa   :  { %1787 = vrot.lane.b32.xlu1 %v1642_v11, %s8366_s25  ;;  %v1122_v36 = vpop.permute.xlu0 %1121  ;;  %v1684_v11 = vsel %vm9101_vm7, %v1682_v18, %v1683_v20  ;;  %v7565_v20 = vld [vmem:[%s13581_s0 + $0xac] sm:$0xf] }
  0xfb   :  { %1258 = vst.msk [vmem:[#allocation2 + $0xe0] sm:$0xf] %vm1201_vm3, %v1122_v36  ;;  %v7540_v36 = vld [vmem:[%s13581_s0 + $0x18] sm:$0xf] }
  0xfc   :  { %v1128_v42 = vpop.permute.xlu1 %1127 }
  0xfd   :  { %1785 = vrot.lane.b32.xlu0 %v1639_v34, %s8366_s25  ;;  %1261 = vst.msk [vmem:[#allocation2 + $0xec] sm:$0xf] %vm1201_vm3, %v1128_v42  ;;  %v7541_v34 = vld [vmem:[%s13581_s0 + $0x1c] sm:$0xf]  ;;  %v7545_v42 = vld [vmem:[%s13581_s0 + $0x34] sm:$0xf] }
  0xfe   :  { %1791 = vrot.lane.b32.xlu1 %v1649_v37, %s8366_s25  ;;  %v1126_v47 = vpop.permute.xlu0 %1125 }
  0xff   :  { %1260 = vst.msk [vmem:[#allocation2 + $0xe8] sm:$0xf] %vm1201_vm3, %v1126_v47 }
 0x100   :  { %v1132_v53 = vpop.permute.xlu1 %1131 }
 0x101   :  { %1789 = vrot.lane.b32.xlu0 %v1646_v45, %s8366_s25  ;;  %1263 = vst.msk [vmem:[#allocation2 + $0xf4] sm:$0xf] %vm1201_vm3, %v1132_v53 }
 0x102   :  { %1795 = vrot.lane.b32.xlu1 %v1656_v48, %s8366_s25  ;;  %v1130_v59 = vpop.permute.xlu0 %1129  ;;  %v7546_v48 = vld [vmem:[%s13581_s0 + $0x3c] sm:$0xf] }
 0x103   :  { %1262 = vst.msk [vmem:[#allocation2 + $0xf0] sm:$0xf] %vm1201_vm3, %v1130_v59  ;;  %v7553_v59 = vld [vmem:[%s13581_s0 + $0x64] sm:$0xf] }
 0x104   :  { %v1136_v54 = vpop.permute.xlu1 %1135 }
 0x105   :  { %1793 = vrot.lane.b32.xlu0 %v1653_v57, %s8366_s25  ;;  %1265 = vst.msk [vmem:[#allocation2 + $0xfc] sm:$0xf] %vm1201_vm3, %v1136_v54  ;;  %v7550_v57 = vld [vmem:[%s13581_s0 + $0x54] sm:$0xf]  ;;  %v7554_v54 = vld [vmem:[%s13581_s0 + $0x6c] sm:$0xf] }
 0x106   :  { %1799 = vrot.lane.b32.xlu1 %v1663_v60, %s8366_s25 }
 0x107   :  { %v1134_v5 = vpop.permute.xlu0 %1133 }
 0x108   :  { %1264 = vst.msk [vmem:[#allocation2 + $0xf8] sm:$0xf] %vm1201_vm3, %v1134_v5  ;;  %v1688_v12 = vpop.permute.xlu1 %1687 }
 0x109   :  { %1797 = vrot.lane.b32.xlu0 %v1660_v3, %s8366_s25  ;;  %1879 = vst.msk [vmem:[#allocation2 + $0x4] sm:$0xf] %vm1877_vm8, %v1688_v12 }
 0x10a   :  { %1803 = vrot.lane.b32.xlu1 %v1670_v6, %s8366_s25  ;;  %v7559_v6 = vld [vmem:[%s13581_s0 + $0x88] sm:$0xf] }
 0x10b   :  { %v1686_v16 = vpop.permute.xlu0 %1685 }
 0x10c   :  { %1878 = vst.msk [vmem:[#allocation2] sm:$0xf] %vm1877_vm8, %v1686_v16  ;;  %v1692_v21 = vpop.permute.xlu1 %1691 }
 0x10d   :  { %1801 = vrot.lane.b32.xlu0 %v1667_v14, %s8366_s25  ;;  %1881 = vst.msk [vmem:[#allocation2 + $0xc] sm:$0xf] %vm1877_vm8, %v1692_v21  ;;  %v7564_v21 = vld [vmem:[%s13581_s0 + $0xa8] sm:$0xf] }
 0x10e   :  { %1807 = vrot.lane.b32.xlu1 %v1677_v17, %s8366_s25  ;;  %v7562_v17 = vld [vmem:[%s13581_s0 + $0x9c] sm:$0xf] }
 0x10f   :  { %v1690_v25 = vpop.permute.xlu0 %1689 }
 0x110   :  { %1880 = vst.msk [vmem:[#allocation2 + $0x8] sm:$0xf] %vm1877_vm8, %v1690_v25  ;;  %v1696_v27 = vpop.permute.xlu1 %1695 }
 0x111   :  { %1805 = vrot.lane.b32.xlu0 %v1674_v22, %s8366_s25  ;;  %1883 = vst.msk [vmem:[#allocation2 + $0x14] sm:$0xf] %vm1877_vm8, %v1696_v27 }
 0x112   :  { %1811 = vrot.lane.b32.xlu1 %v1684_v11, %s8366_s25  ;;  %v7566_v11 = vld [vmem:[%s13581_s0 + $0xb4] sm:$0xf] }
 0x113   :  { %v1694_v29 = vpop.permute.xlu0 %1693 }
 0x114   :  { %1882 = vst.msk [vmem:[#allocation2 + $0x10] sm:$0xf] %vm1877_vm8, %v1694_v29  ;;  %v1700_v31 = vpop.permute.xlu1 %1699 }
 0x115   :  { %1809 = vrot.lane.b32.xlu0 %v1681_v28, %s8366_s25  ;;  %1885 = vst.msk [vmem:[#allocation2 + $0x1c] sm:$0xf] %vm1877_vm8, %v1700_v31  ;;  %v7569_v28 = vld [vmem:[%s13581_s0 + $0xc4] sm:$0xf] }
 0x116   :  { %2073 = vrot.lane.b32.xlu1 %v7539_v30, %s8367_s10  ;;  %v7568_v30 = vld [vmem:[%s13581_s0 + $0xc0] sm:$0xf] }
 0x117   :  { %v1698_v33 = vpop.permute.xlu0 %1697 }
 0x118   :  { %1884 = vst.msk [vmem:[#allocation2 + $0x18] sm:$0xf] %vm1877_vm8, %v1698_v33  ;;  %v1704_v35 = vpop.permute.xlu1 %1703 }
 0x119   :  { %2071 = vrot.lane.b32.xlu0 %v7538_v32, %s8367_s10  ;;  %1887 = vst.msk [vmem:[#allocation2 + $0x24] sm:$0xf] %vm1877_vm8, %v1704_v35  ;;  %v7571_v32 = vld [vmem:[%s13581_s0 + $0xe8] sm:$0xf] }
 0x11a   :  { %2077 = vrot.lane.b32.xlu1 %v7541_v34, %s8367_s10  ;;  %v7570_v34 = vld [vmem:[%s13581_s0 + $0xe4] sm:$0xf] }
 0x11b   :  { %v1702_v37 = vpop.permute.xlu0 %1701 }
 0x11c   :  { %1886 = vst.msk [vmem:[#allocation2 + $0x20] sm:$0xf] %vm1877_vm8, %v1702_v37  ;;  %v1708_v39 = vpop.permute.xlu1 %1707 }
 0x11d   :  { %2075 = vrot.lane.b32.xlu0 %v7540_v36, %s8367_s10  ;;  %1889 = vst.msk [vmem:[#allocation2 + $0x2c] sm:$0xf] %vm1877_vm8, %v1708_v39  ;;  %v7573_v36 = vld [vmem:[%s13581_s0 + $0xf4] sm:$0xf] }
 0x11e   :  { %2081 = vrot.lane.b32.xlu1 %v7543_v38, %s8367_s10  ;;  %v7572_v38 = vld [vmem:[%s13581_s0 + $0xf0] sm:$0xf] }
 0x11f   :  { %v1706_v41 = vpop.permute.xlu0 %1705 }
 0x120   :  { %1888 = vst.msk [vmem:[#allocation2 + $0x28] sm:$0xf] %vm1877_vm8, %v1706_v41  ;;  %v1712_v43 = vpop.permute.xlu1 %1711 }
 0x121   :  { %2079 = vrot.lane.b32.xlu0 %v7542_v40, %s8367_s10  ;;  %1891 = vst.msk [vmem:[#allocation2 + $0x34] sm:$0xf] %vm1877_vm8, %v1712_v43  ;;  %v7575_v40 = vld [vmem:[%s13581_s0 + $0x100] sm:$0xf] }
 0x122   :  { %2085 = vrot.lane.b32.xlu1 %v7545_v42, %s8367_s10  ;;  %v7574_v42 = vld [vmem:[%s13581_s0 + $0xfc] sm:$0xf] }
 0x123   :  { %v1710_v45 = vpop.permute.xlu0 %1709 }
 0x124   :  { %1890 = vst.msk [vmem:[#allocation2 + $0x30] sm:$0xf] %vm1877_vm8, %v1710_v45  ;;  %v1716_v47 = vpop.permute.xlu1 %1715 }
 0x125   :  { %2083 = vrot.lane.b32.xlu0 %v7544_v44, %s8367_s10  ;;  %1893 = vst.msk [vmem:[#allocation2 + $0x3c] sm:$0xf] %vm1877_vm8, %v1716_v47  ;;  %v7577_v44 = vld [vmem:[%s13581_s0 + $0x10c] sm:$0xf] }
 0x126   :  { %2089 = vrot.lane.b32.xlu1 %v7547_v46, %s8367_s10  ;;  %v7576_v46 = vld [vmem:[%s13581_s0 + $0x108] sm:$0xf] }
 0x127   :  { %v1714_v49 = vpop.permute.xlu0 %1713 }
 0x128   :  { %1892 = vst.msk [vmem:[#allocation2 + $0x38] sm:$0xf] %vm1877_vm8, %v1714_v49  ;;  %v1720_v51 = vpop.permute.xlu1 %1719 }
 0x129   :  { %2087 = vrot.lane.b32.xlu0 %v7546_v48, %s8367_s10  ;;  %1895 = vst.msk [vmem:[#allocation2 + $0x44] sm:$0xf] %vm1877_vm8, %v1720_v51  ;;  %v7579_v48 = vld [vmem:[%s13581_s0 + $0x118] sm:$0xf] }
 0x12a   :  { %2093 = vrot.lane.b32.xlu1 %v7549_v50, %s8367_s10  ;;  %v7578_v50 = vld [vmem:[%s13581_s0 + $0x114] sm:$0xf] }
 0x12b   :  { %v1718_v53 = vpop.permute.xlu0 %1717 }
 0x12c   :  { %1894 = vst.msk [vmem:[#allocation2 + $0x40] sm:$0xf] %vm1877_vm8, %v1718_v53  ;;  %v1724_v56 = vpop.permute.xlu1 %1723 }
 0x12d   :  { %2091 = vrot.lane.b32.xlu0 %v7548_v52, %s8367_s10  ;;  %1897 = vst.msk [vmem:[#allocation2 + $0x4c] sm:$0xf] %vm1877_vm8, %v1724_v56  ;;  %v7581_v52 = vld [vmem:[%s13581_s0 + $0x124] sm:$0xf] }
 0x12e   :  { %2097 = vrot.lane.b32.xlu1 %v7551_v55, %s8367_s10  ;;  %v7580_v55 = vld [vmem:[%s13581_s0 + $0x120] sm:$0xf] }
 0x12f   :  { %v1722_v58 = vpop.permute.xlu0 %1721 }
 0x130   :  { %1896 = vst.msk [vmem:[#allocation2 + $0x48] sm:$0xf] %vm1877_vm8, %v1722_v58  ;;  %v1728_v60 = vpop.permute.xlu1 %1727 }
 0x131   :  { %2095 = vrot.lane.b32.xlu0 %v7550_v57, %s8367_s10  ;;  %1899 = vst.msk [vmem:[#allocation2 + $0x54] sm:$0xf] %vm1877_vm8, %v1728_v60  ;;  %v7583_v57 = vld [vmem:[%s13581_s0 + $0x130] sm:$0xf] }
 0x132   :  { %2101 = vrot.lane.b32.xlu1 %v7553_v59, %s8367_s10  ;;  %v7582_v59 = vld [vmem:[%s13581_s0 + $0x12c] sm:$0xf] }
 0x133   :  { %v1726_v62 = vpop.permute.xlu0 %1725 }
 0x134   :  { %1898 = vst.msk [vmem:[#allocation2 + $0x50] sm:$0xf] %vm1877_vm8, %v1726_v62  ;;  %v1732_v0 = vpop.permute.xlu1 %1731 }
 0x135   :  { %2099 = vrot.lane.b32.xlu0 %v7552_v61, %s8367_s10  ;;  %1901 = vst.msk [vmem:[#allocation2 + $0x5c] sm:$0xf] %vm1877_vm8, %v1732_v0  ;;  %v7585_v61 = vld [vmem:[%s13581_s0 + $0x13c] sm:$0xf] }
 0x136   :  { %2105 = vrot.lane.b32.xlu1 %v7555_v63, %s8367_s10  ;;  %v7584_v63 = vld [vmem:[%s13581_s0 + $0x138] sm:$0xf] }
 0x137   :  { %v1730_v1 = vpop.permute.xlu0 %1729 }
 0x138   :  { %1900 = vst.msk [vmem:[#allocation2 + $0x58] sm:$0xf] %vm1877_vm8, %v1730_v1  ;;  %v1736_v3 = vpop.permute.xlu1 %1735 }
 0x139   :  { %2103 = vrot.lane.b32.xlu0 %v7554_v54, %s8367_s10  ;;  %1903 = vst.msk [vmem:[#allocation2 + $0x64] sm:$0xf] %vm1877_vm8, %v1736_v3  ;;  %v7587_v54 = vld [vmem:[%s13581_s0 + $0x148] sm:$0xf] }
 0x13a   :  { %2109 = vrot.lane.b32.xlu1 %v7557_v2, %s8367_s10  ;;  %v7586_v2 = vld [vmem:[%s13581_s0 + $0x144] sm:$0xf] }
 0x13b   :  { %v1734_v5 = vpop.permute.xlu0 %1733 }
 0x13c   :  { %1902 = vst.msk [vmem:[#allocation2 + $0x60] sm:$0xf] %vm1877_vm8, %v1734_v5  ;;  %v1740_v7 = vpop.permute.xlu1 %1739 }
 0x13d   :  { %2107 = vrot.lane.b32.xlu0 %v7556_v4, %s8367_s10  ;;  %1905 = vst.msk [vmem:[#allocation2 + $0x6c] sm:$0xf] %vm1877_vm8, %v1740_v7  ;;  %v7589_v4 = vld [vmem:[%s13581_s0 + $0x154] sm:$0xf] }
 0x13e   :  { %2113 = vrot.lane.b32.xlu1 %v7559_v6, %s8367_s10  ;;  %v7588_v6 = vld [vmem:[%s13581_s0 + $0x150] sm:$0xf] }
 0x13f   :  { %v1738_v9 = vpop.permute.xlu0 %1737 }
 0x140   :  { %1904 = vst.msk [vmem:[#allocation2 + $0x68] sm:$0xf] %vm1877_vm8, %v1738_v9  ;;  %v1744_v12 = vpop.permute.xlu1 %1743 }
 0x141   :  { %2111 = vrot.lane.b32.xlu0 %v7558_v8, %s8367_s10  ;;  %1907 = vst.msk [vmem:[#allocation2 + $0x74] sm:$0xf] %vm1877_vm8, %v1744_v12  ;;  %v7591_v8 = vld [vmem:[%s13581_s0 + $0x160] sm:$0xf]  ;;  %v7590_v12 = vld [vmem:[%s13581_s0 + $0x15c] sm:$0xf] }
 0x142   :  { %2117 = vrot.lane.b32.xlu1 %v7561_v10, %s8367_s10  ;;  %v7603_v10 = vld [vmem:[%s13581_s0 + $0x10] sm:$0xf] }
 0x143   :  { %v1742_v14 = vpop.permute.xlu0 %1741 }
 0x144   :  { %1906 = vst.msk [vmem:[#allocation2 + $0x70] sm:$0xf] %vm1877_vm8, %v1742_v14  ;;  %v1748_v16 = vpop.permute.xlu1 %1747  ;;  %v7593_v14 = vld [vmem:[%s13581_s0 + $0x16c] sm:$0xf] }
 0x145   :  { %2115 = vrot.lane.b32.xlu0 %v7560_v13, %s8367_s10  ;;  %1909 = vst.msk [vmem:[#allocation2 + $0x7c] sm:$0xf] %vm1877_vm8, %v1748_v16  ;;  %v2434_v16 = vshll.u32 %v7603_v10, 16 }
 0x146   :  { %2121 = vrot.lane.b32.xlu1 %v7563_v15, %s8367_s10 }
 0x147   :  { %v1746_v18 = vpop.permute.xlu0 %1745 }
 0x148   :  { %1908 = vst.msk [vmem:[#allocation2 + $0x78] sm:$0xf] %vm1877_vm8, %v1746_v18  ;;  %v1752_v19 = vpop.permute.xlu1 %1751  ;;  %v7592_v18 = vld [vmem:[%s13581_s0 + $0x168] sm:$0xf] }
 0x149   :  { %2119 = vrot.lane.b32.xlu0 %v7562_v17, %s8367_s10  ;;  %1911 = vst.msk [vmem:[#allocation2 + $0x84] sm:$0xf] %vm1877_vm8, %v1752_v19  ;;  %v2438_v17 = vshrl.u32 %v7603_v10, 16  ;;  %v7595_v19 = vld [vmem:[%s13581_s0 + $0x178] sm:$0xf] }
 0x14a   :  { %2125 = vrot.lane.b32.xlu1 %v7565_v20, %s8367_s10  ;;  %v7602_v20 = vld [vmem:[%s13581_s0 + $0xc] sm:$0xf] }
 0x14b   :  { %v1750_v22 = vpop.permute.xlu0 %1749 }
 0x14c   :  { %1910 = vst.msk [vmem:[#allocation2 + $0x80] sm:$0xf] %vm1877_vm8, %v1750_v22  ;;  %v1756_v25 = vpop.permute.xlu1 %1755  ;;  %v7605_v22 = vld [vmem:[%s13581_s0 + $0x18] sm:$0xf] }
 0x14d   :  { %2123 = vrot.lane.b32.xlu0 %v7564_v21, %s8367_s10  ;;  %1913 = vst.msk [vmem:[#allocation2 + $0x8c] sm:$0xf] %vm1877_vm8, %v1756_v25  ;;  %v7606_v21 = vld [vmem:[%s13581_s0 + $0x1c] sm:$0xf]  ;;  %v7609_v25 = vld [vmem:[%s13581_s0 + $0x28] sm:$0xf] }
 0x14e   :  { %2129 = vrot.lane.b32.xlu1 %v7567_v24, %s8367_s10 }
 0x14f   :  { %v1754_v27 = vpop.permute.xlu0 %1753 }
 0x150   :  { %1912 = vst.msk [vmem:[#allocation2 + $0x88] sm:$0xf] %vm1877_vm8, %v1754_v27  ;;  %v1760_v29 = vpop.permute.xlu1 %1759 }
 0x151   :  { %2127 = vrot.lane.b32.xlu0 %v7566_v11, %s8367_s10  ;;  %1915 = vst.msk [vmem:[#allocation2 + $0x94] sm:$0xf] %vm1877_vm8, %v1760_v29  ;;  %v7608_v11 = vld [vmem:[%s13581_s0 + $0x24] sm:$0xf]  ;;  %v2440_v29 = vrot.slane %v2438_v17, 4 }
 0x152   :  { %2133 = vrot.lane.b32.xlu1 %v7569_v28, %s8367_s10  ;;  %v10095_v28 = vrot.slane %v2434_v16, 5 }
 0x153   :  { %v1758_v31 = vpop.permute.xlu0 %1757 }
 0x154   :  { %1914 = vst.msk [vmem:[#allocation2 + $0x90] sm:$0xf] %vm1877_vm8, %v1758_v31  ;;  %v1764_v33 = vpop.permute.xlu1 %1763  ;;  %v2428_v31 = vshll.u32 %v7602_v20, 16 }
 0x155   :  { %2131 = vrot.lane.b32.xlu0 %v7568_v30, %s8367_s10  ;;  %1917 = vst.msk [vmem:[#allocation2 + $0x9c] sm:$0xf] %vm1877_vm8, %v1764_v33  ;;  %v2425_v30 = vshrl.u32 %v7602_v20, 16  ;;  %v7604_v33 = vld [vmem:[%s13581_s0 + $0x14] sm:$0x1] }
 0x156   :  { %2137 = vrot.lane.b32.xlu1 %v7571_v32, %s8367_s10  ;;  %v7612_v32 = vld [vmem:[%s13581_s0 + $0x34] sm:$0xf] }
 0x157   :  { %v1762_v35 = vpop.permute.xlu0 %1761 }
 0x158   :  { %1916 = vst.msk [vmem:[#allocation2 + $0x98] sm:$0xf] %vm1877_vm8, %v1762_v35  ;;  %v1768_v37 = vpop.permute.xlu1 %1767  ;;  %v2462_v35 = vshrl.u32 %v7606_v21, 16 }
 0x159   :  { %2135 = vrot.lane.b32.xlu0 %v7570_v34, %s8367_s10  ;;  %1919 = vst.msk [vmem:[#allocation2 + $0xa4] sm:$0xf] %vm1877_vm8, %v1768_v37  ;;  %v2458_v34 = vshll.u32 %v7606_v21, 16  ;;  %v2452_v37 = vshll.u32 %v7605_v22, 16  ;;  %v7601_v21 = vld [vmem:[%s13581_s0 + $0x19c] sm:$0xf] }
 0x15a   :  { %2141 = vrot.lane.b32.xlu1 %v7573_v36, %s8367_s10  ;;  %v2449_v36 = vshrl.u32 %v7605_v22, 16 }
 0x15b   :  { %v1766_v39 = vpop.permute.xlu0 %1765 }
 0x15c   :  { %1918 = vst.msk [vmem:[#allocation2 + $0xa0] sm:$0xf] %vm1877_vm8, %v1766_v39  ;;  %v1772_v41 = vpop.permute.xlu1 %1771  ;;  %v2482_v39 = vshll.u32 %v7609_v25, 16 }
 0x15d   :  { %2139 = vrot.lane.b32.xlu0 %v7572_v38, %s8367_s10  ;;  %1921 = vst.msk [vmem:[#allocation2 + $0xac] sm:$0xf] %vm1877_vm8, %v1772_v41  ;;  %v7594_v38 = vld [vmem:[%s13581_s0 + $0x174] sm:$0xf]  ;;  %v2473_v41 = vshrl.u32 %v7608_v11, 16 }
 0x15e   :  { %2145 = vrot.lane.b32.xlu1 %v7575_v40, %s8367_s10  ;;  %v2486_v40 = vshrl.u32 %v7609_v25, 16 }
 0x15f   :  { %v1770_v43 = vpop.permute.xlu0 %1769 }
 0x160   :  { %1920 = vst.msk [vmem:[#allocation2 + $0xa8] sm:$0xf] %vm1877_vm8, %v1770_v43  ;;  %v1776_v45 = vpop.permute.xlu1 %1775 }
 0x161   :  { %2143 = vrot.lane.b32.xlu0 %v7574_v42, %s8367_s10  ;;  %1923 = vst.msk [vmem:[#allocation2 + $0xb4] sm:$0xf] %vm1877_vm8, %v1776_v45  ;;  %v2476_v42 = vshll.u32 %v7608_v11, 16  ;;  %v2506_v45 = vshll.u32 %v7612_v32, 16 }
 0x162   :  { %2149 = vrot.lane.b32.xlu1 %v7577_v44, %s8367_s10  ;;  %v7597_v44 = vld [vmem:[%s13581_s0 + $0x184] sm:$0xf] }
 0x163   :  { %v1774_v47 = vpop.permute.xlu0 %1773 }
 0x164   :  { %1922 = vst.msk [vmem:[#allocation2 + $0xb0] sm:$0xf] %vm1877_vm8, %v1774_v47  ;;  %v1780_v49 = vpop.permute.xlu1 %1779 }
 0x165   :  { %2147 = vrot.lane.b32.xlu0 %v7576_v46, %s8367_s10  ;;  %1925 = vst.msk [vmem:[#allocation2 + $0xbc] sm:$0xf] %vm1877_vm8, %v1780_v49  ;;  %v2510_v46 = vshrl.u32 %v7612_v32, 16  ;;  %v2441_v49 = vor.u32 %v2440_v29, %v10095_v28  ;;  %v7600_v29 = vld [vmem:[%s13581_s0 + $0x198] sm:$0xf] }
 0x166   :  { %2153 = vrot.lane.b32.xlu1 %v7579_v48, %s8367_s10  ;;  %v7596_v48 = vld [vmem:[%s13581_s0 + $0x180] sm:$0xf] }
 0x167   :  { %v1778_v51 = vpop.permute.xlu0 %1777  ;;  %v2442_v16 = vrot.slane %v2441_v49, 4 }
 0x168   :  { %1924 = vst.msk [vmem:[#allocation2 + $0xb8] sm:$0xf] %vm1877_vm8, %v1778_v51  ;;  %v1784_v53 = vpop.permute.xlu1 %1783  ;;  %v2427_v51 = vrot.slane %v2425_v30, 4 }
 0x169   :  { %2151 = vrot.lane.b32.xlu0 %v7578_v50, %s8367_s10  ;;  %1927 = vst.msk [vmem:[#allocation2 + $0xc4] sm:$0xf] %vm1877_vm8, %v1784_v53  ;;  %v2444_v50 = vshll.u32 %v7604_v33, 16  ;;  %v7611_v53 = vld [vmem:[%s13581_s0 + $0x30] sm:$0xf] }
 0x16a   :  { %2157 = vrot.lane.b32.xlu1 %v7581_v52, %s8367_s10  ;;  %v2430_v52 = vrot.slane %v2428_v31, 5  ;;  %v7614_v33 = vld [vmem:[%s13581_s0 + $0x3c] sm:$0xf] }
 0x16b   :  { %v1782_v56 = vpop.permute.xlu0 %1781  ;;  %v2446_v17 = vrot.slane %v2444_v50, 5 }
 0x16c   :  { %1926 = vst.msk [vmem:[#allocation2 + $0xc0] sm:$0xf] %vm1877_vm8, %v1782_v56  ;;  %v1788_v58 = vpop.permute.xlu1 %1787  ;;  %v10125_v56 = vrot.slane %v2458_v34, 5 }
 0x16d   :  { %2155 = vrot.lane.b32.xlu0 %v7580_v55, %s8367_s10  ;;  %1929 = vst.msk [vmem:[#allocation2 + $0xcc] sm:$0xf] %vm1877_vm8, %v1788_v58  ;;  %v7607_v55 = vld [vmem:[%s13581_s0 + $0x20] sm:$0x1]  ;;  %v2451_v58 = vrot.slane %v2449_v36, 4 }
 0x16e   :  { %2161 = vrot.lane.b32.xlu1 %v7583_v57, %s8367_s10  ;;  %v2464_v57 = vrot.slane %v2462_v35, 4  ;;  %v2468_v10 = vshll.u32 %v7607_v55, 16 }
 0x16f   :  { %v1786_v60 = vpop.permute.xlu0 %1785 }
 0x170   :  { %1928 = vst.msk [vmem:[#allocation2 + $0xc8] sm:$0xf] %vm1877_vm8, %v1786_v60  ;;  %v1792_v62 = vpop.permute.xlu1 %1791  ;;  %v7610_v60 = vld [vmem:[%s13581_s0 + $0x2c] sm:$0x1]  ;;  %v2470_v35 = vrot.slane %v2468_v10, 5 }
 0x171   :  { %2159 = vrot.lane.b32.xlu0 %v7582_v59, %s8367_s10  ;;  %1931 = vst.msk [vmem:[#allocation2 + $0xd4] sm:$0xf] %vm1877_vm8, %v1792_v62  ;;  %v2454_v59 = vrot.slane %v2452_v37, 5  ;;  %v2488_v62 = vrot.slane %v2486_v40, 4  ;;  %v7623_v10 = vld [vmem:[%s13581_s0 + $0x60] sm:$0xf] }
 0x172   :  { %2165 = vrot.lane.b32.xlu1 %v7585_v61, %s8367_s10  ;;  %v10131_v61 = vrot.slane %v2482_v39, 5  ;;  %v2447_v39 = vsel %vm8413_vm2, %v2442_v16, %v2446_v17  ;;  %v7627_v16 = vld [vmem:[%s13581_s0 + $0x70] sm:$0xf] }
 0x173   :  { %v1790_v0 = vpop.permute.xlu0 %1789  ;;  %v7619_v17 = vld [vmem:[%s13581_s0 + $0x50] sm:$0x1] }
 0x174   :  { %1930 = vst.msk [vmem:[#allocation2 + $0xd0] sm:$0xf] %vm1877_vm8, %v1790_v0  ;;  %v1796_v1 = vpop.permute.xlu1 %1795  ;;  %v2478_v0 = vrot.slane %v2476_v42, 5  ;;  %v7618_v42 = vld [vmem:[%s13581_s0 + $0x4c] sm:$0xf] }
 0x175   :  { %2163 = vrot.lane.b32.xlu0 %v7584_v63, %s8367_s10  ;;  %1933 = vst.msk [vmem:[#allocation2 + $0xdc] sm:$0xf] %vm1877_vm8, %v1796_v1  ;;  %v2475_v63 = vrot.slane %v2473_v41, 4  ;;  %v7599_v1 = vld [vmem:[%s13581_s0 + $0x190] sm:$0xf]  ;;  %v2554_v55 = vshll.u32 %v7618_v42, 16 }
 0x176   :  { %2169 = vrot.lane.b32.xlu1 %v7587_v54, %s8367_s10 }
 0x177   :  { %v1794_v3 = vpop.permute.xlu0 %1793  ;;  %v2479_v20 = vor.u32 %v2478_v0, %v2475_v63 }
 0x178   :  { %1932 = vst.msk [vmem:[#allocation2 + $0xd8] sm:$0xf] %vm1877_vm8, %v1794_v3  ;;  %v1800_v5 = vpop.permute.xlu1 %1799  ;;  %v2512_v3 = vrot.slane %v2510_v46, 4 }
 0x179   :  { %2167 = vrot.lane.b32.xlu0 %v7586_v2, %s8367_s10  ;;  %1935 = vst.msk [vmem:[#allocation2 + $0xe4] sm:$0xf] %vm1877_vm8, %v1800_v5  ;;  %v10136_v2 = vrot.slane %v2506_v45, 5  ;;  %v2500_v5 = vshll.u32 %v7611_v53, 16  ;;  %v10178_v41 = vrot.slane %v2479_v20, 4 }
 0x17a   :  { %2173 = vrot.lane.b32.xlu1 %v7589_v4, %s8367_s10  ;;  %v2497_v4 = vshrl.u32 %v7611_v53, 16  ;;  %v2524_v53 = vshll.u32 %v7614_v33, 16 }
 0x17b   :  { %v1798_v7 = vpop.permute.xlu0 %1797  ;;  %v2513_v22 = vor.u32 %v2512_v3, %v10136_v2  ;;  %v2502_v11 = vrot.slane %v2500_v5, 5 }
 0x17c   :  { %1934 = vst.msk [vmem:[#allocation2 + $0xe0] sm:$0xf] %vm1877_vm8, %v1798_v7  ;;  %v1804_v9 = vpop.permute.xlu1 %1803  ;;  %v2431_v7 = vor.u32 %v2430_v52, %v2427_v51  ;;  %v2499_v25 = vrot.slane %v2497_v4, 4  ;;  %v7621_v4 = vld [vmem:[%s13581_s0 + $0x58] sm:$0xf] }
 0x17d   :  { %2171 = vrot.lane.b32.xlu0 %v7588_v6, %s8367_s10  ;;  %1937 = vst.msk [vmem:[#allocation2 + $0xec] sm:$0xf] %vm1877_vm8, %v1804_v9  ;;  %v2465_v9 = vor.u32 %v2464_v57, %v10125_v56  ;;  %v10186_v45 = vrot.slane %v2513_v22, 4  ;;  %v2558_v57 = vshrl.u32 %v7618_v42, 16  ;;  %v2582_v20 = vshrl.u32 %v7621_v4, 16 }
 0x17e   :  { %2177 = vrot.lane.b32.xlu1 %v7591_v8, %s8367_s10  ;;  %v7613_v8 = vld [vmem:[%s13581_s0 + $0x38] sm:$0x1]  ;;  %v2432_v30 = vrot.slane %v2431_v7, 4 }
 0x17f   :  { %v1802_v13 = vpop.permute.xlu0 %1801  ;;  %v2466_v34 = vrot.slane %v2465_v9, 4  ;;  %v7624_v9 = vld [vmem:[%s13581_s0 + $0x64] sm:$0xf] }
 0x180   :  { %1936 = vst.msk [vmem:[#allocation2 + $0xe8] sm:$0xf] %vm1877_vm8, %v1802_v13  ;;  %v1808_v15 = vpop.permute.xlu1 %1807  ;;  %v2492_v13 = vshll.u32 %v7610_v60, 16  ;;  %v2437_v60 = vsel %vm8413_vm2, %v2432_v30, %v10095_v28 }
 0x181   :  { %2175 = vrot.lane.b32.xlu0 %v7590_v12, %s8367_s10  ;;  %1939 = vst.msk [vmem:[#allocation2 + $0xf4] sm:$0xf] %vm1877_vm8, %v1808_v15  ;;  %v2455_v12 = vor.u32 %v2454_v59, %v2451_v58  ;;  %v7598_v15 = vld [vmem:[%s13581_s0 + $0x18c] sm:$0xf] }
 0x182   :  { %2181 = vrot.lane.b32.xlu1 %v7593_v14, %s8367_s10  ;;  %v7615_v14 = vld [vmem:[%s13581_s0 + $0x40] sm:$0xf]  ;;  %v10168_v37 = vrot.slane %v2492_v13, 5  ;;  %v2560_v13 = vrot.slane %v2558_v57, 4 }
 0x183   :  { %v1806_v24 = vpop.permute.xlu0 %1805  ;;  %v2530_v31 = vshll.u32 %v7615_v14, 16  ;;  %v2534_v32 = vshrl.u32 %v7615_v14, 16  ;;  %v10166_v36 = vrot.slane %v2455_v12, 4  ;;  %v10239_v12 = vrot.slane %v2554_v55, 5 }
 0x184   :  { %1938 = vst.msk [vmem:[#allocation2 + $0xf0] sm:$0xf] %vm1877_vm8, %v1806_v24  ;;  %v1812_v27 = vpop.permute.xlu1 %1811  ;;  %v2516_v24 = vshll.u32 %v7613_v8, 16  ;;  %v2526_v8 = vrot.slane %v2524_v53, 5 }
 0x185   :  { %2179 = vrot.lane.b32.xlu0 %v7592_v18, %s8367_s10  ;;  %1941 = vst.msk [vmem:[#allocation2 + $0xfc] sm:$0xf] %vm1877_vm8, %v1812_v27  ;;  %v2489_v18 = vor.u32 %v2488_v62, %v10131_v61  ;;  %v10191_v50 = vrot.slane %v2530_v31, 5  ;;  %v2536_v51 = vrot.slane %v2534_v32, 4  ;;  %v2471_v62 = vsel %vm8413_vm2, %v2466_v34, %v2470_v35 }
 0x186   :  { %2185 = vrot.lane.b32.xlu1 %v7595_v19, %s8367_s10  ;;  %v10188_v46 = vrot.slane %v2516_v24, 5  ;;  %v2461_v63 = vsel %vm8413_vm2, %v10166_v36, %v10125_v56  ;;  %v7620_v56 = vld [vmem:[%s13581_s0 + $0x54] sm:$0xf]  ;;  %v2602_v24 = vshll.u32 %v7624_v9, 16  ;;  %v2626_v32 = vshll.u32 %v7627_v16, 16 }
 0x187   :  { %v1810_v43 = vpop.permute.xlu0 %1809  ;;  %v10176_v40 = vrot.slane %v2489_v18, 4  ;;  %v2578_v18 = vshll.u32 %v7621_v4, 16  ;;  %v2561_v35 = vor.u32 %v2560_v13, %v10239_v12  ;;  %v2564_v36 = vshll.u32 %v7619_v17, 16 }
 0x188   :  { %1940 = vst.msk [vmem:[#allocation2 + $0xf8] sm:$0xf] %vm1877_vm8, %v1810_v43  ;;  %v2074_v47 = vpop.permute.xlu1 %2073  ;;  %v7617_v43 = vld [vmem:[%s13581_s0 + $0x48] sm:$0xf] }
 0x189   :  { %2183 = vrot.lane.b32.xlu0 %v7594_v38, %s8367_s10  ;;  %2265 = vst.msk [vmem:[#allocation2 + $0x4] sm:$0xf] %vm2263_vm9, %v2074_v47  ;;  %v7616_v38 = vld [vmem:[%s13581_s0 + $0x44] sm:$0x1]  ;;  %v2503_v47 = vor.u32 %v2502_v11, %v2499_v25  ;;  %v2545_v58 = vshrl.u32 %v7617_v43, 16  ;;  %v2548_v59 = vshll.u32 %v7617_v43, 16 }
 0x18a   :  { %2189 = vrot.lane.b32.xlu1 %v7597_v44, %s8367_s10  ;;  %v2540_v52 = vshll.u32 %v7616_v38, 16  ;;  %v2606_v25 = vshrl.u32 %v7624_v9, 16  ;;  %v2593_v11 = vshrl.u32 %v7623_v10, 16  ;;  %v7626_v38 = vld [vmem:[%s13581_s0 + $0x6c] sm:$0xf] }
 0x18b   :  { %v2072_v54 = vpop.permute.xlu0 %2071  ;;  %v10213_v28 = vrot.slane %v2503_v47, 4  ;;  %v2547_v14 = vrot.slane %v2545_v58, 4  ;;  %v2617_v55 = vshrl.u32 %v7626_v38, 16  ;;  %v2620_v57 = vshll.u32 %v7626_v38, 16 }
 0x18c   :  { %2264 = vst.msk [vmem:[#allocation2] sm:$0xf] %vm2263_vm9, %v2072_v54  ;;  %v2078_v6 = vpop.permute.xlu1 %2077  ;;  %v2495_v54 = vsel %vm8413_vm2, %v10176_v40, %v10168_v37  ;;  %v10229_v7 = vrot.slane %v2540_v52, 5  ;;  %v2584_v40 = vrot.slane %v2582_v20, 4  ;;  %v2595_v47 = vrot.slane %v2593_v11, 4 }
 0x18d   :  { %2187 = vrot.lane.b32.xlu0 %v7596_v48, %s8367_s10  ;;  %2267 = vst.msk [vmem:[#allocation2 + $0xc] sm:$0xf] %vm2263_vm9, %v2078_v6  ;;  %v2521_v48 = vshrl.u32 %v7614_v33, 16  ;;  %v2537_v6 = vor.u32 %v2536_v51, %v10191_v50  ;;  %v2509_v30 = vsel %vm8413_vm2, %v10213_v28, %v10136_v2  ;;  %v2630_v33 = vshrl.u32 %v7627_v16, 16  ;;  %v7622_v2 = vld [vmem:[%s13581_s0 + $0x5c] sm:$0x1] }
 0x18e   :  { %2193 = vrot.lane.b32.xlu1 %v7599_v1, %s8367_s10  ;;  %v2485_v1 = vsel %vm8413_vm2, %v10178_v41, %v10131_v61  ;;  %v2519_v61 = vsel %vm8413_vm2, %v10186_v45, %v10188_v46  ;;  %v10269_v45 = vrot.slane %v2602_v24, 5  ;;  %v2608_v46 = vrot.slane %v2606_v25, 4  ;;  %v7628_v51 = vld [vmem:[%s13581_s0 + $0x74] sm:$0x1] }
 0x18f   :  { %v2076_v19 = vpop.permute.xlu0 %2075  ;;  %v10215_v3 = vrot.slane %v2521_v48, 4  ;;  %v2538_v31 = vrot.slane %v2537_v6, 4  ;;  %v10275_v52 = vrot.slane %v2626_v32, 5  ;;  %v2632_v53 = vrot.slane %v2630_v33, 4 }
 0x190   :  { %2266 = vst.msk [vmem:[#allocation2 + $0x8] sm:$0xf] %vm2263_vm9, %v2076_v19  ;;  %v2082_v27 = vpop.permute.xlu1 %2081  ;;  %v2569_v19 = vshrl.u32 %v7620_v56, 16  ;;  %v2619_v9 = vrot.slane %v2617_v55, 4 }
 0x191   :  { %2191 = vrot.lane.b32.xlu0 %v7598_v15, %s8367_s10  ;;  %2269 = vst.msk [vmem:[#allocation2 + $0x14] sm:$0xf] %vm2263_vm9, %v2082_v27  ;;  %v2550_v15 = vrot.slane %v2548_v59, 5  ;;  %v2596_v27 = vshll.u32 %v7623_v10, 16  ;;  %v2527_v34 = vor.u32 %v2526_v8, %v10215_v3  ;;  %v2543_v58 = vsel %vm8413_vm2, %v2538_v31, %v10229_v7  ;;  %v7629_v3 = vld [vmem:[%s13581_s0 + $0x78] sm:$0xf] }
 0x192   :  { %2197 = vrot.lane.b32.xlu1 %v7601_v21, %s8367_s10  ;;  %v2572_v21 = vshll.u32 %v7620_v56, 16  ;;  %v2571_v41 = vrot.slane %v2569_v19, 4  ;;  %v2609_v56 = vor.u32 %v2608_v46, %v10269_v45  ;;  %v2636_v7 = vshll.u32 %v7628_v51, 16 }
 0x193   :  { %v2080_v44 = vpop.permute.xlu0 %2079  ;;  %v2551_v37 = vor.u32 %v2550_v15, %v2547_v14  ;;  %v2598_v48 = vrot.slane %v2596_v27, 5  ;;  %v2528_v59 = vrot.slane %v2527_v34, 4  ;;  %v2622_v10 = vrot.slane %v2620_v57, 5 }
 0x194   :  { %2268 = vst.msk [vmem:[#allocation2 + $0x10] sm:$0xf] %vm2263_vm9, %v2080_v44  ;;  %v2086_v49 = vpop.permute.xlu1 %2085  ;;  %v2574_v42 = vrot.slane %v2572_v21, 5  ;;  %v7625_v44 = vld [vmem:[%s13581_s0 + $0x68] sm:$0x1]  ;;  %v2641_v17 = vshrl.u32 %v7629_v3, 16 }
 0x195   :  { %2195 = vrot.lane.b32.xlu0 %v7600_v29, %s8367_s10  ;;  %2271 = vst.msk [vmem:[#allocation2 + $0x1c] sm:$0xf] %vm2263_vm9, %v2086_v49  ;;  %v2599_v6 = vor.u32 %v2598_v48, %v2595_v47  ;;  %v2533_v14 = vsel %vm8413_vm2, %v2528_v59, %v10191_v50  ;;  %v7631_v21 = vld [vmem:[%s13581_s0 + $0x80] sm:$0x1]  ;;  %v7633_v50 = vld [vmem:[%s13581_s0 + $0x88] sm:$0xf]  ;;  %v2623_v33 = vor.u32 %v2622_v10, %v2619_v9 }
 0x196   :  { %3194 = vrot.lane.b32.xlu1 %v2447_v39, %s8368_s8  ;;  %v10264_v39 = vrot.slane %v2578_v18, 5  ;;  %v2575_v28 = vor.u32 %v2574_v42, %v2571_v41  ;;  %v10313_v11 = vrot.slane %v2609_v56, 4  ;;  %v10325_v32 = vrot.slane %v2636_v7, 5  ;;  %v7634_v56 = vld [vmem:[%s13581_s0 + $0x8c] sm:$0x1] }
 0x197   :  { %v2084_v0 = vpop.permute.xlu0 %2083  ;;  %v2643_v38 = vrot.slane %v2641_v17, 4  ;;  %v2678_v41 = vshrl.u32 %v7633_v50, 16  ;;  %v10349_v57 = vrot.slane %v2623_v33, 4  ;;  %v7637_v9 = vld [vmem:[%s13581_s0 + $0x98] sm:$0x1] }
 0x198   :  { %2270 = vst.msk [vmem:[#allocation2 + $0x18] sm:$0xf] %vm2263_vm9, %v2084_v0  ;;  %v2090_v5 = vpop.permute.xlu1 %2089  ;;  %v2562_v0 = vrot.slane %v2561_v35, 4  ;;  %v2576_v25 = vrot.slane %v2575_v28, 4  ;;  %v7636_v35 = vld [vmem:[%s13581_s0 + $0x94] sm:$0xf] }
 0x199   :  { %3192 = vrot.lane.b32.xlu0 %v2437_v60, %s8368_s8  ;;  %2273 = vst.msk [vmem:[#allocation2 + $0x24] sm:$0xf] %vm2263_vm9, %v2090_v5  ;;  %v2566_v60 = vrot.slane %v2564_v36, 5  ;;  %v2612_v5 = vshll.u32 %v7625_v44, 16  ;;  %v2698_v47 = vshll.u32 %v7636_v35, 16  ;;  %v2702_v48 = vshrl.u32 %v7636_v35, 16 }
 0x19a   :  { %3198 = vrot.lane.b32.xlu1 %v2471_v62, %s8368_s8  ;;  %v2588_v62 = vshll.u32 %v7622_v2, 16  ;;  %v2674_v2 = vshll.u32 %v7633_v50, 16  ;;  %v2581_v51 = vsel %vm8413_vm2, %v2576_v25, %v10264_v39 }
 0x19b   :  { %v2088_v22 = vpop.permute.xlu0 %2087  ;;  %v2567_v18 = vsel %vm8413_vm2, %v2562_v0, %v2566_v60  ;;  %v10315_v27 = vrot.slane %v2612_v5, 5  ;;  %v10378_v5 = vrot.slane %v2698_v47, 5 }
 0x19c   :  { %2272 = vst.msk [vmem:[#allocation2 + $0x20] sm:$0xf] %vm2263_vm9, %v2088_v22  ;;  %v2094_v29 = vpop.permute.xlu1 %2093  ;;  %v2590_v15 = vrot.slane %v2588_v62, 5  ;;  %v2644_v22 = vshll.u32 %v7629_v3, 16  ;;  %v7639_v62 = vld [vmem:[%s13581_s0 + $0xa0] sm:$0xf] }
 0x19d   :  { %3196 = vrot.lane.b32.xlu0 %v2461_v63, %s8368_s8  ;;  %2275 = vst.msk [vmem:[#allocation2 + $0x2c] sm:$0xf] %vm2263_vm9, %v2094_v29  ;;  %v7630_v63 = vld [vmem:[%s13581_s0 + $0x7c] sm:$0xf]  ;;  %v10317_v29 = vrot.slane %v2599_v6, 4  ;;  %v2704_v6 = vrot.slane %v2702_v48, 4 }
 0x19e   :  { %3202 = vrot.lane.b32.xlu1 %v2495_v54, %s8368_s8  ;;  %v10286_v54 = vrot.slane %v2551_v37, 4  ;;  %v2650_v13 = vshll.u32 %v7630_v63, 16  ;;  %v2654_v16 = vshrl.u32 %v7630_v63, 16  ;;  %v2660_v37 = vshll.u32 %v7631_v21, 16  ;;  %v7638_v63 = vld [vmem:[%s13581_s0 + $0x9c] sm:$0xf] }
 0x19f   :  { %v2092_v43 = vpop.permute.xlu0 %2091  ;;  %v2605_v55 = vsel %vm8413_vm2, %v10317_v29, %v10269_v45  ;;  %v10363_v45 = vrot.slane %v2674_v2, 5  ;;  %v7642_v3 = vld [vmem:[%s13581_s0 + $0xac] sm:$0xf]  ;;  %v2722_v10 = vshll.u32 %v7639_v62, 16 }
 0x1a0   :  { %2274 = vst.msk [vmem:[#allocation2 + $0x28] sm:$0xf] %vm2263_vm9, %v2092_v43  ;;  %v2098_v49 = vpop.permute.xlu1 %2097  ;;  %v2557_v20 = vsel %vm8413_vm2, %v10286_v54, %v10239_v12  ;;  %v7632_v12 = vld [vmem:[%s13581_s0 + $0x84] sm:$0xf]  ;;  %v10327_v34 = vrot.slane %v2650_v13, 5  ;;  %v2656_v36 = vrot.slane %v2654_v16, 4  ;;  %v2629_v16 = vsel %vm8413_vm2, %v10349_v57, %v10275_v52 }
 0x1a1   :  { %3200 = vrot.lane.b32.xlu0 %v2485_v1, %s8368_s8  ;;  %2277 = vst.msk [vmem:[#allocation2 + $0x34] sm:$0xf] %vm2263_vm9, %v2098_v49  ;;  %v2585_v1 = vor.u32 %v2584_v40, %v10264_v39  ;;  %v2646_v40 = vrot.slane %v2644_v22, 5  ;;  %v2665_v42 = vshrl.u32 %v7632_v12, 16  ;;  %v2668_v43 = vshll.u32 %v7632_v12, 16 }
 0x1a2   :  { %3206 = vrot.lane.b32.xlu1 %v2519_v61, %s8368_s8  ;;  %v2633_v61 = vor.u32 %v2632_v53, %v10275_v52  ;;  %v2615_v53 = vsel %vm8413_vm2, %v10313_v11, %v10315_v27  ;;  %v2657_v59 = vor.u32 %v2656_v36, %v10327_v34  ;;  %v10361_v60 = vrot.slane %v2660_v37, 5  ;;  %v7643_v36 = vld [vmem:[%s13581_s0 + $0xb0] sm:$0x1] }
 0x1a3   :  { %v2096_v4 = vpop.permute.xlu0 %2095  ;;  %v2586_v19 = vrot.slane %v2585_v1, 4  ;;  %v2647_v0 = vor.u32 %v2646_v40, %v2643_v38  ;;  %v2680_v54 = vrot.slane %v2678_v41, 4  ;;  %v2667_v1 = vrot.slane %v2665_v42, 4 }
 0x1a4   :  { %2276 = vst.msk [vmem:[#allocation2 + $0x30] sm:$0xf] %vm2263_vm9, %v2096_v4  ;;  %v2102_v8 = vpop.permute.xlu1 %2101  ;;  %v10323_v31 = vrot.slane %v2633_v61, 4  ;;  %v2670_v28 = vrot.slane %v2668_v43, 5  ;;  %v2726_v13 = vshrl.u32 %v7639_v62, 16  ;;  %v2658_v17 = vrot.slane %v2657_v59, 4 }
 0x1a5   :  { %3204 = vrot.lane.b32.xlu0 %v2509_v30, %s8368_s8  ;;  %2279 = vst.msk [vmem:[#allocation2 + $0x3c] sm:$0xf] %vm2263_vm9, %v2102_v8  ;;  %v2591_v46 = vsel %vm8413_vm2, %v2586_v19, %v2590_v15  ;;  %v2716_v15 = vshll.u32 %v7638_v63, 16  ;;  %v10391_v19 = vrot.slane %v2647_v0, 4  ;;  %v2681_v21 = vor.u32 %v2680_v54, %v10363_v45 }
 0x1a6   :  { %3210 = vrot.lane.b32.xlu1 %v2543_v58, %s8368_s8  ;;  %v7635_v58 = vld [vmem:[%s13581_s0 + $0x90] sm:$0xf]  ;;  %v2639_v39 = vsel %vm8413_vm2, %v10323_v31, %v10325_v32  ;;  %v2684_v22 = vshll.u32 %v7634_v56, 16  ;;  %v2671_v50 = vor.u32 %v2670_v28, %v2667_v1  ;;  %v2705_v11 = vor.u32 %v2704_v6, %v10378_v5 }
 0x1a7   :  { %v2100_v24 = vpop.permute.xlu0 %2099  ;;  %v2689_v7 = vshrl.u32 %v7635_v58, 16  ;;  %v2692_v8 = vshll.u32 %v7635_v58, 16  ;;  %v2708_v27 = vshll.u32 %v7637_v9, 16  ;;  %v10402_v31 = vrot.slane %v2722_v10, 5 }
 0x1a8   :  { %2278 = vst.msk [vmem:[#allocation2 + $0x38] sm:$0xf] %vm2263_vm9, %v2100_v24  ;;  %v2106_v30 = vpop.permute.xlu1 %2105  ;;  %v7641_v24 = vld [vmem:[%s13581_s0 + $0xa8] sm:$0xf]  ;;  %v2728_v32 = vrot.slane %v2726_v13, 4  ;;  %v2718_v35 = vrot.slane %v2716_v15, 5  ;;  %v2663_v41 = vsel %vm8413_vm2, %v2658_v17, %v10361_v60  ;;  %v2653_v42 = vsel %vm8413_vm2, %v10391_v19, %v10327_v34 }
 0x1a9   :  { %3208 = vrot.lane.b32.xlu0 %v2533_v14, %s8368_s8  ;;  %2281 = vst.msk [vmem:[#allocation2 + $0x44] sm:$0xf] %vm2263_vm9, %v2106_v30  ;;  %v2713_v14 = vshrl.u32 %v7638_v63, 16  ;;  %v2691_v52 = vrot.slane %v2689_v7, 4  ;;  %v2694_v29 = vrot.slane %v2692_v8, 5  ;;  %v2737_v2 = vshrl.u32 %v7641_v24, 16 }
 0x1aa   :  { %3214 = vrot.lane.b32.xlu1 %v2567_v18, %s8368_s8  ;;  %v2746_v18 = vshll.u32 %v7642_v3, 16  ;;  %v7640_v30 = vld [vmem:[%s13581_s0 + $0xa4] sm:$0x1]  ;;  %v2740_v40 = vshll.u32 %v7641_v24, 16  ;;  %v2682_v43 = vrot.slane %v2681_v21, 4  ;;  %v2672_v48 = vrot.slane %v2671_v50, 4 }
 0x1ab   :  { %v2104_v44 = vpop.permute.xlu0 %2103  ;;  %v2715_v33 = vrot.slane %v2713_v14, 4  ;;  %v2729_v57 = vor.u32 %v2728_v32, %v10402_v31  ;;  %v2732_v58 = vshll.u32 %v7640_v30, 16  ;;  %v2756_v59 = vshll.u32 %v7643_v36, 16  ;;  %v7648_v60 = vld [vmem:[%s13581_s0 + $0xc4] sm:$0xf] }
 0x1ac   :  { %2280 = vst.msk [vmem:[#allocation2 + $0x40] sm:$0xf] %vm2263_vm9, %v2104_v44  ;;  %v2110_v49 = vpop.permute.xlu1 %2109  ;;  %v10409_v37 = vrot.slane %v2746_v18, 5  ;;  %v2686_v44 = vrot.slane %v2684_v22, 5  ;;  %v2739_v63 = vrot.slane %v2737_v2, 4  ;;  %v2742_v0 = vrot.slane %v2740_v40, 5 }
 0x1ad   :  { %3212 = vrot.lane.b32.xlu0 %v2557_v20, %s8368_s8  ;;  %2283 = vst.msk [vmem:[#allocation2 + $0x4c] sm:$0xf] %vm2263_vm9, %v2110_v49  ;;  %v2750_v20 = vshrl.u32 %v7642_v3, 16  ;;  %v10422_v49 = vrot.slane %v2705_v11, 4  ;;  %v2677_v6 = vsel %vm8413_vm2, %v2672_v48, %v10363_v45  ;;  %v7646_v8 = vld [vmem:[%s13581_s0 + $0xbc] sm:$0x1] }
 0x1ae   :  { %3218 = vrot.lane.b32.xlu1 %v2591_v46, %s8368_s8  ;;  %v7645_v46 = vld [vmem:[%s13581_s0 + $0xb8] sm:$0xf]  ;;  %v2687_v1 = vsel %vm8413_vm2, %v2682_v43, %v2686_v44  ;;  %v2798_v9 = vshrl.u32 %v7648_v60, 16  ;;  %v2730_v14 = vrot.slane %v2729_v57, 4  ;;  %v2734_v15 = vrot.slane %v2732_v58, 5 }
 0x1af   :  { %v2108_v4 = vpop.permute.xlu0 %2107  ;;  %v2752_v38 = vrot.slane %v2750_v20, 4  ;;  %v2770_v54 = vshll.u32 %v7645_v46, 16  ;;  %v2774_v28 = vshrl.u32 %v7645_v46, 16  ;;  %v7647_v45 = vld [vmem:[%s13581_s0 + $0xc0] sm:$0xf]  ;;  %v10460_v18 = vrot.slane %v2756_v59, 5 }
 0x1b0   :  { %2282 = vst.msk [vmem:[#allocation2 + $0x48] sm:$0xf] %vm2263_vm9, %v2108_v4  ;;  %v2114_v61 = vpop.permute.xlu1 %2113  ;;  %v2743_v20 = vor.u32 %v2742_v0, %v2739_v63  ;;  %v7651_v21 = vld [vmem:[%s13581_s0 + $0xe8] sm:$0xf]  ;;  %v2780_v50 = vshll.u32 %v7646_v8, 16 }
 0x1b1   :  { %3216 = vrot.lane.b32.xlu0 %v2581_v51, %s8368_s8  ;;  %2285 = vst.msk [vmem:[#allocation2 + $0x54] sm:$0xf] %vm2263_vm9, %v2114_v61  ;;  %v10424_v51 = vrot.slane %v2708_v27, 5  ;;  %v2753_v62 = vor.u32 %v2752_v38, %v10409_v37  ;;  %v2794_v61 = vshll.u32 %v7648_v60, 16  ;;  %v10462_v19 = vrot.slane %v2770_v54, 5 }
 0x1b2   :  { %3222 = vrot.lane.b32.xlu1 %v2615_v53, %s8368_s8  ;;  %v2695_v53 = vor.u32 %v2694_v29, %v2691_v52  ;;  %v2776_v22 = vrot.slane %v2774_v28, 4  ;;  %v2800_v52 = vrot.slane %v2798_v9, 4  ;;  %v2785_v29 = vshrl.u32 %v7647_v45, 16  ;;  %v7649_v32 = vld [vmem:[%s13581_s0 + $0xc8] sm:$0x1] }
 0x1b3   :  { %v2112_v25 = vpop.permute.xlu0 %2111  ;;  %v2711_v7 = vsel %vm8413_vm2, %v10422_v49, %v10424_v51  ;;  %v10458_v17 = vrot.slane %v2753_v62, 4  ;;  %v10468_v27 = vrot.slane %v2794_v61, 5  ;;  %v2735_v38 = vsel %vm8413_vm2, %v2730_v14, %v2734_v15  ;;  %v7653_v46 = vld [vmem:[%s13581_s0 + $0xf0] sm:$0xf]  ;;  %v7652_v60 = vld [vmem:[%s13581_s0 + $0xec] sm:$0x1] }
 0x1b4   :  { %2284 = vst.msk [vmem:[#allocation2 + $0x50] sm:$0xf] %vm2263_vm9, %v2112_v25  ;;  %v2118_v12 = vpop.permute.xlu1 %2117  ;;  %v2696_v13 = vrot.slane %v2695_v53, 4  ;;  %v10496_v43 = vrot.slane %v2780_v50, 5  ;;  %v2804_v49 = vshll.u32 %v7649_v32, 16  ;;  %v2787_v51 = vrot.slane %v2785_v29, 4 }
 0x1b5   :  { %3220 = vrot.lane.b32.xlu0 %v2605_v55, %s8368_s8  ;;  %2287 = vst.msk [vmem:[#allocation2 + $0x5c] sm:$0xf] %vm2263_vm9, %v2118_v12  ;;  %v7644_v55 = vld [vmem:[%s13581_s0 + $0xb4] sm:$0xf]  ;;  %v2788_v12 = vshll.u32 %v7647_v45, 16  ;;  %v2759_v40 = vsel %vm8413_vm2, %v10458_v17, %v10460_v18  ;;  %v2801_v48 = vor.u32 %v2800_v52, %v10468_v27  ;;  %v2833_v0 = vshrl.u32 %v7653_v46, 16 }
 0x1b6   :  { %3226 = vrot.lane.b32.xlu1 %v2639_v39, %s8368_s8  ;;  %v2719_v39 = vor.u32 %v2718_v35, %v2715_v33  ;;  %v2761_v3 = vshrl.u32 %v7644_v55, 16  ;;  %v2764_v4 = vshll.u32 %v7644_v55, 16  ;;  %v2818_v33 = vshll.u32 %v7651_v21, 16  ;;  %v7657_v55 = vld [vmem:[%s13581_s0 + $0x100] sm:$0xf] }
 0x1b7   :  { %v2116_v47 = vpop.permute.xlu0 %2115  ;;  %v2822_v35 = vshrl.u32 %v7651_v21, 16  ;;  %v2701_v36 = vsel %vm8413_vm2, %v2696_v13, %v10378_v5  ;;  %v10493_v5 = vrot.slane %v2743_v20, 4  ;;  %v2790_v53 = vrot.slane %v2788_v12, 5  ;;  %v7656_v9 = vld [vmem:[%s13581_s0 + $0xfc] sm:$0xf] }
 0x1b8   :  { %2286 = vst.msk [vmem:[#allocation2 + $0x58] sm:$0xf] %vm2263_vm9, %v2116_v47  ;;  %v2122_v34 = vpop.permute.xlu1 %2121  ;;  %v2763_v24 = vrot.slane %v2761_v3, 4  ;;  %v2766_v25 = vrot.slane %v2764_v4, 5  ;;  %v10509_v57 = vrot.slane %v2818_v33, 5  ;;  %v2836_v54 = vshll.u32 %v7653_v46, 16 }
 0x1b9   :  { %3224 = vrot.lane.b32.xlu0 %v2629_v16, %s8368_s8  ;;  %2289 = vst.msk [vmem:[#allocation2 + $0x64] sm:$0xf] %vm2263_vm9, %v2122_v34  ;;  %v10451_v16 = vrot.slane %v2719_v39, 4  ;;  %v2824_v58 = vrot.slane %v2822_v35, 4  ;;  %v2866_v3 = vshll.u32 %v7657_v55, 16  ;;  %v2870_v4 = vshrl.u32 %v7657_v55, 16 }
 0x1ba   :  { %3230 = vrot.lane.b32.xlu1 %v2663_v41, %s8368_s8  ;;  %v7650_v41 = vld [vmem:[%s13581_s0 + $0xe4] sm:$0xf]  ;;  %v2767_v44 = vor.u32 %v2766_v25, %v2763_v24  ;;  %v10523_v8 = vrot.slane %v2804_v49, 5  ;;  %v2791_v61 = vor.u32 %v2790_v53, %v2787_v51  ;;  %v2835_v18 = vrot.slane %v2833_v0, 4  ;;  %v7655_v21 = vld [vmem:[%s13581_s0 + $0xf8] sm:$0x1] }
 0x1bb   :  { %v2120_v56 = vpop.permute.xlu0 %2119  ;;  %v2725_v2 = vsel %vm8413_vm2, %v10451_v16, %v10402_v31  ;;  %v7654_v31 = vld [vmem:[%s13581_s0 + $0xf4] sm:$0xf]  ;;  %v2809_v39 = vshrl.u32 %v7650_v41, 16  ;;  %v2812_v59 = vshll.u32 %v7650_v41, 16  ;;  %v2825_v13 = vor.u32 %v2824_v58, %v10509_v57  ;;  %v7660_v16 = vld [vmem:[%s13581_s0 + $0x10c] sm:$0xf] }
 0x1bc   :  { %2288 = vst.msk [vmem:[#allocation2 + $0x60] sm:$0xf] %vm2263_vm9, %v2120_v56  ;;  %v2126_v10 = vpop.permute.xlu1 %2125  ;;  %v2842_v62 = vshll.u32 %v7654_v31, 16  ;;  %v2846_v63 = vshrl.u32 %v7654_v31, 16  ;;  %v2838_v20 = vrot.slane %v2836_v54, 5  ;;  %v2872_v50 = vrot.slane %v2870_v4, 4 }
 0x1bd   :  { %3228 = vrot.lane.b32.xlu0 %v2653_v42, %s8368_s8  ;;  %2291 = vst.msk [vmem:[#allocation2 + $0x6c] sm:$0xf] %vm2263_vm9, %v2126_v10  ;;  %v2777_v42 = vor.u32 %v2776_v22, %v10462_v19  ;;  %v2811_v14 = vrot.slane %v2809_v39, 4  ;;  %v2814_v15 = vrot.slane %v2812_v59, 5  ;;  %v10541_v22 = vrot.slane %v2866_v3, 5 }
 0x1be   :  { %3234 = vrot.lane.b32.xlu1 %v2687_v1, %s8368_s8  ;;  %v2749_v1 = vsel %vm8413_vm2, %v10493_v5, %v10409_v37  ;;  %v2828_v37 = vshll.u32 %v7652_v60, 16  ;;  %v10535_v45 = vrot.slane %v2842_v62, 5  ;;  %v2848_v17 = vrot.slane %v2846_v63, 4  ;;  %v7658_v12 = vld [vmem:[%s13581_s0 + $0x104] sm:$0x1] }
 0x1bf   :  { %v2124_v11 = vpop.permute.xlu0 %2123  ;;  %v2778_v28 = vrot.slane %v2777_v42, 4  ;;  %v2857_v24 = vshrl.u32 %v7656_v9, 16  ;;  %v2860_v25 = vshll.u32 %v7656_v9, 16  ;;  %v2894_v32 = vshrl.u32 %v7660_v16, 16  ;;  %v7661_v39 = vld [vmem:[%s13581_s0 + $0x110] sm:$0x1] }
 0x1c0   :  { %2290 = vst.msk [vmem:[#allocation2 + $0x68] sm:$0xf] %vm2263_vm9, %v2124_v11  ;;  %v2130_v30 = vpop.permute.xlu1 %2129  ;;  %v2849_v41 = vor.u32 %v2848_v17, %v10535_v45  ;;  %v2852_v5 = vshll.u32 %v7655_v21, 16  ;;  %v2839_v42 = vor.u32 %v2838_v20, %v2835_v18  ;;  %v2876_v31 = vshll.u32 %v7658_v12, 16 }
 0x1c1   :  { %3232 = vrot.lane.b32.xlu0 %v2677_v6, %s8368_s8  ;;  %2293 = vst.msk [vmem:[#allocation2 + $0x74] sm:$0xf] %vm2263_vm9, %v2130_v30  ;;  %v2768_v6 = vrot.slane %v2767_v44, 4  ;;  %v2783_v52 = vsel %vm8413_vm2, %v2778_v28, %v10496_v43  ;;  %v2890_v30 = vshll.u32 %v7660_v16, 16  ;;  %v7663_v43 = vld [vmem:[%s13581_s0 + $0x118] sm:$0xf]  ;;  %v2873_v44 = vor.u32 %v2872_v50, %v10541_v22 }
 0x1c2   :  { %3238 = vrot.lane.b32.xlu1 %v2711_v7, %s8368_s8  ;;  %v10521_v7 = vrot.slane %v2801_v48, 4  ;;  %v2859_v46 = vrot.slane %v2857_v24, 4  ;;  %v2896_v51 = vrot.slane %v2894_v32, 4  ;;  %v2914_v59 = vshll.u32 %v7663_v43, 16  ;;  %v7664_v16 = vld [vmem:[%s13581_s0 + $0x11c] sm:$0x1] }
 0x1c3   :  { %v2128_v47 = vpop.permute.xlu0 %2127  ;;  %v2773_v29 = vsel %vm8413_vm2, %v2768_v6, %v10462_v19  ;;  %v7659_v19 = vld [vmem:[%s13581_s0 + $0x108] sm:$0xf]  ;;  %v10568_v49 = vrot.slane %v2890_v30, 5  ;;  %v2918_v60 = vshrl.u32 %v7663_v43, 16  ;;  %v2850_v0 = vrot.slane %v2849_v41, 4 }
 0x1c4   :  { %2292 = vst.msk [vmem:[#allocation2 + $0x70] sm:$0xf] %vm2263_vm9, %v2128_v47  ;;  %v2134_v34 = vpop.permute.xlu1 %2133  ;;  %v2807_v35 = vsel %vm8413_vm2, %v10521_v7, %v10523_v8  ;;  %v2862_v47 = vrot.slane %v2860_v25, 5  ;;  %v2881_v53 = vshrl.u32 %v7659_v19, 16  ;;  %v2884_v55 = vshll.u32 %v7659_v19, 16 }
 0x1c5   :  { %3236 = vrot.lane.b32.xlu0 %v2701_v36, %s8368_s8  ;;  %2295 = vst.msk [vmem:[#allocation2 + $0x7c] sm:$0xf] %vm2263_vm9, %v2134_v34  ;;  %v2792_v36 = vrot.slane %v2791_v61, 4  ;;  %v2854_v54 = vrot.slane %v2852_v5, 5  ;;  %v10587_v28 = vrot.slane %v2873_v44, 4  ;;  %v10589_v3 = vrot.slane %v2876_v31, 5 }
 0x1c6   :  { %3242 = vrot.lane.b32.xlu1 %v2735_v38, %s8368_s8  ;;  %v2826_v38 = vrot.slane %v2825_v13, 4  ;;  %v2863_v4 = vor.u32 %v2862_v47, %v2859_v46  ;;  %v2897_v7 = vor.u32 %v2896_v51, %v10568_v49  ;;  %v2900_v8 = vshll.u32 %v7661_v39, 16  ;;  %v7665_v25 = vld [vmem:[%s13581_s0 + $0x120] sm:$0xf]  ;;  %v7668_v30 = vld [vmem:[%s13581_s0 + $0x12c] sm:$0xf] }
 0x1c7   :  { %v2132_v56 = vpop.permute.xlu0 %2131  ;;  %v2797_v58 = vsel %vm8413_vm2, %v2792_v36, %v10468_v27  ;;  %v7662_v27 = vld [vmem:[%s13581_s0 + $0x114] sm:$0xf]  ;;  %v2883_v61 = vrot.slane %v2881_v53, 4  ;;  %v2886_v9 = vrot.slane %v2884_v55, 5  ;;  %v10596_v13 = vrot.slane %v2914_v59, 5 }
 0x1c8   :  { %2294 = vst.msk [vmem:[#allocation2 + $0x78] sm:$0xf] %vm2263_vm9, %v2132_v56  ;;  %v2138_v10 = vpop.permute.xlu1 %2137  ;;  %v7666_v56 = vld [vmem:[%s13581_s0 + $0x124] sm:$0xf]  ;;  %v2855_v21 = vsel %vm8413_vm2, %v2850_v0, %v2854_v54  ;;  %v10613_v24 = vrot.slane %v2863_v4, 4  ;;  %v2929_v41 = vshrl.u32 %v7665_v25, 16 }
 0x1c9   :  { %3240 = vrot.lane.b32.xlu0 %v2725_v2, %s8368_s8  ;;  %2297 = vst.msk [vmem:[#allocation2 + $0x84] sm:$0xf] %vm2263_vm9, %v2138_v10  ;;  %v2830_v2 = vrot.slane %v2828_v37, 5  ;;  %v2920_v37 = vrot.slane %v2918_v60, 4  ;;  %v2938_v17 = vshll.u32 %v7666_v56, 16  ;;  %v2942_v18 = vshrl.u32 %v7666_v56, 16 }
 0x1ca   :  { %3246 = vrot.lane.b32.xlu1 %v2759_v40, %s8368_s8  ;;  %v2815_v40 = vor.u32 %v2814_v15, %v2811_v14  ;;  %v2905_v14 = vshrl.u32 %v7662_v27, 16  ;;  %v2908_v15 = vshll.u32 %v7662_v27, 16  ;;  %v2887_v12 = vor.u32 %v2886_v9, %v2883_v61  ;;  %v7675_v27 = vld [vmem:[%s13581_s0 + $0x148] sm:$0xf] }
 0x1cb   :  { %v2136_v11 = vpop.permute.xlu0 %2135  ;;  %v2831_v62 = vsel %vm8413_vm2, %v2826_v38, %v2830_v2  ;;  %v7672_v2 = vld [vmem:[%s13581_s0 + $0x13c] sm:$0xf]  ;;  %v10639_v19 = vrot.slane %v2938_v17, 5  ;;  %v2932_v5 = vshll.u32 %v7665_v25, 16  ;;  %v2953_v31 = vshrl.u32 %v7668_v30, 16 }
 0x1cc   :  { %2296 = vst.msk [vmem:[#allocation2 + $0x80] sm:$0xf] %vm2263_vm9, %v2136_v11  ;;  %v2142_v33 = vpop.permute.xlu1 %2141  ;;  %v2816_v63 = vrot.slane %v2815_v40, 4  ;;  %v2907_v36 = vrot.slane %v2905_v14, 4  ;;  %v2910_v38 = vrot.slane %v2908_v15, 5  ;;  %v2944_v40 = vrot.slane %v2942_v18, 4 }
 0x1cd   :  { %3244 = vrot.lane.b32.xlu0 %v2749_v1, %s8368_s8  ;;  %2299 = vst.msk [vmem:[#allocation2 + $0x8c] sm:$0xf] %vm2263_vm9, %v2142_v33  ;;  %v10585_v1 = vrot.slane %v2839_v42, 4  ;;  %v2921_v33 = vor.u32 %v2920_v37, %v10596_v13  ;;  %v7667_v42 = vld [vmem:[%s13581_s0 + $0x128] sm:$0x1]  ;;  %v2956_v46 = vshll.u32 %v7668_v30, 16 }
 0x1ce   :  { %3250 = vrot.lane.b32.xlu1 %v2783_v52, %s8368_s8  ;;  %v2821_v20 = vsel %vm8413_vm2, %v2816_v63, %v10509_v57  ;;  %v2879_v57 = vsel %vm8413_vm2, %v10587_v28, %v10589_v3  ;;  %v10622_v52 = vrot.slane %v2897_v7, 4  ;;  %v2986_v53 = vshll.u32 %v7672_v2, 16  ;;  %v7673_v14 = vld [vmem:[%s13581_s0 + $0x140] sm:$0x1] }
 0x1cf   :  { %v2140_v48 = vpop.permute.xlu0 %2139  ;;  %v2845_v50 = vsel %vm8413_vm2, %v10585_v1, %v10535_v45  ;;  %v7669_v45 = vld [vmem:[%s13581_s0 + $0x130] sm:$0xf]  ;;  %v2990_v55 = vshrl.u32 %v7672_v2, 16  ;;  %v2922_v39 = vrot.slane %v2921_v33, 4  ;;  %v2911_v60 = vor.u32 %v2910_v38, %v2907_v36 }
 0x1d0   :  { %2298 = vst.msk [vmem:[#allocation2 + $0x88] sm:$0xf] %vm2263_vm9, %v2140_v48  ;;  %v2146_v34 = vpop.permute.xlu1 %2145  ;;  %v2962_v43 = vshll.u32 %v7669_v45, 16  ;;  %v2966_v44 = vshrl.u32 %v7669_v45, 16  ;;  %v2869_v48 = vsel %vm8413_vm2, %v10613_v24, %v10541_v22  ;;  %v2945_v22 = vor.u32 %v2944_v40, %v10639_v19  ;;  %v7676_v40 = vld [vmem:[%s13581_s0 + $0x14c] sm:$0x1] }
 0x1d1   :  { %3248 = vrot.lane.b32.xlu0 %v2773_v29, %s8368_s8  ;;  %2301 = vst.msk [vmem:[#allocation2 + $0x94] sm:$0xf] %vm2263_vm9, %v2146_v34  ;;  %v10624_v29 = vrot.slane %v2900_v8, 5  ;;  %v2948_v63 = vshll.u32 %v7667_v42, 16  ;;  %v2931_v0 = vrot.slane %v2929_v41, 4  ;;  %v2934_v54 = vrot.slane %v2932_v5, 5 }
 0x1d2   :  { %3254 = vrot.lane.b32.xlu1 %v2807_v35, %s8368_s8  ;;  %v2924_v35 = vshll.u32 %v7664_v16, 16  ;;  %v10664_v1 = vrot.slane %v2962_v43, 5  ;;  %v2968_v28 = vrot.slane %v2966_v44, 4  ;;  %v2955_v3 = vrot.slane %v2953_v31, 4 }
 0x1d3   :  { %v2144_v6 = vpop.permute.xlu0 %2143  ;;  %v2903_v51 = vsel %vm8413_vm2, %v10622_v52, %v10624_v29  ;;  %v2958_v4 = vrot.slane %v2956_v46, 5  ;;  %v10669_v7 = vrot.slane %v2986_v53, 5  ;;  %v2992_v8 = vrot.slane %v2990_v55, 4  ;;  %v7677_v46 = vld [vmem:[%s13581_s0 + $0x150] sm:$0xf] }
 0x1d4   :  { %2300 = vst.msk [vmem:[#allocation2 + $0x90] sm:$0xf] %vm2263_vm9, %v2144_v6  ;;  %v2150_v10 = vpop.permute.xlu1 %2149  ;;  %v2926_v59 = vrot.slane %v2924_v35, 5  ;;  %v7670_v6 = vld [vmem:[%s13581_s0 + $0x134] sm:$0x1]  ;;  %v3010_v15 = vshll.u32 %v7675_v27, 16  ;;  %v2969_v24 = vor.u32 %v2968_v28, %v10664_v1 }
 0x1d5   :  { %3252 = vrot.lane.b32.xlu0 %v2797_v58, %s8368_s8  ;;  %2303 = vst.msk [vmem:[#allocation2 + $0x9c] sm:$0xf] %vm2263_vm9, %v2150_v10  ;;  %v2888_v58 = vrot.slane %v2887_v12, 4  ;;  %v3014_v16 = vshrl.u32 %v7675_v27, 16  ;;  %v2912_v18 = vrot.slane %v2911_v60, 4  ;;  %v2972_v25 = vshll.u32 %v7670_v6, 16 }
 0x1d6   :  { %3258 = vrot.lane.b32.xlu1 %v2831_v62, %s8368_s8  ;;  %v7671_v62 = vld [vmem:[%s13581_s0 + $0x138] sm:$0xf]  ;;  %v2927_v17 = vsel %vm8413_vm2, %v2922_v39, %v2926_v59  ;;  %v2993_v29 = vor.u32 %v2992_v8, %v10669_v7  ;;  %v2996_v12 = vshll.u32 %v7673_v14, 16  ;;  %v10692_v33 = vrot.slane %v3010_v15, 5  ;;  %v7681_v60 = vld [vmem:[%s13581_s0 + $0x160] sm:$0xf] }
 0x1d7   :  { %v2148_v11 = vpop.permute.xlu0 %2147  ;;  %v2977_v61 = vshrl.u32 %v7671_v62, 16  ;;  %v2980_v9 = vshll.u32 %v7671_v62, 16  ;;  %v2893_v37 = vsel %vm8413_vm2, %v2888_v58, %v10568_v49  ;;  %v7674_v49 = vld [vmem:[%s13581_s0 + $0x144] sm:$0xf]  ;;  %v3016_v35 = vrot.slane %v3014_v16, 4 }
 0x1d8   :  { %2302 = vst.msk [vmem:[#allocation2 + $0x98] sm:$0xf] %vm2263_vm9, %v2148_v11  ;;  %v2154_v32 = vpop.permute.xlu1 %2153  ;;  %v2959_v11 = vor.u32 %v2958_v4, %v2955_v3  ;;  %v3001_v36 = vshrl.u32 %v7674_v49, 16  ;;  %v3004_v38 = vshll.u32 %v7674_v49, 16  ;;  %v2917_v2 = vsel %vm8413_vm2, %v2912_v18, %v10596_v13  ;;  %v7679_v28 = vld [vmem:[%s13581_s0 + $0x158] sm:$0x1] }
 0x1d9   :  { %3256 = vrot.lane.b32.xlu0 %v2821_v20, %s8368_s8  ;;  %2305 = vst.msk [vmem:[#allocation2 + $0xa4] sm:$0xf] %vm2263_vm9, %v2154_v32  ;;  %v2946_v20 = vrot.slane %v2945_v22, 4  ;;  %v2979_v45 = vrot.slane %v2977_v61, 4  ;;  %v2982_v30 = vrot.slane %v2980_v9, 5  ;;  %v2970_v44 = vrot.slane %v2969_v24, 4 }
 0x1da   :  { %3262 = vrot.lane.b32.xlu1 %v2855_v21, %s8368_s8  ;;  %v2950_v21 = vrot.slane %v2948_v63, 5  ;;  %v2974_v31 = vrot.slane %v2972_v25, 5  ;;  %v2960_v13 = vrot.slane %v2959_v11, 4  ;;  %v3020_v58 = vshll.u32 %v7676_v40, 16  ;;  %v7684_v61 = vld [vmem:[%s13581_s0 + $0x16c] sm:$0xf] }
 0x1db   :  { %v2152_v47 = vpop.permute.xlu0 %2151  ;;  %v2983_v53 = vor.u32 %v2982_v30, %v2979_v45  ;;  %v3003_v39 = vrot.slane %v3001_v36, 4  ;;  %v3006_v59 = vrot.slane %v3004_v38, 5  ;;  %v3025_v63 = vshrl.u32 %v7677_v46, 16  ;;  %v7683_v15 = vld [vmem:[%s13581_s0 + $0x168] sm:$0xf] }
 0x1dc   :  { %2304 = vst.msk [vmem:[#allocation2 + $0xa0] sm:$0xf] %vm2263_vm9, %v2152_v47  ;;  %v2158_v34 = vpop.permute.xlu1 %2157  ;;  %v2951_v42 = vsel %vm8413_vm2, %v2946_v20, %v2950_v21  ;;  %v2975_v27 = vsel %vm8413_vm2, %v2970_v44, %v2974_v31  ;;  %v2965_v4 = vsel %vm8413_vm2, %v2960_v13, %v10664_v1  ;;  %v3058_v6 = vshll.u32 %v7681_v60, 16  ;;  %v7687_v21 = vld [vmem:[%s13581_s0 + $0x178] sm:$0xf] }
 0x1dd   :  { %3260 = vrot.lane.b32.xlu0 %v2845_v50, %s8368_s8  ;;  %2307 = vst.msk [vmem:[#allocation2 + $0xac] sm:$0xf] %vm2263_vm9, %v2158_v34  ;;  %v2935_v50 = vor.u32 %v2934_v54, %v2931_v0  ;;  %v3017_v34 = vor.u32 %v3016_v35, %v10692_v33  ;;  %v3028_v0 = vshll.u32 %v7677_v46, 16  ;;  %v3062_v8 = vshrl.u32 %v7681_v60, 16  ;;  %v7682_v35 = vld [vmem:[%s13581_s0 + $0x164] sm:$0x1] }
 0x1de   :  { %3266 = vrot.lane.b32.xlu1 %v2879_v57, %s8368_s8  ;;  %v7678_v57 = vld [vmem:[%s13581_s0 + $0x154] sm:$0xf]  ;;  %v3007_v14 = vor.u32 %v3006_v59, %v3003_v39  ;;  %v3027_v18 = vrot.slane %v3025_v63, 4  ;;  %v3082_v24 = vshll.u32 %v7684_v61, 16  ;;  %v3086_v25 = vshrl.u32 %v7684_v61, 16 }
 0x1df   :  { %v2156_v56 = vpop.permute.xlu0 %2155  ;;  %v3034_v41 = vshll.u32 %v7678_v57, 16  ;;  %v3038_v5 = vshrl.u32 %v7678_v57, 16  ;;  %v2936_v43 = vrot.slane %v2935_v50, 4  ;;  %v3018_v1 = vrot.slane %v3017_v34, 4  ;;  %v7690_v46 = vld [vmem:[%s13581_s0 + $0x184] sm:$0xf] }
 0x1e0   :  { %2306 = vst.msk [vmem:[#allocation2 + $0xa8] sm:$0xf] %vm2263_vm9, %v2156_v56  ;;  %v2162_v10 = vpop.permute.xlu1 %2161  ;;  %v3030_v20 = vrot.slane %v3028_v0, 5  ;;  %v10754_v57 = vrot.slane %v3058_v6, 5  ;;  %v3106_v36 = vshll.u32 %v7687_v21, 16  ;;  %v3110_v38 = vshrl.u32 %v7687_v21, 16 }
 0x1e1   :  { %3264 = vrot.lane.b32.xlu0 %v2869_v48, %s8368_s8  ;;  %2309 = vst.msk [vmem:[#allocation2 + $0xb4] sm:$0xf] %vm2263_vm9, %v2162_v10  ;;  %v10708_v48 = vrot.slane %v2993_v29, 4  ;;  %v10719_v62 = vrot.slane %v3034_v41, 5  ;;  %v3040_v22 = vrot.slane %v3038_v5, 4  ;;  %v2941_v54 = vsel %vm8413_vm2, %v2936_v43, %v10639_v19 }
 0x1e2   :  { %3270 = vrot.lane.b32.xlu1 %v2903_v51, %s8368_s8  ;;  %v10710_v51 = vrot.slane %v2996_v12, 5  ;;  %v7680_v19 = vld [vmem:[%s13581_s0 + $0x15c] sm:$0xf]  ;;  %v2984_v10 = vrot.slane %v2983_v53, 4  ;;  %v3073_v29 = vshrl.u32 %v7683_v15, 16  ;;  %v3076_v12 = vshll.u32 %v7683_v15, 16 }
 0x1e3   :  { %v2160_v52 = vpop.permute.xlu0 %2159  ;;  %v3041_v16 = vor.u32 %v3040_v22, %v10719_v62  ;;  %v3049_v49 = vshrl.u32 %v7680_v19, 16  ;;  %v3052_v50 = vshll.u32 %v7680_v19, 16  ;;  %v3031_v5 = vor.u32 %v3030_v20, %v3027_v18  ;;  %v7688_v63 = vld [vmem:[%s13581_s0 + $0x17c] sm:$0x1]  ;;  %v7693_v15 = vld [vmem:[%s13581_s0 + $0x190] sm:$0xf] }
 0x1e4   :  { %2308 = vst.msk [vmem:[#allocation2 + $0xb0] sm:$0xf] %vm2263_vm9, %v2160_v52  ;;  %v2166_v32 = vpop.permute.xlu1 %2165  ;;  %v2999_v56 = vsel %vm8413_vm2, %v10708_v48, %v10710_v51  ;;  %v3064_v52 = vrot.slane %v3062_v8, 4  ;;  %v2989_v30 = vsel %vm8413_vm2, %v2984_v10, %v10669_v7  ;;  %v7686_v7 = vld [vmem:[%s13581_s0 + $0x174] sm:$0xf]  ;;  %v10771_v44 = vrot.slane %v3082_v24, 5 }
 0x1e5   :  { %3268 = vrot.lane.b32.xlu0 %v2893_v37, %s8368_s8  ;;  %2311 = vst.msk [vmem:[#allocation2 + $0xbc] sm:$0xf] %vm2263_vm9, %v2166_v32  ;;  %v3022_v37 = vrot.slane %v3020_v58, 5  ;;  %v3042_v40 = vrot.slane %v3041_v16, 4  ;;  %v3054_v43 = vrot.slane %v3052_v50, 5  ;;  %v3088_v31 = vrot.slane %v3086_v25, 4 }
 0x1e6   :  { %3274 = vrot.lane.b32.xlu1 %v2927_v17, %s8368_s8  ;;  %v3044_v17 = vshll.u32 %v7679_v28, 16  ;;  %v3065_v13 = vor.u32 %v3064_v52, %v10754_v57  ;;  %v3068_v48 = vshll.u32 %v7682_v35, 16  ;;  %v7685_v51 = vld [vmem:[%s13581_s0 + $0x170] sm:$0x1]  ;;  %v3075_v53 = vrot.slane %v3073_v29, 4 }
 0x1e7   :  { %v2164_v47 = vpop.permute.xlu0 %2163  ;;  %v3023_v32 = vsel %vm8413_vm2, %v3018_v1, %v3022_v37  ;;  %v10781_v58 = vrot.slane %v3106_v36, 5  ;;  %v3112_v39 = vrot.slane %v3110_v38, 4  ;;  %v3097_v59 = vshrl.u32 %v7686_v7, 16  ;;  %v7691_v25 = vld [vmem:[%s13581_s0 + $0x188] sm:$0x1] }
 0x1e8   :  { %2310 = vst.msk [vmem:[#allocation2 + $0xb8] sm:$0xf] %vm2263_vm9, %v2164_v47  ;;  %v2170_v55 = vpop.permute.xlu1 %2169  ;;  %v3046_v41 = vrot.slane %v3044_v17, 5  ;;  %v3100_v60 = vshll.u32 %v7686_v7, 16  ;;  %v3130_v0 = vshll.u32 %v7690_v46, 16  ;;  %v3066_v8 = vrot.slane %v3065_v13, 4 }
 0x1e9   :  { %3272 = vrot.lane.b32.xlu0 %v2917_v2, %s8368_s8  ;;  %2313 = vst.msk [vmem:[#allocation2 + $0xc4] sm:$0xf] %vm2263_vm9, %v2170_v55  ;;  %v3008_v2 = vrot.slane %v3007_v14, 4  ;;  %v3078_v55 = vrot.slane %v3076_v12, 5  ;;  %v3070_v19 = vrot.slane %v3068_v48, 5  ;;  %v3113_v10 = vor.u32 %v3112_v39, %v10781_v58 }
 0x1ea   :  { %3278 = vrot.lane.b32.xlu1 %v2951_v42, %s8368_s8  ;;  %v3051_v42 = vrot.slane %v3049_v49, 4  ;;  %v3116_v1 = vshll.u32 %v7688_v63, 16  ;;  %v3099_v37 = vrot.slane %v3097_v59, 4  ;;  %v3102_v14 = vrot.slane %v3100_v60, 5  ;;  %v7696_v38 = vld [vmem:[%s13581_s0 + $0x19c] sm:$0xf] }
 0x1eb   :  { %v2168_v3 = vpop.permute.xlu0 %2167  ;;  %v3013_v22 = vsel %vm8413_vm2, %v3008_v2, %v10692_v33  ;;  %v3047_v33 = vsel %vm8413_vm2, %v3042_v40, %v3046_v41  ;;  %v3079_v61 = vor.u32 %v3078_v55, %v3075_v53  ;;  %v10805_v16 = vrot.slane %v3130_v0, 5  ;;  %v7695_v53 = vld [vmem:[%s13581_s0 + $0x198] sm:$0xf]  ;;  %v7694_v39 = vld [vmem:[%s13581_s0 + $0x194] sm:$0x1] }
 0x1ec   :  { %2312 = vst.msk [vmem:[#allocation2 + $0xc0] sm:$0xf] %vm2263_vm9, %v2168_v3  ;;  %v2174_v9 = vpop.permute.xlu1 %2173  ;;  %v3055_v28 = vor.u32 %v3054_v43, %v3051_v42  ;;  %v3089_v3 = vor.u32 %v3088_v31, %v10771_v44  ;;  %v3071_v52 = vsel %vm8413_vm2, %v3066_v8, %v3070_v19  ;;  %v3154_v29 = vshll.u32 %v7693_v15, 16  ;;  %v7697_v8 = vld [vmem:[%s13581_s0 + $0x1a0] sm:$0x1] }
 0x1ed   :  { %3276 = vrot.lane.b32.xlu0 %v2941_v54, %s8368_s8  ;;  %2315 = vst.msk [vmem:[#allocation2 + $0xcc] sm:$0xf] %vm2263_vm9, %v2174_v9  ;;  %v3134_v54 = vshrl.u32 %v7690_v46, 16  ;;  %v3158_v12 = vshrl.u32 %v7693_v15, 16  ;;  %v3118_v35 = vrot.slane %v3116_v1, 5  ;;  %v3103_v36 = vor.u32 %v3102_v14, %v3099_v37 }
 0x1ee   :  { %3282 = vrot.lane.b32.xlu1 %v2975_v27, %s8368_s8  ;;  %v3032_v27 = vrot.slane %v3031_v5, 4  ;;  %v3056_v49 = vrot.slane %v3055_v28, 4  ;;  %v3090_v50 = vrot.slane %v3089_v3, 4  ;;  %v3140_v40 = vshll.u32 %v7691_v25, 16 }
 0x1ef   :  { %v2172_v11 = vpop.permute.xlu0 %2171  ;;  %v3136_v17 = vrot.slane %v3134_v54, 4  ;;  %v3160_v13 = vrot.slane %v3158_v12, 4  ;;  %v3178_v48 = vshll.u32 %v7696_v38, 16  ;;  %v3104_v59 = vrot.slane %v3103_v36, 4 }
 0x1f0   :  { %2314 = vst.msk [vmem:[#allocation2 + $0xc8] sm:$0xf] %vm2263_vm9, %v2172_v11  ;;  %v2178_v45 = vpop.permute.xlu1 %2177  ;;  %v3037_v21 = vsel %vm8413_vm2, %v3032_v27, %v10719_v62  ;;  %v3061_v7 = vsel %vm8413_vm2, %v3056_v49, %v10754_v57  ;;  %v3172_v27 = vshll.u32 %v7695_v53, 16 }
 0x1f1   :  { %3280 = vrot.lane.b32.xlu0 %v2965_v4, %s8368_s8  ;;  %2317 = vst.msk [vmem:[#allocation2 + $0xd4] sm:$0xf] %vm2263_vm9, %v2178_v45  ;;  %v3092_v4 = vshll.u32 %v7685_v51, 16  ;;  %v7692_v45 = vld [vmem:[%s13581_s0 + $0x18c] sm:$0xf]  ;;  %v3137_v2 = vor.u32 %v3136_v17, %v10805_v16  ;;  %v3182_v51 = vshrl.u32 %v7696_v38, 16  ;;  %v3109_v19 = vsel %vm8413_vm2, %v3104_v59, %v10781_v58 }
 0x1f2   :  { %3286 = vrot.lane.b32.xlu1 %v2999_v56, %s8368_s8  ;;  %v7689_v56 = vld [vmem:[%s13581_s0 + $0x180] sm:$0xf]  ;;  %v3145_v43 = vshrl.u32 %v7692_v45, 16  ;;  %v3148_v31 = vshll.u32 %v7692_v45, 16  ;;  %v3174_v37 = vrot.slane %v3172_v27, 5 }
 0x1f3   :  { %v2176_v47 = vpop.permute.xlu0 %2175  ;;  %v3121_v18 = vshrl.u32 %v7689_v56, 16  ;;  %v3124_v20 = vshll.u32 %v7689_v56, 16  ;;  %v3094_v24 = vrot.slane %v3092_v4, 5  ;;  %v3138_v60 = vrot.slane %v3137_v2, 4  ;;  %v7699_v58 = vld [vmem:[%s13581_s0 + $0x10] sm:$0xf] }
 0x1f4   :  { %2316 = vst.msk [vmem:[#allocation2 + $0xd0] sm:$0xf] %vm2263_vm9, %v2176_v47  ;;  %v2182_v34 = vpop.permute.xlu1 %2181  ;;  %v10832_v47 = vrot.slane %v3154_v29, 5  ;;  %v3147_v0 = vrot.slane %v3145_v43, 4  ;;  %v3150_v54 = vrot.slane %v3148_v31, 5  ;;  %v3164_v4 = vshll.u32 %v7694_v39, 16 }
 0x1f5   :  { %3284 = vrot.lane.b32.xlu0 %v2989_v30, %s8368_s8  ;;  %2319 = vst.msk [vmem:[#allocation2 + $0xdc] sm:$0xf] %vm2263_vm9, %v2182_v34  ;;  %v3080_v30 = vrot.slane %v3079_v61, 4  ;;  %v3123_v41 = vrot.slane %v3121_v18, 4  ;;  %v3126_v5 = vrot.slane %v3124_v20, 5  ;;  %v3095_v42 = vsel %vm8413_vm2, %v3090_v50, %v3094_v24 }
 0x1f6   :  { %3290 = vrot.lane.b32.xlu1 %v3023_v32, %s8368_s8  ;;  %v3114_v32 = vrot.slane %v3113_v10, 4  ;;  %v3161_v3 = vor.u32 %v3160_v13, %v10832_v47  ;;  %v10850_v56 = vrot.slane %v3178_v48, 5  ;;  %v3151_v10 = vor.u32 %v3150_v54, %v3147_v0  ;;  %v7704_v54 = vld [vmem:[%s13581_s0 + $0x24] sm:$0xe] }
 0x1f7   :  { %v2180_v6 = vpop.permute.xlu0 %2179  ;;  %v3085_v57 = vsel %vm8413_vm2, %v3080_v30, %v10771_v44  ;;  %v3127_v63 = vor.u32 %v3126_v5, %v3123_v41  ;;  %v3169_v44 = vshrl.u32 %v7695_v53, 16  ;;  %v3166_v17 = vrot.slane %v3164_v4, 5 }
 0x1f8   :  { %2318 = vst.msk [vmem:[#allocation2 + $0xd8] sm:$0xf] %vm2263_vm9, %v2180_v6  ;;  %v2186_v9 = vpop.permute.xlu1 %2185  ;;  %v3119_v34 = vsel %vm8413_vm2, %v3114_v32, %v3118_v35  ;;  %v3184_v6 = vrot.slane %v3182_v51, 4  ;;  %v3162_v15 = vrot.slane %v3161_v3, 4  ;;  %v3188_v20 = vshll.u32 %v7697_v8, 16 }
 0x1f9   :  { %3288 = vrot.lane.b32.xlu0 %v3013_v22, %s8368_s8  ;;  %2321 = vst.msk [vmem:[#allocation2 + $0xe4] sm:$0xf] %vm2263_vm9, %v2186_v9  ;;  %v3142_v22 = vrot.slane %v3140_v40, 5  ;;  %v3128_v9 = vrot.slane %v3127_v63, 4  ;;  %v3171_v1 = vrot.slane %v3169_v44, 4  ;;  %v3152_v50 = vrot.slane %v3151_v10, 4 }
 0x1fa   :  { %3294 = vrot.lane.b32.xlu1 %v3047_v33, %s8368_s8  ;;  %v3185_v18 = vor.u32 %v3184_v6, %v10850_v56  ;;  %v3190_v29 = vrot.slane %v3188_v20, 5  ;;  %v3643_v12 = vrot.slane %v7699_v58, 5  ;;  %v7698_v40 = vld [vmem:[%s13581_s0 + $0xc] sm:$0xe]  ;;  %v7701_v51 = vld [vmem:[%s13581_s0 + $0x18] sm:$0xe] }
 0x1fb   :  { %v2184_v11 = vpop.permute.xlu0 %2183  ;;  %v3143_v61 = vsel %vm8413_vm2, %v3138_v60, %v3142_v22  ;;  %v3133_v49 = vsel %vm8413_vm2, %v3128_v9, %v10805_v16  ;;  %v3175_v24 = vor.u32 %v3174_v37, %v3171_v1  ;;  %v7702_v16 = vld [vmem:[%s13581_s0 + $0x1c] sm:$0xf]  ;;  %v3157_v30 = vsel %vm8413_vm2, %v3152_v50, %v10832_v47  ;;  %v7711_v3 = vld [vmem:[%s13581_s0 + $0x40] sm:$0xf]  ;;  %v7712_v1 = vld [vmem:[%s13581_s0 + $0x44] sm:$0x1] }
 0x1fc   :  { %2320 = vst.msk [vmem:[#allocation2 + $0xe0] sm:$0xf] %vm2263_vm9, %v2184_v11  ;;  %v2190_v62 = vpop.permute.xlu1 %2189  ;;  %v3167_v11 = vsel %vm8413_vm2, %v3162_v15, %v3166_v17  ;;  %v3645_v38 = vrot.slane %v3643_v12, 4  ;;  %v3650_v41 = vrot.slane %v7702_v16, 5  ;;  %v7794_v31 = vrot.slane %v7698_v40, 9 }
 0x1fd   :  { %3292 = vrot.lane.b32.xlu0 %v3037_v21, %s8368_s8  ;;  %2323 = vst.msk [vmem:[#allocation2 + $0xec] sm:$0xf] %vm2263_vm9, %v2190_v62  ;;  %v7700_v62 = vld [vmem:[%s13581_s0 + $0x14] sm:$0x1]  ;;  %v3176_v32 = vrot.slane %v3175_v24, 4  ;;  %v7795_v59 = vrot.slane %v7701_v51, 9 }
 0x1fe   :  { %3298 = vrot.lane.b32.xlu1 %v3071_v52, %s8368_s8  ;;  %v3186_v52 = vrot.slane %v3185_v18, 4  ;;  %v3646_v2 = vrot.slane %v7700_v62, 5  ;;  %v3652_v13 = vrot.slane %v3650_v41, 4  ;;  %v3644_v39 = vsel %vm9101_vm7, %v7794_v31, %v3643_v12  ;;  %v7714_v37 = vld [vmem:[%s13581_s0 + $0x4c] sm:$0xf] }
 0x1ff   :  { %v2188_v46 = vpop.permute.xlu0 %2187  ;;  %v3181_v43 = vsel %vm8413_vm2, %v3176_v32, %v10850_v56  ;;  %v3651_v4 = vsel %vm9101_vm7, %v7795_v59, %v3650_v41  ;;  %v7796_v56 = vrot.slane %v7704_v54, 9  ;;  %v3671_v9 = vrot.slane %v7711_v3, 5  ;;  %v7710_v58 = vld [vmem:[%s13581_s0 + $0x3c] sm:$0xe]  ;;  %v7715_v24 = vld [vmem:[%s13581_s0 + $0x50] sm:$0x1] }
 0x200   :  { %2322 = vst.msk [vmem:[#allocation2 + $0xe8] sm:$0xf] %vm2263_vm9, %v2188_v46  ;;  %v2194_v55 = vpop.permute.xlu1 %2193  ;;  %v3191_v36 = vsel %vm8413_vm2, %v3186_v52, %v3190_v29  ;;  %v3647_v47 = vsel %vm9101_vm7, %v3645_v38, %v3646_v2  ;;  %v7798_v52 = vrot.slane %v7710_v58, 9  ;;  %v3681_v62 = vrot.slane %v7715_v24, 5  ;;  %v7713_v16 = vld [vmem:[%s13581_s0 + $0x48] sm:$0xe] }
 0x201   :  { %3296 = vrot.lane.b32.xlu0 %v3061_v7, %s8368_s8  ;;  %2325 = vst.msk [vmem:[#allocation2 + $0xf4] sm:$0xf] %vm2263_vm9, %v2194_v55  ;;  %v7703_v7 = vld [vmem:[%s13581_s0 + $0x20] sm:$0x1]  ;;  %v3673_v20 = vrot.slane %v3671_v9, 4  ;;  %v7799_v2 = vrot.slane %v7713_v16, 9 }
 0x202   :  { %3302 = vrot.lane.b32.xlu1 %v3095_v42, %s8368_s8  ;;  %v7705_v42 = vld [vmem:[%s13581_s0 + $0x28] sm:$0xf]  ;;  %v3653_v48 = vrot.slane %v7703_v7, 5  ;;  %v3672_v38 = vsel %vm9101_vm7, %v7798_v52, %v3671_v9  ;;  %v7722_v3 = vld [vmem:[%s13581_s0 + $0x6c] sm:$0xe] }
 0x203   :  { %v2192_v28 = vpop.permute.xlu0 %2191  ;;  %v3657_v53 = vrot.slane %v7705_v42, 5  ;;  %v7716_v42 = vld [vmem:[%s13581_s0 + $0x54] sm:$0xe] }
 0x204   :  { %2324 = vst.msk [vmem:[#allocation2 + $0xf0] sm:$0xf] %vm2263_vm9, %v2192_v28  ;;  %v2198_v33 = vpop.permute.xlu1 %2197  ;;  %v3654_v22 = vsel %vm9101_vm7, %v3652_v13, %v3653_v48  ;;  %v7709_v28 = vld [vmem:[%s13581_s0 + $0x38] sm:$0x1]  ;;  %v7800_v48 = vrot.slane %v7716_v42, 9 }
 0x205   :  { %3300 = vrot.lane.b32.xlu0 %v3085_v57, %s8368_s8  ;;  %2327 = vst.msk [vmem:[#allocation2 + $0xfc] sm:$0xf] %vm2263_vm9, %v2198_v33  ;;  %v7706_v57 = vld [vmem:[%s13581_s0 + $0x2c] sm:$0x1]  ;;  %v3659_v63 = vrot.slane %v3657_v53, 4 }
 0x206   :  { %3306 = vrot.lane.b32.xlu1 %v3119_v34, %s8368_s8  ;;  %v7708_v34 = vld [vmem:[%s13581_s0 + $0x34] sm:$0xf]  ;;  %v3660_v0 = vrot.slane %v7706_v57, 5 }
 0x207   :  { %v2196_v14 = vpop.permute.xlu0 %2195  ;;  %v3664_v44 = vrot.slane %v7708_v34, 5  ;;  %v7719_v34 = vld [vmem:[%s13581_s0 + $0x60] sm:$0xe] }
 0x208   :  { %2326 = vst.msk [vmem:[#allocation2 + $0xf8] sm:$0xf] %vm2263_vm9, %v2196_v14  ;;  %v3195_v21 = vpop.permute.xlu1 %3194  ;;  %v3661_v33 = vsel %vm9101_vm7, %v3659_v63, %v3660_v0  ;;  %v3658_v14 = vsel %vm9101_vm7, %v7796_v56, %v3657_v53  ;;  %v7801_v0 = vrot.slane %v7719_v34, 9 }
 0x209   :  { %3304 = vrot.lane.b32.xlu0 %v3109_v19, %s8368_s8  ;;  %3386 = vst.msk [vmem:[#allocation2 + $0x4] sm:$0xf] %vm3384_vm10, %v3195_v21  ;;  %v3666_v8 = vrot.slane %v3664_v44, 4  ;;  %v3667_v19 = vrot.slane %v7709_v28, 5  ;;  %v3674_v21 = vrot.slane %v7712_v1, 5 }
 0x20a   :  { %3310 = vrot.lane.b32.xlu1 %v3143_v61, %s8368_s8  ;;  %v7707_v61 = vld [vmem:[%s13581_s0 + $0x30] sm:$0xe] }
 0x20b   :  { %v3193_v25 = vpop.permute.xlu0 %3192  ;;  %v7797_v15 = vrot.slane %v7707_v61, 9  ;;  %v3668_v18 = vsel %vm9101_vm7, %v3666_v8, %v3667_v19  ;;  %v3675_v12 = vsel %vm9101_vm7, %v3673_v20, %v3674_v21  ;;  %v7802_v19 = vrot.slane %v7722_v3, 9 }
 0x20c   :  { %3385 = vst.msk [vmem:[#allocation2] sm:$0xf] %vm3384_vm10, %v3193_v25  ;;  %v3199_v45 = vpop.permute.xlu1 %3198  ;;  %v7717_v25 = vld [vmem:[%s13581_s0 + $0x58] sm:$0xf] }
 0x20d   :  { %3308 = vrot.lane.b32.xlu0 %v3133_v49, %s8368_s8  ;;  %3388 = vst.msk [vmem:[#allocation2 + $0xc] sm:$0xf] %vm3384_vm10, %v3199_v45  ;;  %v3678_v49 = vrot.slane %v7714_v37, 5  ;;  %v7725_v37 = vld [vmem:[%s13581_s0 + $0x78] sm:$0xe] }
 0x20e   :  { %3314 = vrot.lane.b32.xlu1 %v3167_v11, %s8368_s8  ;;  %v3665_v11 = vsel %vm9101_vm7, %v7797_v15, %v3664_v44  ;;  %v7803_v21 = vrot.slane %v7725_v37, 9 }
 0x20f   :  { %v3197_v35 = vpop.permute.xlu0 %3196  ;;  %v3680_v45 = vrot.slane %v3678_v49, 4  ;;  %v3679_v13 = vsel %vm9101_vm7, %v7799_v2, %v3678_v49 }
 0x210   :  { %3387 = vst.msk [vmem:[#allocation2 + $0x8] sm:$0xf] %vm3384_vm10, %v3197_v35  ;;  %v3203_v5 = vpop.permute.xlu1 %3202  ;;  %v7718_v35 = vld [vmem:[%s13581_s0 + $0x5c] sm:$0x1] }
 0x211   :  { %3312 = vrot.lane.b32.xlu0 %v3157_v30, %s8368_s8  ;;  %3390 = vst.msk [vmem:[#allocation2 + $0x14] sm:$0xf] %vm3384_vm10, %v3203_v5  ;;  %v3685_v30 = vrot.slane %v7717_v25, 5  ;;  %v3682_v41 = vsel %vm9101_vm7, %v3680_v45, %v3681_v62  ;;  %v3688_v7 = vrot.slane %v7718_v35, 5  ;;  %v7728_v25 = vld [vmem:[%s13581_s0 + $0x84] sm:$0xe] }
 0x212   :  { %3318 = vrot.lane.b32.xlu1 %v3191_v36, %s8368_s8  ;;  %v7720_v36 = vld [vmem:[%s13581_s0 + $0x64] sm:$0xf]  ;;  %v7804_v62 = vrot.slane %v7728_v25, 9 }
 0x213   :  { %v3201_v46 = vpop.permute.xlu0 %3200  ;;  %v3687_v5 = vrot.slane %v3685_v30, 4  ;;  %v3686_v63 = vsel %vm9101_vm7, %v7800_v48, %v3685_v30 }
 0x214   :  { %3389 = vst.msk [vmem:[#allocation2 + $0x10] sm:$0xf] %vm3384_vm10, %v3201_v46  ;;  %v3207_v55 = vpop.permute.xlu1 %3206  ;;  %v7721_v46 = vld [vmem:[%s13581_s0 + $0x68] sm:$0x1] }
 0x215   :  { %3316 = vrot.lane.b32.xlu0 %v3181_v43, %s8368_s8  ;;  %3392 = vst.msk [vmem:[#allocation2 + $0x1c] sm:$0xf] %vm3384_vm10, %v3207_v55  ;;  %v3692_v43 = vrot.slane %v7720_v36, 5  ;;  %v3689_v53 = vsel %vm9101_vm7, %v3687_v5, %v3688_v7  ;;  %v3695_v57 = vrot.slane %v7721_v46, 5  ;;  %v7731_v36 = vld [vmem:[%s13581_s0 + $0x90] sm:$0xe] }
 0x216   :  { %3867 = vrot.lane.b32.xlu1 %v3647_v47, %s8369_s22  ;;  %v7723_v47 = vld [vmem:[%s13581_s0 + $0x70] sm:$0xf]  ;;  %v7805_v7 = vrot.slane %v7731_v36, 9 }
 0x217   :  { %v3205_v60 = vpop.permute.xlu0 %3204  ;;  %v3694_v55 = vrot.slane %v3692_v43, 4  ;;  %v3693_v8 = vsel %vm9101_vm7, %v7801_v0, %v3692_v43 }
 0x218   :  { %3391 = vst.msk [vmem:[#allocation2 + $0x18] sm:$0xf] %vm3384_vm10, %v3205_v60  ;;  %v3211_v27 = vpop.permute.xlu1 %3210  ;;  %v7724_v60 = vld [vmem:[%s13581_s0 + $0x74] sm:$0x1] }
 0x219   :  { %3865 = vrot.lane.b32.xlu0 %v3644_v39, %s8369_s22  ;;  %3394 = vst.msk [vmem:[#allocation2 + $0x24] sm:$0xf] %vm3384_vm10, %v3211_v27  ;;  %v3699_v39 = vrot.slane %v7723_v47, 5  ;;  %v3696_v44 = vsel %vm9101_vm7, %v3694_v55, %v3695_v57  ;;  %v3702_v28 = vrot.slane %v7724_v60, 5  ;;  %v7734_v47 = vld [vmem:[%s13581_s0 + $0x9c] sm:$0xe] }
 0x21a   :  { %3871 = vrot.lane.b32.xlu1 %v3654_v22, %s8369_s22  ;;  %v7726_v22 = vld [vmem:[%s13581_s0 + $0x7c] sm:$0xf]  ;;  %v7806_v57 = vrot.slane %v7734_v47, 9 }
 0x21b   :  { %v3209_v6 = vpop.permute.xlu0 %3208  ;;  %v3701_v27 = vrot.slane %v3699_v39, 4  ;;  %v3700_v20 = vsel %vm9101_vm7, %v7802_v19, %v3699_v39 }
 0x21c   :  { %3393 = vst.msk [vmem:[#allocation2 + $0x20] sm:$0xf] %vm3384_vm10, %v3209_v6  ;;  %v3215_v10 = vpop.permute.xlu1 %3214  ;;  %v7727_v6 = vld [vmem:[%s13581_s0 + $0x80] sm:$0x1] }
 0x21d   :  { %3869 = vrot.lane.b32.xlu0 %v3651_v4, %s8369_s22  ;;  %3396 = vst.msk [vmem:[#allocation2 + $0x2c] sm:$0xf] %vm3384_vm10, %v3215_v10  ;;  %v3706_v4 = vrot.slane %v7726_v22, 5  ;;  %v3703_v9 = vsel %vm9101_vm7, %v3701_v27, %v3702_v28  ;;  %v3709_v1 = vrot.slane %v7727_v6, 5  ;;  %v7737_v22 = vld [vmem:[%s13581_s0 + $0xa8] sm:$0xe] }
 0x21e   :  { %3875 = vrot.lane.b32.xlu1 %v3661_v33, %s8369_s22  ;;  %v7729_v33 = vld [vmem:[%s13581_s0 + $0x88] sm:$0xf]  ;;  %v7807_v28 = vrot.slane %v7737_v22, 9 }
 0x21f   :  { %v3213_v17 = vpop.permute.xlu0 %3212  ;;  %v3708_v10 = vrot.slane %v3706_v4, 4  ;;  %v3707_v45 = vsel %vm9101_vm7, %v7803_v21, %v3706_v4 }
 0x220   :  { %3395 = vst.msk [vmem:[#allocation2 + $0x28] sm:$0xf] %vm3384_vm10, %v3213_v17  ;;  %v3219_v50 = vpop.permute.xlu1 %3218  ;;  %v7730_v17 = vld [vmem:[%s13581_s0 + $0x8c] sm:$0x1] }
 0x221   :  { %3873 = vrot.lane.b32.xlu0 %v3658_v14, %s8369_s22  ;;  %3398 = vst.msk [vmem:[#allocation2 + $0x34] sm:$0xf] %vm3384_vm10, %v3219_v50  ;;  %v3713_v14 = vrot.slane %v7729_v33, 5  ;;  %v3710_v49 = vsel %vm9101_vm7, %v3708_v10, %v3709_v1  ;;  %v3716_v24 = vrot.slane %v7730_v17, 5  ;;  %v7740_v33 = vld [vmem:[%s13581_s0 + $0xb4] sm:$0xe] }
 0x222   :  { %3879 = vrot.lane.b32.xlu1 %v3668_v18, %s8369_s22  ;;  %v7732_v18 = vld [vmem:[%s13581_s0 + $0x94] sm:$0xf]  ;;  %v7808_v1 = vrot.slane %v7740_v33, 9 }
 0x223   :  { %v3217_v29 = vpop.permute.xlu0 %3216  ;;  %v3715_v50 = vrot.slane %v3713_v14, 4  ;;  %v3714_v5 = vsel %vm9101_vm7, %v7804_v62, %v3713_v14 }
 0x224   :  { %3397 = vst.msk [vmem:[#allocation2 + $0x30] sm:$0xf] %vm3384_vm10, %v3217_v29  ;;  %v3223_v32 = vpop.permute.xlu1 %3222  ;;  %v7733_v29 = vld [vmem:[%s13581_s0 + $0x98] sm:$0x1] }
 0x225   :  { %3877 = vrot.lane.b32.xlu0 %v3665_v11, %s8369_s22  ;;  %3400 = vst.msk [vmem:[#allocation2 + $0x3c] sm:$0xf] %vm3384_vm10, %v3223_v32  ;;  %v3720_v11 = vrot.slane %v7732_v18, 5  ;;  %v3717_v30 = vsel %vm9101_vm7, %v3715_v50, %v3716_v24  ;;  %v3723_v35 = vrot.slane %v7733_v29, 5  ;;  %v7743_v18 = vld [vmem:[%s13581_s0 + $0xc0] sm:$0xe] }
 0x226   :  { %3883 = vrot.lane.b32.xlu1 %v3675_v12, %s8369_s22  ;;  %v7735_v12 = vld [vmem:[%s13581_s0 + $0xa0] sm:$0xf]  ;;  %v7809_v24 = vrot.slane %v7743_v18, 9 }
 0x227   :  { %v3221_v40 = vpop.permute.xlu0 %3220  ;;  %v3722_v32 = vrot.slane %v3720_v11, 4  ;;  %v3721_v55 = vsel %vm9101_vm7, %v7805_v7, %v3720_v11 }
 0x228   :  { %3399 = vst.msk [vmem:[#allocation2 + $0x38] sm:$0xf] %vm3384_vm10, %v3221_v40  ;;  %v3227_v31 = vpop.permute.xlu1 %3226  ;;  %v7736_v40 = vld [vmem:[%s13581_s0 + $0xa4] sm:$0x1] }
 0x229   :  { %3881 = vrot.lane.b32.xlu0 %v3672_v38, %s8369_s22  ;;  %3402 = vst.msk [vmem:[#allocation2 + $0x44] sm:$0xf] %vm3384_vm10, %v3227_v31  ;;  %v3727_v38 = vrot.slane %v7735_v12, 5  ;;  %v3724_v43 = vsel %vm9101_vm7, %v3722_v32, %v3723_v35  ;;  %v3730_v46 = vrot.slane %v7736_v40, 5  ;;  %v7746_v12 = vld [vmem:[%s13581_s0 + $0xe4] sm:$0xe] }
 0x22a   :  { %3887 = vrot.lane.b32.xlu1 %v3682_v41, %s8369_s22  ;;  %v7738_v41 = vld [vmem:[%s13581_s0 + $0xac] sm:$0xf]  ;;  %v7810_v35 = vrot.slane %v7746_v12, 9 }
 0x22b   :  { %v3225_v51 = vpop.permute.xlu0 %3224  ;;  %v3729_v31 = vrot.slane %v3727_v38, 4  ;;  %v3728_v27 = vsel %vm9101_vm7, %v7806_v57, %v3727_v38 }
 0x22c   :  { %3401 = vst.msk [vmem:[#allocation2 + $0x40] sm:$0xf] %vm3384_vm10, %v3225_v51  ;;  %v3231_v59 = vpop.permute.xlu1 %3230  ;;  %v7739_v51 = vld [vmem:[%s13581_s0 + $0xb0] sm:$0x1] }
 0x22d   :  { %3885 = vrot.lane.b32.xlu0 %v3679_v13, %s8369_s22  ;;  %3404 = vst.msk [vmem:[#allocation2 + $0x4c] sm:$0xf] %vm3384_vm10, %v3231_v59  ;;  %v3734_v13 = vrot.slane %v7738_v41, 5  ;;  %v3731_v39 = vsel %vm9101_vm7, %v3729_v31, %v3730_v46  ;;  %v3737_v60 = vrot.slane %v7739_v51, 5  ;;  %v7749_v41 = vld [vmem:[%s13581_s0 + $0xf0] sm:$0xe] }
 0x22e   :  { %3891 = vrot.lane.b32.xlu1 %v3689_v53, %s8369_s22  ;;  %v7741_v53 = vld [vmem:[%s13581_s0 + $0xb8] sm:$0xf]  ;;  %v7811_v46 = vrot.slane %v7749_v41, 9 }
 0x22f   :  { %v3229_v54 = vpop.permute.xlu0 %3228  ;;  %v3736_v59 = vrot.slane %v3734_v13, 4  ;;  %v3735_v10 = vsel %vm9101_vm7, %v7807_v28, %v3734_v13 }
 0x230   :  { %3403 = vst.msk [vmem:[#allocation2 + $0x48] sm:$0xf] %vm3384_vm10, %v3229_v54  ;;  %v3235_v56 = vpop.permute.xlu1 %3234  ;;  %v7742_v54 = vld [vmem:[%s13581_s0 + $0xbc] sm:$0x1] }
 0x231   :  { %3889 = vrot.lane.b32.xlu0 %v3686_v63, %s8369_s22  ;;  %3406 = vst.msk [vmem:[#allocation2 + $0x54] sm:$0xf] %vm3384_vm10, %v3235_v56  ;;  %v3741_v63 = vrot.slane %v7741_v53, 5  ;;  %v3738_v4 = vsel %vm9101_vm7, %v3736_v59, %v3737_v60  ;;  %v3744_v6 = vrot.slane %v7742_v54, 5  ;;  %v7752_v53 = vld [vmem:[%s13581_s0 + $0xfc] sm:$0xe] }
 0x232   :  { %3895 = vrot.lane.b32.xlu1 %v3696_v44, %s8369_s22  ;;  %v7744_v44 = vld [vmem:[%s13581_s0 + $0xc4] sm:$0xf]  ;;  %v7812_v60 = vrot.slane %v7752_v53, 9 }
 0x233   :  { %v3233_v61 = vpop.permute.xlu0 %3232  ;;  %v3743_v56 = vrot.slane %v3741_v63, 4  ;;  %v3742_v50 = vsel %vm9101_vm7, %v7808_v1, %v3741_v63 }
 0x234   :  { %3405 = vst.msk [vmem:[#allocation2 + $0x50] sm:$0xf] %vm3384_vm10, %v3233_v61  ;;  %v3239_v15 = vpop.permute.xlu1 %3238  ;;  %v7745_v61 = vld [vmem:[%s13581_s0 + $0xc8] sm:$0x1] }
 0x235   :  { %3893 = vrot.lane.b32.xlu0 %v3693_v8, %s8369_s22  ;;  %3408 = vst.msk [vmem:[#allocation2 + $0x5c] sm:$0xf] %vm3384_vm10, %v3239_v15  ;;  %v3748_v8 = vrot.slane %v7744_v44, 5  ;;  %v3745_v14 = vsel %vm9101_vm7, %v3743_v56, %v3744_v6  ;;  %v3751_v17 = vrot.slane %v7745_v61, 5  ;;  %v7755_v44 = vld [vmem:[%s13581_s0 + $0x108] sm:$0xe] }
 0x236   :  { %3899 = vrot.lane.b32.xlu1 %v3703_v9, %s8369_s22  ;;  %v7747_v9 = vld [vmem:[%s13581_s0 + $0xe8] sm:$0xf]  ;;  %v7813_v6 = vrot.slane %v7755_v44, 9 }
 0x237   :  { %v3237_v58 = vpop.permute.xlu0 %3236  ;;  %v3750_v15 = vrot.slane %v3748_v8, 4  ;;  %v3749_v32 = vsel %vm9101_vm7, %v7809_v24, %v3748_v8 }
 0x238   :  { %3407 = vst.msk [vmem:[#allocation2 + $0x58] sm:$0xf] %vm3384_vm10, %v3237_v58  ;;  %v3243_v52 = vpop.permute.xlu1 %3242  ;;  %v7748_v58 = vld [vmem:[%s13581_s0 + $0xec] sm:$0x1] }
 0x239   :  { %3897 = vrot.lane.b32.xlu0 %v3700_v20, %s8369_s22  ;;  %3410 = vst.msk [vmem:[#allocation2 + $0x64] sm:$0xf] %vm3384_vm10, %v3243_v52  ;;  %v3755_v20 = vrot.slane %v7747_v9, 5  ;;  %v3752_v11 = vsel %vm9101_vm7, %v3750_v15, %v3751_v17  ;;  %v3758_v29 = vrot.slane %v7748_v58, 5  ;;  %v7758_v9 = vld [vmem:[%s13581_s0 + $0x114] sm:$0xe] }
 0x23a   :  { %3903 = vrot.lane.b32.xlu1 %v3710_v49, %s8369_s22  ;;  %v7750_v49 = vld [vmem:[%s13581_s0 + $0xf4] sm:$0xf]  ;;  %v7814_v17 = vrot.slane %v7758_v9, 9 }
 0x23b   :  { %v3241_v16 = vpop.permute.xlu0 %3240  ;;  %v3757_v52 = vrot.slane %v3755_v20, 4  ;;  %v3756_v31 = vsel %vm9101_vm7, %v7810_v35, %v3755_v20 }
 0x23c   :  { %3409 = vst.msk [vmem:[#allocation2 + $0x60] sm:$0xf] %vm3384_vm10, %v3241_v16  ;;  %v3247_v2 = vpop.permute.xlu1 %3246  ;;  %v7751_v16 = vld [vmem:[%s13581_s0 + $0xf8] sm:$0x1] }
 0x23d   :  { %3901 = vrot.lane.b32.xlu0 %v3707_v45, %s8369_s22  ;;  %3412 = vst.msk [vmem:[#allocation2 + $0x6c] sm:$0xf] %vm3384_vm10, %v3247_v2  ;;  %v3762_v45 = vrot.slane %v7750_v49, 5  ;;  %v3759_v38 = vsel %vm9101_vm7, %v3757_v52, %v3758_v29  ;;  %v3765_v40 = vrot.slane %v7751_v16, 5  ;;  %v7761_v49 = vld [vmem:[%s13581_s0 + $0x120] sm:$0xe] }
 0x23e   :  { %3907 = vrot.lane.b32.xlu1 %v3717_v30, %s8369_s22  ;;  %v7753_v30 = vld [vmem:[%s13581_s0 + $0x100] sm:$0xf]  ;;  %v7815_v29 = vrot.slane %v7761_v49, 9 }
 0x23f   :  { %v3245_v42 = vpop.permute.xlu0 %3244  ;;  %v3764_v2 = vrot.slane %v3762_v45, 4  ;;  %v3763_v59 = vsel %vm9101_vm7, %v7811_v46, %v3762_v45 }
 0x240   :  { %3411 = vst.msk [vmem:[#allocation2 + $0x68] sm:$0xf] %vm3384_vm10, %v3245_v42  ;;  %v3251_v48 = vpop.permute.xlu1 %3250  ;;  %v7754_v42 = vld [vmem:[%s13581_s0 + $0x104] sm:$0x1] }
 0x241   :  { %3905 = vrot.lane.b32.xlu0 %v3714_v5, %s8369_s22  ;;  %3414 = vst.msk [vmem:[#allocation2 + $0x74] sm:$0xf] %vm3384_vm10, %v3251_v48  ;;  %v3769_v5 = vrot.slane %v7753_v30, 5  ;;  %v3766_v13 = vsel %vm9101_vm7, %v3764_v2, %v3765_v40  ;;  %v3772_v51 = vrot.slane %v7754_v42, 5  ;;  %v7764_v30 = vld [vmem:[%s13581_s0 + $0x12c] sm:$0xe] }
 0x242   :  { %3911 = vrot.lane.b32.xlu1 %v3724_v43, %s8369_s22  ;;  %v7756_v43 = vld [vmem:[%s13581_s0 + $0x10c] sm:$0xf]  ;;  %v7816_v40 = vrot.slane %v7764_v30, 9 }
 0x243   :  { %v3249_v34 = vpop.permute.xlu0 %3248  ;;  %v3771_v48 = vrot.slane %v3769_v5, 4  ;;  %v3770_v56 = vsel %vm9101_vm7, %v7812_v60, %v3769_v5 }
 0x244   :  { %3413 = vst.msk [vmem:[#allocation2 + $0x70] sm:$0xf] %vm3384_vm10, %v3249_v34  ;;  %v3255_v0 = vpop.permute.xlu1 %3254  ;;  %v7757_v34 = vld [vmem:[%s13581_s0 + $0x110] sm:$0x1] }
 0x245   :  { %3909 = vrot.lane.b32.xlu0 %v3721_v55, %s8369_s22  ;;  %3416 = vst.msk [vmem:[#allocation2 + $0x7c] sm:$0xf] %vm3384_vm10, %v3255_v0  ;;  %v3776_v55 = vrot.slane %v7756_v43, 5  ;;  %v3773_v63 = vsel %vm9101_vm7, %v3771_v48, %v3772_v51  ;;  %v3779_v54 = vrot.slane %v7757_v34, 5  ;;  %v7767_v43 = vld [vmem:[%s13581_s0 + $0x138] sm:$0xe] }
 0x246   :  { %3915 = vrot.lane.b32.xlu1 %v3731_v39, %s8369_s22  ;;  %v7759_v39 = vld [vmem:[%s13581_s0 + $0x118] sm:$0xf]  ;;  %v7817_v51 = vrot.slane %v7767_v43, 9 }
 0x247   :  { %v3253_v3 = vpop.permute.xlu0 %3252  ;;  %v3778_v0 = vrot.slane %v3776_v55, 4  ;;  %v3777_v15 = vsel %vm9101_vm7, %v7813_v6, %v3776_v55 }
 0x248   :  { %3415 = vst.msk [vmem:[#allocation2 + $0x78] sm:$0xf] %vm3384_vm10, %v3253_v3  ;;  %v3259_v19 = vpop.permute.xlu1 %3258  ;;  %v7760_v3 = vld [vmem:[%s13581_s0 + $0x11c] sm:$0x1] }
 0x249   :  { %3913 = vrot.lane.b32.xlu0 %v3728_v27, %s8369_s22  ;;  %3418 = vst.msk [vmem:[#allocation2 + $0x84] sm:$0xf] %vm3384_vm10, %v3259_v19  ;;  %v3783_v27 = vrot.slane %v7759_v39, 5  ;;  %v3780_v8 = vsel %vm9101_vm7, %v3778_v0, %v3779_v54  ;;  %v3786_v61 = vrot.slane %v7760_v3, 5  ;;  %v7770_v39 = vld [vmem:[%s13581_s0 + $0x144] sm:$0xe] }
 0x24a   :  { %3919 = vrot.lane.b32.xlu1 %v3738_v4, %s8369_s22  ;;  %v7762_v4 = vld [vmem:[%s13581_s0 + $0x124] sm:$0xf]  ;;  %v7818_v54 = vrot.slane %v7770_v39, 9 }
 0x24b   :  { %v3257_v37 = vpop.permute.xlu0 %3256  ;;  %v3785_v19 = vrot.slane %v3783_v27, 4  ;;  %v3784_v52 = vsel %vm9101_vm7, %v7814_v17, %v3783_v27 }
 0x24c   :  { %3417 = vst.msk [vmem:[#allocation2 + $0x80] sm:$0xf] %vm3384_vm10, %v3257_v37  ;;  %v3263_v21 = vpop.permute.xlu1 %3262  ;;  %v7763_v37 = vld [vmem:[%s13581_s0 + $0x128] sm:$0x1] }
 0x24d   :  { %3917 = vrot.lane.b32.xlu0 %v3735_v10, %s8369_s22  ;;  %3420 = vst.msk [vmem:[#allocation2 + $0x8c] sm:$0xf] %vm3384_vm10, %v3263_v21  ;;  %v3790_v10 = vrot.slane %v7762_v4, 5  ;;  %v3787_v20 = vsel %vm9101_vm7, %v3785_v19, %v3786_v61  ;;  %v3793_v58 = vrot.slane %v7763_v37, 5  ;;  %v7773_v4 = vld [vmem:[%s13581_s0 + $0x150] sm:$0xe] }
 0x24e   :  { %3923 = vrot.lane.b32.xlu1 %v3745_v14, %s8369_s22  ;;  %v7765_v14 = vld [vmem:[%s13581_s0 + $0x130] sm:$0xf]  ;;  %v7819_v61 = vrot.slane %v7773_v4, 9 }
 0x24f   :  { %v3261_v25 = vpop.permute.xlu0 %3260  ;;  %v3792_v21 = vrot.slane %v3790_v10, 4  ;;  %v3791_v2 = vsel %vm9101_vm7, %v7815_v29, %v3790_v10 }
 0x250   :  { %3419 = vst.msk [vmem:[#allocation2 + $0x88] sm:$0xf] %vm3384_vm10, %v3261_v25  ;;  %v3267_v62 = vpop.permute.xlu1 %3266  ;;  %v7766_v25 = vld [vmem:[%s13581_s0 + $0x134] sm:$0x1] }
 0x251   :  { %3921 = vrot.lane.b32.xlu0 %v3742_v50, %s8369_s22  ;;  %3422 = vst.msk [vmem:[#allocation2 + $0x94] sm:$0xf] %vm3384_vm10, %v3267_v62  ;;  %v3797_v50 = vrot.slane %v7765_v14, 5  ;;  %v3794_v45 = vsel %vm9101_vm7, %v3792_v21, %v3793_v58  ;;  %v3800_v16 = vrot.slane %v7766_v25, 5  ;;  %v7776_v14 = vld [vmem:[%s13581_s0 + $0x15c] sm:$0xe] }
 0x252   :  { %3927 = vrot.lane.b32.xlu1 %v3752_v11, %s8369_s22  ;;  %v7768_v11 = vld [vmem:[%s13581_s0 + $0x13c] sm:$0xf]  ;;  %v7820_v58 = vrot.slane %v7776_v14, 9 }
 0x253   :  { %v3265_v36 = vpop.permute.xlu0 %3264  ;;  %v3799_v62 = vrot.slane %v3797_v50, 4  ;;  %v3798_v48 = vsel %vm9101_vm7, %v7816_v40, %v3797_v50 }
 0x254   :  { %3421 = vst.msk [vmem:[#allocation2 + $0x90] sm:$0xf] %vm3384_vm10, %v3265_v36  ;;  %v3271_v7 = vpop.permute.xlu1 %3270  ;;  %v7769_v36 = vld [vmem:[%s13581_s0 + $0x140] sm:$0x1] }
 0x255   :  { %3925 = vrot.lane.b32.xlu0 %v3749_v32, %s8369_s22  ;;  %3424 = vst.msk [vmem:[#allocation2 + $0x9c] sm:$0xf] %vm3384_vm10, %v3271_v7  ;;  %v3804_v32 = vrot.slane %v7768_v11, 5  ;;  %v3801_v5 = vsel %vm9101_vm7, %v3799_v62, %v3800_v16  ;;  %v3807_v42 = vrot.slane %v7769_v36, 5  ;;  %v7779_v11 = vld [vmem:[%s13581_s0 + $0x168] sm:$0xe] }
 0x256   :  { %3931 = vrot.lane.b32.xlu1 %v3759_v38, %s8369_s22  ;;  %v7771_v38 = vld [vmem:[%s13581_s0 + $0x148] sm:$0xf]  ;;  %v7821_v16 = vrot.slane %v7779_v11, 9  ;;  %v7830_v11 = vld [vmem:[%s13581_s0 + $0x30] sm:$0xf] }
 0x257   :  { %v3269_v47 = vpop.permute.xlu0 %3268  ;;  %v3806_v7 = vrot.slane %v3804_v32, 4  ;;  %v3805_v0 = vsel %vm9101_vm7, %v7817_v51, %v3804_v32 }
 0x258   :  { %3423 = vst.msk [vmem:[#allocation2 + $0x98] sm:$0xf] %vm3384_vm10, %v3269_v47  ;;  %v3275_v57 = vpop.permute.xlu1 %3274  ;;  %v7772_v47 = vld [vmem:[%s13581_s0 + $0x14c] sm:$0x1] }
 0x259   :  { %3929 = vrot.lane.b32.xlu0 %v3756_v31, %s8369_s22  ;;  %3426 = vst.msk [vmem:[#allocation2 + $0xa4] sm:$0xf] %vm3384_vm10, %v3275_v57  ;;  %v3811_v31 = vrot.slane %v7771_v38, 5  ;;  %v3808_v55 = vsel %vm9101_vm7, %v3806_v7, %v3807_v42  ;;  %v3814_v34 = vrot.slane %v7772_v47, 5  ;;  %v7782_v38 = vld [vmem:[%s13581_s0 + $0x174] sm:$0xe] }
 0x25a   :  { %3935 = vrot.lane.b32.xlu1 %v3766_v13, %s8369_s22  ;;  %v7774_v13 = vld [vmem:[%s13581_s0 + $0x154] sm:$0xf]  ;;  %v7822_v42 = vrot.slane %v7782_v38, 9 }
 0x25b   :  { %v3273_v22 = vpop.permute.xlu0 %3272  ;;  %v3813_v57 = vrot.slane %v3811_v31, 4  ;;  %v3812_v19 = vsel %vm9101_vm7, %v7818_v54, %v3811_v31 }
 0x25c   :  { %3425 = vst.msk [vmem:[#allocation2 + $0xa0] sm:$0xf] %vm3384_vm10, %v3273_v22  ;;  %v3279_v28 = vpop.permute.xlu1 %3278  ;;  %v7775_v22 = vld [vmem:[%s13581_s0 + $0x158] sm:$0x1] }
 0x25d   :  { %3933 = vrot.lane.b32.xlu0 %v3763_v59, %s8369_s22  ;;  %3428 = vst.msk [vmem:[#allocation2 + $0xac] sm:$0xf] %vm3384_vm10, %v3279_v28  ;;  %v3818_v59 = vrot.slane %v7774_v13, 5  ;;  %v3815_v27 = vsel %vm9101_vm7, %v3813_v57, %v3814_v34  ;;  %v3821_v3 = vrot.slane %v7775_v22, 5  ;;  %v7785_v13 = vld [vmem:[%s13581_s0 + $0x180] sm:$0xe] }
 0x25e   :  { %3939 = vrot.lane.b32.xlu1 %v3773_v63, %s8369_s22  ;;  %v7777_v63 = vld [vmem:[%s13581_s0 + $0x160] sm:$0xf]  ;;  %v7823_v34 = vrot.slane %v7785_v13, 9  ;;  %v7843_v13 = vld [vmem:[%s13581_s0 + $0x7c] sm:$0xf] }
 0x25f   :  { %v3277_v33 = vpop.permute.xlu0 %3276  ;;  %v3820_v28 = vrot.slane %v3818_v59, 4  ;;  %v3819_v21 = vsel %vm9101_vm7, %v7819_v61, %v3818_v59 }
 0x260   :  { %3427 = vst.msk [vmem:[#allocation2 + $0xa8] sm:$0xf] %vm3384_vm10, %v3277_v33  ;;  %v3283_v1 = vpop.permute.xlu1 %3282  ;;  %v7778_v33 = vld [vmem:[%s13581_s0 + $0x164] sm:$0x1] }
 0x261   :  { %3937 = vrot.lane.b32.xlu0 %v3770_v56, %s8369_s22  ;;  %3430 = vst.msk [vmem:[#allocation2 + $0xb4] sm:$0xf] %vm3384_vm10, %v3283_v1  ;;  %v3825_v56 = vrot.slane %v7777_v63, 5  ;;  %v3822_v10 = vsel %vm9101_vm7, %v3820_v28, %v3821_v3  ;;  %v3828_v37 = vrot.slane %v7778_v33, 5  ;;  %v7788_v63 = vld [vmem:[%s13581_s0 + $0x18c] sm:$0xe] }
 0x262   :  { %3943 = vrot.lane.b32.xlu1 %v3780_v8, %s8369_s22  ;;  %v7780_v8 = vld [vmem:[%s13581_s0 + $0x16c] sm:$0xf]  ;;  %v7824_v28 = vrot.slane %v7788_v63, 9  ;;  %v7791_v33 = vld [vmem:[%s13581_s0 + $0x198] sm:$0xe] }
 0x263   :  { %v3281_v18 = vpop.permute.xlu0 %3280  ;;  %v3827_v1 = vrot.slane %v3825_v56, 4  ;;  %v3826_v62 = vsel %vm9101_vm7, %v7820_v58, %v3825_v56  ;;  %v7825_v61 = vrot.slane %v7791_v33, 9 }
 0x264   :  { %3429 = vst.msk [vmem:[#allocation2 + $0xb0] sm:$0xf] %vm3384_vm10, %v3281_v18  ;;  %v3287_v24 = vpop.permute.xlu1 %3286  ;;  %v7781_v18 = vld [vmem:[%s13581_s0 + $0x170] sm:$0x1] }
 0x265   :  { %3941 = vrot.lane.b32.xlu0 %v3777_v15, %s8369_s22  ;;  %3432 = vst.msk [vmem:[#allocation2 + $0xbc] sm:$0xf] %vm3384_vm10, %v3287_v24  ;;  %v3832_v15 = vrot.slane %v7780_v8, 5  ;;  %v3829_v50 = vsel %vm9101_vm7, %v3827_v1, %v3828_v37  ;;  %v3835_v25 = vrot.slane %v7781_v18, 5  ;;  %v7826_v18 = vld [vmem:[%s13581_s0 + $0x18] sm:$0xf] }
 0x266   :  { %3947 = vrot.lane.b32.xlu1 %v3787_v20, %s8369_s22  ;;  %v7783_v20 = vld [vmem:[%s13581_s0 + $0x178] sm:$0xf] }
 0x267   :  { %v3285_v12 = vpop.permute.xlu0 %3284  ;;  %v3834_v24 = vrot.slane %v3832_v15, 4  ;;  %v3833_v7 = vsel %vm9101_vm7, %v7821_v16, %v3832_v15  ;;  %v7827_v15 = vld [vmem:[%s13581_s0 + $0x1c] sm:$0xf]  ;;  %v7835_v16 = vld [vmem:[%s13581_s0 + $0x4c] sm:$0xf] }
 0x268   :  { %3431 = vst.msk [vmem:[#allocation2 + $0xb8] sm:$0xf] %vm3384_vm10, %v3285_v12  ;;  %v3291_v35 = vpop.permute.xlu1 %3290  ;;  %v7784_v12 = vld [vmem:[%s13581_s0 + $0x17c] sm:$0x1] }
 0x269   :  { %3945 = vrot.lane.b32.xlu0 %v3784_v52, %s8369_s22  ;;  %3434 = vst.msk [vmem:[#allocation2 + $0xc4] sm:$0xf] %vm3384_vm10, %v3291_v35  ;;  %v3839_v52 = vrot.slane %v7783_v20, 5  ;;  %v3836_v32 = vsel %vm9101_vm7, %v3834_v24, %v3835_v25  ;;  %v3842_v36 = vrot.slane %v7784_v12, 5  ;;  %v7831_v24 = vld [vmem:[%s13581_s0 + $0x34] sm:$0xf] }
 0x26a   :  { %3951 = vrot.lane.b32.xlu1 %v3794_v45, %s8369_s22  ;;  %v7786_v45 = vld [vmem:[%s13581_s0 + $0x184] sm:$0xf] }
 0x26b   :  { %v3289_v41 = vpop.permute.xlu0 %3288  ;;  %v3841_v35 = vrot.slane %v3839_v52, 4  ;;  %v3840_v57 = vsel %vm9101_vm7, %v7822_v42, %v3839_v52 }
 0x26c   :  { %3433 = vst.msk [vmem:[#allocation2 + $0xc0] sm:$0xf] %vm3384_vm10, %v3289_v41  ;;  %v3295_v46 = vpop.permute.xlu1 %3294  ;;  %v7787_v41 = vld [vmem:[%s13581_s0 + $0x188] sm:$0x1] }
 0x26d   :  { %3949 = vrot.lane.b32.xlu0 %v3791_v2, %s8369_s22  ;;  %3436 = vst.msk [vmem:[#allocation2 + $0xcc] sm:$0xf] %vm3384_vm10, %v3295_v46  ;;  %v3846_v2 = vrot.slane %v7786_v45, 5  ;;  %v3843_v31 = vsel %vm9101_vm7, %v3841_v35, %v3842_v36  ;;  %v3849_v47 = vrot.slane %v7787_v41, 5  ;;  %v7832_v45 = vld [vmem:[%s13581_s0 + $0x3c] sm:$0xf] }
 0x26e   :  { %3955 = vrot.lane.b32.xlu1 %v3801_v5, %s8369_s22  ;;  %v7789_v5 = vld [vmem:[%s13581_s0 + $0x190] sm:$0xf]  ;;  %v7837_v36 = vld [vmem:[%s13581_s0 + $0x58] sm:$0xf]  ;;  %v7839_v41 = vld [vmem:[%s13581_s0 + $0x64] sm:$0xf] }
 0x26f   :  { %v3293_v53 = vpop.permute.xlu0 %3292  ;;  %v3848_v46 = vrot.slane %v3846_v2, 4 }
 0x270   :  { %3435 = vst.msk [vmem:[#allocation2 + $0xc8] sm:$0xf] %vm3384_vm10, %v3293_v53  ;;  %v3299_v60 = vpop.permute.xlu1 %3298  ;;  %v7790_v53 = vld [vmem:[%s13581_s0 + $0x194] sm:$0x1] }
 0x271   :  { %3953 = vrot.lane.b32.xlu0 %v3798_v48, %s8369_s22  ;;  %3438 = vst.msk [vmem:[#allocation2 + $0xd4] sm:$0xf] %vm3384_vm10, %v3299_v60  ;;  %v3853_v48 = vrot.slane %v7789_v5, 5  ;;  %v3850_v59 = vsel %vm9101_vm7, %v3848_v46, %v3849_v47  ;;  %v3856_v22 = vrot.slane %v7790_v53, 5  ;;  %v7840_v46 = vld [vmem:[%s13581_s0 + $0x6c] sm:$0xf] }
 0x272   :  { %3959 = vrot.lane.b32.xlu1 %v3808_v55, %s8369_s22  ;;  %v7792_v55 = vld [vmem:[%s13581_s0 + $0x19c] sm:$0xf] }
 0x273   :  { %v3297_v44 = vpop.permute.xlu0 %3296  ;;  %v3855_v60 = vrot.slane %v3853_v48, 4 }
 0x274   :  { %3437 = vst.msk [vmem:[#allocation2 + $0xd0] sm:$0xf] %vm3384_vm10, %v3297_v44  ;;  %v3303_v6 = vpop.permute.xlu1 %3302  ;;  %v7793_v44 = vld [vmem:[%s13581_s0 + $0x1a0] sm:$0x1] }
 0x275   :  { %3957 = vrot.lane.b32.xlu0 %v3805_v0, %s8369_s22  ;;  %3440 = vst.msk [vmem:[#allocation2 + $0xdc] sm:$0xf] %vm3384_vm10, %v3303_v6  ;;  %v3860_v0 = vrot.slane %v7792_v55, 5  ;;  %v3857_v4 = vsel %vm9101_vm7, %v3855_v60, %v3856_v22  ;;  %v3863_v6 = vrot.slane %v7793_v44, 5  ;;  %v7845_v55 = vld [vmem:[%s13581_s0 + $0x88] sm:$0xf] }
 0x276   :  { %3963 = vrot.lane.b32.xlu1 %v3815_v27, %s8369_s22  ;;  %v3847_v27 = vsel %vm9101_vm7, %v7823_v34, %v3846_v2  ;;  %v7836_v2 = vld [vmem:[%s13581_s0 + $0x54] sm:$0xf]  ;;  %v7844_v34 = vld [vmem:[%s13581_s0 + $0x84] sm:$0xf]  ;;  %v7846_v22 = vld [vmem:[%s13581_s0 + $0x90] sm:$0xf] }
 0x277   :  { %v3301_v9 = vpop.permute.xlu0 %3300  ;;  %v3862_v56 = vrot.slane %v3860_v0, 4  ;;  %v3861_v37 = vsel %vm9101_vm7, %v7825_v61, %v3860_v0  ;;  %v7849_v0 = vld [vmem:[%s13581_s0 + $0xa0] sm:$0xf]  ;;  %v7848_v44 = vld [vmem:[%s13581_s0 + $0x9c] sm:$0xf] }
 0x278   :  { %3439 = vst.msk [vmem:[#allocation2 + $0xd8] sm:$0xf] %vm3384_vm10, %v3301_v9  ;;  %v3307_v17 = vpop.permute.xlu1 %3306  ;;  %v7855_v61 = vld [vmem:[%s13581_s0 + $0xc4] sm:$0xf] }
 0x279   :  { %3961 = vrot.lane.b32.xlu0 %v3812_v19, %s8369_s22  ;;  %3442 = vst.msk [vmem:[#allocation2 + $0xe4] sm:$0xf] %vm3384_vm10, %v3307_v17  ;;  %v3854_v19 = vsel %vm9101_vm7, %v7824_v28, %v3853_v48  ;;  %v7851_v28 = vld [vmem:[%s13581_s0 + $0xac] sm:$0xf] }
 0x27a   :  { %3967 = vrot.lane.b32.xlu1 %v3822_v10, %s8369_s22  ;;  %v3864_v10 = vsel %vm9101_vm7, %v3862_v56, %v3863_v6  ;;  %v7853_v6 = vld [vmem:[%s13581_s0 + $0xb8] sm:$0xf] }
 0x27b   :  { %v3305_v49 = vpop.permute.xlu0 %3304 }
 0x27c   :  { %3441 = vst.msk [vmem:[#allocation2 + $0xe0] sm:$0xf] %vm3384_vm10, %v3305_v49  ;;  %v3311_v29 = vpop.permute.xlu1 %3310  ;;  %v7828_v49 = vld [vmem:[%s13581_s0 + $0x24] sm:$0xf] }
 0x27d   :  { %3965 = vrot.lane.b32.xlu0 %v3819_v21, %s8369_s22  ;;  %3444 = vst.msk [vmem:[#allocation2 + $0xec] sm:$0xf] %vm3384_vm10, %v3311_v29  ;;  %v7829_v21 = vld [vmem:[%s13581_s0 + $0x28] sm:$0xf]  ;;  %v7833_v29 = vld [vmem:[%s13581_s0 + $0x40] sm:$0xf] }
 0x27e   :  { %3971 = vrot.lane.b32.xlu1 %v3829_v50, %s8369_s22 }
 0x27f   :  { %v3309_v30 = vpop.permute.xlu0 %3308 }
 0x280   :  { %3443 = vst.msk [vmem:[#allocation2 + $0xe8] sm:$0xf] %vm3384_vm10, %v3309_v30  ;;  %v3315_v40 = vpop.permute.xlu1 %3314 }
 0x281   :  { %3969 = vrot.lane.b32.xlu0 %v3826_v62, %s8369_s22  ;;  %3446 = vst.msk [vmem:[#allocation2 + $0xf4] sm:$0xf] %vm3384_vm10, %v3315_v40 }
 0x282   :  { %3975 = vrot.lane.b32.xlu1 %v3836_v32, %s8369_s22  ;;  %v7834_v32 = vld [vmem:[%s13581_s0 + $0x48] sm:$0xf] }
 0x283   :  { %v3313_v43 = vpop.permute.xlu0 %3312 }
 0x284   :  { %3445 = vst.msk [vmem:[#allocation2 + $0xf0] sm:$0xf] %vm3384_vm10, %v3313_v43  ;;  %v3319_v51 = vpop.permute.xlu1 %3318  ;;  %v7841_v43 = vld [vmem:[%s13581_s0 + $0x70] sm:$0xf] }
 0x285   :  { %3973 = vrot.lane.b32.xlu0 %v3833_v7, %s8369_s22  ;;  %3448 = vst.msk [vmem:[#allocation2 + $0xfc] sm:$0xf] %vm3384_vm10, %v3319_v51  ;;  %v7838_v7 = vld [vmem:[%s13581_s0 + $0x60] sm:$0xf]  ;;  %v7842_v51 = vld [vmem:[%s13581_s0 + $0x78] sm:$0xf] }
 0x286   :  { %3979 = vrot.lane.b32.xlu1 %v3843_v31, %s8369_s22 }
 0x287   :  { %v3317_v39 = vpop.permute.xlu0 %3316 }
 0x288   :  { %3447 = vst.msk [vmem:[#allocation2 + $0xf8] sm:$0xf] %vm3384_vm10, %v3317_v39  ;;  %v3868_v54 = vpop.permute.xlu1 %3867 }
 0x289   :  { %3977 = vrot.lane.b32.xlu0 %v3840_v57, %s8369_s22  ;;  %4059 = vst.msk [vmem:[#allocation2 + $0x4] sm:$0xf] %vm4057_vm11, %v3868_v54 }
 0x28a   :  { %3983 = vrot.lane.b32.xlu1 %v3850_v59, %s8369_s22  ;;  %v7847_v59 = vld [vmem:[%s13581_s0 + $0x94] sm:$0xf] }
 0x28b   :  { %v3866_v3 = vpop.permute.xlu0 %3865 }
 0x28c   :  { %4058 = vst.msk [vmem:[#allocation2] sm:$0xf] %vm4057_vm11, %v3866_v3  ;;  %v3872_v8 = vpop.permute.xlu1 %3871 }
 0x28d   :  { %3981 = vrot.lane.b32.xlu0 %v3847_v27, %s8369_s22  ;;  %4061 = vst.msk [vmem:[#allocation2 + $0xc] sm:$0xf] %vm4057_vm11, %v3872_v8  ;;  %v7852_v8 = vld [vmem:[%s13581_s0 + $0xb4] sm:$0xf] }
 0x28e   :  { %3987 = vrot.lane.b32.xlu1 %v3857_v4, %s8369_s22  ;;  %v7850_v4 = vld [vmem:[%s13581_s0 + $0xa8] sm:$0xf] }
 0x28f   :  { %v3870_v9 = vpop.permute.xlu0 %3869 }
 0x290   :  { %4060 = vst.msk [vmem:[#allocation2 + $0x8] sm:$0xf] %vm4057_vm11, %v3870_v9  ;;  %v3876_v1 = vpop.permute.xlu1 %3875 }
 0x291   :  { %3985 = vrot.lane.b32.xlu0 %v3854_v19, %s8369_s22  ;;  %4063 = vst.msk [vmem:[#allocation2 + $0x14] sm:$0xf] %vm4057_vm11, %v3876_v1 }
 0x292   :  { %3991 = vrot.lane.b32.xlu1 %v3864_v10, %s8369_s22  ;;  %v7854_v10 = vld [vmem:[%s13581_s0 + $0xc0] sm:$0xf] }
 0x293   :  { %v3874_v14 = vpop.permute.xlu0 %3873 }
 0x294   :  { %4062 = vst.msk [vmem:[#allocation2 + $0x10] sm:$0xf] %vm4057_vm11, %v3874_v14  ;;  %v3880_v17 = vpop.permute.xlu1 %3879 }
 0x295   :  { %3989 = vrot.lane.b32.xlu0 %v3861_v37, %s8369_s22  ;;  %4065 = vst.msk [vmem:[#allocation2 + $0x1c] sm:$0xf] %vm4057_vm11, %v3880_v17  ;;  %v7857_v37 = vld [vmem:[%s13581_s0 + $0xd0] sm:$0xf] }
 0x296   :  { %4253 = vrot.lane.b32.xlu1 %v7827_v15, %s8370_s16  ;;  %v7856_v15 = vld [vmem:[%s13581_s0 + $0xcc] sm:$0xf] }
 0x297   :  { %v3878_v20 = vpop.permute.xlu0 %3877 }
 0x298   :  { %4064 = vst.msk [vmem:[#allocation2 + $0x18] sm:$0xf] %vm4057_vm11, %v3878_v20  ;;  %v3884_v58 = vpop.permute.xlu1 %3883 }
 0x299   :  { %4251 = vrot.lane.b32.xlu0 %v7826_v18, %s8370_s16  ;;  %4067 = vst.msk [vmem:[#allocation2 + $0x24] sm:$0xf] %vm4057_vm11, %v3884_v58  ;;  %v7859_v18 = vld [vmem:[%s13581_s0 + $0xf4] sm:$0xf]  ;;  %v7890_v58 = vld [vmem:[%s13581_s0 + $0x18] sm:$0xf] }
 0x29a   :  { %4257 = vrot.lane.b32.xlu1 %v7829_v21, %s8370_s16  ;;  %v7858_v21 = vld [vmem:[%s13581_s0 + $0xf0] sm:$0xf] }
 0x29b   :  { %v3882_v50 = vpop.permute.xlu0 %3881 }
 0x29c   :  { %4066 = vst.msk [vmem:[#allocation2 + $0x20] sm:$0xf] %vm4057_vm11, %v3882_v50  ;;  %v3888_v25 = vpop.permute.xlu1 %3887  ;;  %v7861_v50 = vld [vmem:[%s13581_s0 + $0x100] sm:$0xf] }
 0x29d   :  { %4255 = vrot.lane.b32.xlu0 %v7828_v49, %s8370_s16  ;;  %4069 = vst.msk [vmem:[#allocation2 + $0x2c] sm:$0xf] %vm4057_vm11, %v3888_v25  ;;  %v4605_v25 = vshrl.u32 %v7890_v58, 16 }
 0x29e   :  { %4261 = vrot.lane.b32.xlu1 %v7831_v24, %s8370_s16 }
 0x29f   :  { %v3886_v52 = vpop.permute.xlu0 %3885 }
 0x2a0   :  { %4068 = vst.msk [vmem:[#allocation2 + $0x28] sm:$0xf] %vm4057_vm11, %v3886_v52  ;;  %v3892_v12 = vpop.permute.xlu1 %3891  ;;  %v7860_v52 = vld [vmem:[%s13581_s0 + $0xfc] sm:$0xf] }
 0x2a1   :  { %4259 = vrot.lane.b32.xlu0 %v7830_v11, %s8370_s16  ;;  %4071 = vst.msk [vmem:[#allocation2 + $0x34] sm:$0xf] %vm4057_vm11, %v3892_v12  ;;  %v4608_v11 = vshll.u32 %v7890_v58, 16  ;;  %v7863_v12 = vld [vmem:[%s13581_s0 + $0x10c] sm:$0xf] }
 0x2a2   :  { %4265 = vrot.lane.b32.xlu1 %v7833_v29, %s8370_s16  ;;  %v7940_v58 = vld [vmem:[%s13581_s0 + $0xf8] sm:$0x1] }
 0x2a3   :  { %v3890_v62 = vpop.permute.xlu0 %3889 }
 0x2a4   :  { %4070 = vst.msk [vmem:[#allocation2 + $0x30] sm:$0xf] %vm4057_vm11, %v3890_v62  ;;  %v3896_v30 = vpop.permute.xlu1 %3895 }
 0x2a5   :  { %4263 = vrot.lane.b32.xlu0 %v7832_v45, %s8370_s16  ;;  %4073 = vst.msk [vmem:[#allocation2 + $0x3c] sm:$0xf] %vm4057_vm11, %v3896_v30  ;;  %v7938_v45 = vld [vmem:[%s13581_s0 + $0xf0] sm:$0xf]  ;;  %v4610_v30 = vrot.slane %v4608_v11, 5 }
 0x2a6   :  { %4269 = vrot.lane.b32.xlu1 %v7835_v16, %s8370_s16  ;;  %v4607_v16 = vrot.slane %v4605_v25, 4 }
 0x2a7   :  { %v3894_v35 = vpop.permute.xlu0 %3893 }
 0x2a8   :  { %4072 = vst.msk [vmem:[#allocation2 + $0x38] sm:$0xf] %vm4057_vm11, %v3894_v35  ;;  %v3900_v38 = vpop.permute.xlu1 %3899  ;;  %v7891_v35 = vld [vmem:[%s13581_s0 + $0x1c] sm:$0xf] }
 0x2a9   :  { %4267 = vrot.lane.b32.xlu0 %v7834_v32, %s8370_s16  ;;  %4075 = vst.msk [vmem:[#allocation2 + $0x44] sm:$0xf] %vm4057_vm11, %v3900_v38  ;;  %v7862_v32 = vld [vmem:[%s13581_s0 + $0x108] sm:$0xf]  ;;  %v4992_v38 = vshll.u32 %v7938_v45, 16 }
 0x2aa   :  { %4273 = vrot.lane.b32.xlu1 %v7837_v36, %s8370_s16  ;;  %v4989_v36 = vshrl.u32 %v7938_v45, 16 }
 0x2ab   :  { %v3898_v40 = vpop.permute.xlu0 %3897 }
 0x2ac   :  { %4074 = vst.msk [vmem:[#allocation2 + $0x40] sm:$0xf] %vm4057_vm11, %v3898_v40  ;;  %v3904_v5 = vpop.permute.xlu1 %3903  ;;  %v7865_v40 = vld [vmem:[%s13581_s0 + $0x118] sm:$0xf] }
 0x2ad   :  { %4271 = vrot.lane.b32.xlu0 %v7836_v2, %s8370_s16  ;;  %4077 = vst.msk [vmem:[#allocation2 + $0x4c] sm:$0xf] %vm4057_vm11, %v3904_v5  ;;  %v7893_v5 = vld [vmem:[%s13581_s0 + $0x24] sm:$0xf] }
 0x2ae   :  { %4277 = vrot.lane.b32.xlu1 %v7839_v41, %s8370_s16 }
 0x2af   :  { %v3902_v42 = vpop.permute.xlu0 %3901 }
 0x2b0   :  { %4076 = vst.msk [vmem:[#allocation2 + $0x48] sm:$0xf] %vm4057_vm11, %v3902_v42  ;;  %v3908_v31 = vpop.permute.xlu1 %3907  ;;  %v4614_v42 = vshll.u32 %v7891_v35, 16 }
 0x2b1   :  { %4275 = vrot.lane.b32.xlu0 %v7838_v7, %s8370_s16  ;;  %4079 = vst.msk [vmem:[#allocation2 + $0x54] sm:$0xf] %vm4057_vm11, %v3908_v31  ;;  %v4611_v7 = vor.u32 %v4610_v30, %v4607_v16  ;;  %v7864_v31 = vld [vmem:[%s13581_s0 + $0x114] sm:$0xf]  ;;  %v5008_v16 = vshll.u32 %v7940_v58, 16 }
 0x2b2   :  { %4281 = vrot.lane.b32.xlu1 %v7841_v43, %s8370_s16  ;;  %v4618_v43 = vshrl.u32 %v7891_v35, 16 }
 0x2b3   :  { %v3906_v47 = vpop.permute.xlu0 %3905 }
 0x2b4   :  { %4078 = vst.msk [vmem:[#allocation2 + $0x50] sm:$0xf] %vm4057_vm11, %v3906_v47  ;;  %v3912_v48 = vpop.permute.xlu1 %3911  ;;  %v4994_v47 = vrot.slane %v4992_v38, 5 }
 0x2b5   :  { %4279 = vrot.lane.b32.xlu0 %v7840_v46, %s8370_s16  ;;  %4081 = vst.msk [vmem:[#allocation2 + $0x5c] sm:$0xf] %vm4057_vm11, %v3912_v48  ;;  %v4991_v46 = vrot.slane %v4989_v36, 4  ;;  %v7867_v48 = vld [vmem:[%s13581_s0 + $0x124] sm:$0xf] }
 0x2b6   :  { %4285 = vrot.lane.b32.xlu1 %v7843_v13, %s8370_s16 }
 0x2b7   :  { %v3910_v53 = vpop.permute.xlu0 %3909 }
 0x2b8   :  { %4080 = vst.msk [vmem:[#allocation2 + $0x58] sm:$0xf] %vm4057_vm11, %v3910_v53  ;;  %v3916_v57 = vpop.permute.xlu1 %3915  ;;  %v4629_v53 = vshrl.u32 %v7893_v5, 16 }
 0x2b9   :  { %4283 = vrot.lane.b32.xlu0 %v7842_v51, %s8370_s16  ;;  %4083 = vst.msk [vmem:[#allocation2 + $0x64] sm:$0xf] %vm4057_vm11, %v3916_v57  ;;  %v7939_v51 = vld [vmem:[%s13581_s0 + $0xf4] sm:$0xf] }
 0x2ba   :  { %4289 = vrot.lane.b32.xlu1 %v7845_v55, %s8370_s16  ;;  %v4632_v55 = vshll.u32 %v7893_v5, 16 }
 0x2bb   :  { %v3914_v39 = vpop.permute.xlu0 %3913 }
 0x2bc   :  { %4082 = vst.msk [vmem:[#allocation2 + $0x60] sm:$0xf] %vm4057_vm11, %v3914_v39  ;;  %v3920_v60 = vpop.permute.xlu1 %3919  ;;  %v7866_v39 = vld [vmem:[%s13581_s0 + $0x120] sm:$0xf] }
 0x2bd   :  { %4287 = vrot.lane.b32.xlu0 %v7844_v34, %s8370_s16  ;;  %4085 = vst.msk [vmem:[#allocation2 + $0x6c] sm:$0xf] %vm4057_vm11, %v3920_v60  ;;  %v7941_v34 = vld [vmem:[%s13581_s0 + $0xfc] sm:$0xf]  ;;  %v4616_v60 = vrot.slane %v4614_v42, 5 }
 0x2be   :  { %4293 = vrot.lane.b32.xlu1 %v7847_v59, %s8370_s16  ;;  %v4612_v59 = vrot.slane %v4611_v7, 4 }
 0x2bf   :  { %v3918_v63 = vpop.permute.xlu0 %3917 }
 0x2c0   :  { %4084 = vst.msk [vmem:[#allocation2 + $0x68] sm:$0xf] %vm4057_vm11, %v3918_v63  ;;  %v3924_v54 = vpop.permute.xlu1 %3923  ;;  %v7869_v63 = vld [vmem:[%s13581_s0 + $0x130] sm:$0xf] }
 0x2c1   :  { %4291 = vrot.lane.b32.xlu0 %v7846_v22, %s8370_s16  ;;  %4087 = vst.msk [vmem:[#allocation2 + $0x74] sm:$0xf] %vm4057_vm11, %v3924_v54  ;;  %v4620_v22 = vrot.slane %v4618_v43, 4  ;;  %v4998_v54 = vshll.u32 %v7939_v51, 16  ;;  %v5010_v43 = vrot.slane %v5008_v16, 5 }
 0x2c2   :  { %4297 = vrot.lane.b32.xlu1 %v7849_v0, %s8370_s16  ;;  %v4995_v0 = vor.u32 %v4994_v47, %v4991_v46  ;;  %v7943_v47 = vld [vmem:[%s13581_s0 + $0x104] sm:$0x1] }
 0x2c3   :  { %v3922_v27 = vpop.permute.xlu0 %3921 }
 0x2c4   :  { %4086 = vst.msk [vmem:[#allocation2 + $0x70] sm:$0xf] %vm4057_vm11, %v3922_v27  ;;  %v3928_v3 = vpop.permute.xlu1 %3927  ;;  %v7892_v27 = vld [vmem:[%s13581_s0 + $0x20] sm:$0x1] }
 0x2c5   :  { %4295 = vrot.lane.b32.xlu0 %v7848_v44, %s8370_s16  ;;  %4089 = vst.msk [vmem:[#allocation2 + $0x7c] sm:$0xf] %vm4057_vm11, %v3928_v3  ;;  %v5002_v44 = vshrl.u32 %v7939_v51, 16  ;;  %v7894_v3 = vld [vmem:[%s13581_s0 + $0x28] sm:$0xf] }
 0x2c6   :  { %4301 = vrot.lane.b32.xlu1 %v7851_v28, %s8370_s16 }
 0x2c7   :  { %v3926_v56 = vpop.permute.xlu0 %3925 }
 0x2c8   :  { %4088 = vst.msk [vmem:[#allocation2 + $0x78] sm:$0xf] %vm4057_vm11, %v3926_v56  ;;  %v3932_v33 = vpop.permute.xlu1 %3931  ;;  %v4634_v56 = vrot.slane %v4632_v55, 5  ;;  %v7986_v55 = vld [vmem:[%s13581_s0 + $0x18] sm:$0xe] }
 0x2c9   :  { %4299 = vrot.lane.b32.xlu0 %v7850_v4, %s8370_s16  ;;  %4091 = vst.msk [vmem:[#allocation2 + $0x84] sm:$0xf] %vm4057_vm11, %v3932_v33  ;;  %v4631_v4 = vrot.slane %v4629_v53, 4  ;;  %v5016_v33 = vshll.u32 %v7941_v34, 16 }
 0x2ca   :  { %4305 = vrot.lane.b32.xlu1 %v7853_v6, %s8370_s16  ;;  %v5013_v6 = vshrl.u32 %v7941_v34, 16 }
 0x2cb   :  { %v3930_v19 = vpop.permute.xlu0 %3929 }
 0x2cc   :  { %4090 = vst.msk [vmem:[#allocation2 + $0x80] sm:$0xf] %vm4057_vm11, %v3930_v19  ;;  %v3936_v9 = vpop.permute.xlu1 %3935  ;;  %v7868_v19 = vld [vmem:[%s13581_s0 + $0x12c] sm:$0xf] }
 0x2cd   :  { %4303 = vrot.lane.b32.xlu0 %v7852_v8, %s8370_s16  ;;  %4093 = vst.msk [vmem:[#allocation2 + $0x8c] sm:$0xf] %vm4057_vm11, %v3936_v9  ;;  %v4621_v9 = vor.u32 %v4620_v22, %v4616_v60 }
 0x2ce   :  { %4309 = vrot.lane.b32.xlu1 %v7855_v61, %s8370_s16  ;;  %v4617_v61 = vsel %vm8413_vm2, %v4612_v59, %v4616_v60 }
 0x2cf   :  { %v3934_v1 = vpop.permute.xlu0 %3933  ;;  %v4622_v25 = vrot.slane %v4621_v9, 4  ;;  %v7988_v9 = vld [vmem:[%s13581_s0 + $0x20] sm:$0x1] }
 0x2d0   :  { %4092 = vst.msk [vmem:[#allocation2 + $0x88] sm:$0xf] %vm4057_vm11, %v3934_v1  ;;  %v3940_v14 = vpop.permute.xlu1 %3939  ;;  %v5000_v1 = vrot.slane %v4998_v54, 5  ;;  %v5826_v58 = vrot.slane %v7988_v9, 5 }
 0x2d1   :  { %4307 = vrot.lane.b32.xlu0 %v7854_v10, %s8370_s16  ;;  %4095 = vst.msk [vmem:[#allocation2 + $0x94] sm:$0xf] %vm4057_vm11, %v3940_v14  ;;  %v4624_v10 = vshll.u32 %v7892_v27, 16  ;;  %v4642_v14 = vshrl.u32 %v7894_v3, 16 }
 0x2d2   :  { %4313 = vrot.lane.b32.xlu1 %v7857_v37, %s8370_s16  ;;  %v4638_v37 = vshll.u32 %v7894_v3, 16 }
 0x2d3   :  { %v3938_v17 = vpop.permute.xlu0 %3937  ;;  %v4626_v11 = vrot.slane %v4624_v10, 5  ;;  %v4644_v30 = vrot.slane %v4642_v14, 4  ;;  %v7989_v10 = vld [vmem:[%s13581_s0 + $0x24] sm:$0xe] }
 0x2d4   :  { %4094 = vst.msk [vmem:[#allocation2 + $0x90] sm:$0xf] %vm4057_vm11, %v3938_v17  ;;  %v3944_v20 = vpop.permute.xlu1 %3943  ;;  %v7942_v17 = vld [vmem:[%s13581_s0 + $0x100] sm:$0xf]  ;;  %v4640_v45 = vrot.slane %v4638_v37, 5 }
 0x2d5   :  { %4311 = vrot.lane.b32.xlu0 %v7856_v15, %s8370_s16  ;;  %4097 = vst.msk [vmem:[#allocation2 + $0x9c] sm:$0xf] %vm4057_vm11, %v3944_v20  ;;  %v5004_v15 = vrot.slane %v5002_v44, 4  ;;  %v4996_v20 = vrot.slane %v4995_v0, 4  ;;  %v8082_v44 = vrot.slane %v7986_v55, 9 }
 0x2d6   :  { %4317 = vrot.lane.b32.xlu1 %v7859_v18, %s8370_s16  ;;  %v7945_v55 = vld [vmem:[%s13581_s0 + $0x10c] sm:$0xf] }
 0x2d7   :  { %v3942_v49 = vpop.permute.xlu0 %3941  ;;  %v5001_v35 = vsel %vm8413_vm2, %v4996_v20, %v5000_v1 }
 0x2d8   :  { %4096 = vst.msk [vmem:[#allocation2 + $0x98] sm:$0xf] %vm4057_vm11, %v3942_v49  ;;  %v3948_v24 = vpop.permute.xlu1 %3947  ;;  %v5015_v49 = vrot.slane %v5013_v6, 4 }
 0x2d9   :  { %4315 = vrot.lane.b32.xlu0 %v7858_v21, %s8370_s16  ;;  %4099 = vst.msk [vmem:[#allocation2 + $0xa4] sm:$0xf] %vm4057_vm11, %v3948_v24  ;;  %v4635_v21 = vor.u32 %v4634_v56, %v4631_v4  ;;  %v8035_v4 = vld [vmem:[%s13581_s0 + $0xf4] sm:$0xf] }
 0x2da   :  { %4321 = vrot.lane.b32.xlu1 %v7861_v50, %s8370_s16  ;;  %v5018_v50 = vrot.slane %v5016_v33, 5  ;;  %v5935_v14 = vrot.slane %v8035_v4, 5 }
 0x2db   :  { %v3946_v29 = vpop.permute.xlu0 %3945  ;;  %v4636_v36 = vrot.slane %v4635_v21, 4  ;;  %v7990_v21 = vld [vmem:[%s13581_s0 + $0x28] sm:$0xf] }
 0x2dc   :  { %4098 = vst.msk [vmem:[#allocation2 + $0xa0] sm:$0xf] %vm4057_vm11, %v3946_v29  ;;  %v3952_v62 = vpop.permute.xlu1 %3951  ;;  %v5026_v29 = vshrl.u32 %v7942_v17, 16  ;;  %v5019_v38 = vor.u32 %v5018_v50, %v5015_v49  ;;  %v8036_v49 = vld [vmem:[%s13581_s0 + $0xf8] sm:$0x1] }
 0x2dd   :  { %4319 = vrot.lane.b32.xlu0 %v7860_v52, %s8370_s16  ;;  %4101 = vst.msk [vmem:[#allocation2 + $0xac] sm:$0xf] %vm4057_vm11, %v3952_v62  ;;  %v5022_v52 = vshll.u32 %v7942_v17, 16  ;;  %v5005_v62 = vor.u32 %v5004_v15, %v5000_v1  ;;  %v7944_v15 = vld [vmem:[%s13581_s0 + $0x108] sm:$0xf] }
 0x2de   :  { %4325 = vrot.lane.b32.xlu1 %v7863_v12, %s8370_s16  ;;  %v7870_v12 = vld [vmem:[%s13581_s0 + $0x138] sm:$0xf]  ;;  %v5028_v7 = vrot.slane %v5026_v29, 4  ;;  %v5020_v51 = vrot.slane %v5019_v38, 4  ;;  %v7897_v29 = vld [vmem:[%s13581_s0 + $0x34] sm:$0xf] }
 0x2df   :  { %v3950_v2 = vpop.permute.xlu0 %3949  ;;  %v5024_v5 = vrot.slane %v5022_v52, 5  ;;  %v5006_v42 = vrot.slane %v5005_v62, 4  ;;  %v8304_v17 = vld [vmem:[%s13582_s1 + $0x10] ss:$0 sps:$4 sm:$0x33]   ;;  %v8083_v52 = vrot.slane %v7989_v10, 9 }
 0x2e0   :  { %4100 = vst.msk [vmem:[#allocation2 + $0xa8] sm:$0xf] %vm4057_vm11, %v3950_v2  ;;  %v3956_v41 = vpop.permute.xlu1 %3955  ;;  %v7895_v2 = vld [vmem:[%s13581_s0 + $0x2c] sm:$0x1]  ;;  %8292 = vmatprep.subr.msk.bf16.mxu0 %vm6643_vm12, %v8304_v17  ;;  %8293 = vmatprep.subr.msk.bf16.mxu1 %vm6643_vm12, %v8304_v17 }
 0x2e1   :  { %4323 = vrot.lane.b32.xlu0 %v7862_v32, %s8370_s16  ;;  %4103 = vst.msk [vmem:[#allocation2 + $0xb4] sm:$0xf] %vm4057_vm11, %v3956_v41  ;;  %v4627_v41 = vsel %vm8413_vm2, %v4622_v25, %v4626_v11  ;;  %v4648_v46 = vshll.u32 %v7895_v2, 16  ;;  %v5029_v34 = vor.u32 %v5028_v7, %v5024_v5  ;;  %v5011_v59 = vsel %vm8413_vm2, %v5006_v42, %v5010_v43 }
 0x2e2   :  { %4329 = vrot.lane.b32.xlu1 %v7865_v40, %s8370_s16  ;;  %v5025_v54 = vsel %vm8413_vm2, %v5020_v51, %v5024_v5  ;;  %v6645_v25 = vsel %vm6643_vm12, %v8304_v17, 0  ;;  %v5937_v2 = vrot.slane %v5935_v14, 4  ;;  %v4662_v42 = vshll.u32 %v7897_v29, 16 }
 0x2e3   :  { %v3954_v13 = vpop.permute.xlu0 %3953  ;;  %v4650_v22 = vrot.slane %v4648_v46, 5  ;;  %v5030_v56 = vrot.slane %v5029_v34, 4  ;;  %8217 = vmatpush3.bf16.msra.mxu0 %v6645_v25  ;;  %8289 = vmatpush3.bf16.msra.mxu1 %v6645_v25  ;;  %v4666_v43 = vshrl.u32 %v7897_v29, 16  ;;  %v7948_v25 = vld [vmem:[%s13581_s0 + $0x118] sm:$0xf] }
 0x2e4   :  { %4102 = vst.msk [vmem:[#allocation2 + $0xb0] sm:$0xf] %vm4057_vm11, %v3954_v13  ;;  %v3960_v57 = vpop.permute.xlu1 %3959 }
 0x2e5   :  { %4327 = vrot.lane.b32.xlu0 %v7864_v31, %s8370_s16  ;;  %4105 = vst.msk [vmem:[#allocation2 + $0xbc] sm:$0xf] %vm4057_vm11, %v3960_v57  ;;  %v4645_v31 = vor.u32 %v4644_v30, %v4640_v45  ;;  %v7987_v57 = vld [vmem:[%s13581_s0 + $0x1c] sm:$0xf]  ;;  %v5830_v30 = vrot.slane %v7990_v21, 5 }
 0x2e6   :  { %4333 = vrot.lane.b32.xlu1 %v7867_v48, %s8370_s16  ;;  %v4641_v48 = vsel %vm8413_vm2, %v4636_v36, %v4640_v45  ;;  %v5823_v27 = vrot.slane %v7987_v57, 5  ;;  %v5040_v45 = vshll.u32 %v7944_v15, 16  ;;  %v8305_v36 = vld [vmem:[%s13582_s1 + $0x8] sm:$0xff]  }
 0x2e7   :  { %v3958_v28 = vpop.permute.xlu0 %3957  ;;  %v4646_v60 = vrot.slane %v4645_v31, 4  ;;  %8218 = vmatprep.subr.bf16.mxu0 %v8305_v36  ;;  %8287 = vmatprep.subr.bf16.mxu1 %v8305_v36 }
 0x2e8   :  { %4104 = vst.msk [vmem:[#allocation2 + $0xb8] sm:$0xf] %vm4057_vm11, %v3958_v28  ;;  %v3964_v8 = vpop.permute.xlu1 %3963  ;;  %v8034_v28 = vld [vmem:[%s13581_s0 + $0xf0] sm:$0xe]  ;;  %v5824_v37 = vsel %vm9101_vm7, %v8082_v44, %v5823_v27  ;;  %v5825_v20 = vrot.slane %v5823_v27, 4  ;;  %8219 = vmatpush3.bf16.msra.mxu0 %v8305_v36  ;;  %8290 = vmatpush3.bf16.msra.mxu1 %v8305_v36  ;;  %v4664_v44 = vrot.slane %v4662_v42, 5 }
 0x2e9   :  { %4331 = vrot.lane.b32.xlu0 %v7866_v39, %s8370_s16  ;;  %4107 = vst.msk [vmem:[#allocation2 + $0xc4] sm:$0xf] %vm4057_vm11, %v3964_v8  ;;  %v5032_v39 = vshll.u32 %v7943_v47, 16  ;;  %v7991_v47 = vld [vmem:[%s13581_s0 + $0x2c] sm:$0x1]  ;;  %v5070_v36 = vshll.u32 %v7948_v25, 16 }
 0x2ea   :  { %4337 = vrot.lane.b32.xlu1 %v7869_v63, %s8370_s16  ;;  %v7896_v63 = vld [vmem:[%s13581_s0 + $0x30] sm:$0xf]  ;;  %v5827_v5 = vsel %vm9101_vm7, %v5825_v20, %v5826_v58  ;;  %v8039_v27 = vld [vmem:[%s13581_s0 + $0x104] sm:$0x1] }
 0x2eb   :  { %v3962_v18 = vpop.permute.xlu0 %3961  ;;  %v5034_v6 = vrot.slane %v5032_v39, 5  ;;  %v4653_v33 = vshrl.u32 %v7896_v63, 16  ;;  %v4656_v8 = vshll.u32 %v7896_v63, 16  ;;  %v8307_v39 = vld [vmem:[%s13582_s1] sm:$0xff]   ;;  %v7947_v63 = vld [vmem:[%s13581_s0 + $0x114] sm:$0xf] }
 0x2ec   :  { %4106 = vst.msk [vmem:[#allocation2 + $0xc0] sm:$0xf] %vm4057_vm11, %v3962_v18  ;;  %v3968_v24 = vpop.permute.xlu1 %3967  ;;  %8220 = vmatprep.subr.bf16.mxu0 %v8307_v39  ;;  %v5061_v10 = vshrl.u32 %v7947_v63, 16  ;;  %8288 = vmatprep.subr.bf16.mxu1 %v8307_v39 }
 0x2ed   :  { %4335 = vrot.lane.b32.xlu0 %v7868_v19, %s8370_s16  ;;  %4109 = vst.msk [vmem:[#allocation2 + $0xcc] sm:$0xf] %vm4057_vm11, %v3968_v24  ;;  %v4651_v19 = vsel %vm8413_vm2, %v4646_v60, %v4650_v22  ;;  %v4655_v50 = vrot.slane %v4653_v33, 4  ;;  %v4658_v24 = vrot.slane %v4656_v8, 5  ;;  %v5035_v11 = vsel %vm8413_vm2, %v5030_v56, %v5034_v6  ;;  %v7898_v33 = vld [vmem:[%s13581_s0 + $0x38] sm:$0x1]  ;;  %8221 = vmatpush3.bf16.msra.mxu0 %v8307_v39 }
 0x2ee   :  { %5372 = vrot.lane.b32.xlu1 %v4617_v61, %s8371_s19  ;;  %v8098_v61 = vrot.slane %v8034_v28, 9  ;;  %v5832_v22 = vrot.slane %v5830_v30, 4  ;;  %v4668_v28 = vrot.slane %v4666_v43, 4  ;;  %v5046_v56 = vshll.u32 %v7945_v55, 16  ;;  %8291 = vmatpush3.bf16.msra.mxu1 %v8307_v39  ;;  %v7949_v39 = vld [vmem:[%s13581_s0 + $0x11c] sm:$0x1] }
 0x2ef   :  { %v3966_v32 = vpop.permute.xlu0 %3965  ;;  %v4659_v7 = vor.u32 %v4658_v24, %v4655_v50  ;;  %v5050_v6 = vshrl.u32 %v7945_v55, 16  ;;  %v4672_v21 = vshll.u32 %v7898_v33, 16 }
 0x2f0   :  { %4108 = vst.msk [vmem:[#allocation2 + $0xc8] sm:$0xf] %vm4057_vm11, %v3966_v32  ;;  %v3972_v40 = vpop.permute.xlu1 %3971  ;;  %v5936_v16 = vsel %vm9101_vm7, %v8098_v61, %v5935_v14  ;;  %v8037_v32 = vld [vmem:[%s13581_s0 + $0xfc] sm:$0xe]  ;;  %v4669_v20 = vor.u32 %v4668_v28, %v4664_v44  ;;  %v5048_v58 = vrot.slane %v5046_v56, 5 }
 0x2f1   :  { %4339 = vrot.lane.b32.xlu0 %v7870_v12, %s8370_s16  ;;  %4111 = vst.msk [vmem:[#allocation2 + $0xd4] sm:$0xf] %vm4057_vm11, %v3972_v40  ;;  %v5037_v12 = vshrl.u32 %v7944_v15, 16  ;;  %v5938_v40 = vrot.slane %v8036_v49, 5  ;;  %v8099_v31 = vrot.slane %v8037_v32, 9  ;;  %v5945_v15 = vrot.slane %v8039_v27, 5 }
 0x2f2   :  { %5436 = vrot.lane.b32.xlu1 %v5001_v35, %s8371_s19  ;;  %v8038_v35 = vld [vmem:[%s13581_s0 + $0x100] sm:$0xf]  ;;  %v5052_v24 = vrot.slane %v5050_v6, 4  ;;  %v4670_v32 = vrot.slane %v4669_v20, 4  ;;  %v5080_v27 = vshll.u32 %v7949_v39, 16 }
 0x2f3   :  { %v3970_v13 = vpop.permute.xlu0 %3969  ;;  %v5942_v46 = vrot.slane %v8038_v35, 5  ;;  %v5939_v60 = vsel %vm9101_vm7, %v5937_v2, %v5938_v40  ;;  %v4674_v35 = vrot.slane %v4672_v21, 5 }
 0x2f4   :  { %4110 = vst.msk [vmem:[#allocation2 + $0xd0] sm:$0xf] %vm4057_vm11, %v3970_v13  ;;  %v3976_v53 = vpop.permute.xlu1 %3975  ;;  %v5039_v13 = vrot.slane %v5037_v12, 4  ;;  %v7946_v12 = vld [vmem:[%s13581_s0 + $0x110] sm:$0x1]  ;;  %v5053_v40 = vor.u32 %v5052_v24, %v5048_v58 }
 0x2f5   :  { %5374 = vrot.lane.b32.xlu0 %v4627_v41, %s8371_s19  ;;  %4113 = vst.msk [vmem:[#allocation2 + $0xdc] sm:$0xf] %vm4057_vm11, %v3976_v53  ;;  %v7899_v41 = vld [vmem:[%s13581_s0 + $0x3c] sm:$0xf]  ;;  %v5831_v53 = vsel %vm9101_vm7, %v8083_v52, %v5830_v30  ;;  %v5944_v14 = vrot.slane %v5942_v46, 4 }
 0x2f6   :  { %5376 = vrot.lane.b32.xlu1 %v4641_v48, %s8371_s19  ;;  %v5042_v48 = vrot.slane %v5040_v45, 5  ;;  %v4677_v57 = vshrl.u32 %v7899_v41, 16  ;;  %v4680_v34 = vshll.u32 %v7899_v41, 16  ;;  %v5063_v45 = vrot.slane %v5061_v10, 4  ;;  %v8041_v10 = vld [vmem:[%s13581_s0 + $0x10c] sm:$0xf] }
 0x2f7   :  { %v3974_v0 = vpop.permute.xlu0 %3973  ;;  %v5946_v30 = vsel %vm9101_vm7, %v5944_v14, %v5945_v15  ;;  %v5056_v41 = vshll.u32 %v7946_v12, 16  ;;  %v7994_v15 = vld [vmem:[%s13581_s0 + $0x38] sm:$0x1] }
 0x2f8   :  { %4112 = vst.msk [vmem:[#allocation2 + $0xd8] sm:$0xf] %vm4057_vm11, %v3974_v0  ;;  %v3980_v3 = vpop.permute.xlu1 %3979  ;;  %v5833_v0 = vrot.slane %v7991_v47, 5  ;;  %v5043_v4 = vor.u32 %v5042_v48, %v5039_v13  ;;  %v4679_v61 = vrot.slane %v4677_v57, 4  ;;  %v4682_v9 = vrot.slane %v4680_v34, 5 }
 0x2f9   :  { %5438 = vrot.lane.b32.xlu0 %v5011_v59, %s8371_s19  ;;  %4115 = vst.msk [vmem:[#allocation2 + $0xe4] sm:$0xf] %vm4057_vm11, %v3980_v3  ;;  %v5943_v3 = vsel %vm9101_vm7, %v8099_v31, %v5942_v46  ;;  %v7901_v46 = vld [vmem:[%s13581_s0 + $0x44] sm:$0x1]  ;;  %v4675_v13 = vsel %vm8413_vm2, %v4670_v32, %v4674_v35  ;;  %v5072_v48 = vrot.slane %v5070_v36, 5  ;;  %v5058_v55 = vrot.slane %v5056_v41, 5 }
 0x2fa   :  { %5440 = vrot.lane.b32.xlu1 %v5025_v54, %s8371_s19  ;;  %v4660_v54 = vrot.slane %v4659_v7, 4  ;;  %v5834_v17 = vsel %vm9101_vm7, %v5832_v22, %v5833_v0  ;;  %v5044_v52 = vrot.slane %v5043_v4, 4  ;;  %v4683_v29 = vor.u32 %v4682_v9, %v4679_v61  ;;  %v7992_v0 = vld [vmem:[%s13581_s0 + $0x30] sm:$0xe]  ;;  %v8040_v9 = vld [vmem:[%s13581_s0 + $0x108] sm:$0xe] }
 0x2fb   :  { %v3978_v1 = vpop.permute.xlu0 %3977  ;;  %v4696_v34 = vshll.u32 %v7901_v46, 16  ;;  %v8084_v33 = vrot.slane %v7992_v0, 9  ;;  %v5840_v12 = vrot.slane %v7994_v15, 5 }
 0x2fc   :  { %4114 = vst.msk [vmem:[#allocation2 + $0xe0] sm:$0xf] %vm4057_vm11, %v3978_v1  ;;  %v3984_v18 = vpop.permute.xlu1 %3983  ;;  %v5064_v1 = vshll.u32 %v7947_v63, 16  ;;  %v5049_v42 = vsel %vm8413_vm2, %v5044_v52, %v5048_v58  ;;  %v4684_v43 = vrot.slane %v4683_v29, 4  ;;  %v8100_v58 = vrot.slane %v8040_v9, 9 }
 0x2fd   :  { %5378 = vrot.lane.b32.xlu0 %v4651_v19, %s8371_s19  ;;  %4117 = vst.msk [vmem:[#allocation2 + $0xec] sm:$0xf] %vm4057_vm11, %v3984_v18  ;;  %v7900_v19 = vld [vmem:[%s13581_s0 + $0x40] sm:$0xf]  ;;  %v4665_v18 = vsel %vm8413_vm2, %v4660_v54, %v4664_v44  ;;  %v7993_v54 = vld [vmem:[%s13581_s0 + $0x34] sm:$0xf] }
 0x2fe   :  { %6045 = vrot.lane.b32.xlu1 %v5824_v37, %s8372_s23  ;;  %v4686_v49 = vshll.u32 %v7900_v19, 16  ;;  %v4690_v50 = vshrl.u32 %v7900_v19, 16  ;;  %v4698_v4 = vrot.slane %v4696_v34, 5  ;;  %v7902_v19 = vld [vmem:[%s13581_s0 + $0x48] sm:$0xf] }
 0x2ff   :  { %v3982_v62 = vpop.permute.xlu0 %3981  ;;  %v7904_v9 = vld [vmem:[%s13581_s0 + $0x50] sm:$0x1] }
 0x300   :  { %4116 = vst.msk [vmem:[#allocation2 + $0xe8] sm:$0xf] %vm4057_vm11, %v3982_v62  ;;  %v3988_v38 = vpop.permute.xlu1 %3987  ;;  %v5066_v62 = vrot.slane %v5064_v1, 5  ;;  %v4688_v2 = vrot.slane %v4686_v49, 5  ;;  %v5949_v49 = vrot.slane %v8041_v10, 5 }
 0x301   :  { %5442 = vrot.lane.b32.xlu0 %v5035_v11, %s8371_s19  ;;  %4119 = vst.msk [vmem:[#allocation2 + $0xf4] sm:$0xf] %vm4057_vm11, %v3988_v38  ;;  %v5074_v38 = vshrl.u32 %v7948_v25, 16  ;;  %v7995_v25 = vld [vmem:[%s13581_s0 + $0x3c] sm:$0xe] }
 0x302   :  { %6109 = vrot.lane.b32.xlu1 %v5936_v16, %s8372_s23  ;;  %v5067_v31 = vor.u32 %v5066_v62, %v5063_v45  ;;  %v8042_v45 = vld [vmem:[%s13581_s0 + $0x110] sm:$0x1]  ;;  %v8043_v62 = vld [vmem:[%s13581_s0 + $0x114] sm:$0xe] }
 0x303   :  { %v3986_v51 = vpop.permute.xlu0 %3985 }
 0x304   :  { %4118 = vst.msk [vmem:[#allocation2 + $0xf0] sm:$0xf] %vm4057_vm11, %v3986_v51  ;;  %v3992_v59 = vpop.permute.xlu1 %3991  ;;  %v5076_v51 = vrot.slane %v5074_v38, 4  ;;  %v5068_v22 = vrot.slane %v5067_v31, 4  ;;  %v7905_v31 = vld [vmem:[%s13581_s0 + $0x54] sm:$0xf] }
 0x305   :  { %6047 = vrot.lane.b32.xlu0 %v5827_v5, %s8372_s23  ;;  %4121 = vst.msk [vmem:[#allocation2 + $0xfc] sm:$0xf] %vm4057_vm11, %v3992_v59  ;;  %v4692_v5 = vrot.slane %v4690_v50, 4  ;;  %v7950_v50 = vld [vmem:[%s13581_s0 + $0x120] sm:$0xf] }
 0x306   :  { %6049 = vrot.lane.b32.xlu1 %v5831_v53, %s8372_s23  ;;  %v5054_v53 = vrot.slane %v5053_v40, 4  ;;  %v5077_v44 = vor.u32 %v5076_v51, %v5072_v48  ;;  %v5073_v6 = vsel %vm8413_vm2, %v5068_v22, %v5072_v48  ;;  %v5085_v35 = vshrl.u32 %v7950_v50, 16 }
 0x307   :  { %v3990_v8 = vpop.permute.xlu0 %3989  ;;  %v4693_v57 = vor.u32 %v4692_v5, %v4688_v2  ;;  %v5088_v36 = vshll.u32 %v7950_v50, 16  ;;  %v8085_v40 = vrot.slane %v7995_v25, 9  ;;  %v8044_v5 = vld [vmem:[%s13581_s0 + $0x118] sm:$0xf]  ;;  %v4725_v22 = vshrl.u32 %v7905_v31, 16 }
 0x308   :  { %4120 = vst.msk [vmem:[#allocation2 + $0xf8] sm:$0xf] %vm4057_vm11, %v3990_v8  ;;  %v4254_v37 = vpop.permute.xlu1 %4253  ;;  %v5059_v28 = vsel %vm8413_vm2, %v5054_v53, %v5058_v55  ;;  %v5837_v8 = vrot.slane %v7993_v54, 5  ;;  %v5078_v1 = vrot.slane %v5077_v44, 4  ;;  %v5956_v51 = vrot.slane %v8044_v5, 5 }
 0x309   :  { %6111 = vrot.lane.b32.xlu0 %v5939_v60, %s8372_s23  ;;  %4445 = vst.msk [vmem:[#allocation2 + $0x4] sm:$0xf] %vm4443_vm13, %v4254_v37  ;;  %v4689_v60 = vsel %vm8413_vm2, %v4684_v43, %v4688_v2  ;;  %v5082_v37 = vrot.slane %v5080_v27, 5  ;;  %v5950_v2 = vsel %vm9101_vm7, %v8100_v58, %v5949_v49  ;;  %v5952_v43 = vrot.slane %v8042_v45, 5  ;;  %v7951_v55 = vld [vmem:[%s13581_s0 + $0x124] sm:$0xf] }
 0x30a   :  { %6113 = vrot.lane.b32.xlu1 %v5943_v3, %s8372_s23  ;;  %v4694_v3 = vrot.slane %v4693_v57, 4  ;;  %v5838_v21 = vsel %vm9101_vm7, %v8084_v33, %v5837_v8  ;;  %v5839_v29 = vrot.slane %v5837_v8, 4  ;;  %v5087_v57 = vrot.slane %v5085_v35, 4  ;;  %v7953_v27 = vld [vmem:[%s13581_s0 + $0x12c] sm:$0xf] }
 0x30b   :  { %v4252_v11 = vpop.permute.xlu0 %4251  ;;  %v5083_v52 = vsel %vm8413_vm2, %v5078_v1, %v5082_v37  ;;  %v5090_v34 = vrot.slane %v5088_v36, 5  ;;  %v7906_v1 = vld [vmem:[%s13581_s0 + $0x58] sm:$0xf]  ;;  %v4727_v37 = vrot.slane %v4725_v22, 4  ;;  %v5109_v15 = vshrl.u32 %v7953_v27, 16 }
 0x30c   :  { %4444 = vst.msk [vmem:[#allocation2] sm:$0xf] %vm4443_vm13, %v4252_v11  ;;  %v4258_v16 = vpop.permute.xlu1 %4257  ;;  %v4699_v14 = vsel %vm8413_vm2, %v4694_v3, %v4698_v4  ;;  %v7996_v11 = vld [vmem:[%s13581_s0 + $0x40] sm:$0xf]  ;;  %v5841_v46 = vsel %vm9101_vm7, %v5839_v29, %v5840_v12  ;;  %v8045_v3 = vld [vmem:[%s13581_s0 + $0x11c] sm:$0x1] }
 0x30d   :  { %6051 = vrot.lane.b32.xlu0 %v5834_v17, %s8372_s23  ;;  %4447 = vst.msk [vmem:[#allocation2 + $0xc] sm:$0xf] %vm4443_vm13, %v4258_v16  ;;  %v4701_v17 = vshrl.u32 %v7902_v19, 16  ;;  %v7903_v16 = vld [vmem:[%s13581_s0 + $0x4c] sm:$0xf]  ;;  %v5844_v41 = vrot.slane %v7996_v11, 5 }
 0x30e   :  { %5380 = vrot.lane.b32.xlu1 %v4665_v18, %s8371_s19  ;;  %v4704_v18 = vshll.u32 %v7902_v19, 16  ;;  %v4714_v48 = vshrl.u32 %v7903_v16, 16  ;;  %v5094_v4 = vshll.u32 %v7951_v55, 16  ;;  %v4720_v50 = vshll.u32 %v7904_v9, 16  ;;  %v7952_v12 = vld [vmem:[%s13581_s0 + $0x128] sm:$0x1] }
 0x30f   :  { %v4256_v7 = vpop.permute.xlu0 %4255  ;;  %v5846_v44 = vrot.slane %v5844_v41, 4  ;;  %v4738_v29 = vshrl.u32 %v7906_v1, 16  ;;  %v5104_v5 = vshll.u32 %v7952_v12, 16 }
 0x310   :  { %4446 = vst.msk [vmem:[#allocation2 + $0x8] sm:$0xf] %vm4443_vm13, %v4256_v7  ;;  %v4262_v47 = vpop.permute.xlu1 %4261  ;;  %v4706_v32 = vrot.slane %v4704_v18, 5  ;;  %v5096_v58 = vrot.slane %v5094_v4, 5 }
 0x311   :  { %6115 = vrot.lane.b32.xlu0 %v5946_v30, %s8372_s23  ;;  %4449 = vst.msk [vmem:[#allocation2 + $0x14] sm:$0xf] %vm4443_vm13, %v4262_v47  ;;  %v4703_v30 = vrot.slane %v4701_v17, 4  ;;  %v8101_v47 = vrot.slane %v8043_v62, 9  ;;  %v5112_v17 = vshll.u32 %v7953_v27, 16 }
 0x312   :  { %5444 = vrot.lane.b32.xlu1 %v5049_v42, %s8371_s19  ;;  %v5951_v42 = vrot.slane %v5949_v49, 4 }
 0x313   :  { %v4260_v59 = vpop.permute.xlu0 %4259  ;;  %v4707_v53 = vor.u32 %v4706_v32, %v4703_v30  ;;  %v5957_v33 = vsel %vm9101_vm7, %v8101_v47, %v5956_v51  ;;  %v7954_v30 = vld [vmem:[%s13581_s0 + $0x130] sm:$0xf]  ;;  %v5111_v32 = vrot.slane %v5109_v15, 4  ;;  %v5114_v35 = vrot.slane %v5112_v17, 5 }
 0x314   :  { %4448 = vst.msk [vmem:[#allocation2 + $0x10] sm:$0xf] %vm4443_vm13, %v4260_v59  ;;  %v4266_v63 = vpop.permute.xlu1 %4265  ;;  %v5845_v59 = vsel %vm9101_vm7, %v8085_v40, %v5844_v41  ;;  %v5953_v54 = vsel %vm9101_vm7, %v5951_v42, %v5952_v43  ;;  %v4722_v40 = vrot.slane %v4720_v50, 5  ;;  %v5118_v42 = vshll.u32 %v7954_v30, 16  ;;  %v8000_v50 = vld [vmem:[%s13581_s0 + $0x50] sm:$0x1] }
 0x315   :  { %5382 = vrot.lane.b32.xlu0 %v4675_v13, %s8371_s19  ;;  %4451 = vst.msk [vmem:[#allocation2 + $0x1c] sm:$0xf] %vm4443_vm13, %v4266_v63  ;;  %v4710_v13 = vshll.u32 %v7903_v16, 16  ;;  %v4728_v63 = vshll.u32 %v7905_v31, 16  ;;  %v4708_v19 = vrot.slane %v4707_v53, 4  ;;  %v5122_v43 = vshrl.u32 %v7954_v30, 16 }
 0x316   :  { %5384 = vrot.lane.b32.xlu1 %v4689_v60, %s8371_s19  ;;  %v7997_v60 = vld [vmem:[%s13581_s0 + $0x44] sm:$0x1]  ;;  %v4740_v31 = vrot.slane %v4738_v29, 4 }
 0x317   :  { %v4264_v56 = vpop.permute.xlu0 %4263  ;;  %v5847_v8 = vrot.slane %v7997_v60, 5  ;;  %v5124_v22 = vrot.slane %v5122_v43, 4 }
 0x318   :  { %4450 = vst.msk [vmem:[#allocation2 + $0x18] sm:$0xf] %vm4443_vm13, %v4264_v56  ;;  %v4270_v61 = vpop.permute.xlu1 %4269  ;;  %v5098_v56 = vshrl.u32 %v7951_v55, 16 }
 0x319   :  { %5446 = vrot.lane.b32.xlu0 %v5059_v28, %s8371_s19  ;;  %4453 = vst.msk [vmem:[#allocation2 + $0x24] sm:$0xf] %vm4443_vm13, %v4270_v61  ;;  %v4712_v28 = vrot.slane %v4710_v13, 5  ;;  %v5091_v61 = vor.u32 %v5090_v34, %v5087_v57  ;;  %v5848_v25 = vsel %vm9101_vm7, %v5846_v44, %v5847_v8  ;;  %v5106_v34 = vrot.slane %v5104_v5, 5  ;;  %v7955_v44 = vld [vmem:[%s13581_s0 + $0x134] sm:$0x1] }
 0x31a   :  { %5448 = vrot.lane.b32.xlu1 %v5073_v6, %s8371_s19  ;;  %v4716_v6 = vrot.slane %v4714_v48, 4  ;;  %v5115_v48 = vor.u32 %v5114_v35, %v5111_v32  ;;  %v5128_v8 = vshll.u32 %v7955_v44, 16  ;;  %v8048_v35 = vld [vmem:[%s13581_s0 + $0x128] sm:$0x1]  ;;  %v7908_v5 = vld [vmem:[%s13581_s0 + $0x60] sm:$0xf] }
 0x31b   :  { %v4268_v20 = vpop.permute.xlu0 %4267  ;;  %v4713_v11 = vsel %vm8413_vm2, %v4708_v19, %v4712_v28  ;;  %v5092_v62 = vrot.slane %v5091_v61, 4  ;;  %v5966_v43 = vrot.slane %v8048_v35, 5  ;;  %v7956_v44 = vld [vmem:[%s13581_s0 + $0x138] sm:$0xf] }
 0x31c   :  { %4452 = vst.msk [vmem:[#allocation2 + $0x20] sm:$0xf] %vm4443_vm13, %v4268_v20  ;;  %v4274_v24 = vpop.permute.xlu1 %4273  ;;  %v5958_v20 = vrot.slane %v5956_v51, 4  ;;  %v4717_v49 = vor.u32 %v4716_v6, %v4712_v28  ;;  %v7907_v51 = vld [vmem:[%s13581_s0 + $0x5c] sm:$0x1] }
 0x31d   :  { %5386 = vrot.lane.b32.xlu0 %v4699_v14, %s8371_s19  ;;  %4455 = vst.msk [vmem:[#allocation2 + $0x2c] sm:$0xf] %vm4443_vm13, %v4274_v24  ;;  %v4730_v14 = vrot.slane %v4728_v63, 5  ;;  %v5100_v24 = vrot.slane %v5098_v56, 4  ;;  %v5097_v47 = vsel %vm8413_vm2, %v5092_v62, %v5096_v58  ;;  %v4744_v60 = vshll.u32 %v7907_v51, 16 }
 0x31e   :  { %6053 = vrot.lane.b32.xlu1 %v5838_v21, %s8372_s23  ;;  %v5959_v21 = vrot.slane %v8045_v3, 5  ;;  %v7998_v28 = vld [vmem:[%s13581_s0 + $0x48] sm:$0xe]  ;;  %v7999_v3 = vld [vmem:[%s13581_s0 + $0x4c] sm:$0xf] }
 0x31f   :  { %v4272_v38 = vpop.permute.xlu0 %4271  ;;  %v4731_v16 = vor.u32 %v4730_v14, %v4727_v37  ;;  %v5101_v41 = vor.u32 %v5100_v24, %v5096_v58  ;;  %v4746_v6 = vrot.slane %v4744_v60, 5  ;;  %v8086_v9 = vrot.slane %v7998_v28, 9  ;;  %v8046_v37 = vld [vmem:[%s13581_s0 + $0x120] sm:$0xe]  ;;  %v8047_v14 = vld [vmem:[%s13581_s0 + $0x124] sm:$0xf] }
 0x320   :  { %4454 = vst.msk [vmem:[#allocation2 + $0x28] sm:$0xf] %vm4443_vm13, %v4272_v38  ;;  %v4278_v7 = vpop.permute.xlu1 %4277  ;;  %v5960_v38 = vsel %vm9101_vm7, %v5958_v20, %v5959_v21  ;;  %v8102_v58 = vrot.slane %v8046_v37, 9  ;;  %v8003_v51 = vld [vmem:[%s13581_s0 + $0x5c] sm:$0x1] }
 0x321   :  { %5450 = vrot.lane.b32.xlu0 %v5083_v52, %s8371_s19  ;;  %4457 = vst.msk [vmem:[#allocation2 + $0x34] sm:$0xf] %vm4443_vm13, %v4278_v7  ;;  %v4734_v52 = vshll.u32 %v7906_v1, 16  ;;  %v4732_v13 = vrot.slane %v4731_v16, 4  ;;  %v5102_v57 = vrot.slane %v5101_v41, 4 }
 0x322   :  { %6117 = vrot.lane.b32.xlu1 %v5950_v2, %s8372_s23  ;;  %v4718_v2 = vrot.slane %v4717_v49, 4  ;;  %v5963_v49 = vrot.slane %v8047_v14, 5 }
 0x323   :  { %v4276_v39 = vpop.permute.xlu0 %4275  ;;  %v4736_v7 = vrot.slane %v4734_v52, 5  ;;  %v5107_v4 = vsel %vm8413_vm2, %v5102_v57, %v5106_v34  ;;  %v7909_v52 = vld [vmem:[%s13581_s0 + $0x64] sm:$0xf]  ;;  %v4749_v34 = vshrl.u32 %v7908_v5, 16 }
 0x324   :  { %4456 = vst.msk [vmem:[#allocation2 + $0x30] sm:$0xf] %vm4443_vm13, %v4276_v39  ;;  %v4282_v0 = vpop.permute.xlu1 %4281  ;;  %v4723_v55 = vsel %vm8413_vm2, %v4718_v2, %v4722_v40  ;;  %v5120_v39 = vrot.slane %v5118_v42, 5  ;;  %v5964_v16 = vsel %vm9101_vm7, %v8102_v58, %v5963_v49  ;;  %v8050_v2 = vld [vmem:[%s13581_s0 + $0x130] sm:$0xf]  ;;  %v4758_v40 = vshll.u32 %v7909_v52, 16 }
 0x325   :  { %6055 = vrot.lane.b32.xlu0 %v5841_v46, %s8372_s23  ;;  %4459 = vst.msk [vmem:[#allocation2 + $0x3c] sm:$0xf] %vm4443_vm13, %v4282_v0  ;;  %v4737_v0 = vsel %vm8413_vm2, %v4732_v13, %v4736_v7  ;;  %v4762_v41 = vshrl.u32 %v7909_v52, 16  ;;  %v5965_v42 = vrot.slane %v5963_v49, 4  ;;  %v7911_v49 = vld [vmem:[%s13581_s0 + $0x6c] sm:$0xf] }
 0x326   :  { %6057 = vrot.lane.b32.xlu1 %v5845_v59, %s8372_s23  ;;  %v4741_v59 = vor.u32 %v4740_v31, %v4736_v7  ;;  %v7957_v31 = vld [vmem:[%s13581_s0 + $0x13c] sm:$0xf]  ;;  %v7960_v52 = vld [vmem:[%s13581_s0 + $0x148] sm:$0xf]  ;;  %v4776_v35 = vshll.u32 %v7911_v49, 16 }
 0x327   :  { %v4280_v10 = vpop.permute.xlu0 %4279  ;;  %v4764_v57 = vrot.slane %v4762_v41, 4  ;;  %v5142_v60 = vshll.u32 %v7957_v31, 16  ;;  %v5170_v41 = vshrl.u32 %v7960_v52, 16 }
 0x328   :  { %4458 = vst.msk [vmem:[#allocation2 + $0x38] sm:$0xf] %vm4443_vm13, %v4280_v10  ;;  %v4286_v18 = vpop.permute.xlu1 %4285  ;;  %v4742_v56 = vrot.slane %v4741_v59, 4  ;;  %v5851_v10 = vrot.slane %v7999_v3, 5  ;;  %v7910_v59 = vld [vmem:[%s13581_s0 + $0x68] sm:$0x1] }
 0x329   :  { %6119 = vrot.lane.b32.xlu0 %v5953_v54, %s8372_s23  ;;  %4461 = vst.msk [vmem:[#allocation2 + $0x44] sm:$0xf] %vm4443_vm13, %v4286_v18  ;;  %v5116_v54 = vrot.slane %v5115_v48, 4  ;;  %v5130_v18 = vrot.slane %v5128_v8, 5  ;;  %v5970_v48 = vrot.slane %v8050_v2, 5 }
 0x32a   :  { %6121 = vrot.lane.b32.xlu1 %v5957_v33, %s8372_s23  ;;  %v5125_v33 = vor.u32 %v5124_v22, %v5120_v39  ;;  %v4747_v15 = vsel %vm8413_vm2, %v4742_v56, %v4746_v6  ;;  %v5852_v21 = vsel %vm9101_vm7, %v8086_v9, %v5851_v10  ;;  %v5853_v12 = vrot.slane %v5851_v10, 4  ;;  %v8051_v3 = vld [vmem:[%s13581_s0 + $0x134] sm:$0x1] }
 0x32b   :  { %v4284_v45 = vpop.permute.xlu0 %4283  ;;  %v5121_v61 = vsel %vm8413_vm2, %v5116_v54, %v5120_v39  ;;  %v4752_v39 = vshll.u32 %v7908_v5, 16  ;;  %v5146_v22 = vshrl.u32 %v7957_v31, 16  ;;  %v5861_v54 = vrot.slane %v8003_v51, 5  ;;  %v7959_v5 = vld [vmem:[%s13581_s0 + $0x144] sm:$0xf] }
 0x32c   :  { %4460 = vst.msk [vmem:[#allocation2 + $0x40] sm:$0xf] %vm4443_vm13, %v4284_v45  ;;  %v4290_v36 = vpop.permute.xlu1 %4289  ;;  %v5126_v17 = vrot.slane %v5125_v33, 4  ;;  %v5854_v45 = vrot.slane %v8000_v50, 5  ;;  %v4768_v6 = vshll.u32 %v7910_v59, 16  ;;  %v4751_v33 = vrot.slane %v4749_v34, 4 }
 0x32d   :  { %6059 = vrot.lane.b32.xlu0 %v5848_v25, %s8372_s23  ;;  %4463 = vst.msk [vmem:[#allocation2 + $0x4c] sm:$0xf] %vm4443_vm13, %v4290_v36  ;;  %v8001_v25 = vld [vmem:[%s13581_s0 + $0x54] sm:$0xe]  ;;  %v4754_v8 = vrot.slane %v4752_v39, 5  ;;  %v5148_v9 = vrot.slane %v5146_v22, 4 }
 0x32e   :  { %5388 = vrot.lane.b32.xlu1 %v4713_v11, %s8371_s19  ;;  %v8002_v11 = vld [vmem:[%s13581_s0 + $0x58] sm:$0xf]  ;;  %v5131_v29 = vsel %vm8413_vm2, %v5126_v17, %v5130_v18  ;;  %v8087_v30 = vrot.slane %v8001_v25, 9  ;;  %v5855_v7 = vsel %vm9101_vm7, %v5853_v12, %v5854_v45  ;;  %v5133_v10 = vshrl.u32 %v7956_v44, 16  ;;  %v7958_v17 = vld [vmem:[%s13581_s0 + $0x140] sm:$0x1] }
 0x32f   :  { %v4288_v46 = vpop.permute.xlu0 %4287  ;;  %v5858_v32 = vrot.slane %v8002_v11, 5  ;;  %v5972_v14 = vrot.slane %v5970_v48, 4  ;;  %v4770_v25 = vrot.slane %v4768_v6, 5  ;;  %v4755_v11 = vor.u32 %v4754_v8, %v4751_v33 }
 0x330   :  { %4462 = vst.msk [vmem:[#allocation2 + $0x48] sm:$0xf] %vm4443_vm13, %v4288_v46  ;;  %v4294_v53 = vpop.permute.xlu1 %4293  ;;  %v5152_v12 = vshll.u32 %v7958_v17, 16  ;;  %v5135_v45 = vrot.slane %v5133_v10, 4  ;;  %v5160_v34 = vshll.u32 %v7959_v5, 16 }
 0x331   :  { %6123 = vrot.lane.b32.xlu0 %v5960_v38, %s8372_s23  ;;  %4465 = vst.msk [vmem:[#allocation2 + $0x54] sm:$0xf] %vm4443_vm13, %v4294_v53  ;;  %v8049_v38 = vld [vmem:[%s13581_s0 + $0x12c] sm:$0xe] }
 0x332   :  { %5452 = vrot.lane.b32.xlu1 %v5097_v47, %s8371_s19  ;;  %v5859_v47 = vsel %vm9101_vm7, %v8087_v30, %v5858_v32  ;;  %v8103_v13 = vrot.slane %v8049_v38, 9  ;;  %v7873_v30 = vld [vmem:[%s13581_s0 + $0x148] sm:$0xf] }
 0x333   :  { %v4292_v63 = vpop.permute.xlu0 %4291 }
 0x334   :  { %4464 = vst.msk [vmem:[#allocation2 + $0x50] sm:$0xf] %vm4443_vm13, %v4292_v63  ;;  %v4298_v27 = vpop.permute.xlu1 %4297  ;;  %v5967_v63 = vsel %vm9101_vm7, %v5965_v42, %v5966_v43  ;;  %v5971_v28 = vsel %vm9101_vm7, %v8103_v13, %v5970_v48  ;;  %v4756_v42 = vrot.slane %v4755_v11, 4  ;;  %v7913_v43 = vld [vmem:[%s13581_s0 + $0x74] sm:$0x1] }
 0x335   :  { %5390 = vrot.lane.b32.xlu0 %v4723_v55, %s8371_s19  ;;  %4467 = vst.msk [vmem:[#allocation2 + $0x5c] sm:$0xf] %vm4443_vm13, %v4298_v27  ;;  %v12068_v55 = vrot.slane %v4758_v40, 5  ;;  %v5166_v40 = vshll.u32 %v7960_v52, 16  ;;  %v7872_v48 = vld [vmem:[%s13581_s0 + $0x144] sm:$0xf] }
 0x336   :  { %5392 = vrot.lane.b32.xlu1 %v4737_v0, %s8371_s19  ;;  %v5860_v0 = vrot.slane %v5858_v32, 4  ;;  %v4773_v32 = vshrl.u32 %v7911_v49, 16  ;;  %v8006_v49 = vld [vmem:[%s13581_s0 + $0x68] sm:$0x1] }
 0x337   :  { %v4296_v19 = vpop.permute.xlu0 %4295  ;;  %v4765_v56 = vor.u32 %v4764_v57, %v12068_v55  ;;  %v5157_v57 = vshrl.u32 %v7959_v5, 16  ;;  %v12138_v22 = vrot.slane %v5166_v40, 5 }
 0x338   :  { %4466 = vst.msk [vmem:[#allocation2 + $0x58] sm:$0xf] %vm4443_vm13, %v4296_v19  ;;  %v4302_v1 = vpop.permute.xlu1 %4301  ;;  %v7912_v19 = vld [vmem:[%s13581_s0 + $0x70] sm:$0xf]  ;;  %v5862_v37 = vsel %vm9101_vm7, %v5860_v0, %v5861_v54  ;;  %v4775_v51 = vrot.slane %v4773_v32, 4 }
 0x339   :  { %5454 = vrot.lane.b32.xlu0 %v5107_v4, %s8371_s19  ;;  %4469 = vst.msk [vmem:[#allocation2 + $0x64] sm:$0xf] %vm4443_vm13, %v4302_v1  ;;  %v5136_v1 = vshll.u32 %v7956_v44, 16  ;;  %v4786_v58 = vshrl.u32 %v7912_v19, 16  ;;  %v7961_v54 = vld [vmem:[%s13581_s0 + $0x14c] sm:$0x1]  ;;  %v4761_v44 = vsel %vm8413_vm2, %v4756_v42, %v12068_v55 }
 0x33a   :  { %5456 = vrot.lane.b32.xlu1 %v5121_v61, %s8371_s19  ;;  %v12093_v61 = vrot.slane %v5142_v60, 5  ;;  %v4792_v60 = vshll.u32 %v7913_v43, 16  ;;  %v8005_v55 = vld [vmem:[%s13581_s0 + $0x64] sm:$0xf]  ;;  %v8009_v42 = vld [vmem:[%s13581_s0 + $0x74] sm:$0x1] }
 0x33b   :  { %v4300_v20 = vpop.permute.xlu0 %4299  ;;  %v4788_v2 = vrot.slane %v4786_v58, 4  ;;  %v12208_v43 = vld [vmem:[%s13581_s0 + $0x148] sm:$0xf] }
 0x33c   :  { %4468 = vst.msk [vmem:[#allocation2 + $0x60] sm:$0xf] %vm4443_vm13, %v4300_v20  ;;  %v4306_v24 = vpop.permute.xlu1 %4305  ;;  %v7871_v20 = vld [vmem:[%s13581_s0 + $0x13c] sm:$0xf]  ;;  %v4794_v8 = vrot.slane %v4792_v60, 5 }
 0x33d   :  { %5394 = vrot.lane.b32.xlu0 %v4747_v15, %s8371_s19  ;;  %4471 = vst.msk [vmem:[#allocation2 + $0x6c] sm:$0xf] %vm4443_vm13, %v4306_v24  ;;  %v5973_v15 = vrot.slane %v8051_v3, 5  ;;  %v4766_v24 = vrot.slane %v4765_v56, 4  ;;  %v5162_v56 = vrot.slane %v5160_v34, 5  ;;  %v5984_v34 = vrot.slane %v12208_v43, 5 }
 0x33e   :  { %6061 = vrot.lane.b32.xlu1 %v5852_v21, %s8372_s23  ;;  %v4782_v21 = vshll.u32 %v7912_v19, 16  ;;  %v7874_v43 = vld [vmem:[%s13581_s0 + $0x150] sm:$0xf] }
 0x33f   :  { %v4304_v62 = vpop.permute.xlu0 %4303  ;;  %v4771_v31 = vsel %vm8413_vm2, %v4766_v24, %v4770_v25 }
 0x340   :  { %4470 = vst.msk [vmem:[#allocation2 + $0x68] sm:$0xf] %vm4443_vm13, %v4304_v62  ;;  %v4310_v36 = vpop.permute.xlu1 %4309  ;;  %v5138_v62 = vrot.slane %v5136_v1, 5  ;;  %v12120_v38 = vrot.slane %v4782_v21, 5  ;;  %v5865_v21 = vrot.slane %v8005_v55, 5 }
 0x341   :  { %5458 = vrot.lane.b32.xlu0 %v5131_v29, %s8371_s19  ;;  %4473 = vst.msk [vmem:[#allocation2 + $0x74] sm:$0xf] %vm4443_vm13, %v4310_v36  ;;  %v5149_v29 = vor.u32 %v5148_v9, %v12093_v61  ;;  %v5176_v9 = vshll.u32 %v7961_v54, 16 }
 0x342   :  { %6125 = vrot.lane.b32.xlu1 %v5964_v16, %s8372_s23  ;;  %v5974_v16 = vsel %vm9101_vm7, %v5972_v14, %v5973_v15  ;;  %v5139_v13 = vor.u32 %v5138_v62, %v5135_v45  ;;  %v4789_v59 = vor.u32 %v4788_v2, %v12120_v38  ;;  %v5867_v52 = vrot.slane %v5865_v21, 4 }
 0x343   :  { %v4308_v46 = vpop.permute.xlu0 %4307 }
 0x344   :  { %4472 = vst.msk [vmem:[#allocation2 + $0x70] sm:$0xf] %vm4443_vm13, %v4308_v46  ;;  %v4314_v53 = vpop.permute.xlu1 %4313  ;;  %v5150_v46 = vrot.slane %v5149_v29, 4  ;;  %v4790_v33 = vrot.slane %v4789_v59, 4  ;;  %v5868_v29 = vrot.slane %v8006_v49, 5 }
 0x345   :  { %6063 = vrot.lane.b32.xlu0 %v5855_v7, %s8372_s23  ;;  %4475 = vst.msk [vmem:[#allocation2 + $0x7c] sm:$0xf] %vm4443_vm13, %v4314_v53  ;;  %v4778_v53 = vrot.slane %v4776_v35, 5  ;;  %v8057_v59 = vld [vmem:[%s13581_s0 + $0x14c] sm:$0x1] }
 0x346   :  { %6065 = vrot.lane.b32.xlu1 %v5859_v47, %s8372_s23  ;;  %v5154_v47 = vrot.slane %v5152_v12, 5  ;;  %v4795_v17 = vsel %vm8413_vm2, %v4790_v33, %v4794_v8  ;;  %v8004_v12 = vld [vmem:[%s13581_s0 + $0x60] sm:$0xe] }
 0x347   :  { %v4312_v27 = vpop.permute.xlu0 %4311  ;;  %v4779_v3 = vor.u32 %v4778_v53, %v4775_v51  ;;  %v8088_v35 = vrot.slane %v8004_v12, 9  ;;  %v5875_v53 = vrot.slane %v8009_v42, 5  ;;  %v7964_v12 = vld [vmem:[%s13581_s0 + $0x158] sm:$0x1] }
 0x348   :  { %4474 = vst.msk [vmem:[#allocation2 + $0x78] sm:$0xf] %vm4443_vm13, %v4312_v27  ;;  %v4318_v4 = vpop.permute.xlu1 %4317  ;;  %v5155_v27 = vsel %vm8413_vm2, %v5150_v46, %v5154_v47 }
 0x349   :  { %6127 = vrot.lane.b32.xlu0 %v5967_v63, %s8372_s23  ;;  %4477 = vst.msk [vmem:[#allocation2 + $0x84] sm:$0xf] %vm4443_vm13, %v4318_v4  ;;  %v5172_v63 = vrot.slane %v5170_v41, 4  ;;  %v5159_v4 = vrot.slane %v5157_v57, 4  ;;  %v8052_v41 = vld [vmem:[%s13581_s0 + $0x138] sm:$0xe]  ;;  %v5866_v46 = vsel %vm9101_vm7, %v8088_v35, %v5865_v21 }
 0x34a   :  { %6129 = vrot.lane.b32.xlu1 %v5971_v28, %s8372_s23  ;;  %v5140_v28 = vrot.slane %v5139_v13, 4  ;;  %v8104_v47 = vrot.slane %v8052_v41, 9  ;;  %v8007_v57 = vld [vmem:[%s13581_s0 + $0x6c] sm:$0xe] }
 0x34b   :  { %v4316_v18 = vpop.permute.xlu0 %4315  ;;  %v5173_v19 = vor.u32 %v5172_v63, %v12138_v22  ;;  %v5163_v14 = vor.u32 %v5162_v56, %v5159_v4  ;;  %v7914_v63 = vld [vmem:[%s13581_s0 + $0x78] sm:$0xf]  ;;  %v8089_v54 = vrot.slane %v8007_v57, 9  ;;  %v5987_v4 = vrot.slane %v8057_v59, 5  ;;  %v8055_v56 = vld [vmem:[%s13581_s0 + $0x144] sm:$0xe] }
 0x34c   :  { %4476 = vst.msk [vmem:[#allocation2 + $0x80] sm:$0xf] %vm4443_vm13, %v4316_v18  ;;  %v4322_v50 = vpop.permute.xlu1 %4321  ;;  %v5145_v1 = vsel %vm8413_vm2, %v5140_v28, %v12093_v61  ;;  %v8053_v61 = vld [vmem:[%s13581_s0 + $0x13c] sm:$0xf] }
 0x34d   :  { %6067 = vrot.lane.b32.xlu0 %v5862_v37, %s8372_s23  ;;  %4479 = vst.msk [vmem:[#allocation2 + $0x8c] sm:$0xf] %vm4443_vm13, %v4322_v50  ;;  %v4780_v37 = vrot.slane %v4779_v3, 4  ;;  %v5174_v18 = vrot.slane %v5173_v19, 4  ;;  %v5164_v24 = vrot.slane %v5163_v14, 4  ;;  %v5977_v45 = vrot.slane %v8053_v61, 5 }
 0x34e   :  { %4341 = vrot.lane.b32.xlu1 %v7871_v20, %s8370_s16  ;;  %v5178_v20 = vrot.slane %v5176_v9, 5  ;;  %v5986_v3 = vrot.slane %v5984_v34, 4  ;;  %v4797_v19 = vshrl.u32 %v7914_v63, 16  ;;  %v4800_v9 = vshll.u32 %v7914_v63, 16 }
 0x34f   :  { %v4320_v36 = vpop.permute.xlu0 %4319  ;;  %v4785_v50 = vsel %vm8413_vm2, %v4780_v37, %v12120_v38  ;;  %v5169_v32 = vsel %vm8413_vm2, %v5164_v24, %v12138_v22  ;;  %v5869_v38 = vsel %vm9101_vm7, %v5867_v52, %v5868_v29  ;;  %v5979_v2 = vrot.slane %v5977_v45, 4 }
 0x350   :  { %4478 = vst.msk [vmem:[#allocation2 + $0x88] sm:$0xf] %vm4443_vm13, %v4320_v36  ;;  %v4326_v7 = vpop.permute.xlu1 %4325  ;;  %v5179_v11 = vsel %vm8413_vm2, %v5174_v18, %v5178_v20  ;;  %v8105_v14 = vrot.slane %v8055_v56, 9  ;;  %v5988_v18 = vsel %vm9101_vm7, %v5986_v3, %v5987_v4  ;;  %v4799_v49 = vrot.slane %v4797_v19, 4 }
 0x351   :  { %6131 = vrot.lane.b32.xlu0 %v5974_v16, %s8372_s23  ;;  %4481 = vst.msk [vmem:[#allocation2 + $0x94] sm:$0xf] %vm4443_vm13, %v4326_v7  ;;  %v8054_v16 = vld [vmem:[%s13581_s0 + $0x140] sm:$0x1]  ;;  %v4802_v61 = vrot.slane %v4800_v9, 5 }
 0x352   :  { %4345 = vrot.lane.b32.xlu1 %v7873_v30, %s8370_s16  ;;  %v8008_v30 = vld [vmem:[%s13581_s0 + $0x70] sm:$0xf]  ;;  %v5980_v40 = vrot.slane %v8054_v16, 5  ;;  %v5985_v29 = vsel %vm9101_vm7, %v8105_v14, %v5984_v34  ;;  %v7965_v34 = vld [vmem:[%s13581_s0 + $0x15c] sm:$0xf] }
 0x353   :  { %v4324_v39 = vpop.permute.xlu0 %4323  ;;  %v5872_v5 = vrot.slane %v8008_v30, 5  ;;  %v5205_v3 = vshrl.u32 %v7965_v34, 16  ;;  %v5208_v4 = vshll.u32 %v7965_v34, 16 }
 0x354   :  { %4480 = vst.msk [vmem:[#allocation2 + $0x90] sm:$0xf] %vm4443_vm13, %v4324_v39  ;;  %v4330_v0 = vpop.permute.xlu1 %4329 }
 0x355   :  { %4343 = vrot.lane.b32.xlu0 %v7872_v48, %s8370_s16  ;;  %4483 = vst.msk [vmem:[#allocation2 + $0x9c] sm:$0xf] %vm4443_vm13, %v4330_v0  ;;  %v5981_v48 = vsel %vm9101_vm7, %v5979_v2, %v5980_v40  ;;  %v5874_v51 = vrot.slane %v5872_v5, 4  ;;  %v5978_v0 = vsel %vm9101_vm7, %v8104_v47, %v5977_v45  ;;  %v5873_v37 = vsel %vm9101_vm7, %v8089_v54, %v5872_v5  ;;  %v7966_v40 = vld [vmem:[%s13581_s0 + $0x160] sm:$0xf] }
 0x356   :  { %5398 = vrot.lane.b32.xlu1 %v4771_v31, %s8371_s19  ;;  %v7915_v31 = vld [vmem:[%s13581_s0 + $0x7c] sm:$0xf]  ;;  %v4803_v2 = vor.u32 %v4802_v61, %v4799_v49  ;;  %v5200_v5 = vshll.u32 %v7964_v12, 16  ;;  %v5218_v57 = vshrl.u32 %v7966_v40, 16 }
 0x357   :  { %v4328_v6 = vpop.permute.xlu0 %4327  ;;  %v4806_v60 = vshll.u32 %v7915_v31, 16  ;;  %v4810_v22 = vshrl.u32 %v7915_v31, 16  ;;  %v5876_v28 = vsel %vm9101_vm7, %v5874_v51, %v5875_v53  ;;  %v7877_v31 = vld [vmem:[%s13581_s0 + $0x160] sm:$0xf]  ;;  %v5214_v53 = vshll.u32 %v7966_v40, 16 }
 0x358   :  { %4482 = vst.msk [vmem:[#allocation2 + $0x98] sm:$0xf] %vm4443_vm13, %v4328_v6  ;;  %v4334_v10 = vpop.permute.xlu1 %4333  ;;  %v5220_v9 = vrot.slane %v5218_v57, 4  ;;  %v8010_v40 = vld [vmem:[%s13581_s0 + $0x78] sm:$0xe] }
 0x359   :  { %5396 = vrot.lane.b32.xlu0 %v4761_v44, %s8371_s19  ;;  %4485 = vst.msk [vmem:[#allocation2 + $0xa4] sm:$0xf] %vm4443_vm13, %v4334_v10  ;;  %v7963_v44 = vld [vmem:[%s13581_s0 + $0x154] sm:$0xf]  ;;  %v12245_v33 = vrot.slane %v4806_v60, 5  ;;  %v4812_v8 = vrot.slane %v4810_v22, 4 }
 0x35a   :  { %5462 = vrot.lane.b32.xlu1 %v5155_v27, %s8371_s19  ;;  %v7916_v10 = vld [vmem:[%s13581_s0 + $0x80] sm:$0x1]  ;;  %v5190_v55 = vshll.u32 %v7963_v44, 16  ;;  %v7919_v60 = vld [vmem:[%s13581_s0 + $0x8c] sm:$0x1]  ;;  %v4804_v22 = vrot.slane %v4803_v2, 4 }
 0x35b   :  { %v4332_v15 = vpop.permute.xlu0 %4331  ;;  %v4813_v21 = vor.u32 %v4812_v8, %v12245_v33  ;;  %v4840_v8 = vshll.u32 %v7919_v60, 16  ;;  %v12313_v19 = vrot.slane %v5214_v53, 5  ;;  %v8058_v53 = vld [vmem:[%s13581_s0 + $0x150] sm:$0xe] }
 0x35c   :  { %4484 = vst.msk [vmem:[#allocation2 + $0xa0] sm:$0xf] %vm4443_vm13, %v4332_v15  ;;  %v4338_v58 = vpop.permute.xlu1 %4337  ;;  %v7962_v15 = vld [vmem:[%s13581_s0 + $0x150] sm:$0xf]  ;;  %v12267_v24 = vrot.slane %v5190_v55, 5 }
 0x35d   :  { %5460 = vrot.lane.b32.xlu0 %v5145_v1, %s8371_s19  ;;  %4487 = vst.msk [vmem:[#allocation2 + $0xac] sm:$0xf] %vm4443_vm13, %v4338_v58  ;;  %v5194_v1 = vshrl.u32 %v7963_v44, 16  ;;  %v4816_v58 = vshll.u32 %v7916_v10, 16  ;;  %v5184_v52 = vshll.u32 %v7962_v15, 16  ;;  %v4842_v49 = vrot.slane %v4840_v8, 5 }
 0x35e   :  { %5402 = vrot.lane.b32.xlu1 %v4795_v17, %s8371_s19  ;;  %v7876_v44 = vld [vmem:[%s13581_s0 + $0x15c] sm:$0xf]  ;;  %v7967_v55 = vld [vmem:[%s13581_s0 + $0x164] sm:$0x1]  ;;  %v5221_v61 = vor.u32 %v5220_v9, %v12313_v19  ;;  %v8013_v8 = vld [vmem:[%s13581_s0 + $0x84] sm:$0xe] }
 0x35f   :  { %v4336_v25 = vpop.permute.xlu0 %4335  ;;  %v5186_v42 = vrot.slane %v5184_v52, 5 }
 0x360   :  { %4486 = vst.msk [vmem:[#allocation2 + $0xa8] sm:$0xf] %vm4443_vm13, %v4336_v25  ;;  %v5373_v62 = vpop.permute.xlu1 %5372  ;;  %v5196_v25 = vrot.slane %v5194_v1, 4  ;;  %v4809_v1 = vsel %vm8413_vm2, %v4804_v22, %v12245_v33 }
 0x361   :  { %5400 = vrot.lane.b32.xlu0 %v4785_v50, %s8371_s19  ;;  %5565 = vst.msk [vmem:[#allocation2] sm:$0xf] %vm5564_vm14, %v5373_v62  ;;  %v7918_v50 = vld [vmem:[%s13581_s0 + $0x88] sm:$0xf]  ;;  %v7875_v62 = vld [vmem:[%s13581_s0 + $0x154] sm:$0xf] }
 0x362   :  { %5466 = vrot.lane.b32.xlu1 %v5179_v11, %s8371_s19  ;;  %v5181_v11 = vshrl.u32 %v7962_v15, 16  ;;  %v4830_v16 = vshll.u32 %v7918_v50, 16  ;;  %v4834_v30 = vshrl.u32 %v7918_v50, 16  ;;  %v5197_v41 = vor.u32 %v5196_v25, %v12267_v24  ;;  %v8011_v25 = vld [vmem:[%s13581_s0 + $0x7c] sm:$0xf] }
 0x363   :  { %v4340_v36 = vpop.permute.xlu0 %4339  ;;  %v5224_v50 = vshll.u32 %v7967_v55, 16 }
 0x364   :  { %4488 = vst.msk [vmem:[#allocation2 + $0xb0] sm:$0xf] %vm4443_vm13, %v4340_v36  ;;  %v5437_v7 = vpop.permute.xlu1 %5436  ;;  %v4814_v36 = vrot.slane %v4813_v21, 4  ;;  %v4836_v51 = vrot.slane %v4834_v30, 4  ;;  %v5198_v63 = vrot.slane %v5197_v41, 4 }
 0x365   :  { %5464 = vrot.lane.b32.xlu0 %v5169_v32, %s8371_s19  ;;  %5597 = vst.msk [vmem:[#allocation2 + $0x80] sm:$0xf] %vm5564_vm14, %v5437_v7  ;;  %v7917_v32 = vld [vmem:[%s13581_s0 + $0x84] sm:$0xf]  ;;  %v5183_v7 = vrot.slane %v5181_v11, 4  ;;  %v5226_v30 = vrot.slane %v5224_v50, 5 }
 0x366   :  { %6071 = vrot.lane.b32.xlu1 %v5869_v38, %s8372_s23  ;;  %v4818_v38 = vrot.slane %v4816_v58, 5  ;;  %v4824_v47 = vshll.u32 %v7917_v32, 16 }
 0x367   :  { %v5375_v13 = vpop.permute.xlu0 %5374  ;;  %v5187_v54 = vor.u32 %v5186_v42, %v5183_v7 }
 0x368   :  { %5566 = vst.msk [vmem:[#allocation2 + $0x4] sm:$0xf] %vm5564_vm14, %v5375_v13  ;;  %v5377_v39 = vpop.permute.xlu1 %5376  ;;  %v4819_v59 = vsel %vm8413_vm2, %v4814_v36, %v4818_v38  ;;  %v8012_v36 = vld [vmem:[%s13581_s0 + $0x80] sm:$0x1] }
 0x369   :  { %6069 = vrot.lane.b32.xlu0 %v5866_v46, %s8372_s23  ;;  %5567 = vst.msk [vmem:[#allocation2 + $0x8] sm:$0xf] %vm5564_vm14, %v5377_v39  ;;  %v4821_v46 = vshrl.u32 %v7917_v32, 16  ;;  %v5879_v32 = vrot.slane %v8011_v25, 5 }
 0x36a   :  { %6135 = vrot.lane.b32.xlu1 %v5981_v48, %s8372_s23  ;;  %v12295_v48 = vrot.slane %v4830_v16, 5  ;;  %v5222_v16 = vrot.slane %v5221_v61, 4 }
 0x36b   :  { %v5439_v27 = vpop.permute.xlu0 %5438  ;;  %v5881_v42 = vrot.slane %v5879_v32, 4 }
 0x36c   :  { %5598 = vst.msk [vmem:[#allocation2 + $0x84] sm:$0xf] %vm5564_vm14, %v5439_v27  ;;  %v5441_v6 = vpop.permute.xlu1 %5440  ;;  %v4823_v27 = vrot.slane %v4821_v46, 4  ;;  %v5227_v7 = vsel %vm8413_vm2, %v5222_v16, %v5226_v30  ;;  %v7968_v16 = vld [vmem:[%s13581_s0 + $0x168] sm:$0xf] }
 0x36d   :  { %6133 = vrot.lane.b32.xlu0 %v5978_v0, %s8372_s23  ;;  %5599 = vst.msk [vmem:[#allocation2 + $0x88] sm:$0xf] %vm5564_vm14, %v5441_v6  ;;  %v5202_v0 = vrot.slane %v5200_v5, 5  ;;  %v4837_v6 = vor.u32 %v4836_v51, %v12295_v48  ;;  %v8090_v51 = vrot.slane %v8010_v40, 9 }
 0x36e   :  { %6075 = vrot.lane.b32.xlu1 %v5876_v28, %s8372_s23  ;;  %v4826_v28 = vrot.slane %v4824_v47, 5  ;;  %v8060_v47 = vld [vmem:[%s13581_s0 + $0x158] sm:$0x1] }
 0x36f   :  { %v5379_v17 = vpop.permute.xlu0 %5378  ;;  %v5203_v14 = vsel %vm8413_vm2, %v5198_v63, %v5202_v0  ;;  %v4838_v58 = vrot.slane %v4837_v6, 4  ;;  %v5994_v60 = vrot.slane %v8060_v47, 5  ;;  %v8015_v0 = vld [vmem:[%s13581_s0 + $0x8c] sm:$0x1] }
 0x370   :  { %5568 = vst.msk [vmem:[#allocation2 + $0xc] sm:$0xf] %vm5564_vm14, %v5379_v17  ;;  %v6046_v20 = vpop.permute.xlu1 %6045  ;;  %v4827_v15 = vor.u32 %v4826_v28, %v4823_v27  ;;  %v5207_v17 = vrot.slane %v5205_v3, 4  ;;  %v5880_v27 = vsel %vm9101_vm7, %v8090_v51, %v5879_v32  ;;  %v8106_v28 = vrot.slane %v8058_v53, 9  ;;  %v7923_v51 = vld [vmem:[%s13581_s0 + $0x9c] sm:$0xf] }
 0x371   :  { %6073 = vrot.lane.b32.xlu0 %v5873_v37, %s8372_s23  ;;  %6238 = vst.msk [vmem:[#allocation2] sm:$0xf] %vm6237_vm15, %v6046_v20  ;;  %v5188_v37 = vrot.slane %v5187_v54, 4  ;;  %v12386_v54 = vld [vmem:[%s13581_s0 + $0x160] sm:$0xf]  ;;  %v5889_v6 = vrot.slane %v8015_v0, 5 }
 0x372   :  { %6139 = vrot.lane.b32.xlu1 %v5988_v18, %s8372_s23  ;;  %v5210_v18 = vrot.slane %v5208_v4, 5  ;;  %v4828_v52 = vrot.slane %v4827_v15, 4  ;;  %v8091_v15 = vrot.slane %v8013_v8, 9 }
 0x373   :  { %v5443_v45 = vpop.permute.xlu0 %5442  ;;  %v5193_v11 = vsel %vm8413_vm2, %v5188_v37, %v12267_v24  ;;  %v8059_v24 = vld [vmem:[%s13581_s0 + $0x154] sm:$0xf]  ;;  %v7920_v37 = vld [vmem:[%s13581_s0 + $0x90] sm:$0xf] }
 0x374   :  { %5600 = vst.msk [vmem:[#allocation2 + $0x8c] sm:$0xf] %vm5564_vm14, %v5443_v45  ;;  %v6110_v35 = vpop.permute.xlu1 %6109  ;;  %v4833_v38 = vsel %vm8413_vm2, %v4828_v52, %v12295_v48  ;;  %v4845_v25 = vshrl.u32 %v7920_v37, 16  ;;  %v7922_v52 = vld [vmem:[%s13581_s0 + $0x98] sm:$0x1] }
 0x375   :  { %6137 = vrot.lane.b32.xlu0 %v5985_v29, %s8372_s23  ;;  %6270 = vst.msk [vmem:[#allocation2 + $0x80] sm:$0xf] %vm6237_vm15, %v6110_v35  ;;  %v5211_v29 = vor.u32 %v5210_v18, %v5207_v17  ;;  %v7969_v17 = vld [vmem:[%s13581_s0 + $0x16c] sm:$0xf] }
 0x376   :  { %4349 = vrot.lane.b32.xlu1 %v7875_v62, %s8370_s16  ;;  %v4843_v62 = vsel %vm8413_vm2, %v4838_v58, %v4842_v49  ;;  %v8061_v49 = vld [vmem:[%s13581_s0 + $0x15c] sm:$0xe] }
 0x377   :  { %v6048_v13 = vpop.permute.xlu0 %6047  ;;  %v5212_v2 = vrot.slane %v5211_v29, 4  ;;  %v5238_v29 = vshll.u32 %v7969_v17, 16 }
 0x378   :  { %6239 = vst.msk [vmem:[#allocation2 + $0x4] sm:$0xf] %vm6237_vm15, %v6048_v13  ;;  %v6050_v39 = vpop.permute.xlu1 %6049  ;;  %v8014_v13 = vld [vmem:[%s13581_s0 + $0x88] sm:$0xf] }
 0x379   :  { %4347 = vrot.lane.b32.xlu0 %v7874_v43, %s8370_s16  ;;  %6240 = vst.msk [vmem:[#allocation2 + $0x8] sm:$0xf] %vm6237_vm15, %v6050_v39  ;;  %v5882_v43 = vrot.slane %v8012_v36, 5  ;;  %v5217_v48 = vsel %vm8413_vm2, %v5212_v2, %v12313_v19  ;;  %v5886_v22 = vrot.slane %v8014_v13, 5  ;;  %v5998_v19 = vrot.slane %v12386_v54, 5 }
 0x37a   :  { %4353 = vrot.lane.b32.xlu1 %v7877_v31, %s8370_s16  ;;  %v5991_v31 = vrot.slane %v8059_v24, 5  ;;  %v4847_v2 = vrot.slane %v4845_v25, 4  ;;  %v7879_v13 = vld [vmem:[%s13581_s0 + $0x16c] sm:$0xf] }
 0x37b   :  { %v6112_v56 = vpop.permute.xlu0 %6111  ;;  %v5883_v39 = vsel %vm9101_vm7, %v5881_v42, %v5882_v43  ;;  %v5232_v42 = vshll.u32 %v7968_v16, 16 }
 0x37c   :  { %6271 = vst.msk [vmem:[#allocation2 + $0x84] sm:$0xf] %vm6237_vm15, %v6112_v56  ;;  %v6114_v10 = vpop.permute.xlu1 %6113  ;;  %v5888_v56 = vrot.slane %v5886_v22, 4 }
 0x37d   :  { %4351 = vrot.lane.b32.xlu0 %v7876_v44, %s8370_s16  ;;  %6272 = vst.msk [vmem:[#allocation2 + $0x88] sm:$0xf] %vm6237_vm15, %v6114_v10  ;;  %v7921_v44 = vld [vmem:[%s13581_s0 + $0x94] sm:$0xf]  ;;  %v8063_v10 = vld [vmem:[%s13581_s0 + $0x164] sm:$0x1] }
 0x37e   :  { %5406 = vrot.lane.b32.xlu1 %v4819_v59, %s8371_s19  ;;  %v5993_v59 = vrot.slane %v5991_v31, 4  ;;  %v4854_v55 = vshll.u32 %v7921_v44, 16  ;;  %v6001_v58 = vrot.slane %v8063_v10, 5 }
 0x37f   :  { %v6052_v20 = vpop.permute.xlu0 %6051  ;;  %v8306_v21 = vld [vmem:[#allocation2] sm:$0xff]  }
 0x380   :  { %6241 = vst.msk [vmem:[#allocation2 + $0xc] sm:$0xf] %vm6237_vm15, %v6052_v20  ;;  %v5381_v33 = vpop.permute.xlu1 %5380  ;;  %8222 = vmatprep.mubr.msk.bf16.mxu0 %vm6546_vm0, %v8306_v21  ;;  %v5995_v4 = vsel %vm9101_vm7, %v5993_v59, %v5994_v60  ;;  %v5890_v20 = vsel %vm9101_vm7, %v5888_v56, %v5889_v6  ;;  %v6000_v21 = vrot.slane %v5998_v19, 4  ;;  %v12424_v50 = vrot.slane %v4854_v55, 5  ;;  %v7972_v60 = vld [vmem:[%s13581_s0 + $0x178] sm:$0xf] }
 0x381   :  { %5404 = vrot.lane.b32.xlu0 %v4809_v1, %s8371_s19  ;;  %5569 = vst.msk [vmem:[#allocation2 + $0x10] sm:$0xf] %vm5564_vm14, %v5381_v33  ;;  %v4858_v1 = vshrl.u32 %v7921_v44, 16  ;;  %v5234_v44 = vrot.slane %v5232_v42, 5 }
 0x382   :  { %5470 = vrot.lane.b32.xlu1 %v5203_v14, %s8371_s19  ;;  %v5992_v14 = vsel %vm9101_vm7, %v8106_v28, %v5991_v31  ;;  %v6002_v32 = vsel %vm9101_vm7, %v6000_v21, %v6001_v58  ;;  %v7970_v31 = vld [vmem:[%s13581_s0 + $0x170] sm:$0x1]  ;;  %v4869_v28 = vshrl.u32 %v7923_v51, 16 }
 0x383   :  { %v6116_v12 = vpop.permute.xlu0 %6115  ;;  %v8308_v45 = vld [vmem:[#allocation2 + $0x80] sm:$0xff]   ;;  %v4860_v33 = vrot.slane %v4858_v1, 4  ;;  %v5248_v0 = vshll.u32 %v7970_v31, 16 }
 0x384   :  { %6273 = vst.msk [vmem:[#allocation2 + $0x8c] sm:$0xf] %vm6237_vm15, %v6116_v12  ;;  %v5445_v35 = vpop.permute.xlu1 %5444  ;;  %8254 = vmatprep.mubr.msk.bf16.mxu1 %vm6546_vm0, %v8308_v45  ;;  %v5242_v12 = vshrl.u32 %v7969_v17, 16  ;;  %v5887_v45 = vsel %vm9101_vm7, %v8091_v15, %v5886_v22  ;;  %v7881_v22 = vld [vmem:[%s13581_s0 + $0x178] sm:$0xf] }
 0x385   :  { %5468 = vrot.lane.b32.xlu0 %v5193_v11, %s8371_s19  ;;  %5601 = vst.msk [vmem:[#allocation2 + $0x90] sm:$0xf] %vm5564_vm14, %v5445_v35  ;;  %v4848_v11 = vshll.u32 %v7920_v37, 16  ;;  %v7924_v35 = vld [vmem:[%s13581_s0 + $0xa0] sm:$0xf]  ;;  %v4861_v24 = vor.u32 %v4860_v33, %v12424_v50  ;;  %v5250_v15 = vrot.slane %v5248_v0, 5 }
 0x386   :  { %5410 = vrot.lane.b32.xlu1 %v4843_v62, %s8371_s19  ;;  %v8107_v62 = vrot.slane %v8061_v49, 9  ;;  %v7925_v1 = vld [vmem:[%s13581_s0 + $0xa4] sm:$0x1] }
 0x387   :  { %v5383_v41 = vpop.permute.xlu0 %5382  ;;  %v8309_v5 = vld [vmem:[#allocation2 + $0x8] sm:$0xff]   ;;  %v4850_v40 = vrot.slane %v4848_v11, 5  ;;  %v4888_v11 = vshll.u32 %v7925_v1, 16 }
 0x388   :  { %5570 = vst.msk [vmem:[#allocation2 + $0x14] sm:$0xf] %vm5564_vm14, %v5383_v41  ;;  %v5385_v46 = vpop.permute.xlu1 %5384  ;;  %8223 = vmatmul.mubr.msk.bf16.vlgmr.msra.gmra.mxu0 %vm6546_vm0, %v8309_v5  ;;  %v12446_v41 = vrot.slane %v5238_v29, 5  ;;  %v5244_v5 = vrot.slane %v5242_v12, 4  ;;  %v5999_v43 = vsel %vm9101_vm7, %v8107_v62, %v5998_v19  ;;  %v5262_v19 = vshll.u32 %v7972_v60, 16 }
 0x389   :  { %5408 = vrot.lane.b32.xlu0 %v4833_v38, %s8371_s19  ;;  %5571 = vst.msk [vmem:[#allocation2 + $0x18] sm:$0xf] %vm5564_vm14, %v5385_v46  ;;  %v4864_v38 = vshll.u32 %v7922_v52, 16  ;;  %v4878_v46 = vshll.u32 %v7924_v35, 16  ;;  %v4851_v59 = vor.u32 %v4850_v40, %v4847_v2  ;;  %v4890_v40 = vrot.slane %v4888_v11, 5 }
 0x38a   :  { %5474 = vrot.lane.b32.xlu1 %v5227_v7, %s8371_s19  ;;  %v5229_v7 = vshrl.u32 %v7968_v16, 16  ;;  %v12493_v52 = vrot.slane %v5262_v19, 5 }
 0x38b   :  { %v5447_v57 = vpop.permute.xlu0 %5446  ;;  %v8310_v34 = vld [vmem:[#allocation2 + $0x88] sm:$0xff]   ;;  %v4852_v55 = vrot.slane %v4851_v59, 4 }
 0x38c   :  { %5602 = vst.msk [vmem:[#allocation2 + $0x94] sm:$0xf] %vm5564_vm14, %v5447_v57  ;;  %v5449_v63 = vpop.permute.xlu1 %5448  ;;  %8255 = vmatmul.mubr.msk.bf16.vlgmr.msra.gmra.mxu1 %vm6546_vm0, %v8310_v34  ;;  %v7878_v57 = vld [vmem:[%s13581_s0 + $0x168] sm:$0xf]  ;;  %v4862_v34 = vrot.slane %v4861_v24, 4  ;;  %v5231_v54 = vrot.slane %v5229_v7, 4 }
 0x38d   :  { %5472 = vrot.lane.b32.xlu0 %v5217_v48, %s8371_s19  ;;  %5603 = vst.msk [vmem:[#allocation2 + $0x98] sm:$0xf] %vm5564_vm14, %v5449_v63  ;;  %v4882_v48 = vshrl.u32 %v7924_v35, 16  ;;  %v5245_v63 = vor.u32 %v5244_v5, %v12446_v41  ;;  %v4857_v62 = vsel %vm8413_vm2, %v4852_v55, %v12424_v50  ;;  %v8017_v50 = vld [vmem:[%s13581_s0 + $0x94] sm:$0xf] }
 0x38e   :  { %6079 = vrot.lane.b32.xlu1 %v5883_v39, %s8372_s23  ;;  %v4866_v39 = vrot.slane %v4864_v38, 5  ;;  %v5235_v17 = vor.u32 %v5234_v44, %v5231_v54  ;;  %v8016_v44 = vld [vmem:[%s13581_s0 + $0x90] sm:$0xe]  ;;  %v8064_v55 = vld [vmem:[%s13581_s0 + $0x168] sm:$0xe] }
 0x38f   :  { %v5387_v3 = vpop.permute.xlu0 %5386  ;;  %v4884_v8 = vrot.slane %v4882_v48, 4 }
 0x390   :  { %5572 = vst.msk [vmem:[#allocation2 + $0x1c] sm:$0xf] %vm5564_vm14, %v5387_v3  ;;  %v6054_v9 = vpop.permute.xlu1 %6053  ;;  %v4872_v3 = vshll.u32 %v7923_v51, 16  ;;  %v4867_v37 = vsel %vm8413_vm2, %v4862_v34, %v4866_v39  ;;  %v8018_v39 = vld [vmem:[%s13581_s0 + $0x98] sm:$0x1] }
 0x391   :  { %6077 = vrot.lane.b32.xlu0 %v5880_v27, %s8372_s23  ;;  %6242 = vst.msk [vmem:[#allocation2 + $0x10] sm:$0xf] %vm6237_vm15, %v6054_v9  ;;  %v12474_v27 = vrot.slane %v4878_v46, 5  ;;  %v5266_v9 = vshrl.u32 %v7972_v60, 16  ;;  %v5896_v54 = vrot.slane %v8018_v39, 5 }
 0x392   :  { %6143 = vrot.lane.b32.xlu1 %v5995_v4, %s8372_s23  ;;  %v7971_v4 = vld [vmem:[%s13581_s0 + $0x174] sm:$0xf]  ;;  %v4874_v21 = vrot.slane %v4872_v3, 5 }
 0x393   :  { %v5451_v18 = vpop.permute.xlu0 %5450  ;;  %v5253_v58 = vshrl.u32 %v7971_v4, 16  ;;  %v5256_v49 = vshll.u32 %v7971_v4, 16  ;;  %v4885_v25 = vor.u32 %v4884_v8, %v12474_v27  ;;  %v5268_v29 = vrot.slane %v5266_v9, 4  ;;  %v8066_v4 = vld [vmem:[%s13581_s0 + $0x170] sm:$0x1] }
 0x394   :  { %5604 = vst.msk [vmem:[#allocation2 + $0x9c] sm:$0xf] %vm5564_vm14, %v5451_v18  ;;  %v6118_v61 = vpop.permute.xlu1 %6117  ;;  %v7880_v18 = vld [vmem:[%s13581_s0 + $0x174] sm:$0xf] }
 0x395   :  { %6141 = vrot.lane.b32.xlu0 %v5992_v14, %s8372_s23  ;;  %6274 = vst.msk [vmem:[#allocation2 + $0x90] sm:$0xf] %vm6237_vm15, %v6118_v61  ;;  %v5246_v14 = vrot.slane %v5245_v63, 4  ;;  %v5255_v35 = vrot.slane %v5253_v58, 4  ;;  %v4886_v2 = vrot.slane %v4885_v25, 4  ;;  %v5269_v5 = vor.u32 %v5268_v29, %v12493_v52 }
 0x396   :  { %6083 = vrot.lane.b32.xlu1 %v5890_v20, %s8372_s23  ;;  %v4871_v20 = vrot.slane %v4869_v28, 4 }
 0x397   :  { %v6056_v30 = vpop.permute.xlu0 %6055  ;;  %v5251_v16 = vsel %vm8413_vm2, %v5246_v14, %v5250_v15  ;;  %v4891_v48 = vsel %vm8413_vm2, %v4886_v2, %v4890_v40  ;;  %v5270_v51 = vrot.slane %v5269_v5, 4  ;;  %v8021_v14 = vld [vmem:[%s13581_s0 + $0xa4] sm:$0x1]  ;;  %v12566_v15 = vld [vmem:[%s13581_s0 + $0x178] sm:$0xf] }
 0x398   :  { %6243 = vst.msk [vmem:[#allocation2 + $0x14] sm:$0xf] %vm6237_vm15, %v6056_v30  ;;  %v6058_v36 = vpop.permute.xlu1 %6057  ;;  %v5236_v30 = vrot.slane %v5235_v17, 4  ;;  %v7927_v17 = vld [vmem:[%s13581_s0 + $0xac] sm:$0xf]  ;;  %v6012_v25 = vrot.slane %v12566_v15, 5 }
 0x399   :  { %6081 = vrot.lane.b32.xlu0 %v5887_v45, %s8372_s23  ;;  %6244 = vst.msk [vmem:[#allocation2 + $0x18] sm:$0xf] %vm6237_vm15, %v6058_v36  ;;  %v7973_v45 = vld [vmem:[%s13581_s0 + $0x17c] sm:$0x1]  ;;  %v5258_v36 = vrot.slane %v5256_v49, 5  ;;  %v4902_v29 = vshll.u32 %v7927_v17, 16 }
 0x39a   :  { %6147 = vrot.lane.b32.xlu1 %v6002_v32, %s8372_s23  ;;  %v4875_v32 = vor.u32 %v4874_v21, %v4871_v20  ;;  %v5272_v7 = vshll.u32 %v7973_v45, 16  ;;  %v8108_v20 = vrot.slane %v8064_v55, 9  ;;  %v7926_v45 = vld [vmem:[%s13581_s0 + $0xa8] sm:$0xf] }
 0x39b   :  { %v6120_v47 = vpop.permute.xlu0 %6119  ;;  %v5259_v46 = vor.u32 %v5258_v36, %v5255_v35  ;;  %v6014_v36 = vrot.slane %v6012_v25, 4  ;;  %v12603_v40 = vrot.slane %v4902_v29, 5 }
 0x39c   :  { %6275 = vst.msk [vmem:[#allocation2 + $0x94] sm:$0xf] %vm6237_vm15, %v6120_v47  ;;  %v6122_v53 = vpop.permute.xlu1 %6121  ;;  %v4876_v31 = vrot.slane %v4875_v32, 4 }
 0x39d   :  { %6145 = vrot.lane.b32.xlu0 %v5999_v43, %s8372_s23  ;;  %6276 = vst.msk [vmem:[#allocation2 + $0x98] sm:$0xf] %vm6237_vm15, %v6122_v53  ;;  %v5241_v43 = vsel %vm8413_vm2, %v5236_v30, %v12446_v41  ;;  %v5274_v53 = vrot.slane %v5272_v7, 5  ;;  %v8065_v41 = vld [vmem:[%s13581_s0 + $0x16c] sm:$0xf]  ;;  %v5260_v60 = vrot.slane %v5259_v46, 4 }
 0x39e   :  { %4357 = vrot.lane.b32.xlu1 %v7879_v13, %s8370_s16  ;;  %v4881_v59 = vsel %vm8413_vm2, %v4876_v31, %v12474_v27  ;;  %v6005_v28 = vrot.slane %v8065_v41, 5  ;;  %v8020_v27 = vld [vmem:[%s13581_s0 + $0xa0] sm:$0xf]  ;;  %v7975_v30 = vld [vmem:[%s13581_s0 + $0x184] sm:$0xf]  ;;  %v4893_v7 = vshrl.u32 %v7926_v45, 16 }
 0x39f   :  { %v6060_v56 = vpop.permute.xlu0 %6059  ;;  %v8311_v6 = vld [vmem:[#allocation2 + $0x10] sm:$0xff]   ;;  %v5275_v63 = vsel %vm8413_vm2, %v5270_v51, %v5274_v53  ;;  %v5900_v1 = vrot.slane %v8020_v27, 5  ;;  %v5290_v31 = vshrl.u32 %v7975_v30, 16 }
 0x3a0   :  { %6245 = vst.msk [vmem:[#allocation2 + $0x1c] sm:$0xf] %vm6237_vm15, %v6060_v56  ;;  %v5389_v10 = vpop.permute.xlu1 %5388  ;;  %8226 = vmatprep.mubr.msk.bf16.mxu0 %vm6546_vm0, %v8311_v6  ;;  %v5265_v56 = vsel %vm8413_vm2, %v5260_v60, %v12493_v52  ;;  %v8092_v6 = vrot.slane %v8016_v44, 9  ;;  %v6007_v9 = vrot.slane %v6005_v28, 4  ;;  %v8069_v52 = vld [vmem:[%s13581_s0 + $0x17c] sm:$0x1] }
 0x3a1   :  { %4355 = vrot.lane.b32.xlu0 %v7878_v57, %s8370_s16  ;;  %5573 = vst.msk [vmem:[#allocation2 + $0x20] sm:$0xf] %vm5564_vm14, %v5389_v10  ;;  %v5893_v57 = vrot.slane %v8017_v50, 5  ;;  %v6008_v10 = vrot.slane %v8066_v4, 5  ;;  %v5902_v49 = vrot.slane %v5900_v1, 4 }
 0x3a2   :  { %4361 = vrot.lane.b32.xlu1 %v7881_v22, %s8370_s16  ;;  %v7928_v50 = vld [vmem:[%s13581_s0 + $0xb0] sm:$0x1] }
 0x3a3   :  { %v6124_v61 = vpop.permute.xlu0 %6123  ;;  %v8312_v33 = vld [vmem:[#allocation2 + $0x90] sm:$0xff]   ;;  %v5895_v0 = vrot.slane %v5893_v57, 4  ;;  %v6009_v58 = vsel %vm9101_vm7, %v6007_v9, %v6008_v10  ;;  %v4912_v41 = vshll.u32 %v7928_v50, 16  ;;  %v7882_v9 = vld [vmem:[%s13581_s0 + $0x180] sm:$0xf] }
 0x3a4   :  { %6277 = vst.msk [vmem:[#allocation2 + $0x9c] sm:$0xf] %vm6237_vm15, %v6124_v61  ;;  %v5453_v12 = vpop.permute.xlu1 %5452  ;;  %8258 = vmatprep.mubr.msk.bf16.mxu1 %vm6546_vm0, %v8312_v33  ;;  %v5903_v61 = vrot.slane %v8021_v14, 5  ;;  %v8019_v33 = vld [vmem:[%s13581_s0 + $0x9c] sm:$0xe] }
 0x3a5   :  { %4359 = vrot.lane.b32.xlu0 %v7880_v18, %s8370_s16  ;;  %5605 = vst.msk [vmem:[#allocation2 + $0xa0] sm:$0xf] %vm5564_vm14, %v5453_v12  ;;  %v5897_v19 = vsel %vm9101_vm7, %v5895_v0, %v5896_v54  ;;  %v5894_v18 = vsel %vm9101_vm7, %v8092_v6, %v5893_v57  ;;  %v4906_v12 = vshrl.u32 %v7927_v17, 16  ;;  %v7930_v57 = vld [vmem:[%s13581_s0 + $0xb8] sm:$0xf]  ;;  %v4914_v55 = vrot.slane %v4912_v41, 5 }
 0x3a6   :  { %5414 = vrot.lane.b32.xlu1 %v4867_v37, %s8371_s19  ;;  %v5904_v35 = vsel %vm9101_vm7, %v5902_v49, %v5903_v61  ;;  %v4926_v4 = vshll.u32 %v7930_v57, 16  ;;  %v4930_v6 = vshrl.u32 %v7930_v57, 16  ;;  %v7885_v14 = vld [vmem:[%s13581_s0 + $0x190] sm:$0xf]  ;;  %v7977_v61 = vld [vmem:[%s13581_s0 + $0x18c] sm:$0xf] }
 0x3a7   :  { %v5391_v24 = vpop.permute.xlu0 %5390  ;;  %v8313_v38 = vld [vmem:[#allocation2 + $0x18] sm:$0xff]   ;;  %v4908_v5 = vrot.slane %v4906_v12, 4 }
 0x3a8   :  { %5574 = vst.msk [vmem:[#allocation2 + $0x24] sm:$0xf] %vm5564_vm14, %v5391_v24  ;;  %v5393_v42 = vpop.permute.xlu1 %5392  ;;  %8227 = vmatmul.mubr.msk.bf16.gmra.mxu0 %vm6546_vm0, %v8313_v38  ;;  %v6015_v24 = vrot.slane %v8069_v52, 5  ;;  %v8067_v38 = vld [vmem:[%s13581_s0 + $0x174] sm:$0xe] }
 0x3a9   :  { %5412 = vrot.lane.b32.xlu0 %v4857_v62, %s8371_s19  ;;  %5575 = vst.msk [vmem:[#allocation2 + $0x28] sm:$0xf] %vm5564_vm14, %v5393_v42  ;;  %v6006_v62 = vsel %vm9101_vm7, %v8108_v20, %v6005_v28  ;;  %v4896_v42 = vshll.u32 %v7926_v45, 16  ;;  %v4909_v39 = vor.u32 %v4908_v5, %v12603_v40  ;;  %v7883_v28 = vld [vmem:[%s13581_s0 + $0x184] sm:$0xf]  ;;  %v5304_v5 = vshll.u32 %v7977_v61, 16 }
 0x3aa   :  { %5478 = vrot.lane.b32.xlu1 %v5251_v16, %s8371_s19  ;;  %v8093_v16 = vrot.slane %v8019_v33, 9  ;;  %v6016_v53 = vsel %vm9101_vm7, %v6014_v36, %v6015_v24  ;;  %v7884_v36 = vld [vmem:[%s13581_s0 + $0x18c] sm:$0xf] }
 0x3ab   :  { %v5455_v47 = vpop.permute.xlu0 %5454  ;;  %v8314_v13 = vld [vmem:[#allocation2 + $0x98] sm:$0xff]   ;;  %v4898_v60 = vrot.slane %v4896_v42, 5  ;;  %v4910_v10 = vrot.slane %v4909_v39, 4  ;;  %v5306_v39 = vrot.slane %v5304_v5, 5  ;;  %v8025_v5 = vld [vmem:[%s13581_s0 + $0xb4] sm:$0xe] }
 0x3ac   :  { %5606 = vst.msk [vmem:[#allocation2 + $0xa4] sm:$0xf] %vm5564_vm14, %v5455_v47  ;;  %v5457_v34 = vpop.permute.xlu1 %5456  ;;  %8259 = vmatmul.mubr.msk.bf16.gmra.mxu1 %vm6546_vm0, %v8314_v13  ;;  %v5901_v46 = vsel %vm9101_vm7, %v8093_v16, %v5900_v1  ;;  %v8109_v47 = vrot.slane %v8067_v38, 9  ;;  %v7974_v13 = vld [vmem:[%s13581_s0 + $0x180] sm:$0xf] }
 0x3ad   :  { %5476 = vrot.lane.b32.xlu0 %v5241_v43, %s8371_s19  ;;  %5607 = vst.msk [vmem:[#allocation2 + $0xa8] sm:$0xf] %vm5564_vm14, %v5457_v34  ;;  %v5286_v43 = vshll.u32 %v7975_v30, 16  ;;  %v5277_v0 = vshrl.u32 %v7974_v13, 16  ;;  %v5280_v54 = vshll.u32 %v7974_v13, 16  ;;  %v4915_v16 = vsel %vm8413_vm2, %v4910_v10, %v4914_v55 }
 0x3ae   :  { %5418 = vrot.lane.b32.xlu1 %v4891_v48, %s8371_s19  ;;  %v6013_v44 = vsel %vm9101_vm7, %v8109_v47, %v6012_v25  ;;  %v7979_v13 = vld [vmem:[%s13581_s0 + $0x194] sm:$0x1] }
 0x3af   :  { %v5395_v22 = vpop.permute.xlu0 %5394  ;;  %v5282_v20 = vrot.slane %v5280_v54, 5 }
 0x3b0   :  { %5576 = vst.msk [vmem:[#allocation2 + $0x2c] sm:$0xf] %vm5564_vm14, %v5395_v22  ;;  %v6062_v3 = vpop.permute.xlu1 %6061  ;;  %v12626_v22 = vrot.slane %v5286_v43, 5 }
 0x3b1   :  { %5416 = vrot.lane.b32.xlu0 %v4881_v59, %s8371_s19  ;;  %6246 = vst.msk [vmem:[#allocation2 + $0x20] sm:$0xf] %vm6237_vm15, %v6062_v3  ;;  %v4895_v59 = vrot.slane %v4893_v7, 4  ;;  %v7976_v3 = vld [vmem:[%s13581_s0 + $0x188] sm:$0x1] }
 0x3b2   :  { %5482 = vrot.lane.b32.xlu1 %v5275_v63, %s8371_s19  ;;  %v5292_v63 = vrot.slane %v5290_v31, 4  ;;  %v5296_v17 = vshll.u32 %v7976_v3, 16 }
 0x3b3   :  { %v5459_v8 = vpop.permute.xlu0 %5458  ;;  %v4899_v1 = vor.u32 %v4898_v60, %v4895_v59 }
 0x3b4   :  { %5608 = vst.msk [vmem:[#allocation2 + $0xac] sm:$0xf] %vm5564_vm14, %v5459_v8  ;;  %v6126_v37 = vpop.permute.xlu1 %6125  ;;  %v7929_v8 = vld [vmem:[%s13581_s0 + $0xb4] sm:$0xf]  ;;  %v5293_v15 = vor.u32 %v5292_v63, %v12626_v22 }
 0x3b5   :  { %5480 = vrot.lane.b32.xlu0 %v5265_v56, %s8371_s19  ;;  %6278 = vst.msk [vmem:[#allocation2 + $0xa0] sm:$0xf] %vm6237_vm15, %v6126_v37  ;;  %v7978_v37 = vld [vmem:[%s13581_s0 + $0x190] sm:$0xf]  ;;  %v4920_v49 = vshll.u32 %v7929_v8, 16  ;;  %v4900_v45 = vrot.slane %v4899_v1, 4 }
 0x3b6   :  { %6087 = vrot.lane.b32.xlu1 %v5897_v19, %s8372_s23  ;;  %v5310_v52 = vshll.u32 %v7978_v37, 16  ;;  %v5314_v29 = vshrl.u32 %v7978_v37, 16  ;;  %v5294_v30 = vrot.slane %v5293_v15, 4 }
 0x3b7   :  { %v6064_v21 = vpop.permute.xlu0 %6063  ;;  %v4922_v38 = vrot.slane %v4920_v49, 5 }
 0x3b8   :  { %6247 = vst.msk [vmem:[#allocation2 + $0x24] sm:$0xf] %vm6237_vm15, %v6064_v21  ;;  %v6066_v11 = vpop.permute.xlu1 %6065  ;;  %v12655_v21 = vrot.slane %v4926_v4, 5  ;;  %v12674_v31 = vrot.slane %v5310_v52, 5 }
 0x3b9   :  { %6085 = vrot.lane.b32.xlu0 %v5894_v18, %s8372_s23  ;;  %6248 = vst.msk [vmem:[#allocation2 + $0x28] sm:$0xf] %vm6237_vm15, %v6066_v11  ;;  %v5279_v18 = vrot.slane %v5277_v0, 4  ;;  %v4932_v11 = vrot.slane %v4930_v6, 4  ;;  %v5320_v0 = vshll.u32 %v7979_v13, 16  ;;  %v8095_v13 = vrot.slane %v8025_v5, 9 }
 0x3ba   :  { %6151 = vrot.lane.b32.xlu1 %v6009_v58, %s8372_s23  ;;  %v4917_v58 = vshrl.u32 %v7929_v8, 16 }
 0x3bb   :  { %v6128_v32 = vpop.permute.xlu0 %6127  ;;  %v4933_v50 = vor.u32 %v4932_v11, %v12655_v21  ;;  %v5322_v6 = vrot.slane %v5320_v0, 5 }
 0x3bc   :  { %6279 = vst.msk [vmem:[#allocation2 + $0xa4] sm:$0xf] %vm6237_vm15, %v6128_v32  ;;  %v6130_v2 = vpop.permute.xlu1 %6129  ;;  %v5298_v32 = vrot.slane %v5296_v17, 5  ;;  %v4919_v24 = vrot.slane %v4917_v58, 4  ;;  %v8022_v17 = vld [vmem:[%s13581_s0 + $0xa8] sm:$0xe] }
 0x3bd   :  { %6149 = vrot.lane.b32.xlu0 %v6006_v62, %s8372_s23  ;;  %6280 = vst.msk [vmem:[#allocation2 + $0xa8] sm:$0xf] %vm6237_vm15, %v6130_v2  ;;  %v7931_v62 = vld [vmem:[%s13581_s0 + $0xbc] sm:$0x1]  ;;  %v5301_v2 = vshrl.u32 %v7977_v61, 16  ;;  %v4934_v59 = vrot.slane %v4933_v50, 4 }
 0x3be   :  { %6091 = vrot.lane.b32.xlu1 %v5904_v35, %s8372_s23  ;;  %v5283_v35 = vor.u32 %v5282_v20, %v5279_v18  ;;  %v4936_v43 = vshll.u32 %v7931_v62, 16  ;;  %v4923_v57 = vor.u32 %v4922_v38, %v4919_v24  ;;  %v8072_v58 = vld [vmem:[%s13581_s0 + $0x188] sm:$0x1]  ;;  %v8094_v61 = vrot.slane %v8022_v17, 9  ;;  %v8027_v62 = vld [vmem:[%s13581_s0 + $0xbc] sm:$0x1] }
 0x3bf   :  { %v6068_v48 = vpop.permute.xlu0 %6067  ;;  %v8315_v51 = vld [vmem:[#allocation2 + $0x20] sm:$0xff]   ;;  %v6022_v52 = vrot.slane %v8072_v58, 5  ;;  %v8075_v50 = vld [vmem:[%s13581_s0 + $0x194] sm:$0x1]  ;;  %v7887_v58 = vld [vmem:[%s13581_s0 + $0x19c] sm:$0xf] }
 0x3c0   :  { %6249 = vst.msk [vmem:[#allocation2 + $0x2c] sm:$0xf] %vm6237_vm15, %v6068_v48  ;;  %v4342_v34 = vpop.permute.xlu1 %4341  ;;  %8230 = vmatprep.mubr.msk.bf16.mxu0 %vm6546_vm0, %v8315_v51  ;;  %v4905_v48 = vsel %vm8413_vm2, %v4900_v45, %v12603_v40  ;;  %v5299_v51 = vsel %vm8413_vm2, %v5294_v30, %v5298_v32  ;;  %v4938_v60 = vrot.slane %v4936_v43, 5  ;;  %v8023_v40 = vld [vmem:[%s13581_s0 + $0xac] sm:$0xf] }
 0x3c1   :  { %6089 = vrot.lane.b32.xlu0 %v5901_v46, %s8372_s23  ;;  %4489 = vst.msk [vmem:[#allocation2 + $0xb4] sm:$0xf] %vm4443_vm13, %v4342_v34  ;;  %v5316_v46 = vrot.slane %v5314_v29, 4  ;;  %v5303_v34 = vrot.slane %v5301_v2, 4  ;;  %v5907_v8 = vrot.slane %v8023_v40, 5  ;;  %v5917_v2 = vrot.slane %v8027_v62, 5 }
 0x3c2   :  { %6155 = vrot.lane.b32.xlu1 %v6016_v53, %s8372_s23  ;;  %v5284_v53 = vrot.slane %v5283_v35, 4  ;;  %v8070_v29 = vld [vmem:[%s13581_s0 + $0x180] sm:$0xe]  ;;  %v7933_v30 = vld [vmem:[%s13581_s0 + $0xc4] sm:$0xf] }
 0x3c3   :  { %v6132_v27 = vpop.permute.xlu0 %6131  ;;  %v8316_v56 = vld [vmem:[#allocation2 + $0xa0] sm:$0xff]   ;;  %v5317_v63 = vor.u32 %v5316_v46, %v12674_v31  ;;  %v5307_v3 = vor.u32 %v5306_v39, %v5303_v34  ;;  %v5908_v32 = vsel %vm9101_vm7, %v8094_v61, %v5907_v8  ;;  %v8110_v35 = vrot.slane %v8070_v29, 9  ;;  %v7934_v40 = vld [vmem:[%s13581_s0 + $0xc8] sm:$0x1]  ;;  %v7935_v61 = vld [vmem:[%s13581_s0 + $0xcc] sm:$0xf] }
 0x3c4   :  { %6281 = vst.msk [vmem:[#allocation2 + $0xac] sm:$0xf] %vm6237_vm15, %v6132_v27  ;;  %v4346_v19 = vpop.permute.xlu1 %4345  ;;  %8262 = vmatprep.mubr.msk.bf16.mxu1 %vm6546_vm0, %v8316_v56  ;;  %v4939_v27 = vsel %vm8413_vm2, %v4934_v59, %v4938_v60  ;;  %v4950_v43 = vshll.u32 %v7933_v30, 16  ;;  %v7932_v46 = vld [vmem:[%s13581_s0 + $0xc0] sm:$0xf]  ;;  %v4968_v5 = vshll.u32 %v7935_v61, 16 }
 0x3c5   :  { %6153 = vrot.lane.b32.xlu0 %v6013_v44, %s8372_s23  ;;  %4491 = vst.msk [vmem:[#allocation2 + $0xbc] sm:$0xf] %vm4443_vm13, %v4346_v19  ;;  %v5289_v44 = vsel %vm8413_vm2, %v5284_v53, %v12626_v22  ;;  %v5318_v56 = vrot.slane %v5317_v63, 4  ;;  %v8071_v22 = vld [vmem:[%s13581_s0 + $0x184] sm:$0xf]  ;;  %v5308_v55 = vrot.slane %v5307_v3, 4 }
 0x3c6   :  { %4365 = vrot.lane.b32.xlu1 %v7883_v28, %s8370_s16  ;;  %v4924_v28 = vrot.slane %v4923_v57, 4  ;;  %v6019_v18 = vrot.slane %v8071_v22, 5  ;;  %v12782_v60 = vrot.slane %v4950_v43, 5  ;;  %v4941_v0 = vshrl.u32 %v7932_v46, 16 }
 0x3c7   :  { %v4344_v33 = vpop.permute.xlu0 %4343  ;;  %v8317_v25 = vld [vmem:[#allocation2 + $0x28] sm:$0xff]   ;;  %v5323_v37 = vsel %vm8413_vm2, %v5318_v56, %v5322_v6  ;;  %v5313_v49 = vsel %vm8413_vm2, %v5308_v55, %v12674_v31  ;;  %v4954_v31 = vshrl.u32 %v7933_v30, 16 }
 0x3c8   :  { %4490 = vst.msk [vmem:[#allocation2 + $0xb8] sm:$0xf] %vm4443_vm13, %v4344_v33  ;;  %v5399_v12 = vpop.permute.xlu1 %5398  ;;  %8231 = vmatmul.mubr.msk.bf16.gmra.mxu0 %vm6546_vm0, %v8317_v25  ;;  %v4929_v10 = vsel %vm8413_vm2, %v4924_v28, %v12655_v21  ;;  %v8026_v21 = vld [vmem:[%s13581_s0 + $0xb8] sm:$0xf]  ;;  %v6021_v11 = vrot.slane %v6019_v18, 4  ;;  %v4943_v55 = vrot.slane %v4941_v0, 4 }
 0x3c9   :  { %4363 = vrot.lane.b32.xlu0 %v7882_v9, %s8370_s16  ;;  %5578 = vst.msk [vmem:[#allocation2 + $0x34] sm:$0xf] %vm5564_vm14, %v5399_v12  ;;  %v8024_v9 = vld [vmem:[%s13581_s0 + $0xb0] sm:$0x1]  ;;  %v5914_v12 = vrot.slane %v8026_v21, 5  ;;  %v4956_v63 = vrot.slane %v4954_v31, 4 }
 0x3ca   :  { %4369 = vrot.lane.b32.xlu1 %v7885_v14, %s8370_s16  ;;  %v5909_v14 = vrot.slane %v5907_v8, 4  ;;  %v5910_v15 = vrot.slane %v8024_v9, 5  ;;  %v6023_v24 = vsel %vm9101_vm7, %v6021_v11, %v6022_v52  ;;  %v7984_v11 = vld [vmem:[%s13581_s0 + $0x1a8] sm:$0xf]  ;;  %v7983_v31 = vld [vmem:[%s13581_s0 + $0x1a4] sm:$0xf] }
 0x3cb   :  { %v5397_v7 = vpop.permute.xlu0 %5396  ;;  %v8318_v42 = vld [vmem:[#allocation2 + $0xa8] sm:$0xff]   ;;  %v5916_v38 = vrot.slane %v5914_v12, 4  ;;  %v5915_v3 = vsel %vm9101_vm7, %v8095_v13, %v5914_v12  ;;  %v4957_v22 = vor.u32 %v4956_v63, %v12782_v60  ;;  %v5362_v43 = vshrl.u32 %v7984_v11, 16  ;;  %v7937_v13 = vld [vmem:[%s13581_s0 + $0xd4] sm:$0x1] }
 0x3cc   :  { %5577 = vst.msk [vmem:[#allocation2 + $0x30] sm:$0xf] %vm5564_vm14, %v5397_v7  ;;  %v5463_v47 = vpop.permute.xlu1 %5462  ;;  %8263 = vmatmul.mubr.msk.bf16.gmra.mxu1 %vm6546_vm0, %v8318_v42  ;;  %v5911_v25 = vsel %vm9101_vm7, %v5909_v14, %v5910_v15  ;;  %v5352_v63 = vshll.u32 %v7983_v31, 16 }
 0x3cd   :  { %4367 = vrot.lane.b32.xlu0 %v7884_v36, %s8370_s16  ;;  %5610 = vst.msk [vmem:[#allocation2 + $0xb4] sm:$0xf] %vm5564_vm14, %v5463_v47  ;;  %v6020_v47 = vsel %vm9101_vm7, %v8110_v35, %v6019_v18  ;;  %v5918_v34 = vsel %vm9101_vm7, %v5916_v38, %v5917_v2  ;;  %v4958_v29 = vrot.slane %v4957_v22, 4 }
 0x3ce   :  { %5422 = vrot.lane.b32.xlu1 %v4915_v16, %s8371_s19  ;;  %v12745_v16 = vld [vmem:[%s13581_s0 + $0x190] sm:$0xf] }
 0x3cf   :  { %v5461_v41 = vpop.permute.xlu0 %5460  ;;  %v6026_v7 = vrot.slane %v12745_v16, 5  ;;  %v7886_v16 = vld [vmem:[%s13581_s0 + $0x198] sm:$0xf] }
 0x3d0   :  { %5609 = vst.msk [vmem:[#allocation2 + $0xb0] sm:$0xf] %vm5564_vm14, %v5461_v41  ;;  %v5403_v54 = vpop.permute.xlu1 %5402  ;;  %v6029_v41 = vrot.slane %v8075_v50, 5 }
 0x3d1   :  { %5420 = vrot.lane.b32.xlu0 %v4905_v48, %s8371_s19  ;;  %5580 = vst.msk [vmem:[#allocation2 + $0x3c] sm:$0xf] %vm5564_vm14, %v5403_v54  ;;  %v8073_v48 = vld [vmem:[%s13581_s0 + $0x18c] sm:$0xe]  ;;  %v6028_v39 = vrot.slane %v6026_v7, 4  ;;  %v4944_v54 = vshll.u32 %v7932_v46, 16 }
 0x3d2   :  { %5486 = vrot.lane.b32.xlu1 %v5299_v51, %s8371_s19  ;;  %v7981_v51 = vld [vmem:[%s13581_s0 + $0x19c] sm:$0xf] }
 0x3d3   :  { %v5401_v4 = vpop.permute.xlu0 %5400  ;;  %v5338_v28 = vshrl.u32 %v7981_v51, 16  ;;  %v6030_v8 = vsel %vm9101_vm7, %v6028_v39, %v6029_v41  ;;  %v4970_v41 = vrot.slane %v4968_v5, 5 }
 0x3d4   :  { %5579 = vst.msk [vmem:[#allocation2 + $0x38] sm:$0xf] %vm5564_vm14, %v5401_v4  ;;  %v5467_v19 = vpop.permute.xlu1 %5466  ;;  %v8111_v4 = vrot.slane %v8073_v48, 9 }
 0x3d5   :  { %5484 = vrot.lane.b32.xlu0 %v5289_v44, %s8371_s19  ;;  %5612 = vst.msk [vmem:[#allocation2 + $0xbc] sm:$0xf] %vm5564_vm14, %v5467_v19  ;;  %v5334_v44 = vshll.u32 %v7981_v51, 16  ;;  %v7936_v19 = vld [vmem:[%s13581_s0 + $0xd0] sm:$0xf]  ;;  %v5340_v15 = vrot.slane %v5338_v28, 4 }
 0x3d6   :  { %5426 = vrot.lane.b32.xlu1 %v4939_v27, %s8371_s19  ;;  %v7980_v27 = vld [vmem:[%s13581_s0 + $0x198] sm:$0xf]  ;;  %v4974_v21 = vshll.u32 %v7936_v19, 16  ;;  %v5364_v28 = vrot.slane %v5362_v43, 4 }
 0x3d7   :  { %v5465_v1 = vpop.permute.xlu0 %5464  ;;  %v12809_v14 = vrot.slane %v5334_v44, 5  ;;  %v5325_v17 = vshrl.u32 %v7980_v27, 16  ;;  %v5328_v18 = vshll.u32 %v7980_v27, 16  ;;  %v8076_v43 = vld [vmem:[%s13581_s0 + $0x198] sm:$0xe] }
 0x3d8   :  { %5611 = vst.msk [vmem:[#allocation2 + $0xb8] sm:$0xf] %vm5564_vm14, %v5465_v1  ;;  %v6072_v20 = vpop.permute.xlu1 %6071  ;;  %v4946_v1 = vrot.slane %v4944_v54, 5  ;;  %v12835_v38 = vrot.slane %v4974_v21, 5 }
 0x3d9   :  { %5424 = vrot.lane.b32.xlu0 %v4929_v10, %s8371_s19  ;;  %6251 = vst.msk [vmem:[#allocation2 + $0x34] sm:$0xf] %vm6237_vm15, %v6072_v20  ;;  %v4960_v10 = vshll.u32 %v7934_v40, 16  ;;  %v6027_v20 = vsel %vm9101_vm7, %v8111_v4, %v6026_v7  ;;  %v5341_v30 = vor.u32 %v5340_v15, %v12809_v14  ;;  %v5330_v35 = vrot.slane %v5328_v18, 5  ;;  %v7985_v4 = vld [vmem:[%s13581_s0 + $0x1ac] sm:$0x1] }
 0x3da   :  { %5490 = vrot.lane.b32.xlu1 %v5323_v37, %s8371_s19  ;;  %v7982_v37 = vld [vmem:[%s13581_s0 + $0x1a0] sm:$0x1]  ;;  %v5358_v7 = vshll.u32 %v7984_v11, 16  ;;  %v4984_v40 = vshll.u32 %v7937_v13, 16  ;;  %v8030_v11 = vld [vmem:[%s13581_s0 + $0xc8] sm:$0x1] }
 0x3db   :  { %v6070_v33 = vpop.permute.xlu0 %6069  ;;  %v4962_v12 = vrot.slane %v4960_v10, 5  ;;  %v5344_v62 = vshll.u32 %v7982_v37, 16  ;;  %v5342_v51 = vrot.slane %v5341_v30, 4  ;;  %v5368_v37 = vshll.u32 %v7985_v4, 16  ;;  %v8028_v30 = vld [vmem:[%s13581_s0 + $0xc0] sm:$0xe] }
 0x3dc   :  { %6250 = vst.msk [vmem:[#allocation2 + $0x30] sm:$0xf] %vm6237_vm15, %v6070_v33  ;;  %v6136_v45 = vpop.permute.xlu1 %6135  ;;  %v12854_v44 = vrot.slane %v5358_v7, 5 }
 0x3dd   :  { %5488 = vrot.lane.b32.xlu0 %v5313_v49, %s8371_s19  ;;  %6283 = vst.msk [vmem:[#allocation2 + $0xb4] sm:$0xf] %vm6237_vm15, %v6136_v45  ;;  %v4978_v49 = vshrl.u32 %v7936_v19, 16  ;;  %v4947_v45 = vor.u32 %v4946_v1, %v4943_v55  ;;  %v4963_v48 = vsel %vm8413_vm2, %v4958_v29, %v4962_v12  ;;  %v4986_v55 = vrot.slane %v4984_v40, 5  ;;  %v8079_v40 = vld [vmem:[%s13581_s0 + $0x1a4] sm:$0xe] }
 0x3de   :  { %6095 = vrot.lane.b32.xlu1 %v5911_v25, %s8372_s23  ;;  %v5365_v1 = vor.u32 %v5364_v28, %v12854_v44 }
 0x3df   :  { %v6134_v36 = vpop.permute.xlu0 %6133  ;;  %v4980_v2 = vrot.slane %v4978_v49, 4 }
 0x3e0   :  { %6282 = vst.msk [vmem:[#allocation2 + $0xb0] sm:$0xf] %vm6237_vm15, %v6134_v36  ;;  %v6076_v42 = vpop.permute.xlu1 %6075  ;;  %v4965_v36 = vshrl.u32 %v7935_v61, 16  ;;  %v5366_v49 = vrot.slane %v5365_v1, 4  ;;  %v5370_v61 = vrot.slane %v5368_v37, 5 }
 0x3e1   :  { %6093 = vrot.lane.b32.xlu0 %v5908_v32, %s8372_s23  ;;  %6253 = vst.msk [vmem:[#allocation2 + $0x3c] sm:$0xf] %vm6237_vm15, %v6076_v42  ;;  %v5327_v32 = vrot.slane %v5325_v17, 4  ;;  %v4981_v54 = vor.u32 %v4980_v2, %v12835_v38  ;;  %v8096_v2 = vrot.slane %v8028_v30, 9 }
 0x3e2   :  { %6159 = vrot.lane.b32.xlu1 %v6023_v24, %s8372_s23  ;;  %v7889_v24 = vld [vmem:[%s13581_s0 + $0x1a8] sm:$0xf]  ;;  %v4967_v39 = vrot.slane %v4965_v36, 4  ;;  %v8078_v36 = vld [vmem:[%s13581_s0 + $0x1a0] sm:$0x1] }
 0x3e3   :  { %v6074_v53 = vpop.permute.xlu0 %6073  ;;  %v8319_v57 = vld [vmem:[#allocation2 + $0x30] sm:$0xff]   ;;  %v4982_v10 = vrot.slane %v4981_v54, 4 }
 0x3e4   :  { %6252 = vst.msk [vmem:[#allocation2 + $0x38] sm:$0xf] %vm6237_vm15, %v6074_v53  ;;  %v6140_v59 = vpop.permute.xlu1 %6139  ;;  %8234 = vmatprep.mubr.msk.bf16.mxu0 %vm6546_vm0, %v8319_v57  ;;  %v5346_v53 = vrot.slane %v5344_v62, 5  ;;  %v5331_v57 = vor.u32 %v5330_v35, %v5327_v32 }
 0x3e5   :  { %6157 = vrot.lane.b32.xlu0 %v6020_v47, %s8372_s23  ;;  %6285 = vst.msk [vmem:[#allocation2 + $0xbc] sm:$0xf] %vm6237_vm15, %v6140_v59  ;;  %v4948_v47 = vrot.slane %v4947_v45, 4  ;;  %v5349_v59 = vshrl.u32 %v7983_v31, 16  ;;  %v4987_v21 = vsel %vm8413_vm2, %v4982_v10, %v4986_v55  ;;  %v5371_v45 = vsel %vm8413_vm2, %v5366_v49, %v5370_v61 }
 0x3e6   :  { %6099 = vrot.lane.b32.xlu1 %v5918_v34, %s8372_s23  ;;  %v7888_v34 = vld [vmem:[%s13581_s0 + $0x1a4] sm:$0xf] }
 0x3e7   :  { %v6138_v56 = vpop.permute.xlu0 %6137  ;;  %v8320_v6 = vld [vmem:[#allocation2 + $0xb0] sm:$0xff]   ;;  %v4953_v27 = vsel %vm8413_vm2, %v4948_v47, %v12782_v60  ;;  %v5351_v19 = vrot.slane %v5349_v59, 4  ;;  %v8029_v60 = vld [vmem:[%s13581_s0 + $0xc4] sm:$0xf]  ;;  %v8080_v47 = vld [vmem:[%s13581_s0 + $0x1a8] sm:$0xf] }
 0x3e8   :  { %6284 = vst.msk [vmem:[#allocation2 + $0xb8] sm:$0xf] %vm6237_vm15, %v6138_v56  ;;  %v4350_v9 = vpop.permute.xlu1 %4349  ;;  %8266 = vmatprep.mubr.msk.bf16.mxu1 %vm6546_vm0, %v8320_v6  ;;  %v5347_v56 = vsel %vm8413_vm2, %v5342_v51, %v5346_v53  ;;  %v5332_v6 = vrot.slane %v5331_v57, 4 }
 0x3e9   :  { %6097 = vrot.lane.b32.xlu0 %v5915_v3, %s8372_s23  ;;  %4493 = vst.msk [vmem:[#allocation2 + $0xc4] sm:$0xf] %vm4443_vm13, %v4350_v9  ;;  %v5354_v9 = vrot.slane %v5352_v63, 5  ;;  %v8081_v63 = vld [vmem:[%s13581_s0 + $0x1ac] sm:$0x1] }
 0x3ea   :  { %6163 = vrot.lane.b32.xlu1 %v6030_v8, %s8372_s23  ;;  %v4971_v8 = vor.u32 %v4970_v41, %v4967_v39  ;;  %v5337_v17 = vsel %vm8413_vm2, %v5332_v6, %v12809_v14  ;;  %v8077_v14 = vld [vmem:[%s13581_s0 + $0x19c] sm:$0xf]  ;;  %v8031_v39 = vld [vmem:[%s13581_s0 + $0xcc] sm:$0xe]  ;;  %v6040_v41 = vrot.slane %v8080_v47, 5 }
 0x3eb   :  { %v4348_v33 = vpop.permute.xlu0 %4347  ;;  %v8321_v25 = vld [vmem:[#allocation2 + $0x38] sm:$0xff]   ;;  %v6033_v32 = vrot.slane %v8077_v14, 5  ;;  %v8097_v54 = vrot.slane %v8031_v39, 9 }
 0x3ec   :  { %4492 = vst.msk [vmem:[#allocation2 + $0xc0] sm:$0xf] %vm4443_vm13, %v4348_v33  ;;  %v4354_v52 = vpop.permute.xlu1 %4353  ;;  %8235 = vmatmul.mubr.msk.bf16.gmra.mxu0 %vm6546_vm0, %v8321_v25  ;;  %v4972_v18 = vrot.slane %v4971_v8, 4  ;;  %v5921_v33 = vrot.slane %v8029_v60, 5  ;;  %v6042_v4 = vrot.slane %v6040_v41, 4  ;;  %v8113_v8 = vrot.slane %v8079_v40, 9 }
 0x3ed   :  { %6161 = vrot.lane.b32.xlu0 %v6027_v20, %s8372_s23  ;;  %4495 = vst.msk [vmem:[#allocation2 + $0xcc] sm:$0xf] %vm4443_vm13, %v4354_v52  ;;  %v5355_v20 = vor.u32 %v5354_v9, %v5351_v19 }
 0x3ee   :  { %4373 = vrot.lane.b32.xlu1 %v7887_v58, %s8370_s16  ;;  %v4977_v52 = vsel %vm8413_vm2, %v4972_v18, %v12835_v38  ;;  %v5923_v62 = vrot.slane %v5921_v33, 4  ;;  %v5922_v13 = vsel %vm9101_vm7, %v8096_v2, %v5921_v33  ;;  %v6041_v55 = vsel %vm9101_vm7, %v8113_v8, %v6040_v41 }
 0x3ef   :  { %v4352_v42 = vpop.permute.xlu0 %4351  ;;  %v8322_v50 = vld [vmem:[#allocation2 + $0xb8] sm:$0xff]   ;;  %v5356_v29 = vrot.slane %v5355_v20, 4 }
 0x3f0   :  { %4494 = vst.msk [vmem:[#allocation2 + $0xc8] sm:$0xf] %vm4443_vm13, %v4352_v42  ;;  %v5407_v46 = vpop.permute.xlu1 %5406  ;;  %8267 = vmatmul.mubr.msk.bf16.gmra.mxu1 %vm6546_vm0, %v8322_v50  ;;  %v6035_v42 = vrot.slane %v6033_v32, 4  ;;  %v6036_v50 = vrot.slane %v8078_v36, 5 }
 0x3f1   :  { %4371 = vrot.lane.b32.xlu0 %v7886_v16, %s8370_s16  ;;  %5582 = vst.msk [vmem:[#allocation2 + $0x44] sm:$0xf] %vm5564_vm14, %v5407_v46  ;;  %v5924_v16 = vrot.slane %v8030_v11, 5  ;;  %v5361_v38 = vsel %vm8413_vm2, %v5356_v29, %v12854_v44 }
 0x3f2   :  { %4377 = vrot.lane.b32.xlu1 %v7889_v24, %s8370_s16  ;;  %v8032_v24 = vld [vmem:[%s13581_s0 + $0xd0] sm:$0xf]  ;;  %v6037_v53 = vsel %vm9101_vm7, %v6035_v42, %v6036_v50  ;;  %s8373_s0 = smov [#allocation3]  }
 0x3f3   :  { %v5405_v0 = vpop.permute.xlu0 %5404  ;;  %v5925_v7 = vsel %vm9101_vm7, %v5923_v62, %v5924_v16  ;;  %v5928_v31 = vrot.slane %v8032_v24, 5 }
 0x3f4   :  { %5581 = vst.msk [vmem:[#allocation2 + $0x40] sm:$0xf] %vm5564_vm14, %v5405_v0  ;;  %v5471_v3 = vpop.permute.xlu1 %5470 }
 0x3f5   :  { %4375 = vrot.lane.b32.xlu0 %v7888_v34, %s8370_s16  ;;  %5614 = vst.msk [vmem:[#allocation2 + $0xc4] sm:$0xf] %vm5564_vm14, %v5471_v3  ;;  %v5930_v57 = vrot.slane %v5928_v31, 4  ;;  %v5931_v34 = vrot.slane %v8033_v23, 5  ;;  %v5929_v6 = vsel %vm9101_vm7, %v8097_v54, %v5928_v31 }
 0x3f6   :  { %5430 = vrot.lane.b32.xlu1 %v4963_v48, %s8371_s19  ;;  %v8112_v48 = vrot.slane %v8076_v43, 9 }
 0x3f7   :  { %v5469_v22 = vpop.permute.xlu0 %5468  ;;  %v5932_v3 = vsel %vm9101_vm7, %v5930_v57, %v5931_v34 }
 0x3f8   :  { %5613 = vst.msk [vmem:[#allocation2 + $0xc0] sm:$0xf] %vm5564_vm14, %v5469_v22  ;;  %v5411_v15 = vpop.permute.xlu1 %5410  ;;  %v6034_v0 = vsel %vm9101_vm7, %v8112_v48, %v6033_v32 }
 0x3f9   :  { %5428 = vrot.lane.b32.xlu0 %v4953_v27, %s8371_s19  ;;  %5584 = vst.msk [vmem:[#allocation2 + $0x4c] sm:$0xf] %vm5564_vm14, %v5411_v15  ;;  %v6043_v27 = vrot.slane %v8081_v63, 5 }
 0x3fa   :  { %5494 = vrot.lane.b32.xlu1 %v5347_v56, %s8371_s19 }
 0x3fb   :  { %v5409_v58 = vpop.permute.xlu0 %5408  ;;  %v6044_v22 = vsel %vm9101_vm7, %v6042_v4, %v6043_v27 }
 0x3fc   :  { %5583 = vst.msk [vmem:[#allocation2 + $0x48] sm:$0xf] %vm5564_vm14, %v5409_v58  ;;  %v5475_v25 = vpop.permute.xlu1 %5474 }
 0x3fd   :  { %5492 = vrot.lane.b32.xlu0 %v5337_v17, %s8371_s19  ;;  %5616 = vst.msk [vmem:[#allocation2 + $0xcc] sm:$0xf] %vm5564_vm14, %v5475_v25 }
 0x3fe   :  { %5434 = vrot.lane.b32.xlu1 %v4987_v21, %s8371_s19 }
 0x3ff   :  { %v5473_v12 = vpop.permute.xlu0 %5472 }
 0x400   :  { %5615 = vst.msk [vmem:[#allocation2 + $0xc8] sm:$0xf] %vm5564_vm14, %v5473_v12  ;;  %v6080_v35 = vpop.permute.xlu1 %6079 }
 0x401   :  { %5432 = vrot.lane.b32.xlu0 %v4977_v52, %s8371_s19  ;;  %6255 = vst.msk [vmem:[#allocation2 + $0x44] sm:$0xf] %vm6237_vm15, %v6080_v35 }
 0x402   :  { %5498 = vrot.lane.b32.xlu1 %v5371_v45, %s8371_s19 }
 0x403   :  { %v6078_v5 = vpop.permute.xlu0 %6077 }
 0x404   :  { %6254 = vst.msk [vmem:[#allocation2 + $0x40] sm:$0xf] %vm6237_vm15, %v6078_v5  ;;  %v6144_v46 = vpop.permute.xlu1 %6143 }
 0x405   :  { %5496 = vrot.lane.b32.xlu0 %v5361_v38, %s8371_s19  ;;  %6287 = vst.msk [vmem:[#allocation2 + $0xc4] sm:$0xf] %vm6237_vm15, %v6144_v46 }
 0x406   :  { %6103 = vrot.lane.b32.xlu1 %v5925_v7, %s8372_s23 }
 0x407   :  { %v6142_v51 = vpop.permute.xlu0 %6141 }
 0x408   :  { %6286 = vst.msk [vmem:[#allocation2 + $0xc0] sm:$0xf] %vm6237_vm15, %v6142_v51  ;;  %v6084_v59 = vpop.permute.xlu1 %6083 }
 0x409   :  { %6101 = vrot.lane.b32.xlu0 %v5922_v13, %s8372_s23  ;;  %6257 = vst.msk [vmem:[#allocation2 + $0x4c] sm:$0xf] %vm6237_vm15, %v6084_v59 }
 0x40a   :  { %6167 = vrot.lane.b32.xlu1 %v6037_v53, %s8372_s23 }
 0x40b   :  { %v6082_v44 = vpop.permute.xlu0 %6081  ;;  %v8323_v28 = vld [vmem:[#allocation2 + $0x40] sm:$0xff]  }
 0x40c   :  { %6256 = vst.msk [vmem:[#allocation2 + $0x48] sm:$0xf] %vm6237_vm15, %v6082_v44  ;;  %v6148_v56 = vpop.permute.xlu1 %6147  ;;  %8238 = vmatprep.mubr.msk.bf16.mxu0 %vm6546_vm0, %v8323_v28 }
 0x40d   :  { %6165 = vrot.lane.b32.xlu0 %v6034_v0, %s8372_s23  ;;  %6289 = vst.msk [vmem:[#allocation2 + $0xcc] sm:$0xf] %vm6237_vm15, %v6148_v56 }
 0x40e   :  { %6107 = vrot.lane.b32.xlu1 %v5932_v3, %s8372_s23 }
 0x40f   :  { %v6146_v19 = vpop.permute.xlu0 %6145  ;;  %v8324_v9 = vld [vmem:[#allocation2 + $0xc0] sm:$0xff]  }
 0x410   :  { %6288 = vst.msk [vmem:[#allocation2 + $0xc8] sm:$0xf] %vm6237_vm15, %v6146_v19  ;;  %v4358_v10 = vpop.permute.xlu1 %4357  ;;  %8270 = vmatprep.mubr.msk.bf16.mxu1 %vm6546_vm0, %v8324_v9 }
 0x411   :  { %6105 = vrot.lane.b32.xlu0 %v5929_v6, %s8372_s23  ;;  %4497 = vst.msk [vmem:[#allocation2 + $0xd4] sm:$0xf] %vm4443_vm13, %v4358_v10 }
 0x412   :  { %6171 = vrot.lane.b32.xlu1 %v6044_v22, %s8372_s23 }
 0x413   :  { %v4356_v1 = vpop.permute.xlu0 %4355  ;;  %v8325_v37 = vld [vmem:[#allocation2 + $0x48] sm:$0xff]  }
 0x414   :  { %4496 = vst.msk [vmem:[#allocation2 + $0xd0] sm:$0xf] %vm4443_vm13, %v4356_v1  ;;  %v4362_v15 = vpop.permute.xlu1 %4361  ;;  %8239 = vmatmul.mubr.msk.bf16.gmra.mxu0 %vm6546_vm0, %v8325_v37 }
 0x415   :  { %6169 = vrot.lane.b32.xlu0 %v6041_v55, %s8372_s23  ;;  %4499 = vst.msk [vmem:[#allocation2 + $0xdc] sm:$0xf] %vm4443_vm13, %v4362_v15  ;;  %s7495_s23 = sshll.u32 %s8373_s0, 4  ;;  %s7496_s23 = int_to_ptr.vmem [resolvable:$true] %s7495_s23 }
 0x416   :  { %s8343_s29 = scalar_lea.vmem %s7496_s23, 512  ;;  %p8348_p1 = scmp.lt.s32.totalorder %s7496_s23, %s7496_s23 }
 0x417   :  { %v4360_v60 = vpop.permute.xlu0 %4359  ;;  %v8326_v17 = vld [vmem:[#allocation2 + $0xc8] sm:$0xff]   ;;  %p8344_p0 = scmp.ne.s32.totalorder %s7496_s23, %s8343_s29  ;;  %p8349_p2 = scmp.lt.s32.totalorder %s8343_s29, %s8343_s29 }
 0x418   :  { %4498 = vst.msk [vmem:[#allocation2 + $0xd8] sm:$0xf] %vm4443_vm13, %v4360_v60  ;;  %v5415_v18 = vpop.permute.xlu1 %5414  ;;  %8271 = vmatmul.mubr.msk.bf16.gmra.mxu1 %vm6546_vm0, %v8326_v17 }
 0x419   :  { %5586 = vst.msk [vmem:[#allocation2 + $0x54] sm:$0xf] %vm5564_vm14, %v5415_v18  ;;  %p8350_p3 = por %p8349_p2, %p8348_p1 }
 0x41b   :  { %v5413_v26 = vpop.permute.xlu0 %5412  ;;  %p8351_p4 = pnand %p8350_p3, %p8344_p0 }
 0x41c   :  { %5585 = vst.msk [vmem:[#allocation2 + $0x50] sm:$0xf] %vm5564_vm14, %v5413_v26  ;;  %v5479_v20 = vpop.permute.xlu1 %5478 }
 0x41d   :  { %5618 = vst.msk [vmem:[#allocation2 + $0xd4] sm:$0xf] %vm5564_vm14, %v5479_v20 }
 0x41f   :  { %v5477_v58 = vpop.permute.xlu0 %5476 }
 0x420   :  { %5617 = vst.msk [vmem:[#allocation2 + $0xd0] sm:$0xf] %vm5564_vm14, %v5477_v58  ;;  %v5419_v21 = vpop.permute.xlu1 %5418 }
 0x421   :  { %5588 = vst.msk [vmem:[#allocation2 + $0x5c] sm:$0xf] %vm5564_vm14, %v5419_v21 }
 0x423   :  { %v5417_v49 = vpop.permute.xlu0 %5416 }
 0x424   :  { %5587 = vst.msk [vmem:[#allocation2 + $0x58] sm:$0xf] %vm5564_vm14, %v5417_v49  ;;  %v5483_v61 = vpop.permute.xlu1 %5482 }
 0x425   :  { %5620 = vst.msk [vmem:[#allocation2 + $0xdc] sm:$0xf] %vm5564_vm14, %v5483_v61 }
 0x427   :  { %v5481_v33 = vpop.permute.xlu0 %5480 }
 0x428   :  { %5619 = vst.msk [vmem:[#allocation2 + $0xd8] sm:$0xf] %vm5564_vm14, %v5481_v33  ;;  %v6088_v25 = vpop.permute.xlu1 %6087 }
 0x429   :  { %6259 = vst.msk [vmem:[#allocation2 + $0x54] sm:$0xf] %vm6237_vm15, %v6088_v25 }
 0x42b   :  { %v6086_v11 = vpop.permute.xlu0 %6085 }
 0x42c   :  { %6258 = vst.msk [vmem:[#allocation2 + $0x50] sm:$0xf] %vm6237_vm15, %v6086_v11  ;;  %v6152_v14 = vpop.permute.xlu1 %6151 }
 0x42d   :  { %6291 = vst.msk [vmem:[#allocation2 + $0xd4] sm:$0xf] %vm6237_vm15, %v6152_v14 }
 0x42f   :  { %v6150_v52 = vpop.permute.xlu0 %6149 }
 0x430   :  { %6290 = vst.msk [vmem:[#allocation2 + $0xd0] sm:$0xf] %vm6237_vm15, %v6150_v52  ;;  %v6092_v29 = vpop.permute.xlu1 %6091 }
 0x431   :  { %6261 = vst.msk [vmem:[#allocation2 + $0x5c] sm:$0xf] %vm6237_vm15, %v6092_v29 }
 0x433   :  { %v6090_v12 = vpop.permute.xlu0 %6089  ;;  %v8327_v45 = vld [vmem:[#allocation2 + $0x50] sm:$0xff]  }
 0x434   :  { %6260 = vst.msk [vmem:[#allocation2 + $0x58] sm:$0xf] %vm6237_vm15, %v6090_v12  ;;  %v6156_v62 = vpop.permute.xlu1 %6155  ;;  %8242 = vmatprep.mubr.msk.bf16.mxu0 %vm6546_vm0, %v8327_v45 }
 0x435   :  { %6293 = vst.msk [vmem:[#allocation2 + $0xdc] sm:$0xf] %vm6237_vm15, %v6156_v62 }
 0x437   :  { %v6154_v16 = vpop.permute.xlu0 %6153  ;;  %v8328_v30 = vld [vmem:[#allocation2 + $0xd0] sm:$0xff]  }
 0x438   :  { %6292 = vst.msk [vmem:[#allocation2 + $0xd8] sm:$0xf] %vm6237_vm15, %v6154_v16  ;;  %v4366_v32 = vpop.permute.xlu1 %4365  ;;  %8274 = vmatprep.mubr.msk.bf16.mxu1 %vm6546_vm0, %v8328_v30 }
 0x439   :  { %4501 = vst.msk [vmem:[#allocation2 + $0xe4] sm:$0xf] %vm4443_vm13, %v4366_v32 }
 0x43b   :  { %v4364_v35 = vpop.permute.xlu0 %4363  ;;  %v8329_v36 = vld [vmem:[#allocation2 + $0x58] sm:$0xff]  }
 0x43c   :  { %4500 = vst.msk [vmem:[#allocation2 + $0xe0] sm:$0xf] %vm4443_vm13, %v4364_v35  ;;  %v4370_v24 = vpop.permute.xlu1 %4369  ;;  %8243 = vmatmul.mubr.msk.bf16.gmra.mxu0 %vm6546_vm0, %v8329_v36 }
 0x43d   :  { %4503 = vst.msk [vmem:[#allocation2 + $0xec] sm:$0xf] %vm4443_vm13, %v4370_v24 }
 0x43f   :  { %v4368_v38 = vpop.permute.xlu0 %4367  ;;  %v8330_v2 = vld [vmem:[#allocation2 + $0xd8] sm:$0xff]  }
 0x440   :  { %4502 = vst.msk [vmem:[#allocation2 + $0xe8] sm:$0xf] %vm4443_vm13, %v4368_v38  ;;  %v5423_v5 = vpop.permute.xlu1 %5422  ;;  %8275 = vmatmul.mubr.msk.bf16.gmra.mxu1 %vm6546_vm0, %v8330_v2 }
 0x441   :  { %5590 = vst.msk [vmem:[#allocation2 + $0x64] sm:$0xf] %vm5564_vm14, %v5423_v5 }
 0x443   :  { %v5421_v7 = vpop.permute.xlu0 %5420 }
 0x444   :  { %5589 = vst.msk [vmem:[#allocation2 + $0x60] sm:$0xf] %vm5564_vm14, %v5421_v7  ;;  %v5487_v42 = vpop.permute.xlu1 %5486 }
 0x445   :  { %5622 = vst.msk [vmem:[#allocation2 + $0xe4] sm:$0xf] %vm5564_vm14, %v5487_v42 }
 0x447   :  { %v5485_v50 = vpop.permute.xlu0 %5484 }
 0x448   :  { %5621 = vst.msk [vmem:[#allocation2 + $0xe0] sm:$0xf] %vm5564_vm14, %v5485_v50  ;;  %v5427_v43 = vpop.permute.xlu1 %5426  ;;  %v13038_v21 = vpop.f32.mrf.mxu0 }
 0x449   :  { %5592 = vst.msk [vmem:[#allocation2 + $0x6c] sm:$0xf] %vm5564_vm14, %v5427_v43 }
 0x44a   :  { %v13042_v61 = vpop.f32.mrf.mxu0 }
 0x44b   :  { %v5425_v31 = vpop.permute.xlu0 %5424  ;;  %v6975_v24 = vmul.f32 %v13042_v61, %v13042_v61 }
 0x44c   :  { %5591 = vst.msk [vmem:[#allocation2 + $0x68] sm:$0xf] %vm5564_vm14, %v5425_v31  ;;  %v5491_v46 = vpop.permute.xlu1 %5490  ;;  %v13040_v49 = vpop.f32.mrf.mxu1 }
 0x44d   :  { %5624 = vst.msk [vmem:[#allocation2 + $0xec] sm:$0xf] %vm5564_vm14, %v5491_v46  ;;  %13615 = vst [vmem:[#allocation6_spill] sm:$0xff] %v13040_v49  ;;  %v13046_v25 = vpop.f32.mrf.mxu0  ;;  %v6977_v46 = vmul.f32 %v13038_v21, %v13038_v21 }
 0x44e   :  { %v13044_v33 = vpop.f32.mrf.mxu1 }
 0x44f   :  { %v5489_v23 = vpop.permute.xlu0 %5488  ;;  %v13050_v14 = vpop.f32.mrf.mxu0  ;;  %v7251_v50 = vmul.f32 %v13044_v33, %v13044_v33 }
 0x450   :  { %5623 = vst.msk [vmem:[#allocation2 + $0xe8] sm:$0xf] %vm5564_vm14, %v5489_v23  ;;  %v6096_v47 = vpop.permute.xlu1 %6095  ;;  %v13048_v11 = vpop.f32.mrf.mxu1  ;;  %v6976_v35 = vmul.f32 %v13050_v14, %v13050_v14  ;;  %v6936_v38 = vadd.f32 %v13050_v14, %v13042_v61 }
 0x451   :  { %6263 = vst.msk [vmem:[#allocation2 + $0x64] sm:$0xf] %vm6237_vm15, %v6096_v47  ;;  %13616 = vst [vmem:[#allocation7_spill] sm:$0xff] %v13048_v11 }
 0x452   :  { %v13054_v29 = vpop.f32.mrf.mxu1  ;;  %v7007_v7 = vadd.f32 %v6976_v35, %v6975_v24  ;;  %v6937_v23 = vadd.f32 %v13038_v21, %v6936_v38 }
 0x453   :  { %v6094_v13 = vpop.permute.xlu0 %6093  ;;  %13617 = vst [vmem:[#allocation8_spill] sm:$0xff] %v13054_v29  ;;  %v7252_v5 = vmul.f32 %v13054_v29, %v13054_v29  ;;  %v7213_v43 = vadd.f32 %v13054_v29, %v13044_v33 }
 0x454   :  { %6262 = vst.msk [vmem:[#allocation2 + $0x60] sm:$0xf] %vm6237_vm15, %v6094_v13  ;;  %v6160_v48 = vpop.permute.xlu1 %6159  ;;  %v7008_v13 = vadd.f32 %v7007_v7, %v6977_v46 }
 0x455   :  { %6295 = vst.msk [vmem:[#allocation2 + $0xe4] sm:$0xf] %vm6237_vm15, %v6160_v48  ;;  %v7283_v47 = vadd.f32 %v7252_v5, %v7251_v50 }
 0x457   :  { %v6158_v51 = vpop.permute.xlu0 %6157 }
 0x458   :  { %6294 = vst.msk [vmem:[#allocation2 + $0xe0] sm:$0xf] %vm6237_vm15, %v6158_v51  ;;  %v6100_v53 = vpop.permute.xlu1 %6099  ;;  %v7253_v51 = vmul.f32 %v13040_v49, %v13040_v49 }
 0x459   :  { %6265 = vst.msk [vmem:[#allocation2 + $0x6c] sm:$0xf] %vm6237_vm15, %v6100_v53  ;;  %v7214_v53 = vadd.f32 %v13040_v49, %v7213_v43 }
 0x45b   :  { %v6098_v57 = vpop.permute.xlu0 %6097  ;;  %v8331_v34 = vld [vmem:[#allocation2 + $0x60] sm:$0xff]  }
 0x45c   :  { %6264 = vst.msk [vmem:[#allocation2 + $0x68] sm:$0xf] %vm6237_vm15, %v6098_v57  ;;  %v6164_v39 = vpop.permute.xlu1 %6163  ;;  %8246 = vmatprep.mubr.msk.bf16.mxu0 %vm6546_vm0, %v8331_v34  ;;  %v6978_v34 = vmul.f32 %v13046_v25, %v13046_v25 }
 0x45d   :  { %6297 = vst.msk [vmem:[#allocation2 + $0xec] sm:$0xf] %vm6237_vm15, %v6164_v39  ;;  %v6938_v39 = vadd.f32 %v13046_v25, %v6937_v23 }
 0x45f   :  { %v6162_v41 = vpop.permute.xlu0 %6161  ;;  %v8332_v59 = vld [vmem:[#allocation2 + $0xe0] sm:$0xff]  }
 0x460   :  { %6296 = vst.msk [vmem:[#allocation2 + $0xe8] sm:$0xf] %vm6237_vm15, %v6162_v41  ;;  %v4374_v63 = vpop.permute.xlu1 %4373  ;;  %8278 = vmatprep.mubr.msk.bf16.mxu1 %vm6546_vm0, %v8332_v59  ;;  %v7284_v59 = vadd.f32 %v7283_v47, %v7253_v51 }
 0x461   :  { %4505 = vst.msk [vmem:[#allocation2 + $0xf4] sm:$0xf] %vm4443_vm13, %v4374_v63 }
 0x463   :  { %v4372_v0 = vpop.permute.xlu0 %4371  ;;  %v8333_v54 = vld [vmem:[#allocation2 + $0x68] sm:$0xff]  }
 0x464   :  { %4504 = vst.msk [vmem:[#allocation2 + $0xf0] sm:$0xf] %vm4443_vm13, %v4372_v0  ;;  %v4378_v40 = vpop.permute.xlu1 %4377  ;;  %8247 = vmatmul.mubr.msk.bf16.gmra.mxu0 %vm6546_vm0, %v8333_v54  ;;  %v7009_v0 = vadd.f32 %v7008_v13, %v6978_v34 }
 0x465   :  { %4507 = vst.msk [vmem:[#allocation2 + $0xfc] sm:$0xf] %vm4443_vm13, %v4378_v40 }
 0x467   :  { %v4376_v44 = vpop.permute.xlu0 %4375  ;;  %v8334_v28 = vld [vmem:[#allocation2 + $0xe8] sm:$0xff]  }
 0x468   :  { %4506 = vst.msk [vmem:[#allocation2 + $0xf8] sm:$0xf] %vm4443_vm13, %v4376_v44  ;;  %v5431_v3 = vpop.permute.xlu1 %5430  ;;  %8279 = vmatmul.mubr.msk.bf16.gmra.mxu1 %vm6546_vm0, %v8334_v28  ;;  %v13052_v52 = vpop.f32.mrf.mxu0  ;;  %v7254_v44 = vmul.f32 %v13048_v11, %v13048_v11  ;;  %v7215_v28 = vadd.f32 %v13048_v11, %v7214_v53 }
 0x469   :  { %5594 = vst.msk [vmem:[#allocation2 + $0x74] sm:$0xf] %vm5564_vm14, %v5431_v3 }
 0x46a   :  { %v13058_v45 = vpop.f32.mrf.mxu0 }
 0x46b   :  { %v5429_v4 = vpop.permute.xlu0 %5428  ;;  %v6979_v41 = vmul.f32 %v13058_v45, %v13058_v45  ;;  %v6939_v63 = vadd.f32 %v6938_v39, %v13058_v45 }
 0x46c   :  { %5593 = vst.msk [vmem:[#allocation2 + $0x70] sm:$0xf] %vm5564_vm14, %v5429_v4  ;;  %v5495_v27 = vpop.permute.xlu1 %5494  ;;  %v13056_v12 = vpop.f32.mrf.mxu1 }
 0x46d   :  { %5626 = vst.msk [vmem:[#allocation2 + $0xf4] sm:$0xf] %vm5564_vm14, %v5495_v27  ;;  %13618 = vst [vmem:[#allocation9_spill] sm:$0xff] %v13056_v12  ;;  %v13062_v16 = vpop.f32.mrf.mxu0  ;;  %v7010_v27 = vadd.f32 %v7009_v0, %v6979_v41 }
 0x46e   :  { %v13060_v62 = vpop.f32.mrf.mxu1  ;;  %v6982_v35 = vmul.f32 %v13062_v16, %v13062_v16 }
 0x46f   :  { %v5493_v56 = vpop.permute.xlu0 %5492  ;;  %13619 = vst [vmem:[#allocation10_spill] sm:$0xff] %v13060_v62  ;;  %v13066_v32 = vpop.f32.mrf.mxu0  ;;  %v7255_v3 = vmul.f32 %v13060_v62, %v13060_v62 }
 0x470   :  { %5625 = vst.msk [vmem:[#allocation2 + $0xf0] sm:$0xf] %vm5564_vm14, %v5493_v56  ;;  %v5435_v6 = vpop.permute.xlu1 %5434  ;;  %v13064_v30 = vpop.f32.mrf.mxu1  ;;  %v6980_v54 = vmul.f32 %v13066_v32, %v13066_v32  ;;  %v6940_v56 = vadd.f32 %v6939_v63, %v13066_v32 }
 0x471   :  { %5596 = vst.msk [vmem:[#allocation2 + $0x7c] sm:$0xf] %vm5564_vm14, %v5435_v6  ;;  %13620 = vst [vmem:[#allocation11_spill] sm:$0xff] %v13064_v30  ;;  %v7216_v6 = vadd.f32 %v7215_v28, %v13060_v62  ;;  %v7258_v47 = vmul.f32 %v13064_v30, %v13064_v30 }
 0x472   :  { %v13076_v2 = vpop.f32.mrf.mxu1 }
 0x473   :  { %v5433_v8 = vpop.permute.xlu0 %5432  ;;  %13621 = vst [vmem:[#allocation12_spill] sm:$0xff] %v13076_v2 }
 0x474   :  { %5595 = vst.msk [vmem:[#allocation2 + $0x78] sm:$0xf] %vm5564_vm14, %v5433_v8  ;;  %v5499_v19 = vpop.permute.xlu1 %5498  ;;  %v7285_v8 = vadd.f32 %v7284_v59, %v7254_v44 }
 0x475   :  { %5628 = vst.msk [vmem:[#allocation2 + $0xfc] sm:$0xf] %vm5564_vm14, %v5499_v19  ;;  %v7256_v19 = vmul.f32 %v13076_v2, %v13076_v2 }
 0x477   :  { %v5497_v9 = vpop.permute.xlu0 %5496 }
 0x478   :  { %5627 = vst.msk [vmem:[#allocation2 + $0xf8] sm:$0xf] %vm5564_vm14, %v5497_v9  ;;  %v6104_v22 = vpop.permute.xlu1 %6103 }
 0x479   :  { %6267 = vst.msk [vmem:[#allocation2 + $0x74] sm:$0xf] %vm6237_vm15, %v6104_v22  ;;  %v7011_v22 = vadd.f32 %v7010_v27, %v6980_v54 }
 0x47b   :  { %v6102_v10 = vpop.permute.xlu0 %6101 }
 0x47c   :  { %6266 = vst.msk [vmem:[#allocation2 + $0x70] sm:$0xf] %vm6237_vm15, %v6102_v10  ;;  %v6168_v55 = vpop.permute.xlu1 %6167 }
 0x47d   :  { %6299 = vst.msk [vmem:[#allocation2 + $0xf4] sm:$0xf] %vm6237_vm15, %v6168_v55  ;;  %v7286_v55 = vadd.f32 %v7285_v8, %v7255_v3 }
 0x47f   :  { %v6166_v1 = vpop.permute.xlu0 %6165 }
 0x480   :  { %6298 = vst.msk [vmem:[#allocation2 + $0xf0] sm:$0xf] %vm6237_vm15, %v6166_v1  ;;  %v6108_v37 = vpop.permute.xlu1 %6107  ;;  %v7217_v1 = vadd.f32 %v7216_v6, %v13076_v2 }
 0x481   :  { %6269 = vst.msk [vmem:[#allocation2 + $0x7c] sm:$0xf] %vm6237_vm15, %v6108_v37  ;;  %v6981_v37 = vmul.f32 %v13052_v52, %v13052_v52 }
 0x483   :  { %v6106_v15 = vpop.permute.xlu0 %6105  ;;  %v8335_v60 = vld [vmem:[#allocation2 + $0x70] sm:$0xff]  }
 0x484   :  { %6268 = vst.msk [vmem:[#allocation2 + $0x78] sm:$0xf] %vm6237_vm15, %v6106_v15  ;;  %v6172_v17 = vpop.permute.xlu1 %6171  ;;  %8250 = vmatprep.mubr.msk.bf16.mxu0 %vm6546_vm0, %v8335_v60  ;;  %v6941_v15 = vadd.f32 %v13052_v52, %v6940_v56 }
 0x485   :  { %6301 = vst.msk [vmem:[#allocation2 + $0xfc] sm:$0xf] %vm6237_vm15, %v6172_v17  ;;  %v7287_v17 = vadd.f32 %v7286_v55, %v7256_v19 }
 0x486   :  { %v6942_v24 = vadd.f32 %v13062_v16, %v6941_v15 }
 0x487   :  { %v6170_v18 = vpop.permute.xlu0 %6169  ;;  %v8336_v26 = vld [vmem:[#allocation2 + $0xf0] sm:$0xff]  }
 0x488   :  { %6300 = vst.msk [vmem:[#allocation2 + $0xf8] sm:$0xf] %vm6237_vm15, %v6170_v18  ;;  %8282 = vmatprep.mubr.msk.bf16.mxu1 %vm6546_vm0, %v8336_v26  ;;  %v13070_v36 = vpop.f32.mrf.mxu0  ;;  %v7012_v26 = vadd.f32 %v7011_v22, %v6981_v37 }
 0x489   :  { %v6985_v27 = vmul.f32 %v13070_v36, %v13070_v36 }
 0x48a   :  { %v13086_v31 = vpop.f32.mrf.mxu0  ;;  %v7013_v46 = vadd.f32 %v7012_v26, %v6982_v35 }
 0x48b   :  { %v8337_v20 = vld [vmem:[#allocation2 + $0x78] sm:$0xff]   ;;  %v6983_v38 = vmul.f32 %v13086_v31, %v13086_v31  ;;  %v6943_v43 = vadd.f32 %v6942_v24, %v13086_v31 }
 0x48c   :  { %8251 = vmatmul.mubr.msk.bf16.gmra.mxu0 %vm6546_vm0, %v8337_v20  ;;  %v13080_v42 = vpop.f32.mrf.mxu1  ;;  %v13096_v57 = vpop.f32.mrf.mxu0  ;;  %v7257_v20 = vmul.f32 %v13056_v12, %v13056_v12 }
 0x48d   :  { %13622 = vst [vmem:[#allocation13_spill] sm:$0xff] %v13080_v42  ;;  %v7014_v53 = vadd.f32 %v7013_v46, %v6983_v38  ;;  %v7261_v55 = vmul.f32 %v13080_v42, %v13080_v42  ;;  %v6986_v15 = vmul.f32 %v13096_v57, %v13096_v57 }
 0x48e   :  { %v13091_v48 = vpop.f32.mrf.mxu1  ;;  %v13113_v4 = vpop.f32.mrf.mxu0  ;;  %v7288_v7 = vadd.f32 %v7287_v17, %v7257_v20 }
 0x48f   :  { %v8338_v58 = vld [vmem:[#allocation2 + $0xf8] sm:$0xff]   ;;  %13623 = vst [vmem:[#allocation14_spill] sm:$0xff] %v13091_v48  ;;  %v6984_v23 = vmul.f32 %v13113_v4, %v13113_v4  ;;  %v7259_v51 = vmul.f32 %v13091_v48, %v13091_v48  ;;  %v6944_v34 = vadd.f32 %v6943_v43, %v13113_v4 }
 0x490   :  { %8283 = vmatmul.mubr.msk.bf16.gmra.mxu1 %vm6546_vm0, %v8338_v58  ;;  %v13106_v40 = vpop.f32.mrf.mxu1  ;;  %v7218_v58 = vadd.f32 %v13056_v12, %v7217_v1  ;;  %v7289_v59 = vadd.f32 %v7288_v7, %v7258_v47 }
 0x491   :  { %13624 = vst [vmem:[#allocation15_spill] sm:$0xff] %v13106_v40  ;;  %v7015_v54 = vadd.f32 %v7014_v53, %v6984_v23  ;;  %v6945_v56 = vadd.f32 %v13070_v36, %v6944_v34  ;;  %v7262_v7 = vmul.f32 %v13106_v40, %v13106_v40 }
 0x492   :  { %v13121_v10 = vpop.f32.mrf.mxu1  ;;  %v7219_v13 = vadd.f32 %v13064_v30, %v7218_v58  ;;  %v7290_v44 = vadd.f32 %v7289_v59, %v7259_v51 }
 0x493   :  { %13625 = vst [vmem:[#allocation16_spill] sm:$0xff] %v13121_v10  ;;  %v7260_v63 = vmul.f32 %v13121_v10, %v13121_v10  ;;  %v7016_v19 = vadd.f32 %v7015_v54, %v6985_v27  ;;  %v6946_v17 = vadd.f32 %v13096_v57, %v6945_v56 }
 0x494   :  { %v7220_v41 = vadd.f32 %v7219_v13, %v13091_v48 }
 0x495   :  { %v7291_v8 = vadd.f32 %v7290_v44, %v7260_v63  ;;  %v7017_v35 = vadd.f32 %v7016_v19, %v6986_v15 }
 0x496   :  { %v7221_v28 = vadd.f32 %v7220_v41, %v13121_v10 }
 0x497   :  { %v7292_v20 = vadd.f32 %v7291_v8, %v7261_v55 }
 0x498   :  { %v7222_v1 = vadd.f32 %v13080_v42, %v7221_v28 }
 0x499   :  { %v7293_v53 = vadd.f32 %v7292_v20, %v7262_v7 }
 0x49a   :  { %v7223_v43 = vadd.f32 %v13106_v40, %v7222_v1 }
 0x4ac   :  { %v13119_v9 = vpop.f32.mrf.mxu0 }
 0x4ad   :  { %v6989_v28 = vmul.f32 %v13119_v9, %v13119_v9 }
 0x4ae   :  { %v13129_v18 = vpop.f32.mrf.mxu0 }
 0x4af   :  { %v6987_v26 = vmul.f32 %v13129_v18, %v13129_v18  ;;  %v6947_v58 = vadd.f32 %v6946_v17, %v13129_v18 }
 0x4b0   :  { %v13127_v60 = vpop.f32.mrf.mxu1  ;;  %v13141_v50 = vpop.f32.mrf.mxu0 }
 0x4b1   :  { %13626 = vst [vmem:[#allocation17_spill] sm:$0xff] %v13127_v60  ;;  %v7018_v47 = vadd.f32 %v7017_v35, %v6987_v26  ;;  %v7265_v1 = vmul.f32 %v13127_v60, %v13127_v60  ;;  %v6990_v17 = vmul.f32 %v13141_v50, %v13141_v50 }
 0x4b2   :  { %v13139_v5 = vpop.f32.mrf.mxu1  ;;  %v13157_v0 = vpop.f32.mrf.mxu0 }
 0x4b3   :  { %13627 = vst [vmem:[#allocation18_spill] sm:$0xff] %v13139_v5  ;;  %v6988_v24 = vmul.f32 %v13157_v0, %v13157_v0  ;;  %v7263_v46 = vmul.f32 %v13139_v5, %v13139_v5  ;;  %v6948_v13 = vadd.f32 %v6947_v58, %v13157_v0  ;;  %v7224_v51 = vadd.f32 %v7223_v43, %v13139_v5 }
 0x4b4   :  { %v13152_v39 = vpop.f32.mrf.mxu1 }
 0x4b5   :  { %13628 = vst [vmem:[#allocation19_spill] sm:$0xff] %v13152_v39  ;;  %v7019_v41 = vadd.f32 %v7018_v47, %v6988_v24  ;;  %v7294_v63 = vadd.f32 %v7293_v53, %v7263_v46  ;;  %v6949_v27 = vadd.f32 %v13119_v9, %v6948_v13  ;;  %v7266_v47 = vmul.f32 %v13152_v39, %v13152_v39 }
 0x4b6   :  { %v13165_v6 = vpop.f32.mrf.mxu1 }
 0x4b7   :  { %13629 = vst [vmem:[#allocation20_spill] sm:$0xff] %v13165_v6  ;;  %v7264_v34 = vmul.f32 %v13165_v6, %v13165_v6  ;;  %v7225_v54 = vadd.f32 %v7224_v51, %v13165_v6  ;;  %v7020_v19 = vadd.f32 %v7019_v41, %v6989_v28  ;;  %v6950_v26 = vadd.f32 %v13141_v50, %v6949_v27 }
 0x4b9   :  { %v7295_v56 = vadd.f32 %v7294_v63, %v7264_v34  ;;  %v7226_v15 = vadd.f32 %v13127_v60, %v7225_v54  ;;  %v7021_v43 = vadd.f32 %v7020_v19, %v6990_v17 }
 0x4bb   :  { %v7296_v35 = vadd.f32 %v7295_v56, %v7265_v1  ;;  %v7227_v13 = vadd.f32 %v13152_v39, %v7226_v15 }
 0x4bd   :  { %v7297_v54 = vadd.f32 %v7296_v35, %v7266_v47 }
 0x4d4   :  { %v13160_v3 = vpop.f32.mrf.mxu0 }
 0x4d5   :  { %v6993_v15 = vmul.f32 %v13160_v3, %v13160_v3 }
 0x4d6   :  { %v13172_v37 = vpop.f32.mrf.mxu0 }
 0x4d7   :  { %v6991_v20 = vmul.f32 %v13172_v37, %v13172_v37  ;;  %v6951_v7 = vadd.f32 %v6950_v26, %v13172_v37 }
 0x4d8   :  { %v13167_v22 = vpop.f32.mrf.mxu1  ;;  %v13189_v23 = vpop.f32.mrf.mxu0 }
 0x4d9   :  { %13630 = vst [vmem:[#allocation21_spill] sm:$0xff] %v13167_v22  ;;  %v7022_v53 = vadd.f32 %v7021_v43, %v6991_v20  ;;  %v7269_v43 = vmul.f32 %v13167_v22, %v13167_v22 }
 0x4da   :  { %v13182_v38 = vpop.f32.mrf.mxu1  ;;  %v13198_v44 = vpop.f32.mrf.mxu0 }
 0x4db   :  { %v6992_v46 = vmul.f32 %v13198_v44, %v13198_v44  ;;  %v7267_v51 = vmul.f32 %v13182_v38, %v13182_v38  ;;  %v6952_v34 = vadd.f32 %v6951_v7, %v13198_v44  ;;  %v7228_v63 = vadd.f32 %v7227_v13, %v13182_v38 }
 0x4dc   :  { %v13195_v59 = vpop.f32.mrf.mxu1  ;;  %v6994_v13 = vmul.f32 %v13189_v23, %v13189_v23 }
 0x4dd   :  { %13631 = vst [vmem:[#allocation22_spill] sm:$0xff] %v13195_v59  ;;  %v7023_v56 = vadd.f32 %v7022_v53, %v6992_v46  ;;  %v7298_v19 = vadd.f32 %v7297_v54, %v7267_v51  ;;  %v6953_v17 = vadd.f32 %v13160_v3, %v6952_v34 }
 0x4de   :  { %v13205_v55 = vpop.f32.mrf.mxu1 }
 0x4df   :  { %13632 = vst [vmem:[#allocation23_spill] sm:$0xff] %v13205_v55  ;;  %v7268_v28 = vmul.f32 %v13205_v55, %v13205_v55  ;;  %v7229_v1 = vadd.f32 %v7228_v63, %v13205_v55  ;;  %v7024_v35 = vadd.f32 %v7023_v56, %v6993_v15  ;;  %v6954_v51 = vadd.f32 %v13189_v23, %v6953_v17 }
 0x4e1   :  { %v7299_v20 = vadd.f32 %v7298_v19, %v7268_v28  ;;  %v7230_v47 = vadd.f32 %v13167_v22, %v7229_v1  ;;  %v7025_v28 = vadd.f32 %v7024_v35, %v6994_v13  ;;  %v7270_v1 = vmul.f32 %v13195_v59, %v13195_v59 }
 0x4e3   :  { %v7300_v63 = vadd.f32 %v7299_v20, %v7269_v43  ;;  %v7231_v15 = vadd.f32 %v13195_v59, %v7230_v47 }
 0x4e5   :  { %v7301_v43 = vadd.f32 %v7300_v63, %v7270_v1 }
 0x4fc   :  { %v13203_v8 = vpop.f32.mrf.mxu0 }
 0x4fd   :  { %v6997_v42 = vmul.f32 %v13203_v8, %v13203_v8 }
 0x4fe   :  { %v13217_v24 = vpop.f32.mrf.mxu0 }
 0x4ff   :  { %v6995_v53 = vmul.f32 %v13217_v24, %v13217_v24  ;;  %v6955_v54 = vadd.f32 %v6954_v51, %v13217_v24 }
 0x500   :  { %v13215_v58 = vpop.f32.mrf.mxu1  ;;  %v13233_v27 = vpop.f32.mrf.mxu0 }
 0x501   :  { %13633 = vst [vmem:[#allocation24_spill] sm:$0xff] %v13215_v58  ;;  %v7026_v60 = vadd.f32 %v7025_v28, %v6995_v53  ;;  %v7273_v63 = vmul.f32 %v13215_v58, %v13215_v58  ;;  %v6998_v1 = vmul.f32 %v13233_v27, %v13233_v27 }
 0x502   :  { %v13228_v41 = vpop.f32.mrf.mxu1  ;;  %v13241_v7 = vpop.f32.mrf.mxu0 }
 0x503   :  { %13634 = vst [vmem:[#allocation25_spill] sm:$0xff] %v13228_v41  ;;  %v6996_v56 = vmul.f32 %v13241_v7, %v13241_v7  ;;  %v7271_v17 = vmul.f32 %v13228_v41, %v13228_v41  ;;  %v6956_v20 = vadd.f32 %v6955_v54, %v13241_v7  ;;  %v7232_v35 = vadd.f32 %v7231_v15, %v13228_v41 }
 0x504   :  { %v13239_v26 = vpop.f32.mrf.mxu1 }
 0x505   :  { %13635 = vst [vmem:[#allocation26_spill] sm:$0xff] %v13239_v26  ;;  %v7027_v51 = vadd.f32 %v7026_v60, %v6996_v56  ;;  %v7302_v5 = vadd.f32 %v7301_v43, %v7271_v17  ;;  %v6957_v53 = vadd.f32 %v13203_v8, %v6956_v20 }
 0x506   :  { %v13253_v34 = vpop.f32.mrf.mxu1 }
 0x507   :  { %13636 = vst [vmem:[#allocation27_spill] sm:$0xff] %v13253_v34  ;;  %v7272_v13 = vmul.f32 %v13253_v34, %v13253_v34  ;;  %v7233_v47 = vadd.f32 %v7232_v35, %v13253_v34  ;;  %v7028_v28 = vadd.f32 %v7027_v51, %v6997_v42  ;;  %v6958_v17 = vadd.f32 %v13233_v27, %v6957_v53 }
 0x508   :  { %v7274_v51 = vmul.f32 %v13239_v26, %v13239_v26 }
 0x509   :  { %v7303_v54 = vadd.f32 %v7302_v5, %v7272_v13  ;;  %v7234_v60 = vadd.f32 %v13215_v58, %v7233_v47  ;;  %v7029_v5 = vadd.f32 %v7028_v28, %v6998_v1 }
 0x50b   :  { %v7304_v20 = vadd.f32 %v7303_v54, %v7273_v63  ;;  %v7235_v47 = vadd.f32 %v13239_v26, %v7234_v60 }
 0x50d   :  { %v7305_v63 = vadd.f32 %v7304_v20, %v7274_v51 }
 0x524   :  { %v13246_v46 = vpop.f32.mrf.mxu0 }
 0x525   :  { %v7001_v58 = vmul.f32 %v13246_v46, %v13246_v46 }
 0x526   :  { %v13265_v39 = vpop.f32.mrf.mxu0 }
 0x527   :  { %v6999_v35 = vmul.f32 %v13265_v39, %v13265_v39  ;;  %v6959_v42 = vadd.f32 %v6958_v17, %v13265_v39 }
 0x528   :  { %v13258_v19 = vpop.f32.mrf.mxu1  ;;  %v13274_v40 = vpop.f32.mrf.mxu0 }
 0x529   :  { %13637 = vst [vmem:[#allocation28_spill] sm:$0xff] %v13258_v19  ;;  %v7030_v10 = vadd.f32 %v7029_v5, %v6999_v35 }
 0x52a   :  { %v13271_v6 = vpop.f32.mrf.mxu1  ;;  %v13284_v56 = vpop.f32.mrf.mxu0 }
 0x52b   :  { %13638 = vst [vmem:[#allocation29_spill] sm:$0xff] %v13271_v6  ;;  %v7000_v43 = vmul.f32 %v13284_v56, %v13284_v56  ;;  %v7275_v53 = vmul.f32 %v13271_v6, %v13271_v6  ;;  %v6960_v48 = vadd.f32 %v6959_v42, %v13284_v56  ;;  %v7236_v54 = vadd.f32 %v7235_v47, %v13271_v6 }
 0x52c   :  { %v13279_v15 = vpop.f32.mrf.mxu1  ;;  %v7277_v42 = vmul.f32 %v13258_v19, %v13258_v19 }
 0x52d   :  { %13639 = vst [vmem:[#allocation30_spill] sm:$0xff] %v13279_v15  ;;  %v7031_v1 = vadd.f32 %v7030_v10, %v7000_v43  ;;  %v7306_v17 = vadd.f32 %v7305_v63, %v7275_v53  ;;  %v6961_v60 = vadd.f32 %v13246_v46, %v6960_v48  ;;  %v7002_v10 = vmul.f32 %v13274_v40, %v13274_v40 }
 0x52e   :  { %v13294_v13 = vpop.f32.mrf.mxu1 }
 0x52f   :  { %13640 = vst [vmem:[#allocation31_spill] sm:$0xff] %v13294_v13  ;;  %v7276_v28 = vmul.f32 %v13294_v13, %v13294_v13  ;;  %v7237_v30 = vadd.f32 %v7236_v54, %v13294_v13  ;;  %v7032_v35 = vadd.f32 %v7031_v1, %v7001_v58  ;;  %v6962_v43 = vadd.f32 %v13274_v40, %v6961_v60 }
 0x531   :  { %v7307_v26 = vadd.f32 %v7306_v17, %v7276_v28  ;;  %v7238_v20 = vadd.f32 %v13258_v19, %v7237_v30  ;;  %v7033_v54 = vadd.f32 %v7032_v35, %v7002_v10  ;;  %v7278_v30 = vmul.f32 %v13279_v15, %v13279_v15 }
 0x533   :  { %v7308_v48 = vadd.f32 %v7307_v26, %v7277_v42  ;;  %v7239_v1 = vadd.f32 %v13279_v15, %v7238_v20 }
 0x54c   :  { %v13309_v12 = vpop.f32.mrf.mxu0 }
 0x54d   :  { %v7005_v10 = vmul.f32 %v13309_v12, %v13309_v12 }
 0x54e   :  { %v13314_v5 = vpop.f32.mrf.mxu0 }
 0x54f   :  { %v7003_v51 = vmul.f32 %v13314_v5, %v13314_v5  ;;  %v6963_v58 = vadd.f32 %v6962_v43, %v13314_v5  ;;  %v7309_v43 = vadd.f32 %v7308_v48, %v7278_v30 }
 0x550   :  { %v13321_v47 = vpop.f32.mrf.mxu0  ;;  %v13323_v53 = vpop.f32.mrf.mxu1 }
 0x551   :  { %v7034_v17 = vadd.f32 %v7033_v54, %v7003_v51  ;;  %v7006_v51 = vmul.f32 %v13321_v47, %v13321_v47 }
 0x552   :  { %v13328_v63 = vpop.f32.mrf.mxu0  ;;  %v13330_v28 = vpop.f32.mrf.mxu1 }
 0x553   :  { %13641 = vst [vmem:[#allocation32_spill] sm:$0xff] %v13330_v28  ;;  %v6964_v60 = vadd.f32 %v6963_v58, %v13328_v63  ;;  %v7004_v26 = vmul.f32 %v13328_v63, %v13328_v63  ;;  %v7279_v42 = vmul.f32 %v13330_v28, %v13330_v28  ;;  %v7240_v20 = vadd.f32 %v7239_v1, %v13330_v28 }
 0x554   :  { %v13338_v35 = vpop.f32.mrf.mxu1  ;;  %v7281_v58 = vmul.f32 %v13323_v53, %v13323_v53 }
 0x555   :  { %v6965_v19 = vadd.f32 %v13309_v12, %v6964_v60  ;;  %v7035_v13 = vadd.f32 %v7034_v17, %v7004_v26  ;;  %v7310_v54 = vadd.f32 %v7309_v43, %v7279_v42  ;;  %v7282_v2 = vmul.f32 %v13338_v35, %v13338_v35 }
 0x556   :  { %v6924_v15 = vpop.f32.mrf.mxu1 }
 0x557   :  { %v6966_v48 = vadd.f32 %v13321_v47, %v6965_v19  ;;  %v7036_v30 = vadd.f32 %v7035_v13, %v7005_v10  ;;  %v7241_v6 = vadd.f32 %v7240_v20, %v6924_v15  ;;  %v7280_v34 = vmul.f32 %v6924_v15, %v6924_v15 }
 0x559   :  { %v6967_v60 = vrot.slane %v6966_v48, 4  ;;  %v7037_v17 = vadd.f32 %v7036_v30, %v7006_v51  ;;  %v7242_v1 = vadd.f32 %v13323_v53, %v7241_v6  ;;  %v7311_v26 = vadd.f32 %v7310_v54, %v7280_v34 }
 0x55b   :  { %v6968_v28 = vadd.f32 %v6967_v60, %v6966_v48  ;;  %v7038_v41 = vrot.slane %v7037_v17, 4  ;;  %v7243_v62 = vadd.f32 %v13338_v35, %v7242_v1  ;;  %v7312_v59 = vadd.f32 %v7311_v26, %v7281_v58 }
 0x55d   :  { %v6969_v42 = vrot.slane %v6968_v28, 2  ;;  %v7039_v43 = vadd.f32 %v7038_v41, %v7037_v17  ;;  %v7244_v11 = vrot.slane %v7243_v62, 4  ;;  %v7313_v19 = vadd.f32 %v7312_v59, %v7282_v2 }
 0x55f   :  { %v6970_v13 = vadd.f32 %v6969_v42, %v6968_v28  ;;  %v7040_v10 = vrot.slane %v7039_v43, 2  ;;  %v7245_v20 = vadd.f32 %v7244_v11, %v7243_v62  ;;  %v7314_v22 = vrot.slane %v7313_v19, 4 }
 0x561   :  { %v6971_v49 = vrot.slane %v6970_v13, 1  ;;  %v7041_v55 = vadd.f32 %v7040_v10, %v7039_v43  ;;  %v7246_v29 = vrot.slane %v7245_v20, 2  ;;  %v7315_v51 = vadd.f32 %v7314_v22, %v7313_v19 }
 0x563   :  { %v6972_v30 = vadd.f32 %v6971_v49, %v6970_v13  ;;  %v7042_v6 = vrot.slane %v7041_v55, 1  ;;  %v7247_v34 = vadd.f32 %v7246_v29, %v7245_v20  ;;  %v7316_v54 = vrot.slane %v7315_v51, 2 }
 0x565   :  { %v6974_v48 = vmul.f32 0.00390625, %v6972_v30  ;;  %v7043_v60 = vadd.f32 %v7042_v6, %v7041_v55  ;;  %v7248_v1 = vrot.slane %v7247_v34, 1  ;;  %v7317_v58 = vadd.f32 %v7316_v54, %v7315_v51 }
 0x567   :  { %v7044_v26 = vmul.f32 0.00390625, %v7043_v60  ;;  %v7045_v41 = vmul.f32 %v6974_v48, %v6974_v48  ;;  %v7249_v17 = vadd.f32 %v7248_v1, %v7247_v34  ;;  %v7318_v2 = vrot.slane %v7317_v58, 1 }
 0x568   :  { %v7049_v51 = vsub.f32 0.0, %v6974_v48 }
 0x569   :  { %v7046_v59 = vsub.f32 %v7044_v26, %v7045_v41  ;;  %v13353_v28 = vmul.f32 0.00390625, %v7249_v17  ;;  %v7319_v11 = vadd.f32 %v7318_v2, %v7317_v58 }
 0x56b   :  { %v7047_v62 = vadd.f32 1e-05, %v7046_v59  ;;  %v7321_v22 = vmul.f32 %v13353_v28, %v13353_v28  ;;  %v7320_v49 = vmul.f32 0.00390625, %v7319_v11 }
 0x56d   :  { %8339 = vrsqrt.f32 %v7047_v62  ;;  %v7322_v29 = vsub.f32 %v7320_v49, %v7321_v22 }
 0x56f   :  { %v7323_v42 = vadd.f32 1e-05, %v7322_v29 }
 0x571   :  { %8341 = vrsqrt.f32 %v7323_v42 }
 0x57a   :  { %v13357_v55 = vpop.eup %8339 }
 0x57b   :  { %v13361_v43 = vmul.f32 %v13357_v55, %v13328_v63  ;;  %v13367_v13 = vmul.f32 %v13357_v55, %v13309_v12  ;;  %v13371_v10 = vmul.f32 %v13357_v55, %v13321_v47  ;;  %v13377_v30 = vmul.f32 %v13357_v55, %v7049_v51 }
 0x57c   :  { %v7051_v63 = vmul.f32 %v13357_v55, %v13042_v61  ;;  %v7067_v6 = vmul.f32 %v13357_v55, %v13172_v37  ;;  %v7052_v12 = vmul.f32 %v13357_v55, %v13050_v14  ;;  %v7068_v47 = vmul.f32 %v13357_v55, %v13198_v44 }
 0x57d   :  { %v7053_v37 = vmul.f32 %v13357_v55, %v13038_v21  ;;  %v7069_v14 = vmul.f32 %v13357_v55, %v13160_v3  ;;  %v7070_v1 = vmul.f32 %v13357_v55, %v13189_v23  ;;  %v7055_v41 = vmul.f32 %v13357_v55, %v13058_v45 }
 0x57e   :  { %v13363_v19 = vpop.eup %8341  ;;  %v7099_v54 = vadd.f32 %v7067_v6, %v13377_v30  ;;  %v7083_v61 = vadd.f32 %v7051_v63, %v13377_v30  ;;  %v7100_v60 = vadd.f32 %v7068_v47, %v13377_v30  ;;  %v7071_v17 = vmul.f32 %v13357_v55, %v13217_v24 }
 0x57f   :  { %v13374_v20 = vmul.f32 %v13363_v19, %v6924_v15  ;;  %v13389_v15 = vmul.f32 %v13363_v19, %v13323_v53  ;;  %v13393_v34 = vmul.f32 %v13363_v19, %v13338_v35  ;;  %v7084_v53 = vadd.f32 %v7052_v12, %v13377_v30 }
 0x580   :  { %v7131_v48 = vmax.f32 %v7099_v54, 0.0  ;;  %v7115_v44 = vmax.f32 %v7083_v61, 0.0  ;;  %v7054_v35 = vmul.f32 %v13357_v55, %v13046_v25  ;;  %v7132_v58 = vmax.f32 %v7100_v60, 0.0 }
 0x581   :  { %v7116_v26 = vmax.f32 %v7084_v53, 0.0  ;;  %v7101_v21 = vadd.f32 %v7069_v14, %v13377_v30  ;;  %v7085_v3 = vadd.f32 %v7053_v37, %v13377_v30  ;;  %v7102_v25 = vadd.f32 %v7070_v1, %v13377_v30 }
 0x582   :  { %7179 = vxpose.xlu1.b32.start [1/16] (narrow) %v7131_v48, 8  ;;  %7147 = vxpose.xlu0.b32.start [1/16] (narrow) %v7115_v44, 8  ;;  %v7086_v23 = vadd.f32 %v7054_v35, %v13377_v30  ;;  %v7056_v11 = vmul.f32 %v13357_v55, %v13066_v32  ;;  %v7072_v62 = vmul.f32 %v13357_v55, %v13241_v7 }
 0x583   :  { %v7133_v2 = vmax.f32 %v7101_v21, 0.0  ;;  %v7117_v59 = vmax.f32 %v7085_v3, 0.0  ;;  %v7134_v22 = vmax.f32 %v7102_v25, 0.0  ;;  %v7103_v45 = vadd.f32 %v7071_v17, %v13377_v30 }
 0x584   :  { %v7118_v49 = vmax.f32 %v7086_v23, 0.0  ;;  %v7087_v24 = vadd.f32 %v7055_v41, %v13377_v30  ;;  %v7057_v29 = vmul.f32 %v13357_v55, %v13052_v52  ;;  %v7073_v42 = vmul.f32 %v13357_v55, %v13203_v8 }
 0x585   :  { %v7135_v51 = vmax.f32 %v7103_v45, 0.0  ;;  %v7104_v32 = vadd.f32 %v7072_v62, %v13377_v30  ;;  %v7088_v7 = vadd.f32 %v7056_v11, %v13377_v30  ;;  %v7058_v6 = vmul.f32 %v13357_v55, %v13062_v16 }
 0x586   :  { %7180 = vxpose.xlu1.b32.cont [2/16] (narrow) %v7132_v58, 8  ;;  %7148 = vxpose.xlu0.b32.cont [2/16] (narrow) %v7116_v26, 8  ;;  %v7119_v63 = vmax.f32 %v7087_v24, 0.0  ;;  %v7074_v12 = vmul.f32 %v13357_v55, %v13233_v27  ;;  %v7105_v52 = vadd.f32 %v7073_v42, %v13377_v30  ;;  %v7089_v8 = vadd.f32 %v7057_v29, %v13377_v30 }
 0x587   :  { %v7136_v47 = vmax.f32 %v7104_v32, 0.0  ;;  %v7120_v54 = vmax.f32 %v7088_v7, 0.0  ;;  %v7059_v61 = vmul.f32 %v13357_v55, %v13086_v31  ;;  %v7075_v37 = vmul.f32 %v13357_v55, %v13265_v39 }
 0x588   :  { %v7137_v14 = vmax.f32 %v7105_v52, 0.0  ;;  %v7121_v48 = vmax.f32 %v7089_v8, 0.0  ;;  %v7106_v16 = vadd.f32 %v7074_v12, %v13377_v30  ;;  %v7090_v27 = vadd.f32 %v7058_v6, %v13377_v30  ;;  %v13643_v8 = vld [vmem:[#allocation23_spill] sm:$0xff] }
 0x589   :  { %v7060_v44 = vmul.f32 %v13357_v55, %v13113_v4  ;;  %v7076_v60 = vmul.f32 %v13357_v55, %v13284_v56  ;;  %v7107_v31 = vadd.f32 %v7075_v37, %v13377_v30  ;;  %v7091_v39 = vadd.f32 %v7059_v61, %v13377_v30 }
 0x58a   :  { %7181 = vxpose.xlu1.b32.cont [3/16] (narrow) %v7133_v2, 8  ;;  %7149 = vxpose.xlu0.b32.cont [3/16] (narrow) %v7117_v59, 8  ;;  %v7138_v53 = vmax.f32 %v7106_v16, 0.0  ;;  %v7122_v35 = vmax.f32 %v7090_v27, 0.0  ;;  %v7061_v1 = vmul.f32 %v13357_v55, %v13070_v36  ;;  %v7077_v58 = vmul.f32 %v13357_v55, %v13246_v46 }
 0x58b   :  { %v7139_v26 = vmax.f32 %v7107_v31, 0.0  ;;  %v7123_v21 = vmax.f32 %v7091_v39, 0.0  ;;  %v7108_v4 = vadd.f32 %v7076_v60, %v13377_v30  ;;  %v7092_v56 = vadd.f32 %v7060_v44, %v13377_v30  ;;  %v13647_v39 = vld [vmem:[#allocation22_spill] sm:$0xff] }
 0x58c   :  { %v7062_v3 = vmul.f32 %v13357_v55, %v13096_v57  ;;  %v7078_v41 = vmul.f32 %v13357_v55, %v13274_v40  ;;  %v7109_v36 = vadd.f32 %v7077_v58, %v13377_v30  ;;  %v7093_v46 = vadd.f32 %v7061_v1, %v13377_v30 }
 0x58d   :  { %v7140_v17 = vmax.f32 %v7108_v4, 0.0  ;;  %v7124_v2 = vmax.f32 %v7092_v56, 0.0  ;;  %v7063_v59 = vmul.f32 %v13357_v55, %v13129_v18  ;;  %v7079_v25 = vmul.f32 %v13357_v55, %v13314_v5  ;;  %v13648_v56 = vld [vmem:[#allocation10_spill] sm:$0xff] }
 0x58e   :  { %7182 = vxpose.xlu1.b32.cont [4/16] (narrow) %v7134_v22, 8  ;;  %7150 = vxpose.xlu0.b32.cont [4/16] (narrow) %v7118_v49, 8  ;;  %v7141_v23 = vmax.f32 %v7109_v36, 0.0  ;;  %v7125_v11 = vmax.f32 %v7093_v46, 0.0  ;;  %v7110_v57 = vadd.f32 %v7078_v41, %v13377_v30  ;;  %v7094_v40 = vadd.f32 %v7062_v3, %v13377_v30  ;;  %v13649_v41 = vld [vmem:[#allocation25_spill] sm:$0xff] }
 0x58f   :  { %v7064_v62 = vmul.f32 %v13357_v55, %v13157_v0  ;;  %v7111_v45 = vadd.f32 %v7079_v25, %v13377_v30  ;;  %v7095_v18 = vadd.f32 %v7063_v59, %v13377_v30  ;;  %v7112_v5 = vadd.f32 %v13361_v43, %v13377_v30  ;;  %v13650_v25 = vld [vmem:[#allocation12_spill] sm:$0xff] }
 0x590   :  { %v7142_v22 = vmax.f32 %v7110_v57, 0.0  ;;  %v7126_v49 = vmax.f32 %v7094_v40, 0.0  ;;  %v7065_v24 = vmul.f32 %v13357_v55, %v13119_v9  ;;  %v7066_v0 = vmul.f32 %v13357_v55, %v13141_v50 }
 0x591   :  { %v7143_v29 = vmax.f32 %v7111_v45, 0.0  ;;  %v7127_v42 = vmax.f32 %v7095_v18, 0.0  ;;  %v7113_v7 = vadd.f32 %v13367_v13, %v13377_v30  ;;  %v7325_v43 = vsub.f32 0.0, %v13353_v28  ;;  %v13642_v28 = vld [vmem:[#allocation8_spill] sm:$0xff]  ;;  %v13652_v45 = vld [vmem:[#allocation9_spill] sm:$0xff] }
 0x592   :  { %7183 = vxpose.xlu1.b32.cont [5/16] (narrow) %v7135_v51, 8  ;;  %7151 = vxpose.xlu0.b32.cont [5/16] (narrow) %v7119_v63, 8  ;;  %v7096_v51 = vadd.f32 %v7064_v62, %v13377_v30  ;;  %v7144_v63 = vmax.f32 %v7112_v5, 0.0  ;;  %v7097_v6 = vadd.f32 %v7065_v24, %v13377_v30  ;;  %v7327_v12 = vmul.f32 %v13363_v19, %v13044_v33  ;;  %v13653_v5 = vld [vmem:[#allocation24_spill] sm:$0xff] }
 0x593   :  { %v13479_v9 = vmul.f32 %v13363_v19, %v7325_v43  ;;  %v7343_v50 = vmul.f32 %v13363_v19, %v13182_v38  ;;  %v7145_v55 = vmax.f32 %v7113_v7, 0.0  ;;  %v7114_v13 = vadd.f32 %v13371_v10, %v13377_v30  ;;  %v13655_v7 = vld [vmem:[#allocation26_spill] sm:$0xff] }
 0x594   :  { %v7128_v32 = vmax.f32 %v7096_v51, 0.0  ;;  %v7328_v52 = vmul.f32 %v13363_v19, %v13642_v28  ;;  %v7344_v61 = vmul.f32 %v13363_v19, %v13643_v8  ;;  %v7346_v1 = vmul.f32 %v13363_v19, %v13647_v39 }
 0x595   :  { %v7146_v37 = vmax.f32 %v7114_v13, 0.0  ;;  %v7359_v38 = vadd.f32 %v7327_v12, %v13479_v9  ;;  %v7331_v3 = vmul.f32 %v13363_v19, %v13648_v56  ;;  %v7333_v18 = vmul.f32 %v13363_v19, %v13652_v45 }
 0x596   :  { %7184 = vxpose.xlu1.b32.cont [6/16] (narrow) %v7136_v47, 8  ;;  %7152 = vxpose.xlu0.b32.cont [6/16] (narrow) %v7120_v54, 8  ;;  %v7129_v47 = vmax.f32 %v7097_v6, 0.0  ;;  %v7098_v54 = vadd.f32 %v7066_v0, %v13377_v30  ;;  %v13645_v30 = vld [vmem:[#allocation21_spill] sm:$0xff]  ;;  %v7376_v60 = vadd.f32 %v7344_v61, %v13479_v9  ;;  %v7378_v46 = vadd.f32 %v7346_v1, %v13479_v9 }
 0x597   :  { %v7345_v16 = vmul.f32 %v13363_v19, %v13645_v30  ;;  %v7391_v44 = vmax.f32 %v7359_v38, 0.0  ;;  %v7349_v24 = vmul.f32 %v13363_v19, %v13653_v5  ;;  %v7350_v6 = vmul.f32 %v13363_v19, %v13655_v7  ;;  %v13659_v38 = vld [vmem:[#allocation31_spill] sm:$0xff] }
 0x598   :  { %v7130_v33 = vmax.f32 %v7098_v54, 0.0  ;;  %v7408_v58 = vmax.f32 %v7376_v60, 0.0  ;;  %v7410_v40 = vmax.f32 %v7378_v46, 0.0  ;;  %v13657_v54 = vld [vmem:[#allocation29_spill] sm:$0xff] }
 0x599   :  { %v7351_v28 = vmul.f32 %v13363_v19, %v13657_v54  ;;  %v7382_v61 = vadd.f32 %v7350_v6, %v13479_v9 }
 0x59a   :  { %7185 = vxpose.xlu1.b32.cont [7/16] (narrow) %v7137_v14, 8  ;;  %7153 = vxpose.xlu0.b32.cont [7/16] (narrow) %v7121_v48, 8  ;;  %v7375_v14 = vadd.f32 %v7343_v50, %v13479_v9  ;;  %v13644_v48 = vld [vmem:[#allocation6_spill] sm:$0xff]  ;;  %v7381_v50 = vadd.f32 %v7349_v24, %v13479_v9  ;;  %v7388_v24 = vadd.f32 %v13374_v20, %v13479_v9 }
 0x59b   :  { %v7329_v10 = vmul.f32 %v13363_v19, %v13644_v48  ;;  %v7352_v48 = vmul.f32 %v13363_v19, %v13659_v38 }
 0x59c   :  { %v7407_v27 = vmax.f32 %v7375_v14, 0.0  ;;  %v7420_v6 = vmax.f32 %v7388_v24, 0.0 }
 0x59d   :  { %v7361_v4 = vadd.f32 %v7329_v10, %v13479_v9  ;;  %v7414_v10 = vmax.f32 %v7382_v61, 0.0  ;;  %v7384_v1 = vadd.f32 %v7352_v48, %v13479_v9 }
 0x59e   :  { %7186 = vxpose.xlu1.b32.cont [8/16] (narrow) %v7138_v53, 8  ;;  %7154 = vxpose.xlu0.b32.cont [8/16] (narrow) %v7122_v35, 8  ;;  %v7360_v53 = vadd.f32 %v7328_v52, %v13479_v9  ;;  %v13646_v35 = vld [vmem:[#allocation7_spill] sm:$0xff]  ;;  %v7413_v52 = vmax.f32 %v7381_v50, 0.0 }
 0x59f   :  { %v7330_v31 = vmul.f32 %v13363_v19, %v13646_v35  ;;  %v7393_v36 = vmax.f32 %v7361_v4, 0.0  ;;  %v13663_v4 = vld [vmem:[#allocation30_spill] sm:$0xff] }
 0x5a0   :  { %v7354_v56 = vmul.f32 %v13363_v19, %v13663_v4 }
 0x5a1   :  { %v7362_v59 = vadd.f32 %v7330_v31, %v13479_v9 }
 0x5a2   :  { %7187 = vxpose.xlu1.b32.cont [9/16] (narrow) %v7139_v26, 8  ;;  %7155 = vxpose.xlu0.b32.cont [9/16] (narrow) %v7123_v21, 8  ;;  %v7392_v26 = vmax.f32 %v7360_v53, 0.0  ;;  %v7377_v21 = vadd.f32 %v7345_v16, %v13479_v9  ;;  %v7383_v16 = vadd.f32 %v7351_v28, %v13479_v9  ;;  %v13661_v53 = vld [vmem:[#allocation28_spill] sm:$0xff] }
 0x5a3   :  { %v7394_v62 = vmax.f32 %v7362_v59, 0.0  ;;  %v7353_v35 = vmul.f32 %v13363_v19, %v13661_v53  ;;  %v13665_v59 = vld [vmem:[#allocation32_spill] sm:$0xff] }
 0x5a4   :  { %v7415_v31 = vmax.f32 %v7383_v16, 0.0 }
 0x5a6   :  { %7188 = vxpose.xlu1.b32.cont [10/16] (narrow) %v7140_v17, 8  ;;  %7156 = vxpose.xlu0.b32.cont [10/16] (narrow) %v7124_v2, 8  ;;  %v7347_v17 = vmul.f32 %v13363_v19, %v13649_v41  ;;  %v7409_v2 = vmax.f32 %v7377_v21, 0.0 }
 0x5aa   :  { %7189 = vxpose.xlu1.b32.cont [11/16] (narrow) %v7141_v23, 8  ;;  %7157 = vxpose.xlu0.b32.cont [11/16] (narrow) %v7125_v11, 8  ;;  %v7332_v23 = vmul.f32 %v13363_v19, %v13650_v25  ;;  %v13651_v11 = vld [vmem:[#allocation27_spill] sm:$0xff]  ;;  %v7355_v25 = vmul.f32 %v13363_v19, %v13665_v59 }
 0x5ab   :  { %v7348_v57 = vmul.f32 %v13363_v19, %v13651_v11 }
 0x5ac   :  { %v7364_v0 = vadd.f32 %v7332_v23, %v13479_v9 }
 0x5ad   :  { %v7380_v51 = vadd.f32 %v7348_v57, %v13479_v9  ;;  %v7386_v57 = vadd.f32 %v7354_v56, %v13479_v9 }
 0x5ae   :  { %7190 = vxpose.xlu1.b32.cont [12/16] (narrow) %v7142_v22, 8  ;;  %7158 = vxpose.xlu0.b32.cont [12/16] (narrow) %v7126_v49, 8  ;;  %v7379_v22 = vadd.f32 %v7347_v17, %v13479_v9  ;;  %v7363_v49 = vadd.f32 %v7331_v3, %v13479_v9  ;;  %v7396_v12 = vmax.f32 %v7364_v0, 0.0  ;;  %v7416_v3 = vmax.f32 %v7384_v1, 0.0 }
 0x5af   :  { %v7412_v43 = vmax.f32 %v7380_v51, 0.0  ;;  %v7385_v17 = vadd.f32 %v7353_v35, %v13479_v9 }
 0x5b1   :  { %v7417_v23 = vmax.f32 %v7385_v17, 0.0 }
 0x5b2   :  { %7191 = vxpose.xlu1.b32.cont [13/16] (narrow) %v7143_v29, 8  ;;  %7159 = vxpose.xlu0.b32.cont [13/16] (narrow) %v7127_v42, 8  ;;  %v7411_v29 = vmax.f32 %v7379_v22, 0.0  ;;  %v7395_v42 = vmax.f32 %v7363_v49, 0.0  ;;  %v7418_v49 = vmax.f32 %v7386_v57, 0.0 }
 0x5b6   :  { %7192 = vxpose.xlu1.b32.cont [14/16] (narrow) %v7144_v63, 8  ;;  %7160 = vxpose.xlu0.b32.cont [14/16] (narrow) %v7128_v32, 8  ;;  %v13654_v63 = vld [vmem:[#allocation11_spill] sm:$0xff] }
 0x5b7   :  { %v7334_v32 = vmul.f32 %v13363_v19, %v13654_v63 }
 0x5ba   :  { %7193 = vxpose.xlu1.b32.cont [15/16] (narrow) %v7145_v55, 8  ;;  %7161 = vxpose.xlu0.b32.cont [15/16] (narrow) %v7129_v47, 8  ;;  %v7365_v55 = vadd.f32 %v7333_v18, %v13479_v9  ;;  %v13656_v47 = vld [vmem:[#allocation14_spill] sm:$0xff]  ;;  %v7387_v18 = vadd.f32 %v7355_v25, %v13479_v9 }
 0x5bb   :  { %v7335_v13 = vmul.f32 %v13363_v19, %v13656_v47  ;;  %v7390_v47 = vadd.f32 %v13393_v34, %v13479_v9 }
 0x5bc   :  { %v7397_v8 = vmax.f32 %v7365_v55, 0.0  ;;  %v7419_v51 = vmax.f32 %v7387_v18, 0.0 }
 0x5bd   :  { %v7422_v54 = vmax.f32 %v7390_v47, 0.0 }
 0x5be   :  { %7194 = vxpose.xlu1.b32.end [16/16] (narrow) %v7146_v37, 8  ;;  %7162 = vxpose.xlu0.b32.end [16/16] (narrow) %v7130_v33, 8  ;;  %v7366_v37 = vadd.f32 %v7334_v32, %v13479_v9  ;;  %v13658_v33 = vld [vmem:[#allocation16_spill] sm:$0xff]  ;;  %v13668_v32 = vld [vmem:[#allocation19_spill] sm:$0xff] }
 0x5bf   :  { %v7336_v14 = vmul.f32 %v13363_v19, %v13658_v33  ;;  %v7342_v7 = vmul.f32 %v13363_v19, %v13668_v32 }
 0x5c0   :  { %v7398_v30 = vmax.f32 %v7366_v37, 0.0 }
 0x5c2   :  { %7455 = vxpose.xlu1.b32.start [1/16] (narrow) %v7407_v27, 8  ;;  %7423 = vxpose.xlu0.b32.start [1/16] (narrow) %v7391_v44, 8  ;;  %v7367_v27 = vadd.f32 %v7335_v13, %v13479_v9  ;;  %v13660_v44 = vld [vmem:[#allocation13_spill] sm:$0xff]  ;;  %v7374_v13 = vadd.f32 %v7342_v7, %v13479_v9 }
 0x5c3   :  { %v7337_v60 = vmul.f32 %v13363_v19, %v13660_v44 }
 0x5c4   :  { %v7399_v39 = vmax.f32 %v7367_v27, 0.0 }
 0x5c6   :  { %7456 = vxpose.xlu1.b32.cont [2/16] (narrow) %v7408_v58, 8  ;;  %7424 = vxpose.xlu0.b32.cont [2/16] (narrow) %v7392_v26, 8  ;;  %v7368_v58 = vadd.f32 %v7336_v14, %v13479_v9  ;;  %v13662_v26 = vld [vmem:[#allocation15_spill] sm:$0xff] }
 0x5c7   :  { %v7338_v21 = vmul.f32 %v13363_v19, %v13662_v26 }
 0x5c8   :  { %v7400_v41 = vmax.f32 %v7368_v58, 0.0 }
 0x5ca   :  { %7457 = vxpose.xlu1.b32.cont [3/16] (narrow) %v7409_v2, 8  ;;  %7425 = vxpose.xlu0.b32.cont [3/16] (narrow) %v7393_v36, 8  ;;  %v7369_v2 = vadd.f32 %v7337_v60, %v13479_v9  ;;  %v13664_v36 = vld [vmem:[#allocation18_spill] sm:$0xff] }
 0x5cb   :  { %v7339_v46 = vmul.f32 %v13363_v19, %v13664_v36 }
 0x5cc   :  { %v7401_v11 = vmax.f32 %v7369_v2, 0.0 }
 0x5cd   :  { %v7371_v5 = vadd.f32 %v7339_v46, %v13479_v9 }
 0x5ce   :  { %7458 = vxpose.xlu1.b32.cont [4/16] (narrow) %v7410_v40, 8  ;;  %7426 = vxpose.xlu0.b32.cont [4/16] (narrow) %v7394_v62, 8  ;;  %v7370_v40 = vadd.f32 %v7338_v21, %v13479_v9  ;;  %v13666_v62 = vld [vmem:[#allocation20_spill] sm:$0xff] }
 0x5cf   :  { %v7340_v22 = vmul.f32 %v13363_v19, %v13666_v62  ;;  %v7403_v0 = vmax.f32 %v7371_v5, 0.0 }
 0x5d0   :  { %v7402_v45 = vmax.f32 %v7370_v40, 0.0 }
 0x5d1   :  { %v7372_v63 = vadd.f32 %v7340_v22, %v13479_v9 }
 0x5d2   :  { %7459 = vxpose.xlu1.b32.cont [5/16] (narrow) %v7411_v29, 8  ;;  %7427 = vxpose.xlu0.b32.cont [5/16] (narrow) %v7395_v42, 8  ;;  %v13667_v29 = vld [vmem:[#allocation17_spill] sm:$0xff] }
 0x5d3   :  { %v7341_v42 = vmul.f32 %v13363_v19, %v13667_v29  ;;  %v7406_v19 = vmax.f32 %v7374_v13, 0.0 }
 0x5d5   :  { %v7373_v50 = vadd.f32 %v7341_v42, %v13479_v9 }
 0x5d6   :  { %7460 = vxpose.xlu1.b32.cont [6/16] (narrow) %v7412_v43, 8  ;;  %7428 = vxpose.xlu0.b32.cont [6/16] (narrow) %v7396_v12, 8  ;;  %v7404_v43 = vmax.f32 %v7372_v63, 0.0  ;;  %v7389_v12 = vadd.f32 %v13389_v15, %v13479_v9 }
 0x5d7   :  { %v7405_v55 = vmax.f32 %v7373_v50, 0.0 }
 0x5d8   :  { %v7421_v20 = vmax.f32 %v7389_v12, 0.0 }
 0x5da   :  { %7461 = vxpose.xlu1.b32.cont [7/16] (narrow) %v7413_v52, 8  ;;  %7429 = vxpose.xlu0.b32.cont [7/16] (narrow) %v7397_v8, 8 }
 0x5de   :  { %7462 = vxpose.xlu1.b32.cont [8/16] (narrow) %v7414_v10, 8  ;;  %7430 = vxpose.xlu0.b32.cont [8/16] (narrow) %v7398_v30, 8 }
 0x5e2   :  { %7463 = vxpose.xlu1.b32.cont [9/16] (narrow) %v7415_v31, 8  ;;  %7431 = vxpose.xlu0.b32.cont [9/16] (narrow) %v7399_v39, 8 }
 0x5e6   :  { %7464 = vxpose.xlu1.b32.cont [10/16] (narrow) %v7416_v3, 8  ;;  %7432 = vxpose.xlu0.b32.cont [10/16] (narrow) %v7400_v41, 8 }
 0x5ea   :  { %7465 = vxpose.xlu1.b32.cont [11/16] (narrow) %v7417_v23, 8  ;;  %7433 = vxpose.xlu0.b32.cont [11/16] (narrow) %v7401_v11, 8 }
 0x5ee   :  { %7466 = vxpose.xlu1.b32.cont [12/16] (narrow) %v7418_v49, 8  ;;  %7434 = vxpose.xlu0.b32.cont [12/16] (narrow) %v7402_v45, 8 }
 0x5f2   :  { %7467 = vxpose.xlu1.b32.cont [13/16] (narrow) %v7419_v51, 8  ;;  %7435 = vxpose.xlu0.b32.cont [13/16] (narrow) %v7403_v0, 8 }
 0x5f6   :  { %7468 = vxpose.xlu1.b32.cont [14/16] (narrow) %v7420_v6, 8  ;;  %7436 = vxpose.xlu0.b32.cont [14/16] (narrow) %v7404_v43, 8 }
 0x5fa   :  { %7469 = vxpose.xlu1.b32.cont [15/16] (narrow) %v7421_v20, 8  ;;  %7437 = vxpose.xlu0.b32.cont [15/16] (narrow) %v7405_v55, 8 }
 0x5fe   :  { %7470 = vxpose.xlu1.b32.end [16/16] (narrow) %v7422_v54, 8  ;;  %7438 = vxpose.xlu0.b32.end [16/16] (narrow) %v7406_v19, 8  ;;  %v7195_v28 = vpop.trf.xlu1  ;;  %v7163_v52 = vpop.trf.xlu0 }
 0x5ff   :  { %7212 = vst [vmem:[#allocation3 + $0x8] sm:$0xff] %v7195_v28  ;;  %7211 = vst [vmem:[#allocation3] sm:$0xff] %v7163_v52 }
 0x63e   :  { %v7471_v15 = vpop.trf.xlu1  ;;  %v7439_v8 = vpop.trf.xlu0 }
 0x63f   :  { %7489 = vst [vmem:[#allocation3 + $0x18] sm:$0xff] %v7471_v15  ;;  %7488 = vst [vmem:[#allocation3 + $0x10] sm:$0xff] %v7439_v8 }
 0x640   :  { %8354 = shalt.err (!%p8351_p4)
}
 0x641   :  { %s8374_s30 = smov 256  }
 0x642   :  { %7501 = dma.vmem_to_hbm [thread:$0]  %s7496_s23, 512, %s13583_s2, [#allocation4], %s8374_s30, %s8374_s30, %s8368_s8  }
 0x643   :  { %8363 = dma.done.wait [#allocation4], 512  }
 0x644   :  { %8364 = vsyncadd [#allocation4], 4294966784 }
 0x645   :  { %7505 = vsyncpa [#allocation4], 1 }

</bundles_post_ra>
